<compile_context>
chip_gen: v6e
topology: v6e:2x2x1
jax: 0.10.0
libtpu: 0.0.40
codegen_flags: <defaults>
</compile_context>

<pallas_src>
import functools
import math

import numpy as np

import jax
import jax.numpy as jnp
from jax.experimental import pallas as pl
from jax.experimental.pallas import tpu as pltpu  # noqa: F401  (TPU backend assumed)


_LN_EPS = 1e-5

ENC_KEYS = ("qkv_w", "qkv_b", "wo_w", "wo_b", "ln1_g", "ln1_b",
            "w1", "b1", "w2", "b2", "ln2_g", "ln2_b")
DEC_KEYS = ("sa_qkv_w", "sa_qkv_b", "sa_wo_w", "sa_wo_b", "ln1_g", "ln1_b",
            "ca_q_w", "ca_q_b", "ca_kv_w", "ca_kv_b", "ca_wo_w", "ca_wo_b",
            "ln2_g", "ln2_b", "w1", "b1", "w2", "b2", "ln3_g", "ln3_b")


# -----------------------------------------------------------------------------
# In-kernel helpers (traced inline inside the single fused kernel, all in VMEM)
# -----------------------------------------------------------------------------
def _layer_norm(x, g, b, eps=_LN_EPS):
    mu = jnp.mean(x, axis=-1, keepdims=True)
    var = jnp.mean((x - mu) ** 2, axis=-1, keepdims=True)
    return (x - mu) * jax.lax.rsqrt(var + eps) * g + b


def _mha_blockdiag(q2d, k2d, v2d, mask, *, B, S, H, dh):
    """Block-diagonal multi-head attention, fully in VMEM.

    q2d/k2d/v2d: (B*S, H*dh). Repacked head-major to (H*B*S, dh); every
    (batch, head) pair is handled by one pair of MXU matmuls and one masked
    softmax. The 1/sqrt(dh) scale is pre-folded into the Q projection weights.
    """
    M = B * S
    qp = jnp.concatenate([q2d[:, h * dh:(h + 1) * dh] for h in range(H)], axis=0)
    kp = jnp.concatenate([k2d[:, h * dh:(h + 1) * dh] for h in range(H)], axis=0)
    vp = jnp.concatenate([v2d[:, h * dh:(h + 1) * dh] for h in range(H)], axis=0)
    s = jax.lax.dot_general(qp, kp, (((1,), (1,)), ((), ())),
                            preferred_element_type=jnp.float32) + mask
    m = jnp.max(s, axis=-1, keepdims=True)
    p = jnp.exp(s - m)
    p = p / jnp.sum(p, axis=-1, keepdims=True)   # exact softmax (torch parity)
    o = jnp.dot(p, vp, preferred_element_type=jnp.float32)      # (H*B*S, dh)
    return jnp.concatenate([o[h * M:(h + 1) * M, :] for h in range(H)], axis=-1)


# Quaternions as tuples of (M, 1) column vectors: pure VPU elementwise math,
# no lane concatenations inside the FK chain.
def _quat_normalize(w, x, y, z, eps=1e-12):
    inv = 1.0 / jnp.maximum(jnp.sqrt(w * w + x * x + y * y + z * z), eps)
    return (w * inv, x * inv, y * inv, z * inv)


def _quat_mul(a, b):
    aw, ax, ay, az = a
    bw, bx, by, bz = b
    return (aw * bw - ax * bx - ay * by - az * bz,
            aw * bx + ax * bw + ay * bz - az * by,
            aw * by - ax * bz + ay * bw + az * bx,
            aw * bz + ax * by - ay * bx + az * bw)


def _quat_rotate(q, v):
    w, ux, uy, uz = q
    vx, vy, vz = v
    cx = uy * vz - uz * vy
    cy = uz * vx - ux * vz
    cz = ux * vy - uy * vx
    ccx = uy * cz - uz * cy
    ccy = uz * cx - ux * cz
    ccz = ux * cy - uy * cx
    return (vx + 2.0 * (w * cx + ccx),
            vy + 2.0 * (w * cy + ccy),
            vz + 2.0 * (w * cz + ccz))


# -----------------------------------------------------------------------------
# The single fused kernel
# -----------------------------------------------------------------------------
def _fused_forward_kernel(*refs, B, S, H, J, n_enc, n_dec, parents):
    pos_out_ref, bl_out_ref = refs[-2], refs[-1]
    it = iter(refs[:-2])
    x_ref = next(it)        # (B*S, J*3)
    pe_ref = next(it)       # (S, D)
    qe_ref = next(it)       # (S, D)
    mask_ref = next(it)     # (H*B*S, H*B*S)
    emb_w = next(it)
    emb_b = next(it)
    enc = [{k: next(it) for k in ENC_KEYS} for _ in range(n_enc)]
    dec = [{k: next(it) for k in DEC_KEYS} for _ in range(n_dec)]
    head_w = next(it)
    head_b = next(it)
    rest_ref = next(it)     # (1, J*3) raw rest bone offsets (batch element 0)

    D = emb_w.shape[1]
    dh = D // H
    mask = mask_ref[...]
    pe = pe_ref[...]

    def mm(a, w_ref, b_ref):
        return jnp.dot(a, w_ref[...], preferred_element_type=jnp.float32) + b_ref[...]

    # ---- input embedding + positional encoding (dropout == identity) ----
    x = mm(x_ref[...].astype(jnp.float32), emb_w, emb_b)
    x = x + jnp.concatenate([pe] * B, axis=0)            # broadcast PE over batch

    # ---- transformer encoder (post-norm, ReLU FFN; torch defaults) ----
    for p in enc:
        qkv = mm(x, p["qkv_w"], p["qkv_b"])
        a = _mha_blockdiag(qkv[:, :D], qkv[:, D:2 * D], qkv[:, 2 * D:], mask,
                           B=B, S=S, H=H, dh=dh)
        x = _layer_norm(x + mm(a, p["wo_w"], p["wo_b"]),
                        p["ln1_g"][...], p["ln1_b"][...])
        h = jnp.maximum(mm(x, p["w1"], p["b1"]), 0.0)
        x = _layer_norm(x + mm(h, p["w2"], p["b2"]),
                        p["ln2_g"][...], p["ln2_b"][...])
    memory = x

    # ---- decoder queries: query_embed + PE, broadcast over batch ----
    x = jnp.concatenate([qe_ref[...] + pe] * B, axis=0)

    # ---- transformer decoder ----
    for p in dec:
        qkv = mm(x, p["sa_qkv_w"], p["sa_qkv_b"])
        a = _mha_blockdiag(qkv[:, :D], qkv[:, D:2 * D], qkv[:, 2 * D:], mask,
                           B=B, S=S, H=H, dh=dh)
        x = _layer_norm(x + mm(a, p["sa_wo_w"], p["sa_wo_b"]),
                        p["ln1_g"][...], p["ln1_b"][...])
        q = mm(x, p["ca_q_w"], p["ca_q_b"])
        kv = mm(memory, p["ca_kv_w"], p["ca_kv_b"])
        a = _mha_blockdiag(q, kv[:, :D], kv[:, D:], mask, B=B, S=S, H=H, dh=dh)
        x = _layer_norm(x + mm(a, p["ca_wo_w"], p["ca_wo_b"]),
                        p["ln2_g"][...], p["ln2_b"][...])
        h = jnp.maximum(mm(x, p["w1"], p["b1"]), 0.0)
        x = _layer_norm(x + mm(h, p["w2"], p["b2"]),
                        p["ln3_g"][...], p["ln3_b"][...])

    # ---- output head: (B*S, 3 + 4 + 4J + J) ----
    y = mm(x, head_w, head_b)

    # ---- predicted bone lengths (ReLU + 1e-6) ----
    bl = jnp.maximum(y[:, 7 + 4 * J: 7 + 5 * J], 0.0) + 1e-6
    bl_out_ref[...] = bl.astype(bl_out_ref.dtype)

    # ---- quaternion normalize + forward kinematics epilogue (VPU only) ----
    # TODO(synk): reference ForwardKinematics source unavailable; standard
    #             parent-chain convention assumed (see header).
    def col(c):
        return y[:, c:c + 1]

    rest = rest_ref[...]
    root_pos = (col(0), col(1), col(2))
    root_q = _quat_normalize(col(3), col(4), col(5), col(6))

    g_rot = [None] * J
    pos = [None] * J
    for j in range(J):
        base = 7 + 4 * j
        lq = _quat_normalize(col(base), col(base + 1), col(base + 2), col(base + 3))
        par = parents[j]
        if par < 0:
            g_rot[j] = _quat_mul(root_q, lq)
            pos[j] = root_pos
        else:
            g_rot[j] = _quat_mul(g_rot[par], lq)
            rx = rest[:, 3 * j + 0: 3 * j + 1]
            ry = rest[:, 3 * j + 1: 3 * j + 2]
            rz = rest[:, 3 * j + 2: 3 * j + 3]
            rinv = 1.0 / jnp.maximum(jnp.sqrt(rx * rx + ry * ry + rz * rz), 1e-12)
            ln = bl[:, j:j + 1]
            off = (rx * rinv * ln, ry * rinv * ln, rz * rinv * ln)
            dx, dy, dz = _quat_rotate(g_rot[par], off)
            pos[j] = (pos[par][0] + dx, pos[par][1] + dy, pos[par][2] + dz)

    # Write refined joint positions column by column (masked lane stores).
    for j in range(J):
        for c in range(3):
            pos_out_ref[:, 3 * j + c: 3 * j + c + 1] = pos[j][c].astype(pos_out_ref.dtype)


# -----------------------------------------------------------------------------
# Wrapper: one pallas_call for the whole forward pass
# -----------------------------------------------------------------------------
def manifold_refinement_forward(params, noisy_r3j_seq, bone_offsets_at_rest, cfg):
    B, S, J, _ = noisy_r3j_seq.shape
    D = cfg["d_model"]
    H = cfg["nhead"]
    if not cfg["use_quaternions"]:
        # Matches the reference module, which raises NotImplementedError here.
        raise NotImplementedError("use_quaternions=False is not supported.")
    if S != cfg["window_size"]:
        raise ValueError(f"seq_len {S} != window_size {cfg['window_size']}")
    if J != cfg["num_joints"]:
        raise ValueError(f"num_joints {J} != {cfg['num_joints']}")

    x_flat = noisy_r3j_seq.reshape(B * S, J * 3).astype(jnp.float32)
    rest_row = bone_offsets_at_rest[0].reshape(1, J * 3).astype(jnp.float32)

    # Block-diagonal attention mask for the head-major (H*B*S, dh) layout:
    # rows/cols r = (h*B + b)*S + s; valid iff r//S == c//S. Built once as a
    # trace-time numpy constant (hoisted; no per-layer rebuild).
    blk = np.arange(H * B * S) // S
    attn_mask = jnp.asarray(
        np.where(blk[:, None] == blk[None, :], 0.0, -1e30).astype(np.float32))

    args = [x_flat, params["pe"], params["query_embed"], attn_mask,
            params["in_emb"]["w"], params["in_emb"]["b"]]
    for lp in params["enc_layers"]:
        args.extend(lp[k] for k in ENC_KEYS)
    for lp in params["dec_layers"]:
        args.extend(lp[k] for k in DEC_KEYS)
    args.extend([params["head"]["w"], params["head"]["b"], rest_row])

    n_enc = len(params["enc_layers"])
    n_dec = len(params["dec_layers"])
    dff = params["enc_layers"][0]["w1"].shape[1]
    M = B * S
    out_dim = 3 + 4 + 4 * J + J
    attn_flops = 4 * (H * M) * (H * M) * (D // H)
    enc_flops = 2 * M * D * (3 * D + D + 2 * dff) + attn_flops
    dec_flops = 2 * M * D * (3 * D + D + D + 2 * D + D + 2 * dff) + 2 * attn_flops
    flops = int(2 * M * (J * 3) * D + n_enc * enc_flops + n_dec * dec_flops
                + 2 * M * D * out_dim)
    transc = int((n_enc + 2 * n_dec) * (H * M) * (H * M))
    nbytes = int(4 * sum(int(a.size) for a in args) + 4 * (M * J * 3 + M * J))

    kernel = functools.partial(
        _fused_forward_kernel, B=B, S=S, H=H, J=J, n_enc=n_enc, n_dec=n_dec,
        parents=tuple(int(p) for p in cfg["smpl_parents"]))

    pos_flat, bl_flat = pl.pallas_call(
        kernel,
        out_shape=(jax.ShapeDtypeStruct((M, J * 3), jnp.float32),
                   jax.ShapeDtypeStruct((M, J), jnp.float32)),
        cost_estimate=pl.CostEstimate(flops=flops, transcendentals=transc,
                                      bytes_accessed=nbytes),
    )(*args)

    refined_r3j_seq = pos_flat.reshape(B, S, J, 3)
    predicted_bone_lengths = bl_flat.reshape(B, S, J)
    return refined_r3j_seq, predicted_bone_lengths


# -----------------------------------------------------------------------------
# Parameter initialization (deterministic, synthetic; fused QKV / KV layouts,
# attention scale 1/sqrt(dh) pre-folded into the Q projection columns)
# -----------------------------------------------------------------------------
def sinusoidal_pe(window_size, d_model):
    pos = jnp.arange(window_size, dtype=jnp.float32)[:, None]
    div = jnp.exp(jnp.arange(0, d_model, 2, dtype=jnp.float32)
                  * (-math.log(10000.0) / d_model))
    pe = jnp.zeros((window_size, d_model), jnp.float32)
    pe = pe.at[:, 0::2].set(jnp.sin(pos * div))
    pe = pe.at[:, 1::2].set(jnp.cos(pos * div))
    return pe


def _init_enc_layer(key, d, dff, nhead, scale=0.05):
    qscale = 1.0 / math.sqrt(d // nhead)
    kqkv, ko, k1, k2 = jax.random.split(key, 4)
    ones = lambda n: jnp.ones((1, n), jnp.float32)
    zeros = lambda n: jnp.zeros((1, n), jnp.float32)
    qkv_w = scale * jax.random.normal(kqkv, (d, 3 * d), jnp.float32)
    qkv_w = qkv_w.at[:, :d].multiply(qscale)          # fold attention scale into Q
    return {
        "qkv_w": qkv_w, "qkv_b": zeros(3 * d),
        "wo_w": scale * jax.random.normal(ko, (d, d), jnp.float32), "wo_b": zeros(d),
        "w1": scale * jax.random.normal(k1, (d, dff), jnp.float32), "b1": zeros(dff),
        "w2": scale * jax.random.normal(k2, (dff, d), jnp.float32), "b2": zeros(d),
        "ln1_g": ones(d), "ln1_b": zeros(d),
        "ln2_g": ones(d), "ln2_b": zeros(d),
    }


def _init_dec_layer(key, d, dff, nhead, scale=0.05):
    qscale = 1.0 / math.sqrt(d // nhead)
    ksa, kso, kcq, kckv, kco, k1, k2 = jax.random.split(key, 7)
    ones = lambda n: jnp.ones((1, n), jnp.float32)
    zeros = lambda n: jnp.zeros((1, n), jnp.float32)
    sa_qkv_w = scale * jax.random.normal(ksa, (d, 3 * d), jnp.float32)
    sa_qkv_w = sa_qkv_w.at[:, :d].multiply(qscale)    # fold attention scale into Q
    ca_q_w = qscale * scale * jax.random.normal(kcq, (d, d), jnp.float32)
    return {
        "sa_qkv_w": sa_qkv_w, "sa_qkv_b": zeros(3 * d),
        "sa_wo_w": scale * jax.random.normal(kso, (d, d), jnp.float32),
        "sa_wo_b": zeros(d),
        "ca_q_w": ca_q_w, "ca_q_b": zeros(d),
        "ca_kv_w": scale * jax.random.normal(kckv, (d, 2 * d), jnp.float32),
        "ca_kv_b": zeros(2 * d),
        "ca_wo_w": scale * jax.random.normal(kco, (d, d), jnp.float32),
        "ca_wo_b": zeros(d),
        "w1": scale * jax.random.normal(k1, (d, dff), jnp.float32), "b1": zeros(dff),
        "w2": scale * jax.random.normal(k2, (dff, d), jnp.float32), "b2": zeros(d),
        "ln1_g": ones(d), "ln1_b": zeros(d),
        "ln2_g": ones(d), "ln2_b": zeros(d),
        "ln3_g": ones(d), "ln3_b": zeros(d),
    }


def init_params(key, cfg):
    J = cfg["num_joints"]
    S = cfg["window_size"]
    D = cfg["d_model"]
    H = cfg["nhead"]
    dff = cfg["dim_feedforward"]
    n_orient = 4 if cfg["use_quaternions"] else 3
    out_dim = 3 + n_orient + J * n_orient + J
    scale = 0.05
    keys = jax.random.split(key, 3 + cfg["num_encoder_layers"] + cfg["num_decoder_layers"])
    kit = iter(keys)
    return {
        "in_emb": {"w": scale * jax.random.normal(next(kit), (J * 3, D), jnp.float32),
                   "b": jnp.zeros((1, D), jnp.float32)},
        "query_embed": scale * jax.random.normal(next(kit), (S, D), jnp.float32),
        "head": {"w": scale * jax.random.normal(next(kit), (D, out_dim), jnp.float32),
                 "b": jnp.zeros((1, out_dim), jnp.float32)},
        "pe": sinusoidal_pe(S, D),
        "enc_layers": [_init_enc_layer(next(kit), D, dff, H, scale)
                       for _ in range(cfg["num_encoder_layers"])],
        "dec_layers": [_init_dec_layer(next(kit), D, dff, H, scale)
                       for _ in range(cfg["num_decoder_layers"])],
    }


# -----------------------------------------------------------------------------
# Main
# -----------------------------------------------------------------------------
if __name__ == "__main__":
    cfg = dict(
        num_joints=4,
        window_size=8,
        d_model=32,
        nhead=4,
        num_encoder_layers=2,
        num_decoder_layers=2,
        dim_feedforward=64,
        use_quaternions=True,
        smpl_parents=(-1, 0, 1, 2),
    )

    key = jax.random.PRNGKey(0)
    k_param, k_x, k_off = jax.random.split(key, 3)
    params = init_params(k_param, cfg)

    noisy_r3j_seq = jax.random.normal(
        k_x, (2, cfg["window_size"], cfg["num_joints"], 3), jnp.float32)
    bone_offsets_at_rest = jax.random.normal(
        k_off, (2, cfg["num_joints"], 3), jnp.float32)

    fwd = jax.jit(lambda p, x, o: manifold_refinement_forward(p, x, o, cfg))
    refined, bone_lengths = fwd(params, noisy_r3j_seq, bone_offsets_at_rest)
    jax.block_until_ready((refined, bone_lengths))

    assert refined.shape == (2, cfg["window_size"], cfg["num_joints"], 3)
    assert bone_lengths.shape == (2, cfg["window_size"], cfg["num_joints"])
    assert bool(jnp.all(jnp.isfinite(refined))) and bool(jnp.all(jnp.isfinite(bone_lengths)))
    print("KERNEL_OK")
</pallas_src>

<mosaic_0001>
module attributes {stable_mosaic.version = 11 : i64} {
  func.func @_fused_forward_kernel(%arg0: memref<16x12xf32, #tpu.memory_space<vmem>>, %arg1: memref<8x32xf32, #tpu.memory_space<vmem>>, %arg2: memref<8x32xf32, #tpu.memory_space<vmem>>, %arg3: memref<64x64xf32, #tpu.memory_space<vmem>>, %arg4: memref<12x32xf32, #tpu.memory_space<vmem>>, %arg5: memref<1x32xf32, #tpu.memory_space<vmem>>, %arg6: memref<32x96xf32, #tpu.memory_space<vmem>>, %arg7: memref<1x96xf32, #tpu.memory_space<vmem>>, %arg8: memref<32x32xf32, #tpu.memory_space<vmem>>, %arg9: memref<1x32xf32, #tpu.memory_space<vmem>>, %arg10: memref<1x32xf32, #tpu.memory_space<vmem>>, %arg11: memref<1x32xf32, #tpu.memory_space<vmem>>, %arg12: memref<32x64xf32, #tpu.memory_space<vmem>>, %arg13: memref<1x64xf32, #tpu.memory_space<vmem>>, %arg14: memref<64x32xf32, #tpu.memory_space<vmem>>, %arg15: memref<1x32xf32, #tpu.memory_space<vmem>>, %arg16: memref<1x32xf32, #tpu.memory_space<vmem>>, %arg17: memref<1x32xf32, #tpu.memory_space<vmem>>, %arg18: memref<32x96xf32, #tpu.memory_space<vmem>>, %arg19: memref<1x96xf32, #tpu.memory_space<vmem>>, %arg20: memref<32x32xf32, #tpu.memory_space<vmem>>, %arg21: memref<1x32xf32, #tpu.memory_space<vmem>>, %arg22: memref<1x32xf32, #tpu.memory_space<vmem>>, %arg23: memref<1x32xf32, #tpu.memory_space<vmem>>, %arg24: memref<32x64xf32, #tpu.memory_space<vmem>>, %arg25: memref<1x64xf32, #tpu.memory_space<vmem>>, %arg26: memref<64x32xf32, #tpu.memory_space<vmem>>, %arg27: memref<1x32xf32, #tpu.memory_space<vmem>>, %arg28: memref<1x32xf32, #tpu.memory_space<vmem>>, %arg29: memref<1x32xf32, #tpu.memory_space<vmem>>, %arg30: memref<32x96xf32, #tpu.memory_space<vmem>>, %arg31: memref<1x96xf32, #tpu.memory_space<vmem>>, %arg32: memref<32x32xf32, #tpu.memory_space<vmem>>, %arg33: memref<1x32xf32, #tpu.memory_space<vmem>>, %arg34: memref<1x32xf32, #tpu.memory_space<vmem>>, %arg35: memref<1x32xf32, #tpu.memory_space<vmem>>, %arg36: memref<32x32xf32, #tpu.memory_space<vmem>>, %arg37: memref<1x32xf32, #tpu.memory_space<vmem>>, %arg38: memref<32x64xf32, #tpu.memory_space<vmem>>, %arg39: memref<1x64xf32, #tpu.memory_space<vmem>>, %arg40: memref<32x32xf32, #tpu.memory_space<vmem>>, %arg41: memref<1x32xf32, #tpu.memory_space<vmem>>, %arg42: memref<1x32xf32, #tpu.memory_space<vmem>>, %arg43: memref<1x32xf32, #tpu.memory_space<vmem>>, %arg44: memref<32x64xf32, #tpu.memory_space<vmem>>, %arg45: memref<1x64xf32, #tpu.memory_space<vmem>>, %arg46: memref<64x32xf32, #tpu.memory_space<vmem>>, %arg47: memref<1x32xf32, #tpu.memory_space<vmem>>, %arg48: memref<1x32xf32, #tpu.memory_space<vmem>>, %arg49: memref<1x32xf32, #tpu.memory_space<vmem>>, %arg50: memref<32x96xf32, #tpu.memory_space<vmem>>, %arg51: memref<1x96xf32, #tpu.memory_space<vmem>>, %arg52: memref<32x32xf32, #tpu.memory_space<vmem>>, %arg53: memref<1x32xf32, #tpu.memory_space<vmem>>, %arg54: memref<1x32xf32, #tpu.memory_space<vmem>>, %arg55: memref<1x32xf32, #tpu.memory_space<vmem>>, %arg56: memref<32x32xf32, #tpu.memory_space<vmem>>, %arg57: memref<1x32xf32, #tpu.memory_space<vmem>>, %arg58: memref<32x64xf32, #tpu.memory_space<vmem>>, %arg59: memref<1x64xf32, #tpu.memory_space<vmem>>, %arg60: memref<32x32xf32, #tpu.memory_space<vmem>>, %arg61: memref<1x32xf32, #tpu.memory_space<vmem>>, %arg62: memref<1x32xf32, #tpu.memory_space<vmem>>, %arg63: memref<1x32xf32, #tpu.memory_space<vmem>>, %arg64: memref<32x64xf32, #tpu.memory_space<vmem>>, %arg65: memref<1x64xf32, #tpu.memory_space<vmem>>, %arg66: memref<64x32xf32, #tpu.memory_space<vmem>>, %arg67: memref<1x32xf32, #tpu.memory_space<vmem>>, %arg68: memref<1x32xf32, #tpu.memory_space<vmem>>, %arg69: memref<1x32xf32, #tpu.memory_space<vmem>>, %arg70: memref<32x27xf32, #tpu.memory_space<vmem>>, %arg71: memref<1x27xf32, #tpu.memory_space<vmem>>, %arg72: memref<1x12xf32, #tpu.memory_space<vmem>>, %arg73: memref<16x12xf32, #tpu.memory_space<vmem>>, %arg74: memref<16x4xf32, #tpu.memory_space<vmem>>) attributes {dimension_semantics = [], scalar_prefetch = 0 : i64, scratch_operands = 0 : i64, tpu.core_type = #tpu.core_type<tc>} {
    %c0 = arith.constant 0 : index
    %c0_0 = arith.constant 0 : index
    %0 = vector.load %arg3[%c0, %c0_0] : memref<64x64xf32, #tpu.memory_space<vmem>>, vector<64x64xf32>
    %c0_1 = arith.constant 0 : index
    %c0_2 = arith.constant 0 : index
    %1 = vector.load %arg1[%c0_1, %c0_2] : memref<8x32xf32, #tpu.memory_space<vmem>>, vector<8x32xf32>
    %c0_3 = arith.constant 0 : index
    %c0_4 = arith.constant 0 : index
    %2 = vector.load %arg0[%c0_3, %c0_4] : memref<16x12xf32, #tpu.memory_space<vmem>>, vector<16x12xf32>
    %c0_5 = arith.constant 0 : index
    %c0_6 = arith.constant 0 : index
    %3 = vector.load %arg4[%c0_5, %c0_6] : memref<12x32xf32, #tpu.memory_space<vmem>>, vector<12x32xf32>
    %cst = arith.constant dense<0.000000e+00> : vector<16x32xf32>
    %4 = tpu.matmul %2, %3, %cst {dimension_numbers = #tpu.dot_dimension_numbers<[1], [0], [0], [1], [0, 0, 1, 1], [], []>} : vector<16x12xf32>, vector<12x32xf32>, vector<16x32xf32> -> vector<16x32xf32>
    %c0_7 = arith.constant 0 : index
    %c0_8 = arith.constant 0 : index
    %5 = vector.load %arg5[%c0_7, %c0_8] : memref<1x32xf32, #tpu.memory_space<vmem>>, vector<1x32xf32>
    %6 = vector.broadcast %5 : vector<1x32xf32> to vector<16x32xf32>
    %7 = arith.addf %4, %6 : vector<16x32xf32>
    %8 = tpu.concatenate %1, %1 in 0 : vector<8x32xf32>, vector<8x32xf32> -> vector<16x32xf32>
    %9 = arith.addf %7, %8 : vector<16x32xf32>
    %c0_9 = arith.constant 0 : index
    %c0_10 = arith.constant 0 : index
    %10 = vector.load %arg6[%c0_9, %c0_10] : memref<32x96xf32, #tpu.memory_space<vmem>>, vector<32x96xf32>
    %cst_11 = arith.constant dense<0.000000e+00> : vector<16x96xf32>
    %11 = tpu.matmul %9, %10, %cst_11 {dimension_numbers = #tpu.dot_dimension_numbers<[1], [0], [0], [1], [0, 0, 1, 1], [], []>} : vector<16x32xf32>, vector<32x96xf32>, vector<16x96xf32> -> vector<16x96xf32>
    %c0_12 = arith.constant 0 : index
    %c0_13 = arith.constant 0 : index
    %12 = vector.load %arg7[%c0_12, %c0_13] : memref<1x96xf32, #tpu.memory_space<vmem>>, vector<1x96xf32>
    %13 = vector.broadcast %12 : vector<1x96xf32> to vector<16x96xf32>
    %14 = arith.addf %11, %13 : vector<16x96xf32>
    %15 = vector.extract_strided_slice %14 {offsets = [0, 0], sizes = [16, 32], strides = [1, 1]} : vector<16x96xf32> to vector<16x32xf32>
    %16 = vector.extract_strided_slice %14 {offsets = [0, 32], sizes = [16, 32], strides = [1, 1]} : vector<16x96xf32> to vector<16x32xf32>
    %17 = vector.extract_strided_slice %14 {offsets = [0, 64], sizes = [16, 32], strides = [1, 1]} : vector<16x96xf32> to vector<16x32xf32>
    %18 = vector.extract_strided_slice %15 {offsets = [0, 0], sizes = [16, 8], strides = [1, 1]} : vector<16x32xf32> to vector<16x8xf32>
    %19 = vector.extract_strided_slice %15 {offsets = [0, 8], sizes = [16, 8], strides = [1, 1]} : vector<16x32xf32> to vector<16x8xf32>
    %20 = vector.extract_strided_slice %15 {offsets = [0, 16], sizes = [16, 8], strides = [1, 1]} : vector<16x32xf32> to vector<16x8xf32>
    %21 = vector.extract_strided_slice %15 {offsets = [0, 24], sizes = [16, 8], strides = [1, 1]} : vector<16x32xf32> to vector<16x8xf32>
    %22 = tpu.concatenate %18, %19, %20, %21 in 0 : vector<16x8xf32>, vector<16x8xf32>, vector<16x8xf32>, vector<16x8xf32> -> vector<64x8xf32>
    %23 = vector.extract_strided_slice %16 {offsets = [0, 0], sizes = [16, 8], strides = [1, 1]} : vector<16x32xf32> to vector<16x8xf32>
    %24 = vector.extract_strided_slice %16 {offsets = [0, 8], sizes = [16, 8], strides = [1, 1]} : vector<16x32xf32> to vector<16x8xf32>
    %25 = vector.extract_strided_slice %16 {offsets = [0, 16], sizes = [16, 8], strides = [1, 1]} : vector<16x32xf32> to vector<16x8xf32>
    %26 = vector.extract_strided_slice %16 {offsets = [0, 24], sizes = [16, 8], strides = [1, 1]} : vector<16x32xf32> to vector<16x8xf32>
    %27 = tpu.concatenate %23, %24, %25, %26 in 0 : vector<16x8xf32>, vector<16x8xf32>, vector<16x8xf32>, vector<16x8xf32> -> vector<64x8xf32>
    %28 = vector.extract_strided_slice %17 {offsets = [0, 0], sizes = [16, 8], strides = [1, 1]} : vector<16x32xf32> to vector<16x8xf32>
    %29 = vector.extract_strided_slice %17 {offsets = [0, 8], sizes = [16, 8], strides = [1, 1]} : vector<16x32xf32> to vector<16x8xf32>
    %30 = vector.extract_strided_slice %17 {offsets = [0, 16], sizes = [16, 8], strides = [1, 1]} : vector<16x32xf32> to vector<16x8xf32>
    %31 = vector.extract_strided_slice %17 {offsets = [0, 24], sizes = [16, 8], strides = [1, 1]} : vector<16x32xf32> to vector<16x8xf32>
    %32 = tpu.concatenate %28, %29, %30, %31 in 0 : vector<16x8xf32>, vector<16x8xf32>, vector<16x8xf32>, vector<16x8xf32> -> vector<64x8xf32>
    %cst_14 = arith.constant dense<0.000000e+00> : vector<64x64xf32>
    %33 = tpu.matmul %22, %27, %cst_14 {dimension_numbers = #tpu.dot_dimension_numbers<[1], [1], [0], [0], [0, 0, 1, 0], [], []>} : vector<64x8xf32>, vector<64x8xf32>, vector<64x64xf32> -> vector<64x64xf32>
    %34 = arith.addf %33, %0 : vector<64x64xf32>
    %cst_15 = arith.constant dense<0xFF800000> : vector<64xf32>
    %35 = vector.multi_reduction <maximumf>, %34, %cst_15 [1] : vector<64x64xf32> to vector<64xf32>
    %36 = vector.shape_cast %35 : vector<64xf32> to vector<64x1xf32>
    %37 = vector.broadcast %36 : vector<64x1xf32> to vector<64x64xf32>
    %38 = arith.subf %34, %37 : vector<64x64xf32>
    %39 = math.exp %38 : vector<64x64xf32>
    %cst_16 = arith.constant dense<0.000000e+00> : vector<64xf32>
    %40 = vector.multi_reduction <add>, %39, %cst_16 [1] : vector<64x64xf32> to vector<64xf32>
    %41 = vector.shape_cast %40 : vector<64xf32> to vector<64x1xf32>
    %42 = vector.broadcast %41 : vector<64x1xf32> to vector<64x64xf32>
    %43 = arith.divf %39, %42 : vector<64x64xf32>
    %cst_17 = arith.constant dense<0.000000e+00> : vector<64x8xf32>
    %44 = tpu.matmul %43, %32, %cst_17 {dimension_numbers = #tpu.dot_dimension_numbers<[1], [0], [0], [1], [0, 0, 1, 1], [], []>} : vector<64x64xf32>, vector<64x8xf32>, vector<64x8xf32> -> vector<64x8xf32>
    %45 = vector.extract_strided_slice %44 {offsets = [0, 0], sizes = [16, 8], strides = [1, 1]} : vector<64x8xf32> to vector<16x8xf32>
    %46 = vector.extract_strided_slice %44 {offsets = [16, 0], sizes = [16, 8], strides = [1, 1]} : vector<64x8xf32> to vector<16x8xf32>
    %47 = vector.extract_strided_slice %44 {offsets = [32, 0], sizes = [16, 8], strides = [1, 1]} : vector<64x8xf32> to vector<16x8xf32>
    %48 = vector.extract_strided_slice %44 {offsets = [48, 0], sizes = [16, 8], strides = [1, 1]} : vector<64x8xf32> to vector<16x8xf32>
    %49 = tpu.concatenate %45, %46, %47, %48 in 1 : vector<16x8xf32>, vector<16x8xf32>, vector<16x8xf32>, vector<16x8xf32> -> vector<16x32xf32>
    %c0_18 = arith.constant 0 : index
    %c0_19 = arith.constant 0 : index
    %50 = vector.load %arg8[%c0_18, %c0_19] : memref<32x32xf32, #tpu.memory_space<vmem>>, vector<32x32xf32>
    %cst_20 = arith.constant dense<0.000000e+00> : vector<16x32xf32>
    %51 = tpu.matmul %49, %50, %cst_20 {dimension_numbers = #tpu.dot_dimension_numbers<[1], [0], [0], [1], [0, 0, 1, 1], [], []>} : vector<16x32xf32>, vector<32x32xf32>, vector<16x32xf32> -> vector<16x32xf32>
    %c0_21 = arith.constant 0 : index
    %c0_22 = arith.constant 0 : index
    %52 = vector.load %arg9[%c0_21, %c0_22] : memref<1x32xf32, #tpu.memory_space<vmem>>, vector<1x32xf32>
    %53 = vector.broadcast %52 : vector<1x32xf32> to vector<16x32xf32>
    %54 = arith.addf %51, %53 : vector<16x32xf32>
    %55 = arith.addf %9, %54 : vector<16x32xf32>
    %c0_23 = arith.constant 0 : index
    %c0_24 = arith.constant 0 : index
    %56 = vector.load %arg10[%c0_23, %c0_24] : memref<1x32xf32, #tpu.memory_space<vmem>>, vector<1x32xf32>
    %c0_25 = arith.constant 0 : index
    %c0_26 = arith.constant 0 : index
    %57 = vector.load %arg11[%c0_25, %c0_26] : memref<1x32xf32, #tpu.memory_space<vmem>>, vector<1x32xf32>
    %cst_27 = arith.constant dense<0.000000e+00> : vector<16xf32>
    %58 = vector.multi_reduction <add>, %55, %cst_27 [1] : vector<16x32xf32> to vector<16xf32>
    %59 = vector.shape_cast %58 : vector<16xf32> to vector<16x1xf32>
    %cst_28 = arith.constant 3.200000e+01 : f32
    %60 = vector.broadcast %cst_28 : f32 to vector<16x1xf32>
    %61 = arith.divf %59, %60 : vector<16x1xf32>
    %62 = vector.broadcast %61 : vector<16x1xf32> to vector<16x32xf32>
    %63 = arith.subf %55, %62 : vector<16x32xf32>
    %64 = arith.mulf %63, %63 : vector<16x32xf32>
    %cst_29 = arith.constant dense<0.000000e+00> : vector<16xf32>
    %65 = vector.multi_reduction <add>, %64, %cst_29 [1] : vector<16x32xf32> to vector<16xf32>
    %66 = vector.shape_cast %65 : vector<16xf32> to vector<16x1xf32>
    %cst_30 = arith.constant 3.200000e+01 : f32
    %67 = vector.broadcast %cst_30 : f32 to vector<16x1xf32>
    %68 = arith.divf %66, %67 : vector<16x1xf32>
    %69 = vector.broadcast %61 : vector<16x1xf32> to vector<16x32xf32>
    %70 = arith.subf %55, %69 : vector<16x32xf32>
    %cst_31 = arith.constant 9.99999974E-6 : f32
    %71 = vector.broadcast %cst_31 : f32 to vector<16x1xf32>
    %72 = arith.addf %68, %71 : vector<16x1xf32>
    %73 = math.rsqrt %72 : vector<16x1xf32>
    %74 = vector.broadcast %73 : vector<16x1xf32> to vector<16x32xf32>
    %75 = arith.mulf %70, %74 : vector<16x32xf32>
    %76 = vector.broadcast %56 : vector<1x32xf32> to vector<16x32xf32>
    %77 = arith.mulf %75, %76 : vector<16x32xf32>
    %78 = vector.broadcast %57 : vector<1x32xf32> to vector<16x32xf32>
    %79 = arith.addf %77, %78 : vector<16x32xf32>
    %c0_32 = arith.constant 0 : index
    %c0_33 = arith.constant 0 : index
    %80 = vector.load %arg12[%c0_32, %c0_33] : memref<32x64xf32, #tpu.memory_space<vmem>>, vector<32x64xf32>
    %cst_34 = arith.constant dense<0.000000e+00> : vector<16x64xf32>
    %81 = tpu.matmul %79, %80, %cst_34 {dimension_numbers = #tpu.dot_dimension_numbers<[1], [0], [0], [1], [0, 0, 1, 1], [], []>} : vector<16x32xf32>, vector<32x64xf32>, vector<16x64xf32> -> vector<16x64xf32>
    %c0_35 = arith.constant 0 : index
    %c0_36 = arith.constant 0 : index
    %82 = vector.load %arg13[%c0_35, %c0_36] : memref<1x64xf32, #tpu.memory_space<vmem>>, vector<1x64xf32>
    %83 = vector.broadcast %82 : vector<1x64xf32> to vector<16x64xf32>
    %84 = arith.addf %81, %83 : vector<16x64xf32>
    %cst_37 = arith.constant 0.000000e+00 : f32
    %85 = vector.broadcast %cst_37 : f32 to vector<16x64xf32>
    %86 = arith.maximumf %84, %85 : vector<16x64xf32>
    %c0_38 = arith.constant 0 : index
    %c0_39 = arith.constant 0 : index
    %87 = vector.load %arg14[%c0_38, %c0_39] : memref<64x32xf32, #tpu.memory_space<vmem>>, vector<64x32xf32>
    %cst_40 = arith.constant dense<0.000000e+00> : vector<16x32xf32>
    %88 = tpu.matmul %86, %87, %cst_40 {dimension_numbers = #tpu.dot_dimension_numbers<[1], [0], [0], [1], [0, 0, 1, 1], [], []>} : vector<16x64xf32>, vector<64x32xf32>, vector<16x32xf32> -> vector<16x32xf32>
    %c0_41 = arith.constant 0 : index
    %c0_42 = arith.constant 0 : index
    %89 = vector.load %arg15[%c0_41, %c0_42] : memref<1x32xf32, #tpu.memory_space<vmem>>, vector<1x32xf32>
    %90 = vector.broadcast %89 : vector<1x32xf32> to vector<16x32xf32>
    %91 = arith.addf %88, %90 : vector<16x32xf32>
    %92 = arith.addf %79, %91 : vector<16x32xf32>
    %c0_43 = arith.constant 0 : index
    %c0_44 = arith.constant 0 : index
    %93 = vector.load %arg16[%c0_43, %c0_44] : memref<1x32xf32, #tpu.memory_space<vmem>>, vector<1x32xf32>
    %c0_45 = arith.constant 0 : index
    %c0_46 = arith.constant 0 : index
    %94 = vector.load %arg17[%c0_45, %c0_46] : memref<1x32xf32, #tpu.memory_space<vmem>>, vector<1x32xf32>
    %cst_47 = arith.constant dense<0.000000e+00> : vector<16xf32>
    %95 = vector.multi_reduction <add>, %92, %cst_47 [1] : vector<16x32xf32> to vector<16xf32>
    %96 = vector.shape_cast %95 : vector<16xf32> to vector<16x1xf32>
    %cst_48 = arith.constant 3.200000e+01 : f32
    %97 = vector.broadcast %cst_48 : f32 to vector<16x1xf32>
    %98 = arith.divf %96, %97 : vector<16x1xf32>
    %99 = vector.broadcast %98 : vector<16x1xf32> to vector<16x32xf32>
    %100 = arith.subf %92, %99 : vector<16x32xf32>
    %101 = arith.mulf %100, %100 : vector<16x32xf32>
    %cst_49 = arith.constant dense<0.000000e+00> : vector<16xf32>
    %102 = vector.multi_reduction <add>, %101, %cst_49 [1] : vector<16x32xf32> to vector<16xf32>
    %103 = vector.shape_cast %102 : vector<16xf32> to vector<16x1xf32>
    %cst_50 = arith.constant 3.200000e+01 : f32
    %104 = vector.broadcast %cst_50 : f32 to vector<16x1xf32>
    %105 = arith.divf %103, %104 : vector<16x1xf32>
    %106 = vector.broadcast %98 : vector<16x1xf32> to vector<16x32xf32>
    %107 = arith.subf %92, %106 : vector<16x32xf32>
    %cst_51 = arith.constant 9.99999974E-6 : f32
    %108 = vector.broadcast %cst_51 : f32 to vector<16x1xf32>
    %109 = arith.addf %105, %108 : vector<16x1xf32>
    %110 = math.rsqrt %109 : vector<16x1xf32>
    %111 = vector.broadcast %110 : vector<16x1xf32> to vector<16x32xf32>
    %112 = arith.mulf %107, %111 : vector<16x32xf32>
    %113 = vector.broadcast %93 : vector<1x32xf32> to vector<16x32xf32>
    %114 = arith.mulf %112, %113 : vector<16x32xf32>
    %115 = vector.broadcast %94 : vector<1x32xf32> to vector<16x32xf32>
    %116 = arith.addf %114, %115 : vector<16x32xf32>
    %c0_52 = arith.constant 0 : index
    %c0_53 = arith.constant 0 : index
    %117 = vector.load %arg18[%c0_52, %c0_53] : memref<32x96xf32, #tpu.memory_space<vmem>>, vector<32x96xf32>
    %cst_54 = arith.constant dense<0.000000e+00> : vector<16x96xf32>
    %118 = tpu.matmul %116, %117, %cst_54 {dimension_numbers = #tpu.dot_dimension_numbers<[1], [0], [0], [1], [0, 0, 1, 1], [], []>} : vector<16x32xf32>, vector<32x96xf32>, vector<16x96xf32> -> vector<16x96xf32>
    %c0_55 = arith.constant 0 : index
    %c0_56 = arith.constant 0 : index
    %119 = vector.load %arg19[%c0_55, %c0_56] : memref<1x96xf32, #tpu.memory_space<vmem>>, vector<1x96xf32>
    %120 = vector.broadcast %119 : vector<1x96xf32> to vector<16x96xf32>
    %121 = arith.addf %118, %120 : vector<16x96xf32>
    %122 = vector.extract_strided_slice %121 {offsets = [0, 0], sizes = [16, 32], strides = [1, 1]} : vector<16x96xf32> to vector<16x32xf32>
    %123 = vector.extract_strided_slice %121 {offsets = [0, 32], sizes = [16, 32], strides = [1, 1]} : vector<16x96xf32> to vector<16x32xf32>
    %124 = vector.extract_strided_slice %121 {offsets = [0, 64], sizes = [16, 32], strides = [1, 1]} : vector<16x96xf32> to vector<16x32xf32>
    %125 = vector.extract_strided_slice %122 {offsets = [0, 0], sizes = [16, 8], strides = [1, 1]} : vector<16x32xf32> to vector<16x8xf32>
    %126 = vector.extract_strided_slice %122 {offsets = [0, 8], sizes = [16, 8], strides = [1, 1]} : vector<16x32xf32> to vector<16x8xf32>
    %127 = vector.extract_strided_slice %122 {offsets = [0, 16], sizes = [16, 8], strides = [1, 1]} : vector<16x32xf32> to vector<16x8xf32>
    %128 = vector.extract_strided_slice %122 {offsets = [0, 24], sizes = [16, 8], strides = [1, 1]} : vector<16x32xf32> to vector<16x8xf32>
    %129 = tpu.concatenate %125, %126, %127, %128 in 0 : vector<16x8xf32>, vector<16x8xf32>, vector<16x8xf32>, vector<16x8xf32> -> vector<64x8xf32>
    %130 = vector.extract_strided_slice %123 {offsets = [0, 0], sizes = [16, 8], strides = [1, 1]} : vector<16x32xf32> to vector<16x8xf32>
    %131 = vector.extract_strided_slice %123 {offsets = [0, 8], sizes = [16, 8], strides = [1, 1]} : vector<16x32xf32> to vector<16x8xf32>
    %132 = vector.extract_strided_slice %123 {offsets = [0, 16], sizes = [16, 8], strides = [1, 1]} : vector<16x32xf32> to vector<16x8xf32>
    %133 = vector.extract_strided_slice %123 {offsets = [0, 24], sizes = [16, 8], strides = [1, 1]} : vector<16x32xf32> to vector<16x8xf32>
    %134 = tpu.concatenate %130, %131, %132, %133 in 0 : vector<16x8xf32>, vector<16x8xf32>, vector<16x8xf32>, vector<16x8xf32> -> vector<64x8xf32>
    %135 = vector.extract_strided_slice %124 {offsets = [0, 0], sizes = [16, 8], strides = [1, 1]} : vector<16x32xf32> to vector<16x8xf32>
    %136 = vector.extract_strided_slice %124 {offsets = [0, 8], sizes = [16, 8], strides = [1, 1]} : vector<16x32xf32> to vector<16x8xf32>
    %137 = vector.extract_strided_slice %124 {offsets = [0, 16], sizes = [16, 8], strides = [1, 1]} : vector<16x32xf32> to vector<16x8xf32>
    %138 = vector.extract_strided_slice %124 {offsets = [0, 24], sizes = [16, 8], strides = [1, 1]} : vector<16x32xf32> to vector<16x8xf32>
    %139 = tpu.concatenate %135, %136, %137, %138 in 0 : vector<16x8xf32>, vector<16x8xf32>, vector<16x8xf32>, vector<16x8xf32> -> vector<64x8xf32>
    %cst_57 = arith.constant dense<0.000000e+00> : vector<64x64xf32>
    %140 = tpu.matmul %129, %134, %cst_57 {dimension_numbers = #tpu.dot_dimension_numbers<[1], [1], [0], [0], [0, 0, 1, 0], [], []>} : vector<64x8xf32>, vector<64x8xf32>, vector<64x64xf32> -> vector<64x64xf32>
    %141 = arith.addf %140, %0 : vector<64x64xf32>
    %cst_58 = arith.constant dense<0xFF800000> : vector<64xf32>
    %142 = vector.multi_reduction <maximumf>, %141, %cst_58 [1] : vector<64x64xf32> to vector<64xf32>
    %143 = vector.shape_cast %142 : vector<64xf32> to vector<64x1xf32>
    %144 = vector.broadcast %143 : vector<64x1xf32> to vector<64x64xf32>
    %145 = arith.subf %141, %144 : vector<64x64xf32>
    %146 = math.exp %145 : vector<64x64xf32>
    %cst_59 = arith.constant dense<0.000000e+00> : vector<64xf32>
    %147 = vector.multi_reduction <add>, %146, %cst_59 [1] : vector<64x64xf32> to vector<64xf32>
    %148 = vector.shape_cast %147 : vector<64xf32> to vector<64x1xf32>
    %149 = vector.broadcast %148 : vector<64x1xf32> to vector<64x64xf32>
    %150 = arith.divf %146, %149 : vector<64x64xf32>
    %cst_60 = arith.constant dense<0.000000e+00> : vector<64x8xf32>
    %151 = tpu.matmul %150, %139, %cst_60 {dimension_numbers = #tpu.dot_dimension_numbers<[1], [0], [0], [1], [0, 0, 1, 1], [], []>} : vector<64x64xf32>, vector<64x8xf32>, vector<64x8xf32> -> vector<64x8xf32>
    %152 = vector.extract_strided_slice %151 {offsets = [0, 0], sizes = [16, 8], strides = [1, 1]} : vector<64x8xf32> to vector<16x8xf32>
    %153 = vector.extract_strided_slice %151 {offsets = [16, 0], sizes = [16, 8], strides = [1, 1]} : vector<64x8xf32> to vector<16x8xf32>
    %154 = vector.extract_strided_slice %151 {offsets = [32, 0], sizes = [16, 8], strides = [1, 1]} : vector<64x8xf32> to vector<16x8xf32>
    %155 = vector.extract_strided_slice %151 {offsets = [48, 0], sizes = [16, 8], strides = [1, 1]} : vector<64x8xf32> to vector<16x8xf32>
    %156 = tpu.concatenate %152, %153, %154, %155 in 1 : vector<16x8xf32>, vector<16x8xf32>, vector<16x8xf32>, vector<16x8xf32> -> vector<16x32xf32>
    %c0_61 = arith.constant 0 : index
    %c0_62 = arith.constant 0 : index
    %157 = vector.load %arg20[%c0_61, %c0_62] : memref<32x32xf32, #tpu.memory_space<vmem>>, vector<32x32xf32>
    %cst_63 = arith.constant dense<0.000000e+00> : vector<16x32xf32>
    %158 = tpu.matmul %156, %157, %cst_63 {dimension_numbers = #tpu.dot_dimension_numbers<[1], [0], [0], [1], [0, 0, 1, 1], [], []>} : vector<16x32xf32>, vector<32x32xf32>, vector<16x32xf32> -> vector<16x32xf32>
    %c0_64 = arith.constant 0 : index
    %c0_65 = arith.constant 0 : index
    %159 = vector.load %arg21[%c0_64, %c0_65] : memref<1x32xf32, #tpu.memory_space<vmem>>, vector<1x32xf32>
    %160 = vector.broadcast %159 : vector<1x32xf32> to vector<16x32xf32>
    %161 = arith.addf %158, %160 : vector<16x32xf32>
    %162 = arith.addf %116, %161 : vector<16x32xf32>
    %c0_66 = arith.constant 0 : index
    %c0_67 = arith.constant 0 : index
    %163 = vector.load %arg22[%c0_66, %c0_67] : memref<1x32xf32, #tpu.memory_space<vmem>>, vector<1x32xf32>
    %c0_68 = arith.constant 0 : index
    %c0_69 = arith.constant 0 : index
    %164 = vector.load %arg23[%c0_68, %c0_69] : memref<1x32xf32, #tpu.memory_space<vmem>>, vector<1x32xf32>
    %cst_70 = arith.constant dense<0.000000e+00> : vector<16xf32>
    %165 = vector.multi_reduction <add>, %162, %cst_70 [1] : vector<16x32xf32> to vector<16xf32>
    %166 = vector.shape_cast %165 : vector<16xf32> to vector<16x1xf32>
    %cst_71 = arith.constant 3.200000e+01 : f32
    %167 = vector.broadcast %cst_71 : f32 to vector<16x1xf32>
    %168 = arith.divf %166, %167 : vector<16x1xf32>
    %169 = vector.broadcast %168 : vector<16x1xf32> to vector<16x32xf32>
    %170 = arith.subf %162, %169 : vector<16x32xf32>
    %171 = arith.mulf %170, %170 : vector<16x32xf32>
    %cst_72 = arith.constant dense<0.000000e+00> : vector<16xf32>
    %172 = vector.multi_reduction <add>, %171, %cst_72 [1] : vector<16x32xf32> to vector<16xf32>
    %173 = vector.shape_cast %172 : vector<16xf32> to vector<16x1xf32>
    %cst_73 = arith.constant 3.200000e+01 : f32
    %174 = vector.broadcast %cst_73 : f32 to vector<16x1xf32>
    %175 = arith.divf %173, %174 : vector<16x1xf32>
    %176 = vector.broadcast %168 : vector<16x1xf32> to vector<16x32xf32>
    %177 = arith.subf %162, %176 : vector<16x32xf32>
    %cst_74 = arith.constant 9.99999974E-6 : f32
    %178 = vector.broadcast %cst_74 : f32 to vector<16x1xf32>
    %179 = arith.addf %175, %178 : vector<16x1xf32>
    %180 = math.rsqrt %179 : vector<16x1xf32>
    %181 = vector.broadcast %180 : vector<16x1xf32> to vector<16x32xf32>
    %182 = arith.mulf %177, %181 : vector<16x32xf32>
    %183 = vector.broadcast %163 : vector<1x32xf32> to vector<16x32xf32>
    %184 = arith.mulf %182, %183 : vector<16x32xf32>
    %185 = vector.broadcast %164 : vector<1x32xf32> to vector<16x32xf32>
    %186 = arith.addf %184, %185 : vector<16x32xf32>
    %c0_75 = arith.constant 0 : index
    %c0_76 = arith.constant 0 : index
    %187 = vector.load %arg24[%c0_75, %c0_76] : memref<32x64xf32, #tpu.memory_space<vmem>>, vector<32x64xf32>
    %cst_77 = arith.constant dense<0.000000e+00> : vector<16x64xf32>
    %188 = tpu.matmul %186, %187, %cst_77 {dimension_numbers = #tpu.dot_dimension_numbers<[1], [0], [0], [1], [0, 0, 1, 1], [], []>} : vector<16x32xf32>, vector<32x64xf32>, vector<16x64xf32> -> vector<16x64xf32>
    %c0_78 = arith.constant 0 : index
    %c0_79 = arith.constant 0 : index
    %189 = vector.load %arg25[%c0_78, %c0_79] : memref<1x64xf32, #tpu.memory_space<vmem>>, vector<1x64xf32>
    %190 = vector.broadcast %189 : vector<1x64xf32> to vector<16x64xf32>
    %191 = arith.addf %188, %190 : vector<16x64xf32>
    %cst_80 = arith.constant 0.000000e+00 : f32
    %192 = vector.broadcast %cst_80 : f32 to vector<16x64xf32>
    %193 = arith.maximumf %191, %192 : vector<16x64xf32>
    %c0_81 = arith.constant 0 : index
    %c0_82 = arith.constant 0 : index
    %194 = vector.load %arg26[%c0_81, %c0_82] : memref<64x32xf32, #tpu.memory_space<vmem>>, vector<64x32xf32>
    %cst_83 = arith.constant dense<0.000000e+00> : vector<16x32xf32>
    %195 = tpu.matmul %193, %194, %cst_83 {dimension_numbers = #tpu.dot_dimension_numbers<[1], [0], [0], [1], [0, 0, 1, 1], [], []>} : vector<16x64xf32>, vector<64x32xf32>, vector<16x32xf32> -> vector<16x32xf32>
    %c0_84 = arith.constant 0 : index
    %c0_85 = arith.constant 0 : index
    %196 = vector.load %arg27[%c0_84, %c0_85] : memref<1x32xf32, #tpu.memory_space<vmem>>, vector<1x32xf32>
    %197 = vector.broadcast %196 : vector<1x32xf32> to vector<16x32xf32>
    %198 = arith.addf %195, %197 : vector<16x32xf32>
    %199 = arith.addf %186, %198 : vector<16x32xf32>
    %c0_86 = arith.constant 0 : index
    %c0_87 = arith.constant 0 : index
    %200 = vector.load %arg28[%c0_86, %c0_87] : memref<1x32xf32, #tpu.memory_space<vmem>>, vector<1x32xf32>
    %c0_88 = arith.constant 0 : index
    %c0_89 = arith.constant 0 : index
    %201 = vector.load %arg29[%c0_88, %c0_89] : memref<1x32xf32, #tpu.memory_space<vmem>>, vector<1x32xf32>
    %cst_90 = arith.constant dense<0.000000e+00> : vector<16xf32>
    %202 = vector.multi_reduction <add>, %199, %cst_90 [1] : vector<16x32xf32> to vector<16xf32>
    %203 = vector.shape_cast %202 : vector<16xf32> to vector<16x1xf32>
    %cst_91 = arith.constant 3.200000e+01 : f32
    %204 = vector.broadcast %cst_91 : f32 to vector<16x1xf32>
    %205 = arith.divf %203, %204 : vector<16x1xf32>
    %206 = vector.broadcast %205 : vector<16x1xf32> to vector<16x32xf32>
    %207 = arith.subf %199, %206 : vector<16x32xf32>
    %208 = arith.mulf %207, %207 : vector<16x32xf32>
    %cst_92 = arith.constant dense<0.000000e+00> : vector<16xf32>
    %209 = vector.multi_reduction <add>, %208, %cst_92 [1] : vector<16x32xf32> to vector<16xf32>
    %210 = vector.shape_cast %209 : vector<16xf32> to vector<16x1xf32>
    %cst_93 = arith.constant 3.200000e+01 : f32
    %211 = vector.broadcast %cst_93 : f32 to vector<16x1xf32>
    %212 = arith.divf %210, %211 : vector<16x1xf32>
    %213 = vector.broadcast %205 : vector<16x1xf32> to vector<16x32xf32>
    %214 = arith.subf %199, %213 : vector<16x32xf32>
    %cst_94 = arith.constant 9.99999974E-6 : f32
    %215 = vector.broadcast %cst_94 : f32 to vector<16x1xf32>
    %216 = arith.addf %212, %215 : vector<16x1xf32>
    %217 = math.rsqrt %216 : vector<16x1xf32>
    %218 = vector.broadcast %217 : vector<16x1xf32> to vector<16x32xf32>
    %219 = arith.mulf %214, %218 : vector<16x32xf32>
    %220 = vector.broadcast %200 : vector<1x32xf32> to vector<16x32xf32>
    %221 = arith.mulf %219, %220 : vector<16x32xf32>
    %222 = vector.broadcast %201 : vector<1x32xf32> to vector<16x32xf32>
    %223 = arith.addf %221, %222 : vector<16x32xf32>
    %c0_95 = arith.constant 0 : index
    %c0_96 = arith.constant 0 : index
    %224 = vector.load %arg2[%c0_95, %c0_96] : memref<8x32xf32, #tpu.memory_space<vmem>>, vector<8x32xf32>
    %225 = arith.addf %224, %1 : vector<8x32xf32>
    %226 = tpu.concatenate %225, %225 in 0 : vector<8x32xf32>, vector<8x32xf32> -> vector<16x32xf32>
    %c0_97 = arith.constant 0 : index
    %c0_98 = arith.constant 0 : index
    %227 = vector.load %arg30[%c0_97, %c0_98] : memref<32x96xf32, #tpu.memory_space<vmem>>, vector<32x96xf32>
    %cst_99 = arith.constant dense<0.000000e+00> : vector<16x96xf32>
    %228 = tpu.matmul %226, %227, %cst_99 {dimension_numbers = #tpu.dot_dimension_numbers<[1], [0], [0], [1], [0, 0, 1, 1], [], []>} : vector<16x32xf32>, vector<32x96xf32>, vector<16x96xf32> -> vector<16x96xf32>
    %c0_100 = arith.constant 0 : index
    %c0_101 = arith.constant 0 : index
    %229 = vector.load %arg31[%c0_100, %c0_101] : memref<1x96xf32, #tpu.memory_space<vmem>>, vector<1x96xf32>
    %230 = vector.broadcast %229 : vector<1x96xf32> to vector<16x96xf32>
    %231 = arith.addf %228, %230 : vector<16x96xf32>
    %232 = vector.extract_strided_slice %231 {offsets = [0, 0], sizes = [16, 32], strides = [1, 1]} : vector<16x96xf32> to vector<16x32xf32>
    %233 = vector.extract_strided_slice %231 {offsets = [0, 32], sizes = [16, 32], strides = [1, 1]} : vector<16x96xf32> to vector<16x32xf32>
    %234 = vector.extract_strided_slice %231 {offsets = [0, 64], sizes = [16, 32], strides = [1, 1]} : vector<16x96xf32> to vector<16x32xf32>
    %235 = vector.extract_strided_slice %232 {offsets = [0, 0], sizes = [16, 8], strides = [1, 1]} : vector<16x32xf32> to vector<16x8xf32>
    %236 = vector.extract_strided_slice %232 {offsets = [0, 8], sizes = [16, 8], strides = [1, 1]} : vector<16x32xf32> to vector<16x8xf32>
    %237 = vector.extract_strided_slice %232 {offsets = [0, 16], sizes = [16, 8], strides = [1, 1]} : vector<16x32xf32> to vector<16x8xf32>
    %238 = vector.extract_strided_slice %232 {offsets = [0, 24], sizes = [16, 8], strides = [1, 1]} : vector<16x32xf32> to vector<16x8xf32>
    %239 = tpu.concatenate %235, %236, %237, %238 in 0 : vector<16x8xf32>, vector<16x8xf32>, vector<16x8xf32>, vector<16x8xf32> -> vector<64x8xf32>
    %240 = vector.extract_strided_slice %233 {offsets = [0, 0], sizes = [16, 8], strides = [1, 1]} : vector<16x32xf32> to vector<16x8xf32>
    %241 = vector.extract_strided_slice %233 {offsets = [0, 8], sizes = [16, 8], strides = [1, 1]} : vector<16x32xf32> to vector<16x8xf32>
    %242 = vector.extract_strided_slice %233 {offsets = [0, 16], sizes = [16, 8], strides = [1, 1]} : vector<16x32xf32> to vector<16x8xf32>
    %243 = vector.extract_strided_slice %233 {offsets = [0, 24], sizes = [16, 8], strides = [1, 1]} : vector<16x32xf32> to vector<16x8xf32>
    %244 = tpu.concatenate %240, %241, %242, %243 in 0 : vector<16x8xf32>, vector<16x8xf32>, vector<16x8xf32>, vector<16x8xf32> -> vector<64x8xf32>
    %245 = vector.extract_strided_slice %234 {offsets = [0, 0], sizes = [16, 8], strides = [1, 1]} : vector<16x32xf32> to vector<16x8xf32>
    %246 = vector.extract_strided_slice %234 {offsets = [0, 8], sizes = [16, 8], strides = [1, 1]} : vector<16x32xf32> to vector<16x8xf32>
    %247 = vector.extract_strided_slice %234 {offsets = [0, 16], sizes = [16, 8], strides = [1, 1]} : vector<16x32xf32> to vector<16x8xf32>
    %248 = vector.extract_strided_slice %234 {offsets = [0, 24], sizes = [16, 8], strides = [1, 1]} : vector<16x32xf32> to vector<16x8xf32>
    %249 = tpu.concatenate %245, %246, %247, %248 in 0 : vector<16x8xf32>, vector<16x8xf32>, vector<16x8xf32>, vector<16x8xf32> -> vector<64x8xf32>
    %cst_102 = arith.constant dense<0.000000e+00> : vector<64x64xf32>
    %250 = tpu.matmul %239, %244, %cst_102 {dimension_numbers = #tpu.dot_dimension_numbers<[1], [1], [0], [0], [0, 0, 1, 0], [], []>} : vector<64x8xf32>, vector<64x8xf32>, vector<64x64xf32> -> vector<64x64xf32>
    %251 = arith.addf %250, %0 : vector<64x64xf32>
    %cst_103 = arith.constant dense<0xFF800000> : vector<64xf32>
    %252 = vector.multi_reduction <maximumf>, %251, %cst_103 [1] : vector<64x64xf32> to vector<64xf32>
    %253 = vector.shape_cast %252 : vector<64xf32> to vector<64x1xf32>
    %254 = vector.broadcast %253 : vector<64x1xf32> to vector<64x64xf32>
    %255 = arith.subf %251, %254 : vector<64x64xf32>
    %256 = math.exp %255 : vector<64x64xf32>
    %cst_104 = arith.constant dense<0.000000e+00> : vector<64xf32>
    %257 = vector.multi_reduction <add>, %256, %cst_104 [1] : vector<64x64xf32> to vector<64xf32>
    %258 = vector.shape_cast %257 : vector<64xf32> to vector<64x1xf32>
    %259 = vector.broadcast %258 : vector<64x1xf32> to vector<64x64xf32>
    %260 = arith.divf %256, %259 : vector<64x64xf32>
    %cst_105 = arith.constant dense<0.000000e+00> : vector<64x8xf32>
    %261 = tpu.matmul %260, %249, %cst_105 {dimension_numbers = #tpu.dot_dimension_numbers<[1], [0], [0], [1], [0, 0, 1, 1], [], []>} : vector<64x64xf32>, vector<64x8xf32>, vector<64x8xf32> -> vector<64x8xf32>
    %262 = vector.extract_strided_slice %261 {offsets = [0, 0], sizes = [16, 8], strides = [1, 1]} : vector<64x8xf32> to vector<16x8xf32>
    %263 = vector.extract_strided_slice %261 {offsets = [16, 0], sizes = [16, 8], strides = [1, 1]} : vector<64x8xf32> to vector<16x8xf32>
    %264 = vector.extract_strided_slice %261 {offsets = [32, 0], sizes = [16, 8], strides = [1, 1]} : vector<64x8xf32> to vector<16x8xf32>
    %265 = vector.extract_strided_slice %261 {offsets = [48, 0], sizes = [16, 8], strides = [1, 1]} : vector<64x8xf32> to vector<16x8xf32>
    %266 = tpu.concatenate %262, %263, %264, %265 in 1 : vector<16x8xf32>, vector<16x8xf32>, vector<16x8xf32>, vector<16x8xf32> -> vector<16x32xf32>
    %c0_106 = arith.constant 0 : index
    %c0_107 = arith.constant 0 : index
    %267 = vector.load %arg32[%c0_106, %c0_107] : memref<32x32xf32, #tpu.memory_space<vmem>>, vector<32x32xf32>
    %cst_108 = arith.constant dense<0.000000e+00> : vector<16x32xf32>
    %268 = tpu.matmul %266, %267, %cst_108 {dimension_numbers = #tpu.dot_dimension_numbers<[1], [0], [0], [1], [0, 0, 1, 1], [], []>} : vector<16x32xf32>, vector<32x32xf32>, vector<16x32xf32> -> vector<16x32xf32>
    %c0_109 = arith.constant 0 : index
    %c0_110 = arith.constant 0 : index
    %269 = vector.load %arg33[%c0_109, %c0_110] : memref<1x32xf32, #tpu.memory_space<vmem>>, vector<1x32xf32>
    %270 = vector.broadcast %269 : vector<1x32xf32> to vector<16x32xf32>
    %271 = arith.addf %268, %270 : vector<16x32xf32>
    %272 = arith.addf %226, %271 : vector<16x32xf32>
    %c0_111 = arith.constant 0 : index
    %c0_112 = arith.constant 0 : index
    %273 = vector.load %arg34[%c0_111, %c0_112] : memref<1x32xf32, #tpu.memory_space<vmem>>, vector<1x32xf32>
    %c0_113 = arith.constant 0 : index
    %c0_114 = arith.constant 0 : index
    %274 = vector.load %arg35[%c0_113, %c0_114] : memref<1x32xf32, #tpu.memory_space<vmem>>, vector<1x32xf32>
    %cst_115 = arith.constant dense<0.000000e+00> : vector<16xf32>
    %275 = vector.multi_reduction <add>, %272, %cst_115 [1] : vector<16x32xf32> to vector<16xf32>
    %276 = vector.shape_cast %275 : vector<16xf32> to vector<16x1xf32>
    %cst_116 = arith.constant 3.200000e+01 : f32
    %277 = vector.broadcast %cst_116 : f32 to vector<16x1xf32>
    %278 = arith.divf %276, %277 : vector<16x1xf32>
    %279 = vector.broadcast %278 : vector<16x1xf32> to vector<16x32xf32>
    %280 = arith.subf %272, %279 : vector<16x32xf32>
    %281 = arith.mulf %280, %280 : vector<16x32xf32>
    %cst_117 = arith.constant dense<0.000000e+00> : vector<16xf32>
    %282 = vector.multi_reduction <add>, %281, %cst_117 [1] : vector<16x32xf32> to vector<16xf32>
    %283 = vector.shape_cast %282 : vector<16xf32> to vector<16x1xf32>
    %cst_118 = arith.constant 3.200000e+01 : f32
    %284 = vector.broadcast %cst_118 : f32 to vector<16x1xf32>
    %285 = arith.divf %283, %284 : vector<16x1xf32>
    %286 = vector.broadcast %278 : vector<16x1xf32> to vector<16x32xf32>
    %287 = arith.subf %272, %286 : vector<16x32xf32>
    %cst_119 = arith.constant 9.99999974E-6 : f32
    %288 = vector.broadcast %cst_119 : f32 to vector<16x1xf32>
    %289 = arith.addf %285, %288 : vector<16x1xf32>
    %290 = math.rsqrt %289 : vector<16x1xf32>
    %291 = vector.broadcast %290 : vector<16x1xf32> to vector<16x32xf32>
    %292 = arith.mulf %287, %291 : vector<16x32xf32>
    %293 = vector.broadcast %273 : vector<1x32xf32> to vector<16x32xf32>
    %294 = arith.mulf %292, %293 : vector<16x32xf32>
    %295 = vector.broadcast %274 : vector<1x32xf32> to vector<16x32xf32>
    %296 = arith.addf %294, %295 : vector<16x32xf32>
    %c0_120 = arith.constant 0 : index
    %c0_121 = arith.constant 0 : index
    %297 = vector.load %arg36[%c0_120, %c0_121] : memref<32x32xf32, #tpu.memory_space<vmem>>, vector<32x32xf32>
    %cst_122 = arith.constant dense<0.000000e+00> : vector<16x32xf32>
    %298 = tpu.matmul %296, %297, %cst_122 {dimension_numbers = #tpu.dot_dimension_numbers<[1], [0], [0], [1], [0, 0, 1, 1], [], []>} : vector<16x32xf32>, vector<32x32xf32>, vector<16x32xf32> -> vector<16x32xf32>
    %c0_123 = arith.constant 0 : index
    %c0_124 = arith.constant 0 : index
    %299 = vector.load %arg37[%c0_123, %c0_124] : memref<1x32xf32, #tpu.memory_space<vmem>>, vector<1x32xf32>
    %300 = vector.broadcast %299 : vector<1x32xf32> to vector<16x32xf32>
    %301 = arith.addf %298, %300 : vector<16x32xf32>
    %c0_125 = arith.constant 0 : index
    %c0_126 = arith.constant 0 : index
    %302 = vector.load %arg38[%c0_125, %c0_126] : memref<32x64xf32, #tpu.memory_space<vmem>>, vector<32x64xf32>
    %cst_127 = arith.constant dense<0.000000e+00> : vector<16x64xf32>
    %303 = tpu.matmul %223, %302, %cst_127 {dimension_numbers = #tpu.dot_dimension_numbers<[1], [0], [0], [1], [0, 0, 1, 1], [], []>} : vector<16x32xf32>, vector<32x64xf32>, vector<16x64xf32> -> vector<16x64xf32>
    %c0_128 = arith.constant 0 : index
    %c0_129 = arith.constant 0 : index
    %304 = vector.load %arg39[%c0_128, %c0_129] : memref<1x64xf32, #tpu.memory_space<vmem>>, vector<1x64xf32>
    %305 = vector.broadcast %304 : vector<1x64xf32> to vector<16x64xf32>
    %306 = arith.addf %303, %305 : vector<16x64xf32>
    %307 = vector.extract_strided_slice %306 {offsets = [0, 0], sizes = [16, 32], strides = [1, 1]} : vector<16x64xf32> to vector<16x32xf32>
    %308 = vector.extract_strided_slice %306 {offsets = [0, 32], sizes = [16, 32], strides = [1, 1]} : vector<16x64xf32> to vector<16x32xf32>
    %309 = vector.extract_strided_slice %301 {offsets = [0, 0], sizes = [16, 8], strides = [1, 1]} : vector<16x32xf32> to vector<16x8xf32>
    %310 = vector.extract_strided_slice %301 {offsets = [0, 8], sizes = [16, 8], strides = [1, 1]} : vector<16x32xf32> to vector<16x8xf32>
    %311 = vector.extract_strided_slice %301 {offsets = [0, 16], sizes = [16, 8], strides = [1, 1]} : vector<16x32xf32> to vector<16x8xf32>
    %312 = vector.extract_strided_slice %301 {offsets = [0, 24], sizes = [16, 8], strides = [1, 1]} : vector<16x32xf32> to vector<16x8xf32>
    %313 = tpu.concatenate %309, %310, %311, %312 in 0 : vector<16x8xf32>, vector<16x8xf32>, vector<16x8xf32>, vector<16x8xf32> -> vector<64x8xf32>
    %314 = vector.extract_strided_slice %307 {offsets = [0, 0], sizes = [16, 8], strides = [1, 1]} : vector<16x32xf32> to vector<16x8xf32>
    %315 = vector.extract_strided_slice %307 {offsets = [0, 8], sizes = [16, 8], strides = [1, 1]} : vector<16x32xf32> to vector<16x8xf32>
    %316 = vector.extract_strided_slice %307 {offsets = [0, 16], sizes = [16, 8], strides = [1, 1]} : vector<16x32xf32> to vector<16x8xf32>
    %317 = vector.extract_strided_slice %307 {offsets = [0, 24], sizes = [16, 8], strides = [1, 1]} : vector<16x32xf32> to vector<16x8xf32>
    %318 = tpu.concatenate %314, %315, %316, %317 in 0 : vector<16x8xf32>, vector<16x8xf32>, vector<16x8xf32>, vector<16x8xf32> -> vector<64x8xf32>
    %319 = vector.extract_strided_slice %308 {offsets = [0, 0], sizes = [16, 8], strides = [1, 1]} : vector<16x32xf32> to vector<16x8xf32>
    %320 = vector.extract_strided_slice %308 {offsets = [0, 8], sizes = [16, 8], strides = [1, 1]} : vector<16x32xf32> to vector<16x8xf32>
    %321 = vector.extract_strided_slice %308 {offsets = [0, 16], sizes = [16, 8], strides = [1, 1]} : vector<16x32xf32> to vector<16x8xf32>
    %322 = vector.extract_strided_slice %308 {offsets = [0, 24], sizes = [16, 8], strides = [1, 1]} : vector<16x32xf32> to vector<16x8xf32>
    %323 = tpu.concatenate %319, %320, %321, %322 in 0 : vector<16x8xf32>, vector<16x8xf32>, vector<16x8xf32>, vector<16x8xf32> -> vector<64x8xf32>
    %cst_130 = arith.constant dense<0.000000e+00> : vector<64x64xf32>
    %324 = tpu.matmul %313, %318, %cst_130 {dimension_numbers = #tpu.dot_dimension_numbers<[1], [1], [0], [0], [0, 0, 1, 0], [], []>} : vector<64x8xf32>, vector<64x8xf32>, vector<64x64xf32> -> vector<64x64xf32>
    %325 = arith.addf %324, %0 : vector<64x64xf32>
    %cst_131 = arith.constant dense<0xFF800000> : vector<64xf32>
    %326 = vector.multi_reduction <maximumf>, %325, %cst_131 [1] : vector<64x64xf32> to vector<64xf32>
    %327 = vector.shape_cast %326 : vector<64xf32> to vector<64x1xf32>
    %328 = vector.broadcast %327 : vector<64x1xf32> to vector<64x64xf32>
    %329 = arith.subf %325, %328 : vector<64x64xf32>
    %330 = math.exp %329 : vector<64x64xf32>
    %cst_132 = arith.constant dense<0.000000e+00> : vector<64xf32>
    %331 = vector.multi_reduction <add>, %330, %cst_132 [1] : vector<64x64xf32> to vector<64xf32>
    %332 = vector.shape_cast %331 : vector<64xf32> to vector<64x1xf32>
    %333 = vector.broadcast %332 : vector<64x1xf32> to vector<64x64xf32>
    %334 = arith.divf %330, %333 : vector<64x64xf32>
    %cst_133 = arith.constant dense<0.000000e+00> : vector<64x8xf32>
    %335 = tpu.matmul %334, %323, %cst_133 {dimension_numbers = #tpu.dot_dimension_numbers<[1], [0], [0], [1], [0, 0, 1, 1], [], []>} : vector<64x64xf32>, vector<64x8xf32>, vector<64x8xf32> -> vector<64x8xf32>
    %336 = vector.extract_strided_slice %335 {offsets = [0, 0], sizes = [16, 8], strides = [1, 1]} : vector<64x8xf32> to vector<16x8xf32>
    %337 = vector.extract_strided_slice %335 {offsets = [16, 0], sizes = [16, 8], strides = [1, 1]} : vector<64x8xf32> to vector<16x8xf32>
    %338 = vector.extract_strided_slice %335 {offsets = [32, 0], sizes = [16, 8], strides = [1, 1]} : vector<64x8xf32> to vector<16x8xf32>
    %339 = vector.extract_strided_slice %335 {offsets = [48, 0], sizes = [16, 8], strides = [1, 1]} : vector<64x8xf32> to vector<16x8xf32>
    %340 = tpu.concatenate %336, %337, %338, %339 in 1 : vector<16x8xf32>, vector<16x8xf32>, vector<16x8xf32>, vector<16x8xf32> -> vector<16x32xf32>
    %c0_134 = arith.constant 0 : index
    %c0_135 = arith.constant 0 : index
    %341 = vector.load %arg40[%c0_134, %c0_135] : memref<32x32xf32, #tpu.memory_space<vmem>>, vector<32x32xf32>
    %cst_136 = arith.constant dense<0.000000e+00> : vector<16x32xf32>
    %342 = tpu.matmul %340, %341, %cst_136 {dimension_numbers = #tpu.dot_dimension_numbers<[1], [0], [0], [1], [0, 0, 1, 1], [], []>} : vector<16x32xf32>, vector<32x32xf32>, vector<16x32xf32> -> vector<16x32xf32>
    %c0_137 = arith.constant 0 : index
    %c0_138 = arith.constant 0 : index
    %343 = vector.load %arg41[%c0_137, %c0_138] : memref<1x32xf32, #tpu.memory_space<vmem>>, vector<1x32xf32>
    %344 = vector.broadcast %343 : vector<1x32xf32> to vector<16x32xf32>
    %345 = arith.addf %342, %344 : vector<16x32xf32>
    %346 = arith.addf %296, %345 : vector<16x32xf32>
    %c0_139 = arith.constant 0 : index
    %c0_140 = arith.constant 0 : index
    %347 = vector.load %arg42[%c0_139, %c0_140] : memref<1x32xf32, #tpu.memory_space<vmem>>, vector<1x32xf32>
    %c0_141 = arith.constant 0 : index
    %c0_142 = arith.constant 0 : index
    %348 = vector.load %arg43[%c0_141, %c0_142] : memref<1x32xf32, #tpu.memory_space<vmem>>, vector<1x32xf32>
    %cst_143 = arith.constant dense<0.000000e+00> : vector<16xf32>
    %349 = vector.multi_reduction <add>, %346, %cst_143 [1] : vector<16x32xf32> to vector<16xf32>
    %350 = vector.shape_cast %349 : vector<16xf32> to vector<16x1xf32>
    %cst_144 = arith.constant 3.200000e+01 : f32
    %351 = vector.broadcast %cst_144 : f32 to vector<16x1xf32>
    %352 = arith.divf %350, %351 : vector<16x1xf32>
    %353 = vector.broadcast %352 : vector<16x1xf32> to vector<16x32xf32>
    %354 = arith.subf %346, %353 : vector<16x32xf32>
    %355 = arith.mulf %354, %354 : vector<16x32xf32>
    %cst_145 = arith.constant dense<0.000000e+00> : vector<16xf32>
    %356 = vector.multi_reduction <add>, %355, %cst_145 [1] : vector<16x32xf32> to vector<16xf32>
    %357 = vector.shape_cast %356 : vector<16xf32> to vector<16x1xf32>
    %cst_146 = arith.constant 3.200000e+01 : f32
    %358 = vector.broadcast %cst_146 : f32 to vector<16x1xf32>
    %359 = arith.divf %357, %358 : vector<16x1xf32>
    %360 = vector.broadcast %352 : vector<16x1xf32> to vector<16x32xf32>
    %361 = arith.subf %346, %360 : vector<16x32xf32>
    %cst_147 = arith.constant 9.99999974E-6 : f32
    %362 = vector.broadcast %cst_147 : f32 to vector<16x1xf32>
    %363 = arith.addf %359, %362 : vector<16x1xf32>
    %364 = math.rsqrt %363 : vector<16x1xf32>
    %365 = vector.broadcast %364 : vector<16x1xf32> to vector<16x32xf32>
    %366 = arith.mulf %361, %365 : vector<16x32xf32>
    %367 = vector.broadcast %347 : vector<1x32xf32> to vector<16x32xf32>
    %368 = arith.mulf %366, %367 : vector<16x32xf32>
    %369 = vector.broadcast %348 : vector<1x32xf32> to vector<16x32xf32>
    %370 = arith.addf %368, %369 : vector<16x32xf32>
    %c0_148 = arith.constant 0 : index
    %c0_149 = arith.constant 0 : index
    %371 = vector.load %arg44[%c0_148, %c0_149] : memref<32x64xf32, #tpu.memory_space<vmem>>, vector<32x64xf32>
    %cst_150 = arith.constant dense<0.000000e+00> : vector<16x64xf32>
    %372 = tpu.matmul %370, %371, %cst_150 {dimension_numbers = #tpu.dot_dimension_numbers<[1], [0], [0], [1], [0, 0, 1, 1], [], []>} : vector<16x32xf32>, vector<32x64xf32>, vector<16x64xf32> -> vector<16x64xf32>
    %c0_151 = arith.constant 0 : index
    %c0_152 = arith.constant 0 : index
    %373 = vector.load %arg45[%c0_151, %c0_152] : memref<1x64xf32, #tpu.memory_space<vmem>>, vector<1x64xf32>
    %374 = vector.broadcast %373 : vector<1x64xf32> to vector<16x64xf32>
    %375 = arith.addf %372, %374 : vector<16x64xf32>
    %cst_153 = arith.constant 0.000000e+00 : f32
    %376 = vector.broadcast %cst_153 : f32 to vector<16x64xf32>
    %377 = arith.maximumf %375, %376 : vector<16x64xf32>
    %c0_154 = arith.constant 0 : index
    %c0_155 = arith.constant 0 : index
    %378 = vector.load %arg46[%c0_154, %c0_155] : memref<64x32xf32, #tpu.memory_space<vmem>>, vector<64x32xf32>
    %cst_156 = arith.constant dense<0.000000e+00> : vector<16x32xf32>
    %379 = tpu.matmul %377, %378, %cst_156 {dimension_numbers = #tpu.dot_dimension_numbers<[1], [0], [0], [1], [0, 0, 1, 1], [], []>} : vector<16x64xf32>, vector<64x32xf32>, vector<16x32xf32> -> vector<16x32xf32>
    %c0_157 = arith.constant 0 : index
    %c0_158 = arith.constant 0 : index
    %380 = vector.load %arg47[%c0_157, %c0_158] : memref<1x32xf32, #tpu.memory_space<vmem>>, vector<1x32xf32>
    %381 = vector.broadcast %380 : vector<1x32xf32> to vector<16x32xf32>
    %382 = arith.addf %379, %381 : vector<16x32xf32>
    %383 = arith.addf %370, %382 : vector<16x32xf32>
    %c0_159 = arith.constant 0 : index
    %c0_160 = arith.constant 0 : index
    %384 = vector.load %arg48[%c0_159, %c0_160] : memref<1x32xf32, #tpu.memory_space<vmem>>, vector<1x32xf32>
    %c0_161 = arith.constant 0 : index
    %c0_162 = arith.constant 0 : index
    %385 = vector.load %arg49[%c0_161, %c0_162] : memref<1x32xf32, #tpu.memory_space<vmem>>, vector<1x32xf32>
    %cst_163 = arith.constant dense<0.000000e+00> : vector<16xf32>
    %386 = vector.multi_reduction <add>, %383, %cst_163 [1] : vector<16x32xf32> to vector<16xf32>
    %387 = vector.shape_cast %386 : vector<16xf32> to vector<16x1xf32>
    %cst_164 = arith.constant 3.200000e+01 : f32
    %388 = vector.broadcast %cst_164 : f32 to vector<16x1xf32>
    %389 = arith.divf %387, %388 : vector<16x1xf32>
    %390 = vector.broadcast %389 : vector<16x1xf32> to vector<16x32xf32>
    %391 = arith.subf %383, %390 : vector<16x32xf32>
    %392 = arith.mulf %391, %391 : vector<16x32xf32>
    %cst_165 = arith.constant dense<0.000000e+00> : vector<16xf32>
    %393 = vector.multi_reduction <add>, %392, %cst_165 [1] : vector<16x32xf32> to vector<16xf32>
    %394 = vector.shape_cast %393 : vector<16xf32> to vector<16x1xf32>
    %cst_166 = arith.constant 3.200000e+01 : f32
    %395 = vector.broadcast %cst_166 : f32 to vector<16x1xf32>
    %396 = arith.divf %394, %395 : vector<16x1xf32>
    %397 = vector.broadcast %389 : vector<16x1xf32> to vector<16x32xf32>
    %398 = arith.subf %383, %397 : vector<16x32xf32>
    %cst_167 = arith.constant 9.99999974E-6 : f32
    %399 = vector.broadcast %cst_167 : f32 to vector<16x1xf32>
    %400 = arith.addf %396, %399 : vector<16x1xf32>
    %401 = math.rsqrt %400 : vector<16x1xf32>
    %402 = vector.broadcast %401 : vector<16x1xf32> to vector<16x32xf32>
    %403 = arith.mulf %398, %402 : vector<16x32xf32>
    %404 = vector.broadcast %384 : vector<1x32xf32> to vector<16x32xf32>
    %405 = arith.mulf %403, %404 : vector<16x32xf32>
    %406 = vector.broadcast %385 : vector<1x32xf32> to vector<16x32xf32>
    %407 = arith.addf %405, %406 : vector<16x32xf32>
    %c0_168 = arith.constant 0 : index
    %c0_169 = arith.constant 0 : index
    %408 = vector.load %arg50[%c0_168, %c0_169] : memref<32x96xf32, #tpu.memory_space<vmem>>, vector<32x96xf32>
    %cst_170 = arith.constant dense<0.000000e+00> : vector<16x96xf32>
    %409 = tpu.matmul %407, %408, %cst_170 {dimension_numbers = #tpu.dot_dimension_numbers<[1], [0], [0], [1], [0, 0, 1, 1], [], []>} : vector<16x32xf32>, vector<32x96xf32>, vector<16x96xf32> -> vector<16x96xf32>
    %c0_171 = arith.constant 0 : index
    %c0_172 = arith.constant 0 : index
    %410 = vector.load %arg51[%c0_171, %c0_172] : memref<1x96xf32, #tpu.memory_space<vmem>>, vector<1x96xf32>
    %411 = vector.broadcast %410 : vector<1x96xf32> to vector<16x96xf32>
    %412 = arith.addf %409, %411 : vector<16x96xf32>
    %413 = vector.extract_strided_slice %412 {offsets = [0, 0], sizes = [16, 32], strides = [1, 1]} : vector<16x96xf32> to vector<16x32xf32>
    %414 = vector.extract_strided_slice %412 {offsets = [0, 32], sizes = [16, 32], strides = [1, 1]} : vector<16x96xf32> to vector<16x32xf32>
    %415 = vector.extract_strided_slice %412 {offsets = [0, 64], sizes = [16, 32], strides = [1, 1]} : vector<16x96xf32> to vector<16x32xf32>
    %416 = vector.extract_strided_slice %413 {offsets = [0, 0], sizes = [16, 8], strides = [1, 1]} : vector<16x32xf32> to vector<16x8xf32>
    %417 = vector.extract_strided_slice %413 {offsets = [0, 8], sizes = [16, 8], strides = [1, 1]} : vector<16x32xf32> to vector<16x8xf32>
    %418 = vector.extract_strided_slice %413 {offsets = [0, 16], sizes = [16, 8], strides = [1, 1]} : vector<16x32xf32> to vector<16x8xf32>
    %419 = vector.extract_strided_slice %413 {offsets = [0, 24], sizes = [16, 8], strides = [1, 1]} : vector<16x32xf32> to vector<16x8xf32>
    %420 = tpu.concatenate %416, %417, %418, %419 in 0 : vector<16x8xf32>, vector<16x8xf32>, vector<16x8xf32>, vector<16x8xf32> -> vector<64x8xf32>
    %421 = vector.extract_strided_slice %414 {offsets = [0, 0], sizes = [16, 8], strides = [1, 1]} : vector<16x32xf32> to vector<16x8xf32>
    %422 = vector.extract_strided_slice %414 {offsets = [0, 8], sizes = [16, 8], strides = [1, 1]} : vector<16x32xf32> to vector<16x8xf32>
    %423 = vector.extract_strided_slice %414 {offsets = [0, 16], sizes = [16, 8], strides = [1, 1]} : vector<16x32xf32> to vector<16x8xf32>
    %424 = vector.extract_strided_slice %414 {offsets = [0, 24], sizes = [16, 8], strides = [1, 1]} : vector<16x32xf32> to vector<16x8xf32>
    %425 = tpu.concatenate %421, %422, %423, %424 in 0 : vector<16x8xf32>, vector<16x8xf32>, vector<16x8xf32>, vector<16x8xf32> -> vector<64x8xf32>
    %426 = vector.extract_strided_slice %415 {offsets = [0, 0], sizes = [16, 8], strides = [1, 1]} : vector<16x32xf32> to vector<16x8xf32>
    %427 = vector.extract_strided_slice %415 {offsets = [0, 8], sizes = [16, 8], strides = [1, 1]} : vector<16x32xf32> to vector<16x8xf32>
    %428 = vector.extract_strided_slice %415 {offsets = [0, 16], sizes = [16, 8], strides = [1, 1]} : vector<16x32xf32> to vector<16x8xf32>
    %429 = vector.extract_strided_slice %415 {offsets = [0, 24], sizes = [16, 8], strides = [1, 1]} : vector<16x32xf32> to vector<16x8xf32>
    %430 = tpu.concatenate %426, %427, %428, %429 in 0 : vector<16x8xf32>, vector<16x8xf32>, vector<16x8xf32>, vector<16x8xf32> -> vector<64x8xf32>
    %cst_173 = arith.constant dense<0.000000e+00> : vector<64x64xf32>
    %431 = tpu.matmul %420, %425, %cst_173 {dimension_numbers = #tpu.dot_dimension_numbers<[1], [1], [0], [0], [0, 0, 1, 0], [], []>} : vector<64x8xf32>, vector<64x8xf32>, vector<64x64xf32> -> vector<64x64xf32>
    %432 = arith.addf %431, %0 : vector<64x64xf32>
    %cst_174 = arith.constant dense<0xFF800000> : vector<64xf32>
    %433 = vector.multi_reduction <maximumf>, %432, %cst_174 [1] : vector<64x64xf32> to vector<64xf32>
    %434 = vector.shape_cast %433 : vector<64xf32> to vector<64x1xf32>
    %435 = vector.broadcast %434 : vector<64x1xf32> to vector<64x64xf32>
    %436 = arith.subf %432, %435 : vector<64x64xf32>
    %437 = math.exp %436 : vector<64x64xf32>
    %cst_175 = arith.constant dense<0.000000e+00> : vector<64xf32>
    %438 = vector.multi_reduction <add>, %437, %cst_175 [1] : vector<64x64xf32> to vector<64xf32>
    %439 = vector.shape_cast %438 : vector<64xf32> to vector<64x1xf32>
    %440 = vector.broadcast %439 : vector<64x1xf32> to vector<64x64xf32>
    %441 = arith.divf %437, %440 : vector<64x64xf32>
    %cst_176 = arith.constant dense<0.000000e+00> : vector<64x8xf32>
    %442 = tpu.matmul %441, %430, %cst_176 {dimension_numbers = #tpu.dot_dimension_numbers<[1], [0], [0], [1], [0, 0, 1, 1], [], []>} : vector<64x64xf32>, vector<64x8xf32>, vector<64x8xf32> -> vector<64x8xf32>
    %443 = vector.extract_strided_slice %442 {offsets = [0, 0], sizes = [16, 8], strides = [1, 1]} : vector<64x8xf32> to vector<16x8xf32>
    %444 = vector.extract_strided_slice %442 {offsets = [16, 0], sizes = [16, 8], strides = [1, 1]} : vector<64x8xf32> to vector<16x8xf32>
    %445 = vector.extract_strided_slice %442 {offsets = [32, 0], sizes = [16, 8], strides = [1, 1]} : vector<64x8xf32> to vector<16x8xf32>
    %446 = vector.extract_strided_slice %442 {offsets = [48, 0], sizes = [16, 8], strides = [1, 1]} : vector<64x8xf32> to vector<16x8xf32>
    %447 = tpu.concatenate %443, %444, %445, %446 in 1 : vector<16x8xf32>, vector<16x8xf32>, vector<16x8xf32>, vector<16x8xf32> -> vector<16x32xf32>
    %c0_177 = arith.constant 0 : index
    %c0_178 = arith.constant 0 : index
    %448 = vector.load %arg52[%c0_177, %c0_178] : memref<32x32xf32, #tpu.memory_space<vmem>>, vector<32x32xf32>
    %cst_179 = arith.constant dense<0.000000e+00> : vector<16x32xf32>
    %449 = tpu.matmul %447, %448, %cst_179 {dimension_numbers = #tpu.dot_dimension_numbers<[1], [0], [0], [1], [0, 0, 1, 1], [], []>} : vector<16x32xf32>, vector<32x32xf32>, vector<16x32xf32> -> vector<16x32xf32>
    %c0_180 = arith.constant 0 : index
    %c0_181 = arith.constant 0 : index
    %450 = vector.load %arg53[%c0_180, %c0_181] : memref<1x32xf32, #tpu.memory_space<vmem>>, vector<1x32xf32>
    %451 = vector.broadcast %450 : vector<1x32xf32> to vector<16x32xf32>
    %452 = arith.addf %449, %451 : vector<16x32xf32>
    %453 = arith.addf %407, %452 : vector<16x32xf32>
    %c0_182 = arith.constant 0 : index
    %c0_183 = arith.constant 0 : index
    %454 = vector.load %arg54[%c0_182, %c0_183] : memref<1x32xf32, #tpu.memory_space<vmem>>, vector<1x32xf32>
    %c0_184 = arith.constant 0 : index
    %c0_185 = arith.constant 0 : index
    %455 = vector.load %arg55[%c0_184, %c0_185] : memref<1x32xf32, #tpu.memory_space<vmem>>, vector<1x32xf32>
    %cst_186 = arith.constant dense<0.000000e+00> : vector<16xf32>
    %456 = vector.multi_reduction <add>, %453, %cst_186 [1] : vector<16x32xf32> to vector<16xf32>
    %457 = vector.shape_cast %456 : vector<16xf32> to vector<16x1xf32>
    %cst_187 = arith.constant 3.200000e+01 : f32
    %458 = vector.broadcast %cst_187 : f32 to vector<16x1xf32>
    %459 = arith.divf %457, %458 : vector<16x1xf32>
    %460 = vector.broadcast %459 : vector<16x1xf32> to vector<16x32xf32>
    %461 = arith.subf %453, %460 : vector<16x32xf32>
    %462 = arith.mulf %461, %461 : vector<16x32xf32>
    %cst_188 = arith.constant dense<0.000000e+00> : vector<16xf32>
    %463 = vector.multi_reduction <add>, %462, %cst_188 [1] : vector<16x32xf32> to vector<16xf32>
    %464 = vector.shape_cast %463 : vector<16xf32> to vector<16x1xf32>
    %cst_189 = arith.constant 3.200000e+01 : f32
    %465 = vector.broadcast %cst_189 : f32 to vector<16x1xf32>
    %466 = arith.divf %464, %465 : vector<16x1xf32>
    %467 = vector.broadcast %459 : vector<16x1xf32> to vector<16x32xf32>
    %468 = arith.subf %453, %467 : vector<16x32xf32>
    %cst_190 = arith.constant 9.99999974E-6 : f32
    %469 = vector.broadcast %cst_190 : f32 to vector<16x1xf32>
    %470 = arith.addf %466, %469 : vector<16x1xf32>
    %471 = math.rsqrt %470 : vector<16x1xf32>
    %472 = vector.broadcast %471 : vector<16x1xf32> to vector<16x32xf32>
    %473 = arith.mulf %468, %472 : vector<16x32xf32>
    %474 = vector.broadcast %454 : vector<1x32xf32> to vector<16x32xf32>
    %475 = arith.mulf %473, %474 : vector<16x32xf32>
    %476 = vector.broadcast %455 : vector<1x32xf32> to vector<16x32xf32>
    %477 = arith.addf %475, %476 : vector<16x32xf32>
    %c0_191 = arith.constant 0 : index
    %c0_192 = arith.constant 0 : index
    %478 = vector.load %arg56[%c0_191, %c0_192] : memref<32x32xf32, #tpu.memory_space<vmem>>, vector<32x32xf32>
    %cst_193 = arith.constant dense<0.000000e+00> : vector<16x32xf32>
    %479 = tpu.matmul %477, %478, %cst_193 {dimension_numbers = #tpu.dot_dimension_numbers<[1], [0], [0], [1], [0, 0, 1, 1], [], []>} : vector<16x32xf32>, vector<32x32xf32>, vector<16x32xf32> -> vector<16x32xf32>
    %c0_194 = arith.constant 0 : index
    %c0_195 = arith.constant 0 : index
    %480 = vector.load %arg57[%c0_194, %c0_195] : memref<1x32xf32, #tpu.memory_space<vmem>>, vector<1x32xf32>
    %481 = vector.broadcast %480 : vector<1x32xf32> to vector<16x32xf32>
    %482 = arith.addf %479, %481 : vector<16x32xf32>
    %c0_196 = arith.constant 0 : index
    %c0_197 = arith.constant 0 : index
    %483 = vector.load %arg58[%c0_196, %c0_197] : memref<32x64xf32, #tpu.memory_space<vmem>>, vector<32x64xf32>
    %cst_198 = arith.constant dense<0.000000e+00> : vector<16x64xf32>
    %484 = tpu.matmul %223, %483, %cst_198 {dimension_numbers = #tpu.dot_dimension_numbers<[1], [0], [0], [1], [0, 0, 1, 1], [], []>} : vector<16x32xf32>, vector<32x64xf32>, vector<16x64xf32> -> vector<16x64xf32>
    %c0_199 = arith.constant 0 : index
    %c0_200 = arith.constant 0 : index
    %485 = vector.load %arg59[%c0_199, %c0_200] : memref<1x64xf32, #tpu.memory_space<vmem>>, vector<1x64xf32>
    %486 = vector.broadcast %485 : vector<1x64xf32> to vector<16x64xf32>
    %487 = arith.addf %484, %486 : vector<16x64xf32>
    %488 = vector.extract_strided_slice %487 {offsets = [0, 0], sizes = [16, 32], strides = [1, 1]} : vector<16x64xf32> to vector<16x32xf32>
    %489 = vector.extract_strided_slice %487 {offsets = [0, 32], sizes = [16, 32], strides = [1, 1]} : vector<16x64xf32> to vector<16x32xf32>
    %490 = vector.extract_strided_slice %482 {offsets = [0, 0], sizes = [16, 8], strides = [1, 1]} : vector<16x32xf32> to vector<16x8xf32>
    %491 = vector.extract_strided_slice %482 {offsets = [0, 8], sizes = [16, 8], strides = [1, 1]} : vector<16x32xf32> to vector<16x8xf32>
    %492 = vector.extract_strided_slice %482 {offsets = [0, 16], sizes = [16, 8], strides = [1, 1]} : vector<16x32xf32> to vector<16x8xf32>
    %493 = vector.extract_strided_slice %482 {offsets = [0, 24], sizes = [16, 8], strides = [1, 1]} : vector<16x32xf32> to vector<16x8xf32>
    %494 = tpu.concatenate %490, %491, %492, %493 in 0 : vector<16x8xf32>, vector<16x8xf32>, vector<16x8xf32>, vector<16x8xf32> -> vector<64x8xf32>
    %495 = vector.extract_strided_slice %488 {offsets = [0, 0], sizes = [16, 8], strides = [1, 1]} : vector<16x32xf32> to vector<16x8xf32>
    %496 = vector.extract_strided_slice %488 {offsets = [0, 8], sizes = [16, 8], strides = [1, 1]} : vector<16x32xf32> to vector<16x8xf32>
    %497 = vector.extract_strided_slice %488 {offsets = [0, 16], sizes = [16, 8], strides = [1, 1]} : vector<16x32xf32> to vector<16x8xf32>
    %498 = vector.extract_strided_slice %488 {offsets = [0, 24], sizes = [16, 8], strides = [1, 1]} : vector<16x32xf32> to vector<16x8xf32>
    %499 = tpu.concatenate %495, %496, %497, %498 in 0 : vector<16x8xf32>, vector<16x8xf32>, vector<16x8xf32>, vector<16x8xf32> -> vector<64x8xf32>
    %500 = vector.extract_strided_slice %489 {offsets = [0, 0], sizes = [16, 8], strides = [1, 1]} : vector<16x32xf32> to vector<16x8xf32>
    %501 = vector.extract_strided_slice %489 {offsets = [0, 8], sizes = [16, 8], strides = [1, 1]} : vector<16x32xf32> to vector<16x8xf32>
    %502 = vector.extract_strided_slice %489 {offsets = [0, 16], sizes = [16, 8], strides = [1, 1]} : vector<16x32xf32> to vector<16x8xf32>
    %503 = vector.extract_strided_slice %489 {offsets = [0, 24], sizes = [16, 8], strides = [1, 1]} : vector<16x32xf32> to vector<16x8xf32>
    %504 = tpu.concatenate %500, %501, %502, %503 in 0 : vector<16x8xf32>, vector<16x8xf32>, vector<16x8xf32>, vector<16x8xf32> -> vector<64x8xf32>
    %cst_201 = arith.constant dense<0.000000e+00> : vector<64x64xf32>
    %505 = tpu.matmul %494, %499, %cst_201 {dimension_numbers = #tpu.dot_dimension_numbers<[1], [1], [0], [0], [0, 0, 1, 0], [], []>} : vector<64x8xf32>, vector<64x8xf32>, vector<64x64xf32> -> vector<64x64xf32>
    %506 = arith.addf %505, %0 : vector<64x64xf32>
    %cst_202 = arith.constant dense<0xFF800000> : vector<64xf32>
    %507 = vector.multi_reduction <maximumf>, %506, %cst_202 [1] : vector<64x64xf32> to vector<64xf32>
    %508 = vector.shape_cast %507 : vector<64xf32> to vector<64x1xf32>
    %509 = vector.broadcast %508 : vector<64x1xf32> to vector<64x64xf32>
    %510 = arith.subf %506, %509 : vector<64x64xf32>
    %511 = math.exp %510 : vector<64x64xf32>
    %cst_203 = arith.constant dense<0.000000e+00> : vector<64xf32>
    %512 = vector.multi_reduction <add>, %511, %cst_203 [1] : vector<64x64xf32> to vector<64xf32>
    %513 = vector.shape_cast %512 : vector<64xf32> to vector<64x1xf32>
    %514 = vector.broadcast %513 : vector<64x1xf32> to vector<64x64xf32>
    %515 = arith.divf %511, %514 : vector<64x64xf32>
    %cst_204 = arith.constant dense<0.000000e+00> : vector<64x8xf32>
    %516 = tpu.matmul %515, %504, %cst_204 {dimension_numbers = #tpu.dot_dimension_numbers<[1], [0], [0], [1], [0, 0, 1, 1], [], []>} : vector<64x64xf32>, vector<64x8xf32>, vector<64x8xf32> -> vector<64x8xf32>
    %517 = vector.extract_strided_slice %516 {offsets = [0, 0], sizes = [16, 8], strides = [1, 1]} : vector<64x8xf32> to vector<16x8xf32>
    %518 = vector.extract_strided_slice %516 {offsets = [16, 0], sizes = [16, 8], strides = [1, 1]} : vector<64x8xf32> to vector<16x8xf32>
    %519 = vector.extract_strided_slice %516 {offsets = [32, 0], sizes = [16, 8], strides = [1, 1]} : vector<64x8xf32> to vector<16x8xf32>
    %520 = vector.extract_strided_slice %516 {offsets = [48, 0], sizes = [16, 8], strides = [1, 1]} : vector<64x8xf32> to vector<16x8xf32>
    %521 = tpu.concatenate %517, %518, %519, %520 in 1 : vector<16x8xf32>, vector<16x8xf32>, vector<16x8xf32>, vector<16x8xf32> -> vector<16x32xf32>
    %c0_205 = arith.constant 0 : index
    %c0_206 = arith.constant 0 : index
    %522 = vector.load %arg60[%c0_205, %c0_206] : memref<32x32xf32, #tpu.memory_space<vmem>>, vector<32x32xf32>
    %cst_207 = arith.constant dense<0.000000e+00> : vector<16x32xf32>
    %523 = tpu.matmul %521, %522, %cst_207 {dimension_numbers = #tpu.dot_dimension_numbers<[1], [0], [0], [1], [0, 0, 1, 1], [], []>} : vector<16x32xf32>, vector<32x32xf32>, vector<16x32xf32> -> vector<16x32xf32>
    %c0_208 = arith.constant 0 : index
    %c0_209 = arith.constant 0 : index
    %524 = vector.load %arg61[%c0_208, %c0_209] : memref<1x32xf32, #tpu.memory_space<vmem>>, vector<1x32xf32>
    %525 = vector.broadcast %524 : vector<1x32xf32> to vector<16x32xf32>
    %526 = arith.addf %523, %525 : vector<16x32xf32>
    %527 = arith.addf %477, %526 : vector<16x32xf32>
    %c0_210 = arith.constant 0 : index
    %c0_211 = arith.constant 0 : index
    %528 = vector.load %arg62[%c0_210, %c0_211] : memref<1x32xf32, #tpu.memory_space<vmem>>, vector<1x32xf32>
    %c0_212 = arith.constant 0 : index
    %c0_213 = arith.constant 0 : index
    %529 = vector.load %arg63[%c0_212, %c0_213] : memref<1x32xf32, #tpu.memory_space<vmem>>, vector<1x32xf32>
    %cst_214 = arith.constant dense<0.000000e+00> : vector<16xf32>
    %530 = vector.multi_reduction <add>, %527, %cst_214 [1] : vector<16x32xf32> to vector<16xf32>
    %531 = vector.shape_cast %530 : vector<16xf32> to vector<16x1xf32>
    %cst_215 = arith.constant 3.200000e+01 : f32
    %532 = vector.broadcast %cst_215 : f32 to vector<16x1xf32>
    %533 = arith.divf %531, %532 : vector<16x1xf32>
    %534 = vector.broadcast %533 : vector<16x1xf32> to vector<16x32xf32>
    %535 = arith.subf %527, %534 : vector<16x32xf32>
    %536 = arith.mulf %535, %535 : vector<16x32xf32>
    %cst_216 = arith.constant dense<0.000000e+00> : vector<16xf32>
    %537 = vector.multi_reduction <add>, %536, %cst_216 [1] : vector<16x32xf32> to vector<16xf32>
    %538 = vector.shape_cast %537 : vector<16xf32> to vector<16x1xf32>
    %cst_217 = arith.constant 3.200000e+01 : f32
    %539 = vector.broadcast %cst_217 : f32 to vector<16x1xf32>
    %540 = arith.divf %538, %539 : vector<16x1xf32>
    %541 = vector.broadcast %533 : vector<16x1xf32> to vector<16x32xf32>
    %542 = arith.subf %527, %541 : vector<16x32xf32>
    %cst_218 = arith.constant 9.99999974E-6 : f32
    %543 = vector.broadcast %cst_218 : f32 to vector<16x1xf32>
    %544 = arith.addf %540, %543 : vector<16x1xf32>
    %545 = math.rsqrt %544 : vector<16x1xf32>
    %546 = vector.broadcast %545 : vector<16x1xf32> to vector<16x32xf32>
    %547 = arith.mulf %542, %546 : vector<16x32xf32>
    %548 = vector.broadcast %528 : vector<1x32xf32> to vector<16x32xf32>
    %549 = arith.mulf %547, %548 : vector<16x32xf32>
    %550 = vector.broadcast %529 : vector<1x32xf32> to vector<16x32xf32>
    %551 = arith.addf %549, %550 : vector<16x32xf32>
    %c0_219 = arith.constant 0 : index
    %c0_220 = arith.constant 0 : index
    %552 = vector.load %arg64[%c0_219, %c0_220] : memref<32x64xf32, #tpu.memory_space<vmem>>, vector<32x64xf32>
    %cst_221 = arith.constant dense<0.000000e+00> : vector<16x64xf32>
    %553 = tpu.matmul %551, %552, %cst_221 {dimension_numbers = #tpu.dot_dimension_numbers<[1], [0], [0], [1], [0, 0, 1, 1], [], []>} : vector<16x32xf32>, vector<32x64xf32>, vector<16x64xf32> -> vector<16x64xf32>
    %c0_222 = arith.constant 0 : index
    %c0_223 = arith.constant 0 : index
    %554 = vector.load %arg65[%c0_222, %c0_223] : memref<1x64xf32, #tpu.memory_space<vmem>>, vector<1x64xf32>
    %555 = vector.broadcast %554 : vector<1x64xf32> to vector<16x64xf32>
    %556 = arith.addf %553, %555 : vector<16x64xf32>
    %cst_224 = arith.constant 0.000000e+00 : f32
    %557 = vector.broadcast %cst_224 : f32 to vector<16x64xf32>
    %558 = arith.maximumf %556, %557 : vector<16x64xf32>
    %c0_225 = arith.constant 0 : index
    %c0_226 = arith.constant 0 : index
    %559 = vector.load %arg66[%c0_225, %c0_226] : memref<64x32xf32, #tpu.memory_space<vmem>>, vector<64x32xf32>
    %cst_227 = arith.constant dense<0.000000e+00> : vector<16x32xf32>
    %560 = tpu.matmul %558, %559, %cst_227 {dimension_numbers = #tpu.dot_dimension_numbers<[1], [0], [0], [1], [0, 0, 1, 1], [], []>} : vector<16x64xf32>, vector<64x32xf32>, vector<16x32xf32> -> vector<16x32xf32>
    %c0_228 = arith.constant 0 : index
    %c0_229 = arith.constant 0 : index
    %561 = vector.load %arg67[%c0_228, %c0_229] : memref<1x32xf32, #tpu.memory_space<vmem>>, vector<1x32xf32>
    %562 = vector.broadcast %561 : vector<1x32xf32> to vector<16x32xf32>
    %563 = arith.addf %560, %562 : vector<16x32xf32>
    %564 = arith.addf %551, %563 : vector<16x32xf32>
    %c0_230 = arith.constant 0 : index
    %c0_231 = arith.constant 0 : index
    %565 = vector.load %arg68[%c0_230, %c0_231] : memref<1x32xf32, #tpu.memory_space<vmem>>, vector<1x32xf32>
    %c0_232 = arith.constant 0 : index
    %c0_233 = arith.constant 0 : index
    %566 = vector.load %arg69[%c0_232, %c0_233] : memref<1x32xf32, #tpu.memory_space<vmem>>, vector<1x32xf32>
    %cst_234 = arith.constant dense<0.000000e+00> : vector<16xf32>
    %567 = vector.multi_reduction <add>, %564, %cst_234 [1] : vector<16x32xf32> to vector<16xf32>
    %568 = vector.shape_cast %567 : vector<16xf32> to vector<16x1xf32>
    %cst_235 = arith.constant 3.200000e+01 : f32
    %569 = vector.broadcast %cst_235 : f32 to vector<16x1xf32>
    %570 = arith.divf %568, %569 : vector<16x1xf32>
    %571 = vector.broadcast %570 : vector<16x1xf32> to vector<16x32xf32>
    %572 = arith.subf %564, %571 : vector<16x32xf32>
    %573 = arith.mulf %572, %572 : vector<16x32xf32>
    %cst_236 = arith.constant dense<0.000000e+00> : vector<16xf32>
    %574 = vector.multi_reduction <add>, %573, %cst_236 [1] : vector<16x32xf32> to vector<16xf32>
    %575 = vector.shape_cast %574 : vector<16xf32> to vector<16x1xf32>
    %cst_237 = arith.constant 3.200000e+01 : f32
    %576 = vector.broadcast %cst_237 : f32 to vector<16x1xf32>
    %577 = arith.divf %575, %576 : vector<16x1xf32>
    %578 = vector.broadcast %570 : vector<16x1xf32> to vector<16x32xf32>
    %579 = arith.subf %564, %578 : vector<16x32xf32>
    %cst_238 = arith.constant 9.99999974E-6 : f32
    %580 = vector.broadcast %cst_238 : f32 to vector<16x1xf32>
    %581 = arith.addf %577, %580 : vector<16x1xf32>
    %582 = math.rsqrt %581 : vector<16x1xf32>
    %583 = vector.broadcast %582 : vector<16x1xf32> to vector<16x32xf32>
    %584 = arith.mulf %579, %583 : vector<16x32xf32>
    %585 = vector.broadcast %565 : vector<1x32xf32> to vector<16x32xf32>
    %586 = arith.mulf %584, %585 : vector<16x32xf32>
    %587 = vector.broadcast %566 : vector<1x32xf32> to vector<16x32xf32>
    %588 = arith.addf %586, %587 : vector<16x32xf32>
    %c0_239 = arith.constant 0 : index
    %c0_240 = arith.constant 0 : index
    %589 = vector.load %arg70[%c0_239, %c0_240] : memref<32x27xf32, #tpu.memory_space<vmem>>, vector<32x27xf32>
    %cst_241 = arith.constant dense<0.000000e+00> : vector<16x27xf32>
    %590 = tpu.matmul %588, %589, %cst_241 {dimension_numbers = #tpu.dot_dimension_numbers<[1], [0], [0], [1], [0, 0, 1, 1], [], []>} : vector<16x32xf32>, vector<32x27xf32>, vector<16x27xf32> -> vector<16x27xf32>
    %c0_242 = arith.constant 0 : index
    %c0_243 = arith.constant 0 : index
    %591 = vector.load %arg71[%c0_242, %c0_243] : memref<1x27xf32, #tpu.memory_space<vmem>>, vector<1x27xf32>
    %592 = vector.broadcast %591 : vector<1x27xf32> to vector<16x27xf32>
    %593 = arith.addf %590, %592 : vector<16x27xf32>
    %594 = vector.extract_strided_slice %593 {offsets = [0, 23], sizes = [16, 4], strides = [1, 1]} : vector<16x27xf32> to vector<16x4xf32>
    %cst_244 = arith.constant 0.000000e+00 : f32
    %595 = vector.broadcast %cst_244 : f32 to vector<16x4xf32>
    %596 = arith.maximumf %594, %595 : vector<16x4xf32>
    %cst_245 = arith.constant 9.99999997E-7 : f32
    %597 = vector.broadcast %cst_245 : f32 to vector<16x4xf32>
    %598 = arith.addf %596, %597 : vector<16x4xf32>
    %c0_246 = arith.constant 0 : index
    %c0_247 = arith.constant 0 : index
    %599 = vector.load %arg74[%c0_246, %c0_247] : memref<16x4xf32, #tpu.memory_space<vmem>>, vector<16x4xf32>
    tpu.vector_store %arg74[%c0_246, %c0_247], %598 {strides = array<i32>} : memref<16x4xf32, #tpu.memory_space<vmem>>, vector<16x4xf32>,
    %c0_248 = arith.constant 0 : index
    %c0_249 = arith.constant 0 : index
    %600 = vector.load %arg72[%c0_248, %c0_249] : memref<1x12xf32, #tpu.memory_space<vmem>>, vector<1x12xf32>
    %601 = vector.extract_strided_slice %593 {offsets = [0, 0], sizes = [16, 1], strides = [1, 1]} : vector<16x27xf32> to vector<16x1xf32>
    %602 = vector.extract_strided_slice %593 {offsets = [0, 1], sizes = [16, 1], strides = [1, 1]} : vector<16x27xf32> to vector<16x1xf32>
    %603 = vector.extract_strided_slice %593 {offsets = [0, 2], sizes = [16, 1], strides = [1, 1]} : vector<16x27xf32> to vector<16x1xf32>
    %604 = vector.extract_strided_slice %593 {offsets = [0, 3], sizes = [16, 1], strides = [1, 1]} : vector<16x27xf32> to vector<16x1xf32>
    %605 = vector.extract_strided_slice %593 {offsets = [0, 4], sizes = [16, 1], strides = [1, 1]} : vector<16x27xf32> to vector<16x1xf32>
    %606 = vector.extract_strided_slice %593 {offsets = [0, 5], sizes = [16, 1], strides = [1, 1]} : vector<16x27xf32> to vector<16x1xf32>
    %607 = vector.extract_strided_slice %593 {offsets = [0, 6], sizes = [16, 1], strides = [1, 1]} : vector<16x27xf32> to vector<16x1xf32>
    %608 = arith.mulf %604, %604 : vector<16x1xf32>
    %609 = arith.mulf %605, %605 : vector<16x1xf32>
    %610 = arith.addf %608, %609 : vector<16x1xf32>
    %611 = arith.mulf %606, %606 : vector<16x1xf32>
    %612 = arith.addf %610, %611 : vector<16x1xf32>
    %613 = arith.mulf %607, %607 : vector<16x1xf32>
    %614 = arith.addf %612, %613 : vector<16x1xf32>
    %615 = math.sqrt %614 : vector<16x1xf32>
    %cst_250 = arith.constant 9.99999996E-13 : f32
    %616 = vector.broadcast %cst_250 : f32 to vector<16x1xf32>
    %617 = arith.maximumf %615, %616 : vector<16x1xf32>
    %cst_251 = arith.constant 1.000000e+00 : f32
    %618 = vector.broadcast %cst_251 : f32 to vector<16x1xf32>
    %619 = arith.divf %618, %617 : vector<16x1xf32>
    %620 = arith.mulf %604, %619 : vector<16x1xf32>
    %621 = arith.mulf %605, %619 : vector<16x1xf32>
    %622 = arith.mulf %606, %619 : vector<16x1xf32>
    %623 = arith.mulf %607, %619 : vector<16x1xf32>
    %624 = vector.extract_strided_slice %593 {offsets = [0, 7], sizes = [16, 1], strides = [1, 1]} : vector<16x27xf32> to vector<16x1xf32>
    %625 = vector.extract_strided_slice %593 {offsets = [0, 8], sizes = [16, 1], strides = [1, 1]} : vector<16x27xf32> to vector<16x1xf32>
    %626 = vector.extract_strided_slice %593 {offsets = [0, 9], sizes = [16, 1], strides = [1, 1]} : vector<16x27xf32> to vector<16x1xf32>
    %627 = vector.extract_strided_slice %593 {offsets = [0, 10], sizes = [16, 1], strides = [1, 1]} : vector<16x27xf32> to vector<16x1xf32>
    %628 = arith.mulf %624, %624 : vector<16x1xf32>
    %629 = arith.mulf %625, %625 : vector<16x1xf32>
    %630 = arith.addf %628, %629 : vector<16x1xf32>
    %631 = arith.mulf %626, %626 : vector<16x1xf32>
    %632 = arith.addf %630, %631 : vector<16x1xf32>
    %633 = arith.mulf %627, %627 : vector<16x1xf32>
    %634 = arith.addf %632, %633 : vector<16x1xf32>
    %635 = math.sqrt %634 : vector<16x1xf32>
    %cst_252 = arith.constant 9.99999996E-13 : f32
    %636 = vector.broadcast %cst_252 : f32 to vector<16x1xf32>
    %637 = arith.maximumf %635, %636 : vector<16x1xf32>
    %cst_253 = arith.constant 1.000000e+00 : f32
    %638 = vector.broadcast %cst_253 : f32 to vector<16x1xf32>
    %639 = arith.divf %638, %637 : vector<16x1xf32>
    %640 = arith.mulf %624, %639 : vector<16x1xf32>
    %641 = arith.mulf %625, %639 : vector<16x1xf32>
    %642 = arith.mulf %626, %639 : vector<16x1xf32>
    %643 = arith.mulf %627, %639 : vector<16x1xf32>
    %644 = arith.mulf %620, %640 : vector<16x1xf32>
    %645 = arith.mulf %621, %641 : vector<16x1xf32>
    %646 = arith.subf %644, %645 : vector<16x1xf32>
    %647 = arith.mulf %622, %642 : vector<16x1xf32>
    %648 = arith.subf %646, %647 : vector<16x1xf32>
    %649 = arith.mulf %623, %643 : vector<16x1xf32>
    %650 = arith.subf %648, %649 : vector<16x1xf32>
    %651 = arith.mulf %620, %641 : vector<16x1xf32>
    %652 = arith.mulf %621, %640 : vector<16x1xf32>
    %653 = arith.addf %651, %652 : vector<16x1xf32>
    %654 = arith.mulf %622, %643 : vector<16x1xf32>
    %655 = arith.addf %653, %654 : vector<16x1xf32>
    %656 = arith.mulf %623, %642 : vector<16x1xf32>
    %657 = arith.subf %655, %656 : vector<16x1xf32>
    %658 = arith.mulf %620, %642 : vector<16x1xf32>
    %659 = arith.mulf %621, %643 : vector<16x1xf32>
    %660 = arith.subf %658, %659 : vector<16x1xf32>
    %661 = arith.mulf %622, %640 : vector<16x1xf32>
    %662 = arith.addf %660, %661 : vector<16x1xf32>
    %663 = arith.mulf %623, %641 : vector<16x1xf32>
    %664 = arith.addf %662, %663 : vector<16x1xf32>
    %665 = arith.mulf %620, %643 : vector<16x1xf32>
    %666 = arith.mulf %621, %642 : vector<16x1xf32>
    %667 = arith.addf %665, %666 : vector<16x1xf32>
    %668 = arith.mulf %622, %641 : vector<16x1xf32>
    %669 = arith.subf %667, %668 : vector<16x1xf32>
    %670 = arith.mulf %623, %640 : vector<16x1xf32>
    %671 = arith.addf %669, %670 : vector<16x1xf32>
    %672 = vector.extract_strided_slice %593 {offsets = [0, 11], sizes = [16, 1], strides = [1, 1]} : vector<16x27xf32> to vector<16x1xf32>
    %673 = vector.extract_strided_slice %593 {offsets = [0, 12], sizes = [16, 1], strides = [1, 1]} : vector<16x27xf32> to vector<16x1xf32>
    %674 = vector.extract_strided_slice %593 {offsets = [0, 13], sizes = [16, 1], strides = [1, 1]} : vector<16x27xf32> to vector<16x1xf32>
    %675 = vector.extract_strided_slice %593 {offsets = [0, 14], sizes = [16, 1], strides = [1, 1]} : vector<16x27xf32> to vector<16x1xf32>
    %676 = arith.mulf %672, %672 : vector<16x1xf32>
    %677 = arith.mulf %673, %673 : vector<16x1xf32>
    %678 = arith.addf %676, %677 : vector<16x1xf32>
    %679 = arith.mulf %674, %674 : vector<16x1xf32>
    %680 = arith.addf %678, %679 : vector<16x1xf32>
    %681 = arith.mulf %675, %675 : vector<16x1xf32>
    %682 = arith.addf %680, %681 : vector<16x1xf32>
    %683 = math.sqrt %682 : vector<16x1xf32>
    %cst_254 = arith.constant 9.99999996E-13 : f32
    %684 = vector.broadcast %cst_254 : f32 to vector<16x1xf32>
    %685 = arith.maximumf %683, %684 : vector<16x1xf32>
    %cst_255 = arith.constant 1.000000e+00 : f32
    %686 = vector.broadcast %cst_255 : f32 to vector<16x1xf32>
    %687 = arith.divf %686, %685 : vector<16x1xf32>
    %688 = arith.mulf %672, %687 : vector<16x1xf32>
    %689 = arith.mulf %673, %687 : vector<16x1xf32>
    %690 = arith.mulf %674, %687 : vector<16x1xf32>
    %691 = arith.mulf %675, %687 : vector<16x1xf32>
    %692 = arith.mulf %650, %688 : vector<16x1xf32>
    %693 = arith.mulf %657, %689 : vector<16x1xf32>
    %694 = arith.subf %692, %693 : vector<16x1xf32>
    %695 = arith.mulf %664, %690 : vector<16x1xf32>
    %696 = arith.subf %694, %695 : vector<16x1xf32>
    %697 = arith.mulf %671, %691 : vector<16x1xf32>
    %698 = arith.subf %696, %697 : vector<16x1xf32>
    %699 = arith.mulf %650, %689 : vector<16x1xf32>
    %700 = arith.mulf %657, %688 : vector<16x1xf32>
    %701 = arith.addf %699, %700 : vector<16x1xf32>
    %702 = arith.mulf %664, %691 : vector<16x1xf32>
    %703 = arith.addf %701, %702 : vector<16x1xf32>
    %704 = arith.mulf %671, %690 : vector<16x1xf32>
    %705 = arith.subf %703, %704 : vector<16x1xf32>
    %706 = arith.mulf %650, %690 : vector<16x1xf32>
    %707 = arith.mulf %657, %691 : vector<16x1xf32>
    %708 = arith.subf %706, %707 : vector<16x1xf32>
    %709 = arith.mulf %664, %688 : vector<16x1xf32>
    %710 = arith.addf %708, %709 : vector<16x1xf32>
    %711 = arith.mulf %671, %689 : vector<16x1xf32>
    %712 = arith.addf %710, %711 : vector<16x1xf32>
    %713 = arith.mulf %650, %691 : vector<16x1xf32>
    %714 = arith.mulf %657, %690 : vector<16x1xf32>
    %715 = arith.addf %713, %714 : vector<16x1xf32>
    %716 = arith.mulf %664, %689 : vector<16x1xf32>
    %717 = arith.subf %715, %716 : vector<16x1xf32>
    %718 = arith.mulf %671, %688 : vector<16x1xf32>
    %719 = arith.addf %717, %718 : vector<16x1xf32>
    %720 = vector.extract_strided_slice %600 {offsets = [0, 3], sizes = [1, 1], strides = [1, 1]} : vector<1x12xf32> to vector<1x1xf32>
    %721 = vector.extract_strided_slice %600 {offsets = [0, 4], sizes = [1, 1], strides = [1, 1]} : vector<1x12xf32> to vector<1x1xf32>
    %722 = vector.extract_strided_slice %600 {offsets = [0, 5], sizes = [1, 1], strides = [1, 1]} : vector<1x12xf32> to vector<1x1xf32>
    %723 = arith.mulf %720, %720 : vector<1x1xf32>
    %724 = arith.mulf %721, %721 : vector<1x1xf32>
    %725 = arith.addf %723, %724 : vector<1x1xf32>
    %726 = arith.mulf %722, %722 : vector<1x1xf32>
    %727 = arith.addf %725, %726 : vector<1x1xf32>
    %728 = math.sqrt %727 : vector<1x1xf32>
    %cst_256 = arith.constant 9.99999996E-13 : f32
    %729 = vector.broadcast %cst_256 : f32 to vector<1x1xf32>
    %730 = arith.maximumf %728, %729 : vector<1x1xf32>
    %cst_257 = arith.constant 1.000000e+00 : f32
    %731 = vector.broadcast %cst_257 : f32 to vector<1x1xf32>
    %732 = arith.divf %731, %730 : vector<1x1xf32>
    %733 = vector.extract_strided_slice %598 {offsets = [0, 1], sizes = [16, 1], strides = [1, 1]} : vector<16x4xf32> to vector<16x1xf32>
    %734 = arith.mulf %720, %732 : vector<1x1xf32>
    %735 = vector.broadcast %734 : vector<1x1xf32> to vector<16x1xf32>
    %736 = arith.mulf %735, %733 : vector<16x1xf32>
    %737 = arith.mulf %721, %732 : vector<1x1xf32>
    %738 = vector.broadcast %737 : vector<1x1xf32> to vector<16x1xf32>
    %739 = arith.mulf %738, %733 : vector<16x1xf32>
    %740 = arith.mulf %722, %732 : vector<1x1xf32>
    %741 = vector.broadcast %740 : vector<1x1xf32> to vector<16x1xf32>
    %742 = arith.mulf %741, %733 : vector<16x1xf32>
    %743 = arith.mulf %664, %742 : vector<16x1xf32>
    %744 = arith.mulf %671, %739 : vector<16x1xf32>
    %745 = arith.subf %743, %744 : vector<16x1xf32>
    %746 = arith.mulf %671, %736 : vector<16x1xf32>
    %747 = arith.mulf %657, %742 : vector<16x1xf32>
    %748 = arith.subf %746, %747 : vector<16x1xf32>
    %749 = arith.mulf %657, %739 : vector<16x1xf32>
    %750 = arith.mulf %664, %736 : vector<16x1xf32>
    %751 = arith.subf %749, %750 : vector<16x1xf32>
    %752 = arith.mulf %664, %751 : vector<16x1xf32>
    %753 = arith.mulf %671, %748 : vector<16x1xf32>
    %754 = arith.subf %752, %753 : vector<16x1xf32>
    %755 = arith.mulf %671, %745 : vector<16x1xf32>
    %756 = arith.mulf %657, %751 : vector<16x1xf32>
    %757 = arith.subf %755, %756 : vector<16x1xf32>
    %758 = arith.mulf %657, %748 : vector<16x1xf32>
    %759 = arith.mulf %664, %745 : vector<16x1xf32>
    %760 = arith.subf %758, %759 : vector<16x1xf32>
    %761 = arith.mulf %650, %745 : vector<16x1xf32>
    %762 = arith.addf %761, %754 : vector<16x1xf32>
    %cst_258 = arith.constant 2.000000e+00 : f32
    %763 = vector.broadcast %cst_258 : f32 to vector<16x1xf32>
    %764 = arith.mulf %763, %762 : vector<16x1xf32>
    %765 = arith.addf %736, %764 : vector<16x1xf32>
    %766 = arith.mulf %650, %748 : vector<16x1xf32>
    %767 = arith.addf %766, %757 : vector<16x1xf32>
    %cst_259 = arith.constant 2.000000e+00 : f32
    %768 = vector.broadcast %cst_259 : f32 to vector<16x1xf32>
    %769 = arith.mulf %768, %767 : vector<16x1xf32>
    %770 = arith.addf %739, %769 : vector<16x1xf32>
    %771 = arith.mulf %650, %751 : vector<16x1xf32>
    %772 = arith.addf %771, %760 : vector<16x1xf32>
    %cst_260 = arith.constant 2.000000e+00 : f32
    %773 = vector.broadcast %cst_260 : f32 to vector<16x1xf32>
    %774 = arith.mulf %773, %772 : vector<16x1xf32>
    %775 = arith.addf %742, %774 : vector<16x1xf32>
    %776 = arith.addf %601, %765 : vector<16x1xf32>
    %777 = arith.addf %602, %770 : vector<16x1xf32>
    %778 = arith.addf %603, %775 : vector<16x1xf32>
    %779 = vector.extract_strided_slice %593 {offsets = [0, 15], sizes = [16, 1], strides = [1, 1]} : vector<16x27xf32> to vector<16x1xf32>
    %780 = vector.extract_strided_slice %593 {offsets = [0, 16], sizes = [16, 1], strides = [1, 1]} : vector<16x27xf32> to vector<16x1xf32>
    %781 = vector.extract_strided_slice %593 {offsets = [0, 17], sizes = [16, 1], strides = [1, 1]} : vector<16x27xf32> to vector<16x1xf32>
    %782 = vector.extract_strided_slice %593 {offsets = [0, 18], sizes = [16, 1], strides = [1, 1]} : vector<16x27xf32> to vector<16x1xf32>
    %783 = arith.mulf %779, %779 : vector<16x1xf32>
    %784 = arith.mulf %780, %780 : vector<16x1xf32>
    %785 = arith.addf %783, %784 : vector<16x1xf32>
    %786 = arith.mulf %781, %781 : vector<16x1xf32>
    %787 = arith.addf %785, %786 : vector<16x1xf32>
    %788 = arith.mulf %782, %782 : vector<16x1xf32>
    %789 = arith.addf %787, %788 : vector<16x1xf32>
    %790 = math.sqrt %789 : vector<16x1xf32>
    %cst_261 = arith.constant 9.99999996E-13 : f32
    %791 = vector.broadcast %cst_261 : f32 to vector<16x1xf32>
    %792 = arith.maximumf %790, %791 : vector<16x1xf32>
    %cst_262 = arith.constant 1.000000e+00 : f32
    %793 = vector.broadcast %cst_262 : f32 to vector<16x1xf32>
    %794 = arith.divf %793, %792 : vector<16x1xf32>
    %795 = arith.mulf %779, %794 : vector<16x1xf32>
    %796 = arith.mulf %780, %794 : vector<16x1xf32>
    %797 = arith.mulf %781, %794 : vector<16x1xf32>
    %798 = arith.mulf %782, %794 : vector<16x1xf32>
    %799 = arith.mulf %698, %795 : vector<16x1xf32>
    %800 = arith.mulf %705, %796 : vector<16x1xf32>
    %801 = arith.subf %799, %800 : vector<16x1xf32>
    %802 = arith.mulf %712, %797 : vector<16x1xf32>
    %803 = arith.subf %801, %802 : vector<16x1xf32>
    %804 = arith.mulf %719, %798 : vector<16x1xf32>
    %805 = arith.subf %803, %804 : vector<16x1xf32>
    %806 = arith.mulf %698, %796 : vector<16x1xf32>
    %807 = arith.mulf %705, %795 : vector<16x1xf32>
    %808 = arith.addf %806, %807 : vector<16x1xf32>
    %809 = arith.mulf %712, %798 : vector<16x1xf32>
    %810 = arith.addf %808, %809 : vector<16x1xf32>
    %811 = arith.mulf %719, %797 : vector<16x1xf32>
    %812 = arith.subf %810, %811 : vector<16x1xf32>
    %813 = arith.mulf %698, %797 : vector<16x1xf32>
    %814 = arith.mulf %705, %798 : vector<16x1xf32>
    %815 = arith.subf %813, %814 : vector<16x1xf32>
    %816 = arith.mulf %712, %795 : vector<16x1xf32>
    %817 = arith.addf %815, %816 : vector<16x1xf32>
    %818 = arith.mulf %719, %796 : vector<16x1xf32>
    %819 = arith.addf %817, %818 : vector<16x1xf32>
    %820 = arith.mulf %698, %798 : vector<16x1xf32>
    %821 = arith.mulf %705, %797 : vector<16x1xf32>
    %822 = arith.addf %820, %821 : vector<16x1xf32>
    %823 = arith.mulf %712, %796 : vector<16x1xf32>
    %824 = arith.subf %822, %823 : vector<16x1xf32>
    %825 = arith.mulf %719, %795 : vector<16x1xf32>
    %826 = arith.addf %824, %825 : vector<16x1xf32>
    %827 = vector.extract_strided_slice %600 {offsets = [0, 6], sizes = [1, 1], strides = [1, 1]} : vector<1x12xf32> to vector<1x1xf32>
    %828 = vector.extract_strided_slice %600 {offsets = [0, 7], sizes = [1, 1], strides = [1, 1]} : vector<1x12xf32> to vector<1x1xf32>
    %829 = vector.extract_strided_slice %600 {offsets = [0, 8], sizes = [1, 1], strides = [1, 1]} : vector<1x12xf32> to vector<1x1xf32>
    %830 = arith.mulf %827, %827 : vector<1x1xf32>
    %831 = arith.mulf %828, %828 : vector<1x1xf32>
    %832 = arith.addf %830, %831 : vector<1x1xf32>
    %833 = arith.mulf %829, %829 : vector<1x1xf32>
    %834 = arith.addf %832, %833 : vector<1x1xf32>
    %835 = math.sqrt %834 : vector<1x1xf32>
    %cst_263 = arith.constant 9.99999996E-13 : f32
    %836 = vector.broadcast %cst_263 : f32 to vector<1x1xf32>
    %837 = arith.maximumf %835, %836 : vector<1x1xf32>
    %cst_264 = arith.constant 1.000000e+00 : f32
    %838 = vector.broadcast %cst_264 : f32 to vector<1x1xf32>
    %839 = arith.divf %838, %837 : vector<1x1xf32>
    %840 = vector.extract_strided_slice %598 {offsets = [0, 2], sizes = [16, 1], strides = [1, 1]} : vector<16x4xf32> to vector<16x1xf32>
    %841 = arith.mulf %827, %839 : vector<1x1xf32>
    %842 = vector.broadcast %841 : vector<1x1xf32> to vector<16x1xf32>
    %843 = arith.mulf %842, %840 : vector<16x1xf32>
    %844 = arith.mulf %828, %839 : vector<1x1xf32>
    %845 = vector.broadcast %844 : vector<1x1xf32> to vector<16x1xf32>
    %846 = arith.mulf %845, %840 : vector<16x1xf32>
    %847 = arith.mulf %829, %839 : vector<1x1xf32>
    %848 = vector.broadcast %847 : vector<1x1xf32> to vector<16x1xf32>
    %849 = arith.mulf %848, %840 : vector<16x1xf32>
    %850 = arith.mulf %712, %849 : vector<16x1xf32>
    %851 = arith.mulf %719, %846 : vector<16x1xf32>
    %852 = arith.subf %850, %851 : vector<16x1xf32>
    %853 = arith.mulf %719, %843 : vector<16x1xf32>
    %854 = arith.mulf %705, %849 : vector<16x1xf32>
    %855 = arith.subf %853, %854 : vector<16x1xf32>
    %856 = arith.mulf %705, %846 : vector<16x1xf32>
    %857 = arith.mulf %712, %843 : vector<16x1xf32>
    %858 = arith.subf %856, %857 : vector<16x1xf32>
    %859 = arith.mulf %712, %858 : vector<16x1xf32>
    %860 = arith.mulf %719, %855 : vector<16x1xf32>
    %861 = arith.subf %859, %860 : vector<16x1xf32>
    %862 = arith.mulf %719, %852 : vector<16x1xf32>
    %863 = arith.mulf %705, %858 : vector<16x1xf32>
    %864 = arith.subf %862, %863 : vector<16x1xf32>
    %865 = arith.mulf %705, %855 : vector<16x1xf32>
    %866 = arith.mulf %712, %852 : vector<16x1xf32>
    %867 = arith.subf %865, %866 : vector<16x1xf32>
    %868 = arith.mulf %698, %852 : vector<16x1xf32>
    %869 = arith.addf %868, %861 : vector<16x1xf32>
    %cst_265 = arith.constant 2.000000e+00 : f32
    %870 = vector.broadcast %cst_265 : f32 to vector<16x1xf32>
    %871 = arith.mulf %870, %869 : vector<16x1xf32>
    %872 = arith.addf %843, %871 : vector<16x1xf32>
    %873 = arith.mulf %698, %855 : vector<16x1xf32>
    %874 = arith.addf %873, %864 : vector<16x1xf32>
    %cst_266 = arith.constant 2.000000e+00 : f32
    %875 = vector.broadcast %cst_266 : f32 to vector<16x1xf32>
    %876 = arith.mulf %875, %874 : vector<16x1xf32>
    %877 = arith.addf %846, %876 : vector<16x1xf32>
    %878 = arith.mulf %698, %858 : vector<16x1xf32>
    %879 = arith.addf %878, %867 : vector<16x1xf32>
    %cst_267 = arith.constant 2.000000e+00 : f32
    %880 = vector.broadcast %cst_267 : f32 to vector<16x1xf32>
    %881 = arith.mulf %880, %879 : vector<16x1xf32>
    %882 = arith.addf %849, %881 : vector<16x1xf32>
    %883 = arith.addf %776, %872 : vector<16x1xf32>
    %884 = arith.addf %777, %877 : vector<16x1xf32>
    %885 = arith.addf %778, %882 : vector<16x1xf32>
    %886 = vector.extract_strided_slice %600 {offsets = [0, 9], sizes = [1, 1], strides = [1, 1]} : vector<1x12xf32> to vector<1x1xf32>
    %887 = vector.extract_strided_slice %600 {offsets = [0, 10], sizes = [1, 1], strides = [1, 1]} : vector<1x12xf32> to vector<1x1xf32>
    %888 = vector.extract_strided_slice %600 {offsets = [0, 11], sizes = [1, 1], strides = [1, 1]} : vector<1x12xf32> to vector<1x1xf32>
    %889 = arith.mulf %886, %886 : vector<1x1xf32>
    %890 = arith.mulf %887, %887 : vector<1x1xf32>
    %891 = arith.addf %889, %890 : vector<1x1xf32>
    %892 = arith.mulf %888, %888 : vector<1x1xf32>
    %893 = arith.addf %891, %892 : vector<1x1xf32>
    %894 = math.sqrt %893 : vector<1x1xf32>
    %cst_268 = arith.constant 9.99999996E-13 : f32
    %895 = vector.broadcast %cst_268 : f32 to vector<1x1xf32>
    %896 = arith.maximumf %894, %895 : vector<1x1xf32>
    %cst_269 = arith.constant 1.000000e+00 : f32
    %897 = vector.broadcast %cst_269 : f32 to vector<1x1xf32>
    %898 = arith.divf %897, %896 : vector<1x1xf32>
    %899 = vector.extract_strided_slice %598 {offsets = [0, 3], sizes = [16, 1], strides = [1, 1]} : vector<16x4xf32> to vector<16x1xf32>
    %900 = arith.mulf %886, %898 : vector<1x1xf32>
    %901 = vector.broadcast %900 : vector<1x1xf32> to vector<16x1xf32>
    %902 = arith.mulf %901, %899 : vector<16x1xf32>
    %903 = arith.mulf %887, %898 : vector<1x1xf32>
    %904 = vector.broadcast %903 : vector<1x1xf32> to vector<16x1xf32>
    %905 = arith.mulf %904, %899 : vector<16x1xf32>
    %906 = arith.mulf %888, %898 : vector<1x1xf32>
    %907 = vector.broadcast %906 : vector<1x1xf32> to vector<16x1xf32>
    %908 = arith.mulf %907, %899 : vector<16x1xf32>
    %909 = arith.mulf %819, %908 : vector<16x1xf32>
    %910 = arith.mulf %826, %905 : vector<16x1xf32>
    %911 = arith.subf %909, %910 : vector<16x1xf32>
    %912 = arith.mulf %826, %902 : vector<16x1xf32>
    %913 = arith.mulf %812, %908 : vector<16x1xf32>
    %914 = arith.subf %912, %913 : vector<16x1xf32>
    %915 = arith.mulf %812, %905 : vector<16x1xf32>
    %916 = arith.mulf %819, %902 : vector<16x1xf32>
    %917 = arith.subf %915, %916 : vector<16x1xf32>
    %918 = arith.mulf %819, %917 : vector<16x1xf32>
    %919 = arith.mulf %826, %914 : vector<16x1xf32>
    %920 = arith.subf %918, %919 : vector<16x1xf32>
    %921 = arith.mulf %826, %911 : vector<16x1xf32>
    %922 = arith.mulf %812, %917 : vector<16x1xf32>
    %923 = arith.subf %921, %922 : vector<16x1xf32>
    %924 = arith.mulf %812, %914 : vector<16x1xf32>
    %925 = arith.mulf %819, %911 : vector<16x1xf32>
    %926 = arith.subf %924, %925 : vector<16x1xf32>
    %927 = arith.mulf %805, %911 : vector<16x1xf32>
    %928 = arith.addf %927, %920 : vector<16x1xf32>
    %cst_270 = arith.constant 2.000000e+00 : f32
    %929 = vector.broadcast %cst_270 : f32 to vector<16x1xf32>
    %930 = arith.mulf %929, %928 : vector<16x1xf32>
    %931 = arith.addf %902, %930 : vector<16x1xf32>
    %932 = arith.mulf %805, %914 : vector<16x1xf32>
    %933 = arith.addf %932, %923 : vector<16x1xf32>
    %cst_271 = arith.constant 2.000000e+00 : f32
    %934 = vector.broadcast %cst_271 : f32 to vector<16x1xf32>
    %935 = arith.mulf %934, %933 : vector<16x1xf32>
    %936 = arith.addf %905, %935 : vector<16x1xf32>
    %937 = arith.mulf %805, %917 : vector<16x1xf32>
    %938 = arith.addf %937, %926 : vector<16x1xf32>
    %cst_272 = arith.constant 2.000000e+00 : f32
    %939 = vector.broadcast %cst_272 : f32 to vector<16x1xf32>
    %940 = arith.mulf %939, %938 : vector<16x1xf32>
    %941 = arith.addf %908, %940 : vector<16x1xf32>
    %942 = arith.addf %883, %931 : vector<16x1xf32>
    %943 = arith.addf %884, %936 : vector<16x1xf32>
    %944 = arith.addf %885, %941 : vector<16x1xf32>
    %c0_273 = arith.constant 0 : index
    %c0_274 = arith.constant 0 : index
    %945 = vector.load %arg73[%c0_273, %c0_274] : memref<16x12xf32, #tpu.memory_space<vmem>>, vector<16x1xf32>
    tpu.vector_store %arg73[%c0_273, %c0_274], %601 {strides = array<i32>} : memref<16x12xf32, #tpu.memory_space<vmem>>, vector<16x1xf32>,
    %c0_275 = arith.constant 0 : index
    %c1 = arith.constant 1 : index
    %946 = vector.load %arg73[%c0_275, %c1] : memref<16x12xf32, #tpu.memory_space<vmem>>, vector<16x1xf32>
    tpu.vector_store %arg73[%c0_275, %c1], %602 {strides = array<i32>} : memref<16x12xf32, #tpu.memory_space<vmem>>, vector<16x1xf32>,
    %c0_276 = arith.constant 0 : index
    %c2 = arith.constant 2 : index
    %947 = vector.load %arg73[%c0_276, %c2] : memref<16x12xf32, #tpu.memory_space<vmem>>, vector<16x1xf32>
    tpu.vector_store %arg73[%c0_276, %c2], %603 {strides = array<i32>} : memref<16x12xf32, #tpu.memory_space<vmem>>, vector<16x1xf32>,
    %c0_277 = arith.constant 0 : index
    %c3 = arith.constant 3 : index
    %948 = vector.load %arg73[%c0_277, %c3] : memref<16x12xf32, #tpu.memory_space<vmem>>, vector<16x1xf32>
    tpu.vector_store %arg73[%c0_277, %c3], %776 {strides = array<i32>} : memref<16x12xf32, #tpu.memory_space<vmem>>, vector<16x1xf32>,
    %c0_278 = arith.constant 0 : index
    %c4 = arith.constant 4 : index
    %949 = vector.load %arg73[%c0_278, %c4] : memref<16x12xf32, #tpu.memory_space<vmem>>, vector<16x1xf32>
    tpu.vector_store %arg73[%c0_278, %c4], %777 {strides = array<i32>} : memref<16x12xf32, #tpu.memory_space<vmem>>, vector<16x1xf32>,
    %c0_279 = arith.constant 0 : index
    %c5 = arith.constant 5 : index
    %950 = vector.load %arg73[%c0_279, %c5] : memref<16x12xf32, #tpu.memory_space<vmem>>, vector<16x1xf32>
    tpu.vector_store %arg73[%c0_279, %c5], %778 {strides = array<i32>} : memref<16x12xf32, #tpu.memory_space<vmem>>, vector<16x1xf32>,
    %c0_280 = arith.constant 0 : index
    %c6 = arith.constant 6 : index
    %951 = vector.load %arg73[%c0_280, %c6] : memref<16x12xf32, #tpu.memory_space<vmem>>, vector<16x1xf32>
    tpu.vector_store %arg73[%c0_280, %c6], %883 {strides = array<i32>} : memref<16x12xf32, #tpu.memory_space<vmem>>, vector<16x1xf32>,
    %c0_281 = arith.constant 0 : index
    %c7 = arith.constant 7 : index
    %952 = vector.load %arg73[%c0_281, %c7] : memref<16x12xf32, #tpu.memory_space<vmem>>, vector<16x1xf32>
    tpu.vector_store %arg73[%c0_281, %c7], %884 {strides = array<i32>} : memref<16x12xf32, #tpu.memory_space<vmem>>, vector<16x1xf32>,
    %c0_282 = arith.constant 0 : index
    %c8 = arith.constant 8 : index
    %953 = vector.load %arg73[%c0_282, %c8] : memref<16x12xf32, #tpu.memory_space<vmem>>, vector<16x1xf32>
    tpu.vector_store %arg73[%c0_282, %c8], %885 {strides = array<i32>} : memref<16x12xf32, #tpu.memory_space<vmem>>, vector<16x1xf32>,
    %c0_283 = arith.constant 0 : index
    %c9 = arith.constant 9 : index
    %954 = vector.load %arg73[%c0_283, %c9] : memref<16x12xf32, #tpu.memory_space<vmem>>, vector<16x1xf32>
    tpu.vector_store %arg73[%c0_283, %c9], %942 {strides = array<i32>} : memref<16x12xf32, #tpu.memory_space<vmem>>, vector<16x1xf32>,
    %c0_284 = arith.constant 0 : index
    %c10 = arith.constant 10 : index
    %955 = vector.load %arg73[%c0_284, %c10] : memref<16x12xf32, #tpu.memory_space<vmem>>, vector<16x1xf32>
    tpu.vector_store %arg73[%c0_284, %c10], %943 {strides = array<i32>} : memref<16x12xf32, #tpu.memory_space<vmem>>, vector<16x1xf32>,
    %c0_285 = arith.constant 0 : index
    %c11 = arith.constant 11 : index
    %956 = vector.load %arg73[%c0_285, %c11] : memref<16x12xf32, #tpu.memory_space<vmem>>, vector<16x1xf32>
    tpu.vector_store %arg73[%c0_285, %c11], %944 {strides = array<i32>} : memref<16x12xf32, #tpu.memory_space<vmem>>, vector<16x1xf32>,
    return
  }
}

</mosaic_0001>

<bundles_post_ra>
// kernel: squeeze.1
= control target key start
LH: loop header
LB: loop body
LE: loop exit
PB: predicated region body
PF: predicated region fallthrough
CT: control target
= control target key end

     0   :  { %vm8_vm0 = vcmask 23552   ;;  %s40_s8 = smov 3   ;;  %s41_s9 = smov 6   ;;  %vm14_vm1 = vcmask 97352   ;;  %vm20_vm2 = vcmask 72752   ;;  %vm26_vm3 = vcmask 48152   ;;  %s58_s0 = inlined_call_operand.vmem [shape: f32[1,4,3], index: 0, kind: input, shape index: {}]   ;;  %s59_s1 = inlined_call_operand.vmem [shape: f32[1,12], index: 1, kind: output, shape index: {}]  }
   0x1   :  { %v5_v0 = vld [vmem:[%s58_s0] sm:$0xf]  ;;  %s39_s0 = smov 9  }
   0x2   :  { %6 = vst [vmem:[#allocation1] sm:$0xf] %v5_v0 }
   0x9   :  { %v11_v1 = vld [vmem:[#allocation1 + $0x3] sm:$0x1]   ;;  %v23_v2 = vld [vmem:[#allocation1 + $0x1] sm:$0x1]   ;;  %v7_v3 = vld [vmem:[#allocation1] sm:$0x1]  }
   0xa   :  { %12 = vrot.lane.b32.xlu0 %v11_v1, %s39_s0  ;;  %24 = vrot.lane.b32.xlu1 %v23_v2, %s40_s8  ;;  %v17_v4 = vld [vmem:[#allocation1 + $0x2] sm:$0x1]   ;;  %9 = vst.msk [vmem:[#allocation0] sm:$0x1] %vm8_vm0, %v7_v3  }
   0xe   :  { %18 = vrot.lane.b32.xlu0 %v17_v4, %s41_s9 }
  0x7c   :  { %v13_v5 = vpop.permute.xlu0 %12   ;;  %v25_v6 = vpop.permute.xlu1 %24  }
  0x7d   :  { %15 = vst.msk [vmem:[#allocation0] sm:$0x1] %vm14_vm1, %v13_v5  }
  0x80   :  { %v19_v7 = vpop.permute.xlu0 %18  }
  0x81   :  { %21 = vst.msk [vmem:[#allocation0] sm:$0x1] %vm20_vm2, %v19_v7  }
  0x82   :  { %27 = vst.msk [vmem:[#allocation0] sm:$0x1] %vm26_vm3, %v25_v6  }
  0x89   :  { %v32_v8 = vld [vmem:[#allocation0] sm:$0x1] }
  0x8a   :  { %35 = vst [vmem:[%s59_s1] sm:$0x1] %v32_v8 }

// kernel: _lambda_.1
= control target key start
LH: loop header
LB: loop body
LE: loop exit
PB: predicated region body
PF: predicated region fallthrough
CT: control target
= control target key end

     0   :  { %s10173_s6 = smov 1   ;;  %s10174_s10 = smov 2   ;;  %s12991_s0 = inlined_call_operand.smem [shape: u32[75], index: -1, kind: input, shape index: {}] }
   0x1   :  { %s10343_s5 = sld [smem:[%s12991_s0]]   ;;  %s10175_s14 = smov 3  }
   0x2   :  { %s10348_s9 = sld [smem:[%s12991_s0 + %s10173_s6]]   ;;  %s10176_s18 = smov 4  }
   0x3   :  { %s10353_s13 = sld [smem:[%s12991_s0 + %s10174_s10]]   ;;  %s10177_s22 = smov 5  }
   0x4   :  { %s10358_s17 = sld [smem:[%s12991_s0 + %s10175_s14]]   ;;  %s10178_s26 = smov 6  }
   0x5   :  { %s10363_s21 = sld [smem:[%s12991_s0 + %s10176_s18]]   ;;  %s10179_s30 = smov 7  }
   0x6   :  { %s10368_s25 = sld [smem:[%s12991_s0 + %s10177_s22]]   ;;  %s10180_s4 = smov 8  }
   0x7   :  { %13047 = sst [smem:[#allocation105_spill]] %s10343_s5  ;;  %s10181_s10 = smov 9  }
   0x8   :  { %13048 = sst [smem:[#allocation106_spill]] %s10348_s9  ;;  %s10182_s15 = smov 10  }
   0x9   :  { %13049 = sst [smem:[#allocation107_spill]] %s10353_s13  ;;  %s10183_s20 = smov 11  }
   0xa   :  { %13050 = sst [smem:[#allocation108_spill]] %s10358_s17  ;;  %s10185_s1 = smov 13  }
   0xb   :  { %s10373_s29 = sld [smem:[%s12991_s0 + %s10178_s26]]   ;;  %s10184_s26 = smov 12  }
   0xc   :  { %13051 = sst [smem:[#allocation109_spill]] %s10368_s25  ;;  %s10186_s7 = smov 14  }
   0xd   :  { %s10378_s3 = sld [smem:[%s12991_s0 + %s10179_s30]]   ;;  %s10188_s22 = smov 16  }
   0xe   :  { %s10383_s8 = sld [smem:[%s12991_s0 + %s10180_s4]]   ;;  %s10189_s28 = smov 17  }
   0xf   :  { %s10388_s14 = sld [smem:[%s12991_s0 + %s10181_s10]]  }
  0x10   :  { %s10393_s19 = sld [smem:[%s12991_s0 + %s10182_s15]]   ;;  %s10187_s15 = smov 15  }
  0x11   :  { %13052 = sst [smem:[#allocation110_spill]] %s10373_s29 }
  0x12   :  { %s10398_s24 = sld [smem:[%s12991_s0 + %s10183_s20]]  }
  0x13   :  { %13053 = sst [smem:[#allocation111_spill]] %s10378_s3 }
  0x14   :  { %13054 = sst [smem:[#allocation112_spill]] %s10383_s8 }
  0x15   :  { %s10403_s30 = sld [smem:[%s12991_s0 + %s10184_s26]]  }
  0x16   :  { %13055 = sst [smem:[#allocation113_spill]] %s10393_s19 }
  0x17   :  { %s10408_s6 = sld [smem:[%s12991_s0 + %s10185_s1]]  }
  0x18   :  { %s10413_s12 = sld [smem:[%s12991_s0 + %s10186_s7]]   ;;  %s10190_s7 = smov 18  }
  0x19   :  { %s10418_s20 = sld [smem:[%s12991_s0 + %s10187_s15]]   ;;  %s10191_s15 = smov 19  }
  0x1a   :  { %s10423_s27 = sld [smem:[%s12991_s0 + %s10188_s22]]   ;;  %s10192_s22 = smov 20  }
  0x1b   :  { %13056 = sst [smem:[#allocation114_spill]] %s10403_s30 }
  0x1c   :  { %s10428_s4 = sld [smem:[%s12991_s0 + %s10189_s28]]   ;;  %s10193_s28 = smov 21  }
  0x1d   :  { %13057 = sst [smem:[#allocation115_spill]] %s10408_s6 }
  0x1e   :  { %13058 = sst [smem:[#allocation116_spill]] %s10413_s12 }
  0x1f   :  { %s10433_s13 = sld [smem:[%s12991_s0 + %s10190_s7]]   ;;  %s10194_s7 = smov 22  }
  0x20   :  { %13059 = sst [smem:[#allocation117_spill]] %s10423_s27 }
  0x21   :  { %s10438_s12 = sld [smem:[%s12991_s0 + %s10191_s15]]   ;;  %s10195_s15 = smov 23  }
  0x22   :  { %s10443_s30 = sld [smem:[%s12991_s0 + %s10192_s22]]   ;;  %s10196_s22 = smov 24  }
  0x23   :  { %s10448_s8 = sld [smem:[%s12991_s0 + %s10193_s28]]   ;;  %s10197_s28 = smov 25  }
  0x24   :  { %s10458_s17 = sld [smem:[%s12991_s0 + %s10195_s15]]   ;;  %s10199_s15 = smov 27  }
  0x25   :  { %13060 = sst [smem:[#allocation118_spill]] %s10433_s13 }
  0x26   :  { %s10453_s13 = sld [smem:[%s12991_s0 + %s10194_s7]]   ;;  %s10198_s7 = smov 26  }
  0x27   :  { %13061 = sst [smem:[#allocation119_spill]] %s10438_s12 }
  0x28   :  { %13062 = sst [smem:[#allocation120_spill]] %s10443_s30 }
  0x29   :  { %s10463_s30 = sld [smem:[%s12991_s0 + %s10196_s22]]   ;;  %s10200_s22 = smov 28  }
  0x2a   :  { %s10468_s25 = sld [smem:[%s12991_s0 + %s10197_s28]]   ;;  %s10201_s28 = smov 29  }
  0x2b   :  { %s10473_s29 = sld [smem:[%s12991_s0 + %s10198_s7]]   ;;  %s10202_s7 = smov 30  }
  0x2c   :  { %13063 = sst [smem:[#allocation121_spill]] %s10453_s13 }
  0x2d   :  { %s10478_s5 = sld [smem:[%s12991_s0 + %s10199_s15]]   ;;  %s10203_s15 = smov 31  }
  0x2e   :  { %s10498_s13 = sld [smem:[%s12991_s0 + %s10203_s15]]   ;;  %s10207_s15 = smov 35  }
  0x2f   :  { %13064 = sst [smem:[#allocation122_spill]] %s10463_s30 }
  0x30   :  { %13065 = sst [smem:[#allocation123_spill]] %s10468_s25 }
  0x31   :  { %13066 = sst [smem:[#allocation124_spill]] %s10473_s29 }
  0x32   :  { %s10483_s30 = sld [smem:[%s12991_s0 + %s10200_s22]]   ;;  %s10204_s22 = smov 32  }
  0x33   :  { %s10488_s25 = sld [smem:[%s12991_s0 + %s10201_s28]]   ;;  %s10205_s28 = smov 33  }
  0x34   :  { %s10493_s29 = sld [smem:[%s12991_s0 + %s10202_s7]]   ;;  %s10206_s7 = smov 34  }
  0x35   :  { %13069 = sst [smem:[#allocation127_spill]] %s10498_s13 }
  0x36   :  { %s10508_s12 = sld [smem:[%s12991_s0 + %s10205_s28]]   ;;  %s10209_s28 = smov 37  }
  0x37   :  { %s10518_s13 = sld [smem:[%s12991_s0 + %s10207_s15]]   ;;  %s10211_s15 = smov 39  }
  0x38   :  { %13067 = sst [smem:[#allocation125_spill]] %s10483_s30 }
  0x39   :  { %s10503_s30 = sld [smem:[%s12991_s0 + %s10204_s22]]   ;;  %s10208_s22 = smov 36  }
  0x3a   :  { %13068 = sst [smem:[#allocation126_spill]] %s10493_s29 }
  0x3b   :  { %s10513_s29 = sld [smem:[%s12991_s0 + %s10206_s7]]   ;;  %s10210_s7 = smov 38  }
  0x3c   :  { %s10528_s27 = sld [smem:[%s12991_s0 + %s10209_s28]]   ;;  %s10213_s28 = smov 41  }
  0x3d   :  { %s10538_s6 = sld [smem:[%s12991_s0 + %s10211_s15]]   ;;  %s10215_s15 = smov 43  }
  0x3e   :  { %s10558_s19 = sld [smem:[%s12991_s0 + %s10215_s15]]   ;;  %s10219_s15 = smov 47  }
  0x3f   :  { %13070 = sst [smem:[#allocation128_spill]] %s10503_s30 }
  0x40   :  { %s10523_s30 = sld [smem:[%s12991_s0 + %s10208_s22]]   ;;  %s10212_s22 = smov 40  }
  0x41   :  { %13071 = sst [smem:[#allocation129_spill]] %s10513_s29 }
  0x42   :  { %13073 = sst [smem:[#allocation131_spill]] %s10528_s27 }
  0x43   :  { %s10533_s29 = sld [smem:[%s12991_s0 + %s10210_s7]]   ;;  %s10214_s7 = smov 42  }
  0x44   :  { %s10548_s27 = sld [smem:[%s12991_s0 + %s10213_s28]]   ;;  %s10217_s28 = smov 45  }
  0x45   :  { %s10568_s3 = sld [smem:[%s12991_s0 + %s10217_s28]]   ;;  %s10221_s28 = smov 49  }
  0x46   :  { %13072 = sst [smem:[#allocation130_spill]] %s10523_s30 }
  0x47   :  { %s10543_s30 = sld [smem:[%s12991_s0 + %s10212_s22]]   ;;  %s10216_s22 = smov 44  }
  0x48   :  { %s10578_s9 = sld [smem:[%s12991_s0 + %s10219_s15]]   ;;  %s10223_s15 = smov 51  }
  0x49   :  { %13074 = sst [smem:[#allocation132_spill]] %s10533_s29 }
  0x4a   :  { %s10553_s29 = sld [smem:[%s12991_s0 + %s10214_s7]]   ;;  %s10218_s7 = smov 46  }
  0x4b   :  { %13078 = sst [smem:[#allocation136_spill]] %s10568_s3 }
  0x4c   :  { %s10588_s3 = sld [smem:[%s12991_s0 + %s10221_s28]]   ;;  %s10225_s28 = smov 53  }
  0x4d   :  { %13075 = sst [smem:[#allocation133_spill]] %s10543_s30 }
  0x4e   :  { %s10563_s30 = sld [smem:[%s12991_s0 + %s10216_s22]]   ;;  %s10220_s22 = smov 48  }
  0x4f   :  { %13080 = sst [smem:[#allocation138_spill]] %s10578_s9 }
  0x50   :  { %13076 = sst [smem:[#allocation134_spill]] %s10553_s29 }
  0x51   :  { %s10573_s29 = sld [smem:[%s12991_s0 + %s10218_s7]]   ;;  %s10222_s7 = smov 50  }
  0x52   :  { %13082 = sst [smem:[#allocation140_spill]] %s10588_s3 }
  0x53   :  { %s10598_s9 = sld [smem:[%s12991_s0 + %s10223_s15]]   ;;  %s10227_s15 = smov 55  }
  0x54   :  { %13077 = sst [smem:[#allocation135_spill]] %s10563_s30 }
  0x55   :  { %s10583_s30 = sld [smem:[%s12991_s0 + %s10220_s22]]   ;;  %s10224_s22 = smov 52  }
  0x56   :  { %s10608_s3 = sld [smem:[%s12991_s0 + %s10225_s28]]   ;;  %s10229_s28 = smov 57  }
  0x57   :  { %13079 = sst [smem:[#allocation137_spill]] %s10573_s29 }
  0x58   :  { %s10593_s29 = sld [smem:[%s12991_s0 + %s10222_s7]]   ;;  %s10226_s7 = smov 54  }
  0x59   :  { %13084 = sst [smem:[#allocation142_spill]] %s10598_s9 }
  0x5a   :  { %s10618_s9 = sld [smem:[%s12991_s0 + %s10227_s15]]   ;;  %s10231_s15 = smov 59  }
  0x5b   :  { %13081 = sst [smem:[#allocation139_spill]] %s10583_s30 }
  0x5c   :  { %s10603_s30 = sld [smem:[%s12991_s0 + %s10224_s22]]   ;;  %s10228_s22 = smov 56  }
  0x5d   :  { %13086 = sst [smem:[#allocation144_spill]] %s10608_s3 }
  0x5e   :  { %13083 = sst [smem:[#allocation141_spill]] %s10593_s29 }
  0x5f   :  { %s10613_s29 = sld [smem:[%s12991_s0 + %s10226_s7]]   ;;  %s10230_s7 = smov 58  }
  0x60   :  { %13088 = sst [smem:[#allocation146_spill]] %s10618_s9 }
  0x61   :  { %s10628_s3 = sld [smem:[%s12991_s0 + %s10229_s28]]   ;;  %s10233_s28 = smov 61  }
  0x62   :  { %13085 = sst [smem:[#allocation143_spill]] %s10603_s30 }
  0x63   :  { %s10623_s30 = sld [smem:[%s12991_s0 + %s10228_s22]]   ;;  %s10232_s22 = smov 60  }
  0x64   :  { %s10638_s9 = sld [smem:[%s12991_s0 + %s10231_s15]]   ;;  %s10235_s15 = smov 63  }
  0x65   :  { %13087 = sst [smem:[#allocation145_spill]] %s10613_s29 }
  0x66   :  { %s10633_s29 = sld [smem:[%s12991_s0 + %s10230_s7]]   ;;  %s10234_s7 = smov 62  }
  0x67   :  { %13090 = sst [smem:[#allocation148_spill]] %s10628_s3 }
  0x68   :  { %s10648_s3 = sld [smem:[%s12991_s0 + %s10233_s28]]   ;;  %s10237_s28 = smov 65  }
  0x69   :  { %13089 = sst [smem:[#allocation147_spill]] %s10623_s30 }
  0x6a   :  { %13092 = sst [smem:[#allocation150_spill]] %s10638_s9 }
  0x6b   :  { %s10643_s30 = sld [smem:[%s12991_s0 + %s10232_s22]]   ;;  %s10236_s22 = smov 64  }
  0x6c   :  { %13091 = sst [smem:[#allocation149_spill]] %s10633_s29 }
  0x6d   :  { %s10653_s29 = sld [smem:[%s12991_s0 + %s10234_s7]]   ;;  %s10238_s7 = smov 66  }
  0x6e   :  { %13094 = sst [smem:[#allocation152_spill]] %s10648_s3 }
  0x6f   :  { %s10658_s9 = sld [smem:[%s12991_s0 + %s10235_s15]]   ;;  %s10239_s15 = smov 67  }
  0x70   :  { %s10668_s3 = sld [smem:[%s12991_s0 + %s10237_s28]]   ;;  %s10241_s28 = smov 69  }
  0x71   :  { %13093 = sst [smem:[#allocation151_spill]] %s10643_s30 }
  0x72   :  { %s10663_s30 = sld [smem:[%s12991_s0 + %s10236_s22]]   ;;  %s10240_s22 = smov 68  }
  0x73   :  { %13095 = sst [smem:[#allocation153_spill]] %s10653_s29 }
  0x74   :  { %s10673_s29 = sld [smem:[%s12991_s0 + %s10238_s7]]   ;;  %s10242_s7 = smov 70  }
  0x75   :  { %13096 = sst [smem:[#allocation154_spill]] %s10658_s9 }
  0x76   :  { %13098 = sst [smem:[#allocation156_spill]] %s10668_s3 }
  0x77   :  { %s10678_s9 = sld [smem:[%s12991_s0 + %s10239_s15]]   ;;  %s10243_s15 = smov 71  }
  0x78   :  { %13097 = sst [smem:[#allocation155_spill]] %s10663_s30 }
  0x79   :  { %s10683_s30 = sld [smem:[%s12991_s0 + %s10240_s22]]   ;;  %s10244_s22 = smov 72  }
  0x7a   :  { %13099 = sst [smem:[#allocation157_spill]] %s10673_s29 }
  0x7b   :  { %s10688_s3 = sld [smem:[%s12991_s0 + %s10241_s28]]   ;;  %s10245_s28 = smov 73  }
  0x7c   :  { %s10693_s29 = sld [smem:[%s12991_s0 + %s10242_s7]]   ;;  %s10246_s7 = smov 74  }
  0x7d   :  { %13100 = sst [smem:[#allocation158_spill]] %s10678_s9 }
  0x7e   :  { %s10698_s9 = sld [smem:[%s12991_s0 + %s10243_s15]]  }
  0x7f   :  { %13101 = sst [smem:[#allocation159_spill]] %s10683_s30 }
  0x80   :  { %s10703_s30 = sld [smem:[%s12991_s0 + %s10244_s22]]  }
  0x81   :  { %13102 = sst [smem:[#allocation160_spill]] %s10688_s3 }
  0x82   :  { %13103 = sst [smem:[#allocation161_spill]] %s10693_s29 }
  0x83   :  { %s10708_s3 = sld [smem:[%s12991_s0 + %s10245_s28]]  }
  0x84   :  { %s10713_s29 = sld [smem:[%s12991_s0 + %s10246_s7]]  }
  0x85   :  { %155 = vsyncpa [#allocation3], 0 }
  0x86   :  { %156 = vsyncpa [#allocation5], 0 }
  0x87   :  { %157 = vsyncpa [#allocation8], 0 }
  0x88   :  { %158 = vsyncpa [#allocation11], 0 }
  0x89   :  { %159 = vsyncpa [#allocation14], 0 }
  0x8a   :  { %160 = vsyncpa [#allocation17], 0 }
  0x8b   :  { %161 = vsyncpa [#allocation20], 0 }
  0x8c   :  { %162 = vsyncpa [#allocation23], 0 }
  0x8d   :  { %163 = vsyncpa [#allocation26], 0 }
  0x8e   :  { %164 = vsyncpa [#allocation29], 0 }
  0x8f   :  { %165 = vsyncpa [#allocation32], 0 }
  0x90   :  { %166 = vsyncpa [#allocation35], 0 }
  0x91   :  { %167 = vsyncpa [#allocation38], 0 }
  0x92   :  { %168 = vsyncpa [#allocation41], 0 }
  0x93   :  { %169 = vsyncpa [#allocation44], 0 }
  0x94   :  { %170 = vsyncpa [#allocation47], 0 }
  0x95   :  { %171 = vsyncpa [#allocation50], 0 }
  0x96   :  { %172 = vsyncpa [#allocation53], 0 }
  0x97   :  { %173 = vsyncpa [#allocation56], 0 }
  0x98   :  { %174 = vsyncpa [#allocation59], 0 }
  0x99   :  { %175 = vsyncpa [#allocation62], 0 }
  0x9a   :  { %176 = vsyncpa [#allocation65], 0 }
  0x9b   :  { %177 = vsyncpa [#allocation68], 0 }
  0x9c   :  { %178 = vsyncpa [#allocation71], 0 }
  0x9d   :  { %179 = vsyncpa [#allocation74], 0 }
  0x9e   :  { %180 = vsyncpa [#allocation77], 0  ;;  %s10247_s0 = smov [#allocation4]  }
  0x9f   :  { %s202_s15 = sshll.u32 %s10247_s0, 4  ;;  %s203_s15 = int_to_ptr.vmem [resolvable:$true] %s202_s15 }
  0xa0   :  { %s9109_s16 = scalar_lea.vmem %s203_s15, 256  ;;  %p9114_p1 = scmp.lt.s32.totalorder %s203_s15, %s203_s15 }
  0xa1   :  { %p9110_p0 = scmp.ne.s32.totalorder %s203_s15, %s9109_s16  ;;  %p9115_p2 = scmp.lt.s32.totalorder %s9109_s16, %s9109_s16 }
  0xa3   :  { %p9116_p3 = por %p9115_p2, %p9114_p1 }
  0xa5   :  { %p9117_p4 = pnand %p9116_p3, %p9110_p0 }
  0xa7   :  { %9120 = shalt.err (!%p9117_p4)
}
  0xa8   :  { %s10248_s18 = smov 128   ;;  %s10249_s22 = smov 8  }
  0xa9   :  { %208 = dma.hbm_to_vmem [thread:$0]  %s10363_s21, 256, %s203_s15, [#allocation5], %s10248_s18, %s10248_s18, %s10249_s22  }
  0xaa   :  { %s10250_s23 = smov [#allocation7]   ;;  %s10251_s28 = smov [#allocation10]  }
  0xab   :  { %s231_s26 = sshll.u32 %s10250_s23, 4  ;;  %s251_s1 = sshll.u32 %s10251_s28, 4  ;;  %s232_s26 = int_to_ptr.vmem [resolvable:$true] %s231_s26  ;;  %s252_s1 = int_to_ptr.vmem [resolvable:$true] %s251_s1 }
  0xac   :  { %s9129_s2 = scalar_lea.vmem %s232_s26, 16  ;;  %s9133_s7 = scalar_lea.vmem %s232_s26, 32 }
  0xad   :  { %p9130_p5 = scmp.ne.s32.totalorder %s232_s26, %s9129_s2  ;;  %p9134_p6 = scmp.lt.s32.totalorder %s232_s26, %s232_s26 }
  0xae   :  { %p9135_p7 = scmp.lt.s32.totalorder %s9133_s7, %s9129_s2 }
  0xb0   :  { %p9136_p8 = por %p9135_p7, %p9134_p6 }
  0xb2   :  { %p9137_p9 = pnand %p9136_p8, %p9130_p5 }
  0xb4   :  { %9140 = shalt.err (!%p9137_p9)
}
  0xb5   :  { %234 = dma.hbm_to_vmem [thread:$0]  %s10388_s14, 16, %s232_s26, [#allocation8]  }
  0xb6   :  { %s9149_s10 = scalar_lea.vmem %s252_s1, 16  ;;  %s9153_s11 = scalar_lea.vmem %s252_s1, 32 }
  0xb7   :  { %p9150_p10 = scmp.ne.s32.totalorder %s252_s1, %s9149_s10  ;;  %p9154_p11 = scmp.lt.s32.totalorder %s252_s1, %s252_s1 }
  0xb8   :  { %p9155_p12 = scmp.lt.s32.totalorder %s9153_s11, %s9149_s10 }
  0xba   :  { %p9156_p13 = por %p9155_p12, %p9154_p11 }
  0xbc   :  { %p9157_p0 = pnand %p9156_p13, %p9150_p10 }
  0xbe   :  { %9160 = shalt.err (!%p9157_p0)
}
  0xbf   :  { %254 = dma.hbm_to_vmem [thread:$0]  %s10398_s24, 16, %s252_s1, [#allocation11]  }
  0xc0   :  { %s10252_s21 = smov [#allocation13]   ;;  %s10253_s15 = smov [#allocation16]  }
  0xc1   :  { %s275_s0 = sshll.u32 %s10252_s21, 4  ;;  %s295_s16 = sshll.u32 %s10253_s15, 4  ;;  %s276_s0 = int_to_ptr.vmem [resolvable:$true] %s275_s0  ;;  %s296_s16 = int_to_ptr.vmem [resolvable:$true] %s295_s16 }
  0xc2   :  { %s9169_s23 = scalar_lea.vmem %s276_s0, 16  ;;  %s9173_s28 = scalar_lea.vmem %s276_s0, 32 }
  0xc3   :  { %p9170_p1 = scmp.ne.s32.totalorder %s276_s0, %s9169_s23  ;;  %p9174_p2 = scmp.lt.s32.totalorder %s276_s0, %s276_s0 }
  0xc4   :  { %p9175_p3 = scmp.lt.s32.totalorder %s9173_s28, %s9169_s23 }
  0xc6   :  { %p9176_p4 = por %p9175_p3, %p9174_p2 }
  0xc8   :  { %p9177_p5 = pnand %p9176_p4, %p9170_p1 }
  0xca   :  { %9180 = shalt.err (!%p9177_p5)
}
  0xcb   :  { %278 = dma.hbm_to_vmem [thread:$0]  %s10418_s20, 16, %s276_s0, [#allocation14]  }
  0xcc   :  { %s9189_s14 = scalar_lea.vmem %s296_s16, 16  ;;  %s9193_s26 = scalar_lea.vmem %s296_s16, 32 }
  0xcd   :  { %p9190_p6 = scmp.ne.s32.totalorder %s296_s16, %s9189_s14  ;;  %p9194_p7 = scmp.lt.s32.totalorder %s296_s16, %s296_s16 }
  0xce   :  { %p9195_p8 = scmp.lt.s32.totalorder %s9193_s26, %s9189_s14 }
  0xd0   :  { %p9196_p9 = por %p9195_p8, %p9194_p7 }
  0xd2   :  { %p9197_p10 = pnand %p9196_p9, %p9190_p6 }
  0xd4   :  { %9200 = shalt.err (!%p9197_p10)
}
  0xd5   :  { %298 = dma.hbm_to_vmem [thread:$0]  %s10428_s4, 16, %s296_s16, [#allocation17]  }
  0xd6   :  { %s10254_s24 = smov [#allocation19]   ;;  %s10255_s2 = smov [#allocation22]  }
  0xd7   :  { %s319_s1 = sshll.u32 %s10254_s24, 4  ;;  %s339_s7 = sshll.u32 %s10255_s2, 4  ;;  %s320_s1 = int_to_ptr.vmem [resolvable:$true] %s319_s1  ;;  %s340_s7 = int_to_ptr.vmem [resolvable:$true] %s339_s7 }
  0xd8   :  { %s9209_s10 = scalar_lea.vmem %s320_s1, 16  ;;  %s9213_s11 = scalar_lea.vmem %s320_s1, 32 }
  0xd9   :  { %p9210_p11 = scmp.ne.s32.totalorder %s320_s1, %s9209_s10  ;;  %p9214_p12 = scmp.lt.s32.totalorder %s320_s1, %s320_s1 }
  0xda   :  { %p9215_p13 = scmp.lt.s32.totalorder %s9213_s11, %s9209_s10 }
  0xdc   :  { %p9216_p0 = por %p9215_p13, %p9214_p12 }
  0xde   :  { %p9217_p1 = pnand %p9216_p0, %p9210_p11 }
  0xe0   :  { %9220 = shalt.err (!%p9217_p1)
}
  0xe1   :  { %322 = dma.hbm_to_vmem [thread:$0]  %s10448_s8, 16, %s320_s1, [#allocation20]  }
  0xe2   :  { %s9229_s20 = scalar_lea.vmem %s340_s7, 16  ;;  %s9233_s21 = scalar_lea.vmem %s340_s7, 32 }
  0xe3   :  { %p9230_p2 = scmp.ne.s32.totalorder %s340_s7, %s9229_s20  ;;  %p9234_p3 = scmp.lt.s32.totalorder %s340_s7, %s340_s7 }
  0xe4   :  { %p9235_p4 = scmp.lt.s32.totalorder %s9233_s21, %s9229_s20 }
  0xe6   :  { %p9236_p5 = por %p9235_p4, %p9234_p3 }
  0xe8   :  { %p9237_p6 = pnand %p9236_p5, %p9230_p2 }
  0xea   :  { %9240 = shalt.err (!%p9237_p6)
}
  0xeb   :  { %342 = dma.hbm_to_vmem [thread:$0]  %s10458_s17, 16, %s340_s7, [#allocation23]  }
  0xec   :  { %s10256_s4 = smov [#allocation25]   ;;  %s10257_s15 = smov [#allocation28]  }
  0xed   :  { %s363_s0 = sshll.u32 %s10256_s4, 4  ;;  %s383_s16 = sshll.u32 %s10257_s15, 4  ;;  %s364_s0 = int_to_ptr.vmem [resolvable:$true] %s363_s0  ;;  %s384_s16 = int_to_ptr.vmem [resolvable:$true] %s383_s16 }
  0xee   :  { %s9249_s23 = scalar_lea.vmem %s364_s0, 16  ;;  %s9253_s28 = scalar_lea.vmem %s364_s0, 32 }
  0xef   :  { %p9250_p7 = scmp.ne.s32.totalorder %s364_s0, %s9249_s23  ;;  %p9254_p8 = scmp.lt.s32.totalorder %s364_s0, %s364_s0 }
  0xf0   :  { %p9255_p9 = scmp.lt.s32.totalorder %s9253_s28, %s9249_s23 }
  0xf2   :  { %p9256_p10 = por %p9255_p9, %p9254_p8 }
  0xf4   :  { %p9257_p11 = pnand %p9256_p10, %p9250_p7 }
  0xf6   :  { %9260 = shalt.err (!%p9257_p11)
}
  0xf7   :  { %366 = dma.hbm_to_vmem [thread:$0]  %s10478_s5, 16, %s364_s0, [#allocation26]  }
  0xf8   :  { %s9269_s8 = scalar_lea.vmem %s384_s16, 16  ;;  %s9273_s14 = scalar_lea.vmem %s384_s16, 32 }
  0xf9   :  { %p9270_p12 = scmp.ne.s32.totalorder %s384_s16, %s9269_s8  ;;  %p9274_p13 = scmp.lt.s32.totalorder %s384_s16, %s384_s16 }
  0xfa   :  { %p9275_p0 = scmp.lt.s32.totalorder %s9273_s14, %s9269_s8 }
  0xfc   :  { %p9276_p1 = por %p9275_p0, %p9274_p13 }
  0xfe   :  { %p9277_p2 = pnand %p9276_p1, %p9270_p12 }
 0x100   :  { %9280 = shalt.err (!%p9277_p2)
}
 0x101   :  { %386 = dma.hbm_to_vmem [thread:$0]  %s10488_s25, 16, %s384_s16, [#allocation29]  }
 0x102   :  { %s10258_s17 = smov [#allocation31]   ;;  %s10259_s24 = smov [#allocation34]  }
 0x103   :  { %s407_s26 = sshll.u32 %s10258_s17, 4  ;;  %s427_s1 = sshll.u32 %s10259_s24, 4  ;;  %s408_s26 = int_to_ptr.vmem [resolvable:$true] %s407_s26  ;;  %s428_s1 = int_to_ptr.vmem [resolvable:$true] %s427_s1 }
 0x104   :  { %s9289_s2 = scalar_lea.vmem %s408_s26, 16  ;;  %s9293_s7 = scalar_lea.vmem %s408_s26, 32 }
 0x105   :  { %p9290_p3 = scmp.ne.s32.totalorder %s408_s26, %s9289_s2  ;;  %p9294_p4 = scmp.lt.s32.totalorder %s408_s26, %s408_s26 }
 0x106   :  { %p9295_p5 = scmp.lt.s32.totalorder %s9293_s7, %s9289_s2 }
 0x108   :  { %p9296_p6 = por %p9295_p5, %p9294_p4 }
 0x10a   :  { %p9297_p7 = pnand %p9296_p6, %p9290_p3 }
 0x10c   :  { %9300 = shalt.err (!%p9297_p7)
}
 0x10d   :  { %410 = dma.hbm_to_vmem [thread:$0]  %s10508_s12, 16, %s408_s26, [#allocation32]  }
 0x10e   :  { %s9309_s5 = scalar_lea.vmem %s428_s1, 16  ;;  %s9313_s10 = scalar_lea.vmem %s428_s1, 32 }
 0x10f   :  { %p9310_p8 = scmp.ne.s32.totalorder %s428_s1, %s9309_s5  ;;  %p9314_p9 = scmp.lt.s32.totalorder %s428_s1, %s428_s1 }
 0x110   :  { %p9315_p10 = scmp.lt.s32.totalorder %s9313_s10, %s9309_s5 }
 0x112   :  { %p9316_p11 = por %p9315_p10, %p9314_p9 }
 0x114   :  { %p9317_p12 = pnand %p9316_p11, %p9310_p8 }
 0x116   :  { %9320 = shalt.err (!%p9317_p12)
}
 0x117   :  { %430 = dma.hbm_to_vmem [thread:$0]  %s10518_s13, 16, %s428_s1, [#allocation35]  }
 0x118   :  { %s10260_s25 = smov [#allocation37]   ;;  %s10261_s20 = smov [#allocation40]  }
 0x119   :  { %s451_s11 = sshll.u32 %s10260_s25, 4  ;;  %s473_s21 = sshll.u32 %s10261_s20, 4  ;;  %s452_s11 = int_to_ptr.vmem [resolvable:$true] %s451_s11  ;;  %s474_s21 = int_to_ptr.vmem [resolvable:$true] %s473_s21 }
 0x11a   :  { %s9329_s4 = scalar_lea.vmem %s452_s11, 16  ;;  %s9333_s0 = scalar_lea.vmem %s452_s11, 32 }
 0x11b   :  { %p9330_p13 = scmp.ne.s32.totalorder %s452_s11, %s9329_s4  ;;  %p9334_p0 = scmp.lt.s32.totalorder %s452_s11, %s452_s11 }
 0x11c   :  { %p9335_p1 = scmp.lt.s32.totalorder %s9333_s0, %s9329_s4 }
 0x11e   :  { %p9336_p2 = por %p9335_p1, %p9334_p0 }
 0x120   :  { %p9337_p3 = pnand %p9336_p2, %p9330_p13 }
 0x122   :  { %9340 = shalt.err (!%p9337_p3)
}
 0x123   :  { %454 = dma.hbm_to_vmem [thread:$0]  %s10538_s6, 16, %s452_s11, [#allocation38]  }
 0x124   :  { %s9349_s12 = scalar_lea.vmem %s474_s21, 16  ;;  %s9353_s15 = scalar_lea.vmem %s474_s21, 32 }
 0x125   :  { %p9350_p4 = scmp.ne.s32.totalorder %s474_s21, %s9349_s12  ;;  %p9354_p5 = scmp.lt.s32.totalorder %s474_s21, %s474_s21 }
 0x126   :  { %p9355_p6 = scmp.lt.s32.totalorder %s9353_s15, %s9349_s12 }
 0x128   :  { %p9356_p7 = por %p9355_p6, %p9354_p5 }
 0x12a   :  { %p9357_p8 = pnand %p9356_p7, %p9350_p4 }
 0x12c   :  { %9360 = shalt.err (!%p9357_p8)
}
 0x12d   :  { %476 = dma.hbm_to_vmem [thread:$0]  %s10548_s27, 16, %s474_s21, [#allocation41]  }
 0x12e   :  { %s10262_s13 = smov [#allocation43]   ;;  %s10263_s23 = smov [#allocation46]  }
 0x12f   :  { %s493_s16 = sshll.u32 %s10262_s13, 4  ;;  %s517_s28 = sshll.u32 %s10263_s23, 4  ;;  %s494_s16 = int_to_ptr.vmem [resolvable:$true] %s493_s16  ;;  %s518_s28 = int_to_ptr.vmem [resolvable:$true] %s517_s28 }
 0x130   :  { %s9369_s8 = scalar_lea.vmem %s494_s16, 16  ;;  %s9373_s14 = scalar_lea.vmem %s494_s16, 32 }
 0x131   :  { %p9370_p9 = scmp.ne.s32.totalorder %s494_s16, %s9369_s8  ;;  %p9374_p10 = scmp.lt.s32.totalorder %s494_s16, %s494_s16 }
 0x132   :  { %p9375_p11 = scmp.lt.s32.totalorder %s9373_s14, %s9369_s8 }
 0x134   :  { %p9376_p12 = por %p9375_p11, %p9374_p10 }
 0x136   :  { %p9377_p13 = pnand %p9376_p12, %p9370_p9 }
 0x138   :  { %9380 = shalt.err (!%p9377_p13)
}
 0x139   :  { %496 = dma.hbm_to_vmem [thread:$0]  %s10558_s19, 16, %s494_s16, [#allocation44]  }
 0x13a   :  { %s9389_s6 = scalar_lea.vmem %s518_s28, 16  ;;  %s9393_s17 = scalar_lea.vmem %s518_s28, 32 }
 0x13b   :  { %p9390_p0 = scmp.ne.s32.totalorder %s518_s28, %s9389_s6  ;;  %p9394_p1 = scmp.lt.s32.totalorder %s518_s28, %s518_s28 }
 0x13c   :  { %p9395_p2 = scmp.lt.s32.totalorder %s9393_s17, %s9389_s6 }
 0x13e   :  { %p9396_p3 = por %p9395_p2, %p9394_p1 }
 0x140   :  { %p9397_p4 = pnand %p9396_p3, %p9390_p0 }
 0x142   :  { %9400 = shalt.err (!%p9397_p4)
}
 0x143   :  { %s13104_s27 = sld [smem:[#allocation138_spill]]  ;;  %s10264_s26 = smov [#allocation49]  }
 0x144   :  { %s537_s24 = sshll.u32 %s10264_s26, 4  ;;  %s10265_s1 = smov [#allocation52]   ;;  %s538_s24 = int_to_ptr.vmem [resolvable:$true] %s537_s24 }
 0x145   :  { %s558_s2 = sshll.u32 %s10265_s1, 4  ;;  %s9409_s7 = scalar_lea.vmem %s538_s24, 16  ;;  %s559_s2 = int_to_ptr.vmem [resolvable:$true] %s558_s2 }
 0x146   :  { %p9410_p5 = scmp.ne.s32.totalorder %s538_s24, %s9409_s7  ;;  %s9413_s5 = scalar_lea.vmem %s538_s24, 32 }
 0x147   :  { %p9414_p6 = scmp.lt.s32.totalorder %s538_s24, %s538_s24  ;;  %p9415_p7 = scmp.lt.s32.totalorder %s9413_s5, %s9409_s7 }
 0x149   :  { %520 = dma.hbm_to_vmem [thread:$0]  %s13104_s27, 16, %s518_s28, [#allocation47]  }
 0x14a   :  { %p9416_p8 = por %p9415_p7, %p9414_p6 }
 0x14c   :  { %p9417_p9 = pnand %p9416_p8, %p9410_p5 }
 0x14e   :  { %9420 = shalt.err (!%p9417_p9)
}
 0x14f   :  { %s13105_s19 = sld [smem:[#allocation140_spill]]  ;;  %s9429_s10 = scalar_lea.vmem %s559_s2, 512 }
 0x150   :  { %p9430_p10 = scmp.ne.s32.totalorder %s559_s2, %s9429_s10  ;;  %p9434_p11 = scmp.lt.s32.totalorder %s559_s2, %s559_s2 }
 0x151   :  { %p9435_p12 = scmp.lt.s32.totalorder %s9429_s10, %s9429_s10 }
 0x153   :  { %p9436_p13 = por %p9435_p12, %p9434_p11 }
 0x155   :  { %540 = dma.hbm_to_vmem [thread:$0]  %s13105_s19, 16, %s538_s24, [#allocation50]  }
 0x156   :  { %p9437_p0 = pnand %p9436_p13, %p9430_p10 }
 0x158   :  { %9440 = shalt.err (!%p9437_p0)
}
 0x159   :  { %s13106_s25 = sld [smem:[#allocation143_spill]]  ;;  %s10266_s11 = smov [#allocation55]  }
 0x15a   :  { %s581_s20 = sshll.u32 %s10266_s11, 4  ;;  %s10267_s21 = smov [#allocation58]   ;;  %s582_s20 = int_to_ptr.vmem [resolvable:$true] %s581_s20 }
 0x15b   :  { %s600_s4 = sshll.u32 %s10267_s21, 4  ;;  %s9449_s0 = scalar_lea.vmem %s582_s20, 16  ;;  %s601_s4 = int_to_ptr.vmem [resolvable:$true] %s600_s4 }
 0x15c   :  { %p9450_p1 = scmp.ne.s32.totalorder %s582_s20, %s9449_s0  ;;  %s9453_s12 = scalar_lea.vmem %s582_s20, 32 }
 0x15d   :  { %p9454_p2 = scmp.lt.s32.totalorder %s582_s20, %s582_s20  ;;  %p9455_p3 = scmp.lt.s32.totalorder %s9453_s12, %s9449_s0 }
 0x15f   :  { %564 = dma.hbm_to_vmem [thread:$0]  %s13106_s25, 512, %s559_s2, [#allocation53], %s10248_s18, %s10248_s18, %s10249_s22  }
 0x160   :  { %p9456_p4 = por %p9455_p3, %p9454_p2 }
 0x162   :  { %p9457_p5 = pnand %p9456_p4, %p9450_p1 }
 0x164   :  { %9460 = shalt.err (!%p9457_p5)
}
 0x165   :  { %s13107_s15 = sld [smem:[#allocation145_spill]]  ;;  %s9469_s13 = scalar_lea.vmem %s601_s4, 512 }
 0x166   :  { %p9470_p6 = scmp.ne.s32.totalorder %s601_s4, %s9469_s13  ;;  %p9474_p7 = scmp.lt.s32.totalorder %s601_s4, %s601_s4 }
 0x167   :  { %p9475_p8 = scmp.lt.s32.totalorder %s9469_s13, %s9469_s13 }
 0x169   :  { %p9476_p9 = por %p9475_p8, %p9474_p7 }
 0x16b   :  { %584 = dma.hbm_to_vmem [thread:$0]  %s13107_s15, 16, %s582_s20, [#allocation56]  }
 0x16c   :  { %p9477_p10 = pnand %p9476_p9, %p9470_p6 }
 0x16e   :  { %9480 = shalt.err (!%p9477_p10)
}
 0x16f   :  { %s13108_s16 = sld [smem:[#allocation147_spill]]  ;;  %s10268_s23 = smov [#allocation61]  }
 0x170   :  { %s622_s28 = sshll.u32 %s10268_s23, 4  ;;  %s10269_s8 = smov [#allocation64]   ;;  %s623_s28 = int_to_ptr.vmem [resolvable:$true] %s622_s28 }
 0x171   :  { %s644_s14 = sshll.u32 %s10269_s8, 4  ;;  %s9489_s6 = scalar_lea.vmem %s623_s28, 512  ;;  %s645_s14 = int_to_ptr.vmem [resolvable:$true] %s644_s14 }
 0x172   :  { %p9490_p11 = scmp.ne.s32.totalorder %s623_s28, %s9489_s6  ;;  %p9494_p12 = scmp.lt.s32.totalorder %s623_s28, %s623_s28 }
 0x173   :  { %p9495_p13 = scmp.lt.s32.totalorder %s9489_s6, %s9489_s6 }
 0x175   :  { %606 = dma.hbm_to_vmem [thread:$0]  %s13108_s16, 512, %s601_s4, [#allocation59], %s10248_s18, %s10248_s18, %s10249_s22  }
 0x176   :  { %p9496_p0 = por %p9495_p13, %p9494_p12 }
 0x178   :  { %p9497_p1 = pnand %p9496_p0, %p9490_p11 }
 0x17a   :  { %9500 = shalt.err (!%p9497_p1)
}
 0x17b   :  { %s13109_s17 = sld [smem:[#allocation149_spill]]  ;;  %s9509_s27 = scalar_lea.vmem %s645_s14, 512 }
 0x17c   :  { %p9510_p2 = scmp.ne.s32.totalorder %s645_s14, %s9509_s27  ;;  %p9514_p3 = scmp.lt.s32.totalorder %s645_s14, %s645_s14 }
 0x17d   :  { %p9515_p4 = scmp.lt.s32.totalorder %s9509_s27, %s9509_s27 }
 0x17f   :  { %p9516_p5 = por %p9515_p4, %p9514_p3 }
 0x181   :  { %628 = dma.hbm_to_vmem [thread:$0]  %s13109_s17, 512, %s623_s28, [#allocation62], %s10248_s18, %s10248_s18, %s10249_s22  }
 0x182   :  { %p9517_p6 = pnand %p9516_p5, %p9510_p2 }
 0x184   :  { %9520 = shalt.err (!%p9517_p6)
}
 0x185   :  { %s13110_s26 = sld [smem:[#allocation151_spill]]  ;;  %s10270_s24 = smov [#allocation67]  }
 0x186   :  { %s667_s1 = sshll.u32 %s10270_s24, 4  ;;  %s10271_s2 = smov [#allocation70]   ;;  %s668_s1 = int_to_ptr.vmem [resolvable:$true] %s667_s1 }
 0x187   :  { %s686_s7 = sshll.u32 %s10271_s2, 4  ;;  %s9529_s5 = scalar_lea.vmem %s668_s1, 16  ;;  %s687_s7 = int_to_ptr.vmem [resolvable:$true] %s686_s7 }
 0x188   :  { %p9530_p7 = scmp.ne.s32.totalorder %s668_s1, %s9529_s5  ;;  %s9533_s19 = scalar_lea.vmem %s668_s1, 32 }
 0x189   :  { %p9534_p8 = scmp.lt.s32.totalorder %s668_s1, %s668_s1  ;;  %p9535_p9 = scmp.lt.s32.totalorder %s9533_s19, %s9529_s5 }
 0x18b   :  { %650 = dma.hbm_to_vmem [thread:$0]  %s13110_s26, 512, %s645_s14, [#allocation65], %s10248_s18, %s10248_s18, %s10249_s22  }
 0x18c   :  { %p9536_p10 = por %p9535_p9, %p9534_p8 }
 0x18e   :  { %p9537_p11 = pnand %p9536_p10, %p9530_p7 }
 0x190   :  { %9540 = shalt.err (!%p9537_p11)
}
 0x191   :  { %s13111_s10 = sld [smem:[#allocation153_spill]]  ;;  %s9549_s25 = scalar_lea.vmem %s687_s7, 512 }
 0x192   :  { %p9550_p12 = scmp.ne.s32.totalorder %s687_s7, %s9549_s25  ;;  %p9554_p13 = scmp.lt.s32.totalorder %s687_s7, %s687_s7 }
 0x193   :  { %p9555_p0 = scmp.lt.s32.totalorder %s9549_s25, %s9549_s25 }
 0x195   :  { %p9556_p1 = por %p9555_p0, %p9554_p13 }
 0x197   :  { %670 = dma.hbm_to_vmem [thread:$0]  %s13111_s10, 16, %s668_s1, [#allocation68]  }
 0x198   :  { %p9557_p2 = pnand %p9556_p1, %p9550_p12 }
 0x19a   :  { %9560 = shalt.err (!%p9557_p2)
}
 0x19b   :  { %s13112_s11 = sld [smem:[#allocation155_spill]]  ;;  %s10272_s20 = smov [#allocation73]  }
 0x19c   :  { %s711_s21 = sshll.u32 %s10272_s20, 4  ;;  %s10273_s4 = smov [#allocation76]   ;;  %s712_s21 = int_to_ptr.vmem [resolvable:$true] %s711_s21 }
 0x19d   :  { %s731_s0 = sshll.u32 %s10273_s4, 4  ;;  %s9569_s12 = scalar_lea.vmem %s712_s21, 16  ;;  %s732_s0 = int_to_ptr.vmem [resolvable:$true] %s731_s0 }
 0x19e   :  { %p9570_p3 = scmp.ne.s32.totalorder %s712_s21, %s9569_s12  ;;  %s9573_s15 = scalar_lea.vmem %s712_s21, 32 }
 0x19f   :  { %p9574_p4 = scmp.lt.s32.totalorder %s712_s21, %s712_s21  ;;  %p9575_p5 = scmp.lt.s32.totalorder %s9573_s15, %s9569_s12 }
 0x1a1   :  { %692 = dma.hbm_to_vmem [thread:$0]  %s13112_s11, 512, %s687_s7, [#allocation71], %s10248_s18, %s10248_s18, %s10249_s22  }
 0x1a2   :  { %p9576_p6 = por %p9575_p5, %p9574_p4 }
 0x1a4   :  { %p9577_p7 = pnand %p9576_p6, %p9570_p3 }
 0x1a6   :  { %9580 = shalt.err (!%p9577_p7)
}
 0x1a7   :  { %s13113_s13 = sld [smem:[#allocation158_spill]]  ;;  %s9589_s16 = scalar_lea.vmem %s732_s0, 16 }
 0x1a8   :  { %p9590_p8 = scmp.ne.s32.totalorder %s732_s0, %s9589_s16  ;;  %s9593_s23 = scalar_lea.vmem %s732_s0, 32 }
 0x1a9   :  { %p9594_p9 = scmp.lt.s32.totalorder %s732_s0, %s732_s0  ;;  %p9595_p10 = scmp.lt.s32.totalorder %s9593_s23, %s9589_s16 }
 0x1ab   :  { %p9596_p11 = por %p9595_p10, %p9594_p9 }
 0x1ad   :  { %714 = dma.hbm_to_vmem [thread:$0]  %s13113_s13, 16, %s712_s21, [#allocation74]  }
 0x1ae   :  { %p9597_p12 = pnand %p9596_p11, %p9590_p8 }
 0x1b0   :  { %9600 = shalt.err (!%p9597_p12)
}
 0x1b1   :  { %s13114_s28 = sld [smem:[#allocation160_spill]]  ;;  %s10274_s8 = smov [#allocation2]  }
 0x1b2   :  { %s189_s14 = sshll.u32 %s10274_s8, 4  ;;  %s10275_s6 = smov [#allocation6]   ;;  %s190_s14 = int_to_ptr.vmem [resolvable:$true] %s189_s14 }
 0x1b3   :  { %s219_s17 = sshll.u32 %s10275_s6, 4  ;;  %s9609_s27 = scalar_lea.vmem %s190_s14, 128  ;;  %s220_s17 = int_to_ptr.vmem [resolvable:$true] %s219_s17 }
 0x1b4   :  { %p9610_p13 = scmp.ne.s32.totalorder %s190_s14, %s9609_s27  ;;  %p9614_p0 = scmp.lt.s32.totalorder %s190_s14, %s190_s14 }
 0x1b5   :  { %p9615_p1 = scmp.lt.s32.totalorder %s9609_s27, %s9609_s27 }
 0x1b7   :  { %734 = dma.hbm_to_vmem [thread:$0]  %s13114_s28, 16, %s732_s0, [#allocation77]  }
 0x1b8   :  { %p9616_p2 = por %p9615_p1, %p9614_p0 }
 0x1ba   :  { %p9617_p3 = pnand %p9616_p2, %p9610_p13 }
 0x1bc   :  { %9620 = shalt.err (!%p9617_p3)
}
 0x1bd   :  { %s13115_s26 = sld [smem:[#allocation106_spill]]  ;;  %s9629_s24 = scalar_lea.vmem %s220_s17, 16 }
 0x1be   :  { %p9630_p4 = scmp.ne.s32.totalorder %s220_s17, %s9629_s24  ;;  %s9633_s1 = scalar_lea.vmem %s220_s17, 32 }
 0x1bf   :  { %p9634_p5 = scmp.lt.s32.totalorder %s220_s17, %s220_s17  ;;  %p9635_p6 = scmp.lt.s32.totalorder %s9633_s1, %s9629_s24 }
 0x1c1   :  { %p9636_p7 = por %p9635_p6, %p9634_p5 }
 0x1c3   :  { %192 = dma.hbm_to_vmem [thread:$0]  %s13115_s26, 128, %s190_s14, [#allocation3]  }
 0x1c4   :  { %p9637_p8 = pnand %p9636_p7, %p9630_p4 }
 0x1c6   :  { %9640 = shalt.err (!%p9637_p8)
}
 0x1c7   :  { %s13116_s2 = sld [smem:[#allocation111_spill]]  ;;  %s10276_s7 = smov [#allocation9]  }
 0x1c8   :  { %s241_s5 = sshll.u32 %s10276_s7, 4  ;;  %s10277_s19 = smov [#allocation12]   ;;  %s242_s5 = int_to_ptr.vmem [resolvable:$true] %s241_s5 }
 0x1c9   :  { %s263_s10 = sshll.u32 %s10277_s19, 4  ;;  %s9649_s25 = scalar_lea.vmem %s242_s5, 16  ;;  %s264_s10 = int_to_ptr.vmem [resolvable:$true] %s263_s10 }
 0x1ca   :  { %p9650_p9 = scmp.ne.s32.totalorder %s242_s5, %s9649_s25  ;;  %s9653_s11 = scalar_lea.vmem %s242_s5, 32 }
 0x1cb   :  { %p9654_p10 = scmp.lt.s32.totalorder %s242_s5, %s242_s5  ;;  %p9655_p11 = scmp.lt.s32.totalorder %s9653_s11, %s9649_s25 }
 0x1cd   :  { %222 = dma.hbm_to_vmem [thread:$0]  %s13116_s2, 16, %s220_s17, [#allocation5]  }
 0x1ce   :  { %p9656_p12 = por %p9655_p11, %p9654_p10 }
 0x1d0   :  { %p9657_p13 = pnand %p9656_p12, %p9650_p9 }
 0x1d2   :  { %9660 = shalt.err (!%p9657_p13)
}
 0x1d3   :  { %s13117_s20 = sld [smem:[#allocation113_spill]]  ;;  %s9669_s21 = scalar_lea.vmem %s264_s10, 16 }
 0x1d4   :  { %p9670_p0 = scmp.ne.s32.totalorder %s264_s10, %s9669_s21  ;;  %s9673_s4 = scalar_lea.vmem %s264_s10, 32 }
 0x1d5   :  { %p9674_p1 = scmp.lt.s32.totalorder %s264_s10, %s264_s10  ;;  %p9675_p2 = scmp.lt.s32.totalorder %s9673_s4, %s9669_s21 }
 0x1d7   :  { %p9676_p3 = por %p9675_p2, %p9674_p1 }
 0x1d9   :  { %244 = dma.hbm_to_vmem [thread:$0]  %s13117_s20, 16, %s242_s5, [#allocation8]  }
 0x1da   :  { %p9677_p4 = pnand %p9676_p3, %p9670_p0 }
 0x1dc   :  { %9680 = shalt.err (!%p9677_p4)
}
 0x1dd   :  { %s13118_s0 = sld [smem:[#allocation115_spill]]  ;;  %s10278_s12 = smov [#allocation15]  }
 0x1de   :  { %s285_s15 = sshll.u32 %s10278_s12, 4  ;;  %s10279_s13 = smov [#allocation18]   ;;  %s286_s15 = int_to_ptr.vmem [resolvable:$true] %s285_s15 }
 0x1df   :  { %s307_s16 = sshll.u32 %s10279_s13, 4  ;;  %s9689_s23 = scalar_lea.vmem %s286_s15, 16  ;;  %s308_s16 = int_to_ptr.vmem [resolvable:$true] %s307_s16 }
 0x1e0   :  { %p9690_p5 = scmp.ne.s32.totalorder %s286_s15, %s9689_s23  ;;  %s9693_s28 = scalar_lea.vmem %s286_s15, 32 }
 0x1e1   :  { %p9694_p6 = scmp.lt.s32.totalorder %s286_s15, %s286_s15  ;;  %p9695_p7 = scmp.lt.s32.totalorder %s9693_s28, %s9689_s23 }
 0x1e3   :  { %266 = dma.hbm_to_vmem [thread:$0]  %s13118_s0, 16, %s264_s10, [#allocation11]  }
 0x1e4   :  { %p9696_p8 = por %p9695_p7, %p9694_p6 }
 0x1e6   :  { %p9697_p9 = pnand %p9696_p8, %p9690_p5 }
 0x1e8   :  { %9700 = shalt.err (!%p9697_p9)
}
 0x1e9   :  { %s13119_s8 = sld [smem:[#allocation117_spill]]  ;;  %s9709_s14 = scalar_lea.vmem %s308_s16, 16 }
 0x1ea   :  { %p9710_p10 = scmp.ne.s32.totalorder %s308_s16, %s9709_s14  ;;  %s9713_s6 = scalar_lea.vmem %s308_s16, 32 }
 0x1eb   :  { %p9714_p11 = scmp.lt.s32.totalorder %s308_s16, %s308_s16  ;;  %p9715_p12 = scmp.lt.s32.totalorder %s9713_s6, %s9709_s14 }
 0x1ed   :  { %p9716_p13 = por %p9715_p12, %p9714_p11 }
 0x1ef   :  { %288 = dma.hbm_to_vmem [thread:$0]  %s13119_s8, 16, %s286_s15, [#allocation14]  }
 0x1f0   :  { %p9717_p0 = pnand %p9716_p13, %p9710_p10 }
 0x1f2   :  { %9720 = shalt.err (!%p9717_p0)
}
 0x1f3   :  { %s13120_s17 = sld [smem:[#allocation119_spill]]  ;;  %s10280_s27 = smov [#allocation21]  }
 0x1f4   :  { %s329_s26 = sshll.u32 %s10280_s27, 4  ;;  %s10281_s24 = smov [#allocation24]   ;;  %s330_s26 = int_to_ptr.vmem [resolvable:$true] %s329_s26 }
 0x1f5   :  { %s351_s1 = sshll.u32 %s10281_s24, 4  ;;  %s9729_s2 = scalar_lea.vmem %s330_s26, 16  ;;  %s352_s1 = int_to_ptr.vmem [resolvable:$true] %s351_s1 }
 0x1f6   :  { %p9730_p1 = scmp.ne.s32.totalorder %s330_s26, %s9729_s2  ;;  %s9733_s7 = scalar_lea.vmem %s330_s26, 32 }
 0x1f7   :  { %p9734_p2 = scmp.lt.s32.totalorder %s330_s26, %s330_s26  ;;  %p9735_p3 = scmp.lt.s32.totalorder %s9733_s7, %s9729_s2 }
 0x1f9   :  { %310 = dma.hbm_to_vmem [thread:$0]  %s13120_s17, 16, %s308_s16, [#allocation17]  }
 0x1fa   :  { %p9736_p4 = por %p9735_p3, %p9734_p2 }
 0x1fc   :  { %p9737_p5 = pnand %p9736_p4, %p9730_p1 }
 0x1fe   :  { %9740 = shalt.err (!%p9737_p5)
}
 0x1ff   :  { %s13121_s5 = sld [smem:[#allocation121_spill]]  ;;  %s9749_s19 = scalar_lea.vmem %s352_s1, 16 }
 0x200   :  { %p9750_p6 = scmp.ne.s32.totalorder %s352_s1, %s9749_s19  ;;  %s9753_s10 = scalar_lea.vmem %s352_s1, 32 }
 0x201   :  { %p9754_p7 = scmp.lt.s32.totalorder %s352_s1, %s352_s1  ;;  %p9755_p8 = scmp.lt.s32.totalorder %s9753_s10, %s9749_s19 }
 0x203   :  { %p9756_p9 = por %p9755_p8, %p9754_p7 }
 0x205   :  { %332 = dma.hbm_to_vmem [thread:$0]  %s13121_s5, 16, %s330_s26, [#allocation20]  }
 0x206   :  { %p9757_p10 = pnand %p9756_p9, %p9750_p6 }
 0x208   :  { %9760 = shalt.err (!%p9757_p10)
}
 0x209   :  { %s13122_s25 = sld [smem:[#allocation123_spill]]  ;;  %s10282_s11 = smov [#allocation27]  }
 0x20a   :  { %s373_s20 = sshll.u32 %s10282_s11, 4  ;;  %s10283_s21 = smov [#allocation30]   ;;  %s374_s20 = int_to_ptr.vmem [resolvable:$true] %s373_s20 }
 0x20b   :  { %s395_s4 = sshll.u32 %s10283_s21, 4  ;;  %s9769_s0 = scalar_lea.vmem %s374_s20, 16  ;;  %s396_s4 = int_to_ptr.vmem [resolvable:$true] %s395_s4 }
 0x20c   :  { %p9770_p11 = scmp.ne.s32.totalorder %s374_s20, %s9769_s0  ;;  %s9773_s12 = scalar_lea.vmem %s374_s20, 32 }
 0x20d   :  { %p9774_p12 = scmp.lt.s32.totalorder %s374_s20, %s374_s20  ;;  %p9775_p13 = scmp.lt.s32.totalorder %s9773_s12, %s9769_s0 }
 0x20f   :  { %354 = dma.hbm_to_vmem [thread:$0]  %s13122_s25, 16, %s352_s1, [#allocation23]  }
 0x210   :  { %p9776_p0 = por %p9775_p13, %p9774_p12 }
 0x212   :  { %p9777_p1 = pnand %p9776_p0, %p9770_p11 }
 0x214   :  { %9780 = shalt.err (!%p9777_p1)
}
 0x215   :  { %s13123_s15 = sld [smem:[#allocation125_spill]]  ;;  %s9789_s13 = scalar_lea.vmem %s396_s4, 16 }
 0x216   :  { %p9790_p2 = scmp.ne.s32.totalorder %s396_s4, %s9789_s13  ;;  %s9793_s16 = scalar_lea.vmem %s396_s4, 32 }
 0x217   :  { %p9794_p3 = scmp.lt.s32.totalorder %s396_s4, %s396_s4  ;;  %p9795_p4 = scmp.lt.s32.totalorder %s9793_s16, %s9789_s13 }
 0x219   :  { %p9796_p5 = por %p9795_p4, %p9794_p3 }
 0x21b   :  { %376 = dma.hbm_to_vmem [thread:$0]  %s13123_s15, 16, %s374_s20, [#allocation26]  }
 0x21c   :  { %p9797_p6 = pnand %p9796_p5, %p9790_p2 }
 0x21e   :  { %9800 = shalt.err (!%p9797_p6)
}
 0x21f   :  { %s13124_s23 = sld [smem:[#allocation127_spill]]  ;;  %s10284_s28 = smov [#allocation33]  }
 0x220   :  { %s417_s8 = sshll.u32 %s10284_s28, 4  ;;  %s10285_s14 = smov [#allocation36]   ;;  %s418_s8 = int_to_ptr.vmem [resolvable:$true] %s417_s8 }
 0x221   :  { %s439_s6 = sshll.u32 %s10285_s14, 4  ;;  %s9809_s17 = scalar_lea.vmem %s418_s8, 16  ;;  %s440_s6 = int_to_ptr.vmem [resolvable:$true] %s439_s6 }
 0x222   :  { %p9810_p7 = scmp.ne.s32.totalorder %s418_s8, %s9809_s17  ;;  %s9813_s27 = scalar_lea.vmem %s418_s8, 32 }
 0x223   :  { %p9814_p8 = scmp.lt.s32.totalorder %s418_s8, %s418_s8  ;;  %p9815_p9 = scmp.lt.s32.totalorder %s9813_s27, %s9809_s17 }
 0x225   :  { %398 = dma.hbm_to_vmem [thread:$0]  %s13124_s23, 16, %s396_s4, [#allocation29]  }
 0x226   :  { %p9816_p10 = por %p9815_p9, %p9814_p8 }
 0x228   :  { %p9817_p11 = pnand %p9816_p10, %p9810_p7 }
 0x22a   :  { %9820 = shalt.err (!%p9817_p11)
}
 0x22b   :  { %s13125_s26 = sld [smem:[#allocation129_spill]]  ;;  %s9829_s24 = scalar_lea.vmem %s440_s6, 16 }
 0x22c   :  { %p9830_p12 = scmp.ne.s32.totalorder %s440_s6, %s9829_s24  ;;  %s9833_s1 = scalar_lea.vmem %s440_s6, 32 }
 0x22d   :  { %p9834_p13 = scmp.lt.s32.totalorder %s440_s6, %s440_s6  ;;  %p9835_p0 = scmp.lt.s32.totalorder %s9833_s1, %s9829_s24 }
 0x22f   :  { %p9836_p1 = por %p9835_p0, %p9834_p13 }
 0x231   :  { %420 = dma.hbm_to_vmem [thread:$0]  %s13125_s26, 16, %s418_s8, [#allocation32]  }
 0x232   :  { %p9837_p2 = pnand %p9836_p1, %p9830_p12 }
 0x234   :  { %9840 = shalt.err (!%p9837_p2)
}
 0x235   :  { %s13126_s2 = sld [smem:[#allocation131_spill]]  ;;  %s10286_s7 = smov [#allocation39]  }
 0x236   :  { %s460_s5 = sshll.u32 %s10286_s7, 4  ;;  %s10287_s19 = smov [#allocation42]   ;;  %s461_s5 = int_to_ptr.vmem [resolvable:$true] %s460_s5 }
 0x237   :  { %s483_s10 = sshll.u32 %s10287_s19, 4  ;;  %s9849_s25 = scalar_lea.vmem %s461_s5, 512  ;;  %s484_s10 = int_to_ptr.vmem [resolvable:$true] %s483_s10 }
 0x238   :  { %p9850_p3 = scmp.ne.s32.totalorder %s461_s5, %s9849_s25  ;;  %p9854_p4 = scmp.lt.s32.totalorder %s461_s5, %s461_s5 }
 0x239   :  { %p9855_p5 = scmp.lt.s32.totalorder %s9849_s25, %s9849_s25 }
 0x23b   :  { %442 = dma.hbm_to_vmem [thread:$0]  %s13126_s2, 16, %s440_s6, [#allocation35]  }
 0x23c   :  { %p9856_p6 = por %p9855_p5, %p9854_p4 }
 0x23e   :  { %p9857_p7 = pnand %p9856_p6, %p9850_p3 }
 0x240   :  { %9860 = shalt.err (!%p9857_p7)
}
 0x241   :  { %s13127_s11 = sld [smem:[#allocation133_spill]]  ;;  %s9869_s20 = scalar_lea.vmem %s484_s10, 16 }
 0x242   :  { %p9870_p8 = scmp.ne.s32.totalorder %s484_s10, %s9869_s20  ;;  %s9873_s21 = scalar_lea.vmem %s484_s10, 32 }
 0x243   :  { %p9874_p9 = scmp.lt.s32.totalorder %s484_s10, %s484_s10  ;;  %p9875_p10 = scmp.lt.s32.totalorder %s9873_s21, %s9869_s20 }
 0x245   :  { %p9876_p11 = por %p9875_p10, %p9874_p9 }
 0x247   :  { %466 = dma.hbm_to_vmem [thread:$0]  %s13127_s11, 512, %s461_s5, [#allocation38], %s10248_s18, %s10248_s18, %s10249_s22  }
 0x248   :  { %p9877_p12 = pnand %p9876_p11, %p9870_p8 }
 0x24a   :  { %9880 = shalt.err (!%p9877_p12)
}
 0x24b   :  { %s13128_s4 = sld [smem:[#allocation134_spill]]  ;;  %s10288_s0 = smov [#allocation45]  }
 0x24c   :  { %s505_s12 = sshll.u32 %s10288_s0, 4  ;;  %s10289_s15 = smov [#allocation48]   ;;  %s506_s12 = int_to_ptr.vmem [resolvable:$true] %s505_s12 }
 0x24d   :  { %s527_s13 = sshll.u32 %s10289_s15, 4  ;;  %s9889_s16 = scalar_lea.vmem %s506_s12, 16  ;;  %s528_s13 = int_to_ptr.vmem [resolvable:$true] %s527_s13 }
 0x24e   :  { %p9890_p13 = scmp.ne.s32.totalorder %s506_s12, %s9889_s16  ;;  %s9893_s23 = scalar_lea.vmem %s506_s12, 32 }
 0x24f   :  { %p9894_p0 = scmp.lt.s32.totalorder %s506_s12, %s506_s12  ;;  %p9895_p1 = scmp.lt.s32.totalorder %s9893_s23, %s9889_s16 }
 0x251   :  { %486 = dma.hbm_to_vmem [thread:$0]  %s13128_s4, 16, %s484_s10, [#allocation41]  }
 0x252   :  { %p9896_p2 = por %p9895_p1, %p9894_p0 }
 0x254   :  { %p9897_p3 = pnand %p9896_p2, %p9890_p13 }
 0x256   :  { %9900 = shalt.err (!%p9897_p3)
}
 0x257   :  { %s13129_s18 = sld [smem:[#allocation136_spill]]  ;;  %s9909_s28 = scalar_lea.vmem %s528_s13, 16 }
 0x258   :  { %p9910_p4 = scmp.ne.s32.totalorder %s528_s13, %s9909_s28  ;;  %s9913_s8 = scalar_lea.vmem %s528_s13, 32 }
 0x259   :  { %p9914_p5 = scmp.lt.s32.totalorder %s528_s13, %s528_s13  ;;  %p9915_p6 = scmp.lt.s32.totalorder %s9913_s8, %s9909_s28 }
 0x25b   :  { %p9916_p7 = por %p9915_p6, %p9914_p5 }
 0x25d   :  { %508 = dma.hbm_to_vmem [thread:$0]  %s13129_s18, 16, %s506_s12, [#allocation44]  }
 0x25e   :  { %p9917_p8 = pnand %p9916_p7, %p9910_p4 }
 0x260   :  { %9920 = shalt.err (!%p9917_p8)
}
 0x261   :  { %s13130_s14 = sld [smem:[#allocation139_spill]]  ;;  %s10290_s6 = smov [#allocation51]  }
 0x262   :  { %s549_s17 = sshll.u32 %s10290_s6, 4  ;;  %s10291_s27 = smov [#allocation54]   ;;  %s550_s17 = int_to_ptr.vmem [resolvable:$true] %s549_s17 }
 0x263   :  { %s571_s26 = sshll.u32 %s10291_s27, 4  ;;  %s9929_s24 = scalar_lea.vmem %s550_s17, 16  ;;  %s572_s26 = int_to_ptr.vmem [resolvable:$true] %s571_s26 }
 0x264   :  { %p9930_p9 = scmp.ne.s32.totalorder %s550_s17, %s9929_s24  ;;  %s9933_s1 = scalar_lea.vmem %s550_s17, 32 }
 0x265   :  { %p9934_p10 = scmp.lt.s32.totalorder %s550_s17, %s550_s17  ;;  %p9935_p11 = scmp.lt.s32.totalorder %s9933_s1, %s9929_s24 }
 0x267   :  { %530 = dma.hbm_to_vmem [thread:$0]  %s13130_s14, 16, %s528_s13, [#allocation47]  }
 0x268   :  { %p9936_p12 = por %p9935_p11, %p9934_p10 }
 0x26a   :  { %p9937_p13 = pnand %p9936_p12, %p9930_p9 }
 0x26c   :  { %9940 = shalt.err (!%p9937_p13)
}
 0x26d   :  { %s13131_s2 = sld [smem:[#allocation142_spill]]  ;;  %s9949_s7 = scalar_lea.vmem %s572_s26, 16 }
 0x26e   :  { %p9950_p0 = scmp.ne.s32.totalorder %s572_s26, %s9949_s7  ;;  %s9953_s5 = scalar_lea.vmem %s572_s26, 32 }
 0x26f   :  { %p9954_p1 = scmp.lt.s32.totalorder %s572_s26, %s572_s26  ;;  %p9955_p2 = scmp.lt.s32.totalorder %s9953_s5, %s9949_s7 }
 0x271   :  { %p9956_p3 = por %p9955_p2, %p9954_p1 }
 0x273   :  { %552 = dma.hbm_to_vmem [thread:$0]  %s13131_s2, 16, %s550_s17, [#allocation50]  }
 0x274   :  { %p9957_p4 = pnand %p9956_p3, %p9950_p0 }
 0x276   :  { %9960 = shalt.err (!%p9957_p4)
}
 0x277   :  { %s13132_s19 = sld [smem:[#allocation144_spill]]  ;;  %s10292_s10 = smov [#allocation57]  }
 0x278   :  { %s591_s25 = sshll.u32 %s10292_s10, 4  ;;  %s10293_s11 = smov [#allocation60]   ;;  %s592_s25 = int_to_ptr.vmem [resolvable:$true] %s591_s25 }
 0x279   :  { %s613_s20 = sshll.u32 %s10293_s11, 4  ;;  %s9969_s21 = scalar_lea.vmem %s592_s25, 16  ;;  %s614_s20 = int_to_ptr.vmem [resolvable:$true] %s613_s20 }
 0x27a   :  { %p9970_p5 = scmp.ne.s32.totalorder %s592_s25, %s9969_s21  ;;  %s9973_s4 = scalar_lea.vmem %s592_s25, 32 }
 0x27b   :  { %p9974_p6 = scmp.lt.s32.totalorder %s592_s25, %s592_s25  ;;  %p9975_p7 = scmp.lt.s32.totalorder %s9973_s4, %s9969_s21 }
 0x27d   :  { %574 = dma.hbm_to_vmem [thread:$0]  %s13132_s19, 16, %s572_s26, [#allocation53]  }
 0x27e   :  { %p9976_p8 = por %p9975_p7, %p9974_p6 }
 0x280   :  { %p9977_p9 = pnand %p9976_p8, %p9970_p5 }
 0x282   :  { %9980 = shalt.err (!%p9977_p9)
}
 0x283   :  { %s13133_s0 = sld [smem:[#allocation146_spill]]  ;;  %s9989_s12 = scalar_lea.vmem %s614_s20, 16 }
 0x284   :  { %p9990_p10 = scmp.ne.s32.totalorder %s614_s20, %s9989_s12  ;;  %s9993_s15 = scalar_lea.vmem %s614_s20, 32 }
 0x285   :  { %p9994_p11 = scmp.lt.s32.totalorder %s614_s20, %s614_s20  ;;  %p9995_p12 = scmp.lt.s32.totalorder %s9993_s15, %s9989_s12 }
 0x287   :  { %p9996_p13 = por %p9995_p12, %p9994_p11 }
 0x289   :  { %594 = dma.hbm_to_vmem [thread:$0]  %s13133_s0, 16, %s592_s25, [#allocation56]  }
 0x28a   :  { %p9997_p0 = pnand %p9996_p13, %p9990_p10 }
 0x28c   :  { %10000 = shalt.err (!%p9997_p0)
}
 0x28d   :  { %s13134_s13 = sld [smem:[#allocation148_spill]]  ;;  %s10294_s16 = smov [#allocation63]  }
 0x28e   :  { %s635_s23 = sshll.u32 %s10294_s16, 4  ;;  %s10295_s18 = smov [#allocation66]   ;;  %s636_s23 = int_to_ptr.vmem [resolvable:$true] %s635_s23 }
 0x28f   :  { %s657_s28 = sshll.u32 %s10295_s18, 4  ;;  %s10009_s8 = scalar_lea.vmem %s636_s23, 16  ;;  %s658_s28 = int_to_ptr.vmem [resolvable:$true] %s657_s28 }
 0x290   :  { %p10010_p1 = scmp.ne.s32.totalorder %s636_s23, %s10009_s8  ;;  %s10013_s14 = scalar_lea.vmem %s636_s23, 32 }
 0x291   :  { %p10014_p2 = scmp.lt.s32.totalorder %s636_s23, %s636_s23  ;;  %p10015_p3 = scmp.lt.s32.totalorder %s10013_s14, %s10009_s8 }
 0x293   :  { %616 = dma.hbm_to_vmem [thread:$0]  %s13134_s13, 16, %s614_s20, [#allocation59]  }
 0x294   :  { %p10016_p4 = por %p10015_p3, %p10014_p2 }
 0x296   :  { %p10017_p5 = pnand %p10016_p4, %p10010_p1 }
 0x298   :  { %10020 = shalt.err (!%p10017_p5)
}
 0x299   :  { %s13135_s6 = sld [smem:[#allocation150_spill]]  ;;  %s10029_s17 = scalar_lea.vmem %s658_s28, 16 }
 0x29a   :  { %p10030_p6 = scmp.ne.s32.totalorder %s658_s28, %s10029_s17  ;;  %s10033_s27 = scalar_lea.vmem %s658_s28, 32 }
 0x29b   :  { %p10034_p7 = scmp.lt.s32.totalorder %s658_s28, %s658_s28  ;;  %p10035_p8 = scmp.lt.s32.totalorder %s10033_s27, %s10029_s17 }
 0x29d   :  { %p10036_p9 = por %p10035_p8, %p10034_p7 }
 0x29f   :  { %638 = dma.hbm_to_vmem [thread:$0]  %s13135_s6, 16, %s636_s23, [#allocation62]  }
 0x2a0   :  { %p10037_p10 = pnand %p10036_p9, %p10030_p6 }
 0x2a2   :  { %10040 = shalt.err (!%p10037_p10)
}
 0x2a3   :  { %s13136_s26 = sld [smem:[#allocation152_spill]]  ;;  %s10296_s24 = smov [#allocation69]  }
 0x2a4   :  { %s677_s1 = sshll.u32 %s10296_s24, 4  ;;  %s10297_s2 = smov [#allocation72]   ;;  %s678_s1 = int_to_ptr.vmem [resolvable:$true] %s677_s1 }
 0x2a5   :  { %s699_s7 = sshll.u32 %s10297_s2, 4  ;;  %s10049_s5 = scalar_lea.vmem %s678_s1, 16  ;;  %s700_s7 = int_to_ptr.vmem [resolvable:$true] %s699_s7 }
 0x2a6   :  { %p10050_p11 = scmp.ne.s32.totalorder %s678_s1, %s10049_s5  ;;  %s10053_s19 = scalar_lea.vmem %s678_s1, 32 }
 0x2a7   :  { %p10054_p12 = scmp.lt.s32.totalorder %s678_s1, %s678_s1  ;;  %p10055_p13 = scmp.lt.s32.totalorder %s10053_s19, %s10049_s5 }
 0x2a9   :  { %660 = dma.hbm_to_vmem [thread:$0]  %s13136_s26, 16, %s658_s28, [#allocation65]  }
 0x2aa   :  { %p10056_p0 = por %p10055_p13, %p10054_p12 }
 0x2ac   :  { %p10057_p1 = pnand %p10056_p0, %p10050_p11 }
 0x2ae   :  { %10060 = shalt.err (!%p10057_p1)
}
 0x2af   :  { %s13137_s10 = sld [smem:[#allocation154_spill]]  ;;  %s10069_s25 = scalar_lea.vmem %s700_s7, 16 }
 0x2b0   :  { %p10070_p2 = scmp.ne.s32.totalorder %s700_s7, %s10069_s25  ;;  %s10073_s11 = scalar_lea.vmem %s700_s7, 32 }
 0x2b1   :  { %p10074_p3 = scmp.lt.s32.totalorder %s700_s7, %s700_s7  ;;  %p10075_p4 = scmp.lt.s32.totalorder %s10073_s11, %s10069_s25 }
 0x2b3   :  { %p10076_p5 = por %p10075_p4, %p10074_p3 }
 0x2b5   :  { %680 = dma.hbm_to_vmem [thread:$0]  %s13137_s10, 16, %s678_s1, [#allocation68]  }
 0x2b6   :  { %p10077_p6 = pnand %p10076_p5, %p10070_p2 }
 0x2b8   :  { %10080 = shalt.err (!%p10077_p6)
}
 0x2b9   :  { %s13138_s20 = sld [smem:[#allocation156_spill]]  ;;  %s10298_s21 = smov [#allocation75]  }
 0x2ba   :  { %s721_s4 = sshll.u32 %s10298_s21, 4  ;;  %s10299_s0 = smov [#allocation78]   ;;  %s722_s4 = int_to_ptr.vmem [resolvable:$true] %s721_s4 }
 0x2bb   :  { %s743_s12 = sshll.u32 %s10299_s0, 4  ;;  %s10089_s15 = scalar_lea.vmem %s722_s4, 16  ;;  %s744_s12 = int_to_ptr.vmem [resolvable:$true] %s743_s12 }
 0x2bc   :  { %p10090_p7 = scmp.ne.s32.totalorder %s722_s4, %s10089_s15  ;;  %s10093_s13 = scalar_lea.vmem %s722_s4, 32 }
 0x2bd   :  { %p10094_p8 = scmp.lt.s32.totalorder %s722_s4, %s722_s4  ;;  %p10095_p9 = scmp.lt.s32.totalorder %s10093_s13, %s10089_s15 }
 0x2bf   :  { %702 = dma.hbm_to_vmem [thread:$0]  %s13138_s20, 16, %s700_s7, [#allocation71]  }
 0x2c0   :  { %p10096_p10 = por %p10095_p9, %p10094_p8 }
 0x2c2   :  { %p10097_p11 = pnand %p10096_p10, %p10090_p7 }
 0x2c4   :  { %10100 = shalt.err (!%p10097_p11)
}
 0x2c5   :  { %s13139_s16 = sld [smem:[#allocation159_spill]]  ;;  %s10109_s23 = scalar_lea.vmem %s744_s12, 16 }
 0x2c6   :  { %p10110_p12 = scmp.ne.s32.totalorder %s744_s12, %s10109_s23  ;;  %s10113_s18 = scalar_lea.vmem %s744_s12, 32 }
 0x2c7   :  { %p10114_p13 = scmp.lt.s32.totalorder %s744_s12, %s744_s12  ;;  %p10115_p0 = scmp.lt.s32.totalorder %s10113_s18, %s10109_s23 }
 0x2c9   :  { %p10116_p1 = por %p10115_p0, %p10114_p13 }
 0x2cb   :  { %724 = dma.hbm_to_vmem [thread:$0]  %s13139_s16, 16, %s722_s4, [#allocation74]  }
 0x2cc   :  { %p10117_p2 = pnand %p10116_p1, %p10110_p12 }
 0x2ce   :  { %10120 = shalt.err (!%p10117_p2)
}
 0x2cf   :  { %746 = dma.hbm_to_vmem [thread:$0]  %s10698_s9, 16, %s744_s12, [#allocation77]  }
 0x2d0   :  { %10121 = dma.done.wait [#allocation3], 128  }
 0x2d1   :  { %10122 = vsyncadd [#allocation3], 4294967168 }
 0x2d2   :  { %10123 = dma.done.wait [#allocation5], 272  }
 0x2d3   :  { %10124 = vsyncadd [#allocation5], 4294967024 }
 0x2d4   :  { %10125 = dma.done.wait [#allocation8], 32  }
 0x2d5   :  { %10126 = vsyncadd [#allocation8], 4294967264 }
 0x2d6   :  { %10127 = dma.done.wait [#allocation11], 32  }
 0x2d7   :  { %10128 = vsyncadd [#allocation11], 4294967264 }
 0x2d8   :  { %10129 = dma.done.wait [#allocation14], 32  }
 0x2d9   :  { %10130 = vsyncadd [#allocation14], 4294967264 }
 0x2da   :  { %10131 = dma.done.wait [#allocation17], 32  }
 0x2db   :  { %10132 = vsyncadd [#allocation17], 4294967264 }
 0x2dc   :  { %10133 = dma.done.wait [#allocation20], 32  }
 0x2dd   :  { %10134 = vsyncadd [#allocation20], 4294967264 }
 0x2de   :  { %10135 = dma.done.wait [#allocation23], 32  }
 0x2df   :  { %10136 = vsyncadd [#allocation23], 4294967264 }
 0x2e0   :  { %10137 = dma.done.wait [#allocation26], 32  }
 0x2e1   :  { %10138 = vsyncadd [#allocation26], 4294967264 }
 0x2e2   :  { %10139 = dma.done.wait [#allocation29], 32  }
 0x2e3   :  { %10140 = vsyncadd [#allocation29], 4294967264 }
 0x2e4   :  { %10141 = dma.done.wait [#allocation32], 32  }
 0x2e5   :  { %10142 = vsyncadd [#allocation32], 4294967264 }
 0x2e6   :  { %10143 = dma.done.wait [#allocation35], 32  }
 0x2e7   :  { %10144 = vsyncadd [#allocation35], 4294967264 }
 0x2e8   :  { %10145 = dma.done.wait [#allocation38], 528  }
 0x2e9   :  { %10146 = vsyncadd [#allocation38], 4294966768 }
 0x2ea   :  { %10147 = dma.done.wait [#allocation41], 32  }
 0x2eb   :  { %10148 = vsyncadd [#allocation41], 4294967264 }
 0x2ec   :  { %10149 = dma.done.wait [#allocation44], 32  }
 0x2ed   :  { %10150 = vsyncadd [#allocation44], 4294967264 }
 0x2ee   :  { %10151 = dma.done.wait [#allocation47], 32  }
 0x2ef   :  { %10152 = vsyncadd [#allocation47], 4294967264 }
 0x2f0   :  { %10153 = dma.done.wait [#allocation50], 32  }
 0x2f1   :  { %10154 = vsyncadd [#allocation50], 4294967264 }
 0x2f2   :  { %10155 = dma.done.wait [#allocation53], 528  }
 0x2f3   :  { %10156 = vsyncadd [#allocation53], 4294966768 }
 0x2f4   :  { %10157 = dma.done.wait [#allocation56], 32  }
 0x2f5   :  { %10158 = vsyncadd [#allocation56], 4294967264 }
 0x2f6   :  { %10159 = dma.done.wait [#allocation59], 528  }
 0x2f7   :  { %10160 = vsyncadd [#allocation59], 4294966768 }
 0x2f8   :  { %10161 = dma.done.wait [#allocation62], 528  }
 0x2f9   :  { %10162 = vsyncadd [#allocation62], 4294966768 }
 0x2fa   :  { %10163 = dma.done.wait [#allocation65], 528  }
 0x2fb   :  { %10164 = vsyncadd [#allocation65], 4294966768 }
 0x2fc   :  { %10165 = dma.done.wait [#allocation68], 32  }
 0x2fd   :  { %10166 = vsyncadd [#allocation68], 4294967264 }
 0x2fe   :  { %10167 = dma.done.wait [#allocation71], 528  }
 0x2ff   :  { %10168 = vsyncadd [#allocation71], 4294966768 }
 0x300   :  { %10169 = dma.done.wait [#allocation74], 32  }
 0x301   :  { %10170 = vsyncadd [#allocation74], 4294967264 }
 0x302   :  { %10171 = dma.done.wait [#allocation77], 32  }
 0x303   :  { %10172 = vsyncadd [#allocation77], 4294967264  ;;  %s13140_s9 = sld [smem:[#allocation105_spill]]  ;;  %vm929_vm0 = vcmask 1043456   ;;  %vm922_vm1 = vcmask 97280   ;;  %v913_v1 = vld [vmem:[#allocation4] sm:$0xff] }
 0x304   :  { %s13141_s28 = sld [smem:[#allocation110_spill]]  ;;  %v914_v0 = vld [vmem:[#allocation4 + $0x8] sm:$0xf]  ;;  %v910_v12 = vld [vmem:[#allocation2] sm:$0xff]  ;;  %vm1021_vm2 = vcmask 261120   ;;  %vm1133_vm3 = vcmask 64512  }
 0x305   :  { %8050 = vmatprep.subr.msk.mxu0 %vm929_vm0, %v914_v0  ;;  %s13142_s8 = sld [smem:[#allocation109_spill]]  ;;  %v7467_v16 = vld [vmem:[#allocation6] ss:$0 sm:$0xff]  ;;  %s10300_s14 = smov 112   ;;  %vm1271_vm4 = vcmask 523264   ;;  %vm1539_vm5 = vcmask 130048  }
 0x306   :  { %8051 = vmatpush3.msk.msra.mxu0 %vm929_vm0, %v914_v0  ;;  %s10301_s6 = smov 104   ;;  %s10302_s17 = smov 120   ;;  %vm1542_vm6 = vcmask 195584   ;;  %vm7247_vm7 = vcmask 7168   ;;  %vm7250_vm8 = vcmask 15368   ;;  %vm7253_vm9 = vcmask 23568  }
 0x307   :  { %8052 = vmatprep.subr.mxu0 %v913_v1  ;;  %s10303_s27 = smov 96   ;;  %s13143_s26 = sld [smem:[#allocation108_spill]]  ;;  %vm7264_vm0 = vcmask 31768  }
 0x308   :  { %8053 = vmatpush3.msra.mxu0 %v913_v1  ;;  %s10304_s24 = smov 64   ;;  %s13144_s1 = sld [smem:[#allocation112_spill]] }
 0x309   :  { %v911_v2 = vld [vmem:[%s13140_s9] sm:$0xff]  ;;  %v912_v3 = vld [vmem:[%s13140_s9 + $0x8] sm:$0xff]  ;;  %s10305_s2 = smov 16   ;;  %s10306_s7 = smov 24  }
 0x30a   :  { %8054 = vmatprep.mubr.msk.f32.mxu0 %vm922_vm1, %v911_v2  ;;  %v1013_v4 = vld [vmem:[%s13141_s28 + $0x18] sm:$0xff]  ;;  %v1012_v5 = vld [vmem:[%s13141_s28 + $0x10] sm:$0xff]  ;;  %v1011_v6 = vld [vmem:[%s13141_s28 + $0x8] sm:$0xff]  ;;  %s13145_s5 = sld [smem:[#allocation114_spill]] }
 0x30b   :  { %8055 = vmatmul.mubr.msk.f32.vlgmr.msra.gmra.mxu0 %vm922_vm1, %v912_v3  ;;  %8057 = vmatprep.subr.mxu1 %v1013_v4  ;;  %v1010_v7 = vld [vmem:[%s13141_s28] sm:$0xff]  ;;  %s13146_s19 = sld [smem:[#allocation116_spill]]  ;;  %s10307_s28 = smov 126   ;;  %vm6245_vm1 = vcmask 31744  }
 0x30c   :  { %8058 = vmatpush3.msra.mxu1 %v1013_v4  ;;  %v7463_v8 = vld [vmem:[%s13142_s8] ss:$0 sm:$0xff]  ;;  %s13147_s10 = sld [smem:[#allocation118_spill]]  ;;  %s10308_s8 = smov 127  }
 0x30d   :  { %8059 = vmatprep.subr.mxu1 %v1012_v5  ;;  %v10879_v35 = vld [vmem:[%s13143_s26 + $0x8] sm:$0xff]  ;;  %v10882_v37 = vld [vmem:[%s13143_s26] sm:$0xff]  ;;  %v10888_v43 = vld [vmem:[%s13143_s26 + $0x10] sm:$0xff]  ;;  %s13148_s25 = sld [smem:[#allocation120_spill]] }
 0x30e   :  { %8060 = vmatpush3.msra.mxu1 %v1012_v5  ;;  %v10892_v45 = vld [vmem:[%s13143_s26 + $0x18] sm:$0xff]  ;;  %v10896_v49 = vld [vmem:[%s13143_s26 + $0x20] sm:$0xff]  ;;  %v10901_v52 = vld [vmem:[%s13143_s26 + $0x28] sm:$0xff]  ;;  %s13149_s11 = sld [smem:[#allocation122_spill]] }
 0x30f   :  { %8061 = vmatprep.subr.mxu1 %v1011_v6  ;;  %v10908_v58 = vld [vmem:[%s13143_s26 + $0x38] sm:$0xff]  ;;  %v10922_v0 = vld [vmem:[%s13143_s26 + $0x30] sm:$0xff]  ;;  %s13150_s20 = sld [smem:[#allocation126_spill]] }
 0x310   :  { %8062 = vmatpush3.msra.mxu1 %v1011_v6  ;;  %s13151_s21 = sld [smem:[#allocation124_spill]] }
 0x311   :  { %8063 = vmatprep.subr.mxu1 %v1010_v7  ;;  %s13152_s4 = sld [smem:[#allocation107_spill]] }
 0x312   :  { %8064 = vmatpush3.msra.mxu1 %v1010_v7  ;;  %s13153_s0 = sld [smem:[#allocation128_spill]] }
 0x313   :  { %s13154_s12 = sld [smem:[#allocation132_spill]] }
 0x314   :  { %s13155_s15 = sld [smem:[#allocation130_spill]] }
 0x315   :  { %s13156_s13 = sld [smem:[#allocation135_spill]] }
 0x316   :  { %s13157_s16 = sld [smem:[#allocation137_spill]] }
 0x317   :  { %s13158_s23 = sld [smem:[#allocation141_spill]] }
 0x318   :  { %s13159_s18 = sld [smem:[#allocation157_spill]] }
 0x319   :  { %s13160_s9 = sld [smem:[#allocation161_spill]] }
 0x3cb   :  { %v8056_v9 = vpop.f32.mrf.mxu0 }
 0x3cc   :  { %v1005_v10 = vadd.f32 %v8056_v9, %v7463_v8 }
 0x3cd   :  { %v999_v11 = vpop.f32.mrf.mxu0 }
 0x3ce   :  { %v1000_v13 = vadd.f32 %v7463_v8, %v999_v11  ;;  %v10796_v15 = vadd.f32 %v1005_v10, %v910_v12 }
 0x3d0   :  { %v10794_v14 = vadd.f32 %v1000_v13, %v910_v12 }
 0x3d2   :  { %8065 = vmatprep.mubr.msk.f32.mxu1 %vm1021_vm2, %v10794_v14 }
 0x3d3   :  { %8066 = vmatmul.mubr.msk.f32.vlgmr.msra.gmra.mxu1 %vm1021_vm2, %v10796_v15 }
 0x493   :  { %v8067_v17 = vpop.f32.mrf.mxu1 }
 0x494   :  { %v10802_v18 = vadd.f32 %v8067_v17, %v7467_v16 }
 0x495   :  { %v1094_v19 = vpop.f32.mrf.mxu1 }
 0x496   :  { %v10804_v20 = vadd.f32 %v7467_v16, %v1094_v19  ;;  %1111 = vrot.lane.b32.xlu1 %v10802_v18, %s10300_s14  ;;  %1115 = vrot.lane.b32.xlu0 %v10802_v18, %s10301_s6 }
 0x498   :  { %8084 = vmatprep.mubr.msk.f32.mxu0 %vm1133_vm3, %v10804_v20 }
 0x49a   :  { %1109 = vrot.lane.b32.xlu1 %v10804_v20, %s10300_s14  ;;  %1113 = vrot.lane.b32.xlu0 %v10804_v20, %s10301_s6 }
 0x49e   :  { %1105 = vrot.lane.b32.xlu1 %v10804_v20, %s10302_s17  ;;  %1107 = vrot.lane.b32.xlu0 %v10802_v18, %s10302_s17 }
 0x508   :  { %v10820_v21 = vpop.permute.xlu1 %1111  ;;  %v10822_v22 = vpop.permute.xlu0 %1115 }
 0x509   :  { %1131 = vrot.lane.b32.xlu0 %v10822_v22, %s10303_s27 }
 0x50c   :  { %v10826_v23 = vpop.permute.xlu0 %1113  ;;  %v10832_v24 = vpop.permute.xlu1 %1109 }
 0x50d   :  { %1127 = vrot.lane.b32.xlu0 %v10820_v21, %s10303_s27  ;;  %1129 = vrot.lane.b32.xlu1 %v10826_v23, %s10303_s27 }
 0x510   :  { %v10834_v25 = vpop.permute.xlu0 %1107  ;;  %v10840_v26 = vpop.permute.xlu1 %1105 }
 0x511   :  { %1125 = vrot.lane.b32.xlu1 %v10832_v24, %s10303_s27  ;;  %1123 = vrot.lane.b32.xlu0 %v10834_v25, %s10303_s27 }
 0x515   :  { %1121 = vrot.lane.b32.xlu1 %v10840_v26, %s10303_s27  ;;  %1119 = vrot.lane.b32.xlu0 %v10802_v18, %s10303_s27 }
 0x519   :  { %1117 = vrot.lane.b32.xlu1 %v10804_v20, %s10303_s27 }
 0x57b   :  { %v1132_v27 = vpop.permute.xlu0 %1131 }
 0x57c   :  { %8068 = vmatprep.subr.msk.mxu0 %vm1133_vm3, %v1132_v27 }
 0x57d   :  { %8069 = vmatpush3.xpose.msk.msra.mxu0 %vm1133_vm3, %v1132_v27 }
 0x57f   :  { %v1130_v28 = vpop.permute.xlu1 %1129  ;;  %v1128_v29 = vpop.permute.xlu0 %1127 }
 0x580   :  { %8070 = vmatprep.subr.msk.mxu0 %vm1133_vm3, %v1130_v28 }
 0x581   :  { %8071 = vmatpush3.xpose.msk.msra.mxu0 %vm1133_vm3, %v1130_v28 }
 0x582   :  { %8072 = vmatprep.subr.msk.mxu0 %vm1133_vm3, %v1128_v29 }
 0x583   :  { %v1126_v30 = vpop.permute.xlu1 %1125  ;;  %v1124_v31 = vpop.permute.xlu0 %1123 }
 0x585   :  { %8073 = vmatpush3.xpose.msk.msra.mxu0 %vm1133_vm3, %v1128_v29 }
 0x586   :  { %8074 = vmatprep.subr.msk.mxu0 %vm1133_vm3, %v1126_v30 }
 0x587   :  { %v1122_v32 = vpop.permute.xlu1 %1121  ;;  %v1120_v33 = vpop.permute.xlu0 %1119 }
 0x589   :  { %8075 = vmatpush3.xpose.msk.msra.mxu0 %vm1133_vm3, %v1126_v30 }
 0x58a   :  { %8076 = vmatprep.subr.msk.mxu0 %vm1133_vm3, %v1124_v31 }
 0x58b   :  { %v1118_v34 = vpop.permute.xlu1 %1117 }
 0x58d   :  { %8077 = vmatpush3.xpose.msk.msra.mxu0 %vm1133_vm3, %v1124_v31 }
 0x58e   :  { %8078 = vmatprep.subr.msk.mxu0 %vm1133_vm3, %v1122_v32 }
 0x591   :  { %8079 = vmatpush3.xpose.msk.msra.mxu0 %vm1133_vm3, %v1122_v32 }
 0x592   :  { %8080 = vmatprep.subr.msk.mxu0 %vm1133_vm3, %v1120_v33 }
 0x595   :  { %8081 = vmatpush3.xpose.msk.msra.mxu0 %vm1133_vm3, %v1120_v33 }
 0x596   :  { %8082 = vmatprep.subr.msk.mxu0 %vm1133_vm3, %v1118_v34 }
 0x599   :  { %8083 = vmatpush3.xpose.msk.msra.mxu0 %vm1133_vm3, %v1118_v34 }
 0x59c   :  { %8085 = vmatmul.mubr.msk.f32.vlgmr.msra.gmra.mxu0 %vm1133_vm3, %v10802_v18 }
 0x59d   :  { %8087 = vmatprep.mubr.msk.f32.mxu0 %vm1133_vm3, %v10840_v26 }
 0x5a0   :  { %8088 = vmatmul.mubr.msk.f32.gmra.mxu0 %vm1133_vm3, %v10834_v25 }
 0x5a1   :  { %8090 = vmatprep.mubr.msk.f32.mxu0 %vm1133_vm3, %v10832_v24 }
 0x5a4   :  { %8091 = vmatmul.mubr.msk.f32.gmra.mxu0 %vm1133_vm3, %v10820_v21 }
 0x5a5   :  { %8093 = vmatprep.mubr.msk.f32.mxu0 %vm1133_vm3, %v10826_v23 }
 0x5a8   :  { %8094 = vmatmul.mubr.msk.f32.gmra.mxu0 %vm1133_vm3, %v10822_v22 }
 0x65c   :  { %v8086_v36 = vpop.f32.mrf.mxu0 }
 0x65d   :  { %v1238_v38 = vadd.f32 %v8086_v36, %v10879_v35 }
 0x65e   :  { %v1232_v39 = vpop.f32.mrf.mxu0 }
 0x65f   :  { %v1233_v40 = vadd.f32 %v1232_v39, %v10882_v37  ;;  %v1275_v41 = vsel %vm1271_vm4, %v1238_v38, -inf }
 0x660   :  { %v8089_v42 = vpop.f32.mrf.mxu0  ;;  %1276 = vmax.xlane.f32.xlu1 %v1275_v41 }
 0x661   :  { %v1272_v44 = vsel %vm1271_vm4, %v1233_v40, -inf  ;;  %v1248_v50 = vadd.f32 %v8089_v42, %v10892_v45 }
 0x662   :  { %v1242_v46 = vpop.f32.mrf.mxu0  ;;  %1273 = vmax.xlane.f32.xlu0 %v1272_v44 }
 0x663   :  { %v1243_v47 = vadd.f32 %v1242_v46, %v10888_v43  ;;  %v1281_v56 = vsel %vm1271_vm4, %v1248_v50, -inf }
 0x664   :  { %v8092_v48 = vpop.f32.mrf.mxu0 }
 0x665   :  { %v1278_v51 = vsel %vm1271_vm4, %v1243_v47, -inf  ;;  %v1258_v55 = vadd.f32 %v8092_v48, %v10901_v52 }
 0x666   :  { %v1252_v53 = vpop.f32.mrf.mxu0  ;;  %1279 = vmax.xlane.f32.xlu0 %v1278_v51 }
 0x667   :  { %v1253_v54 = vadd.f32 %v1252_v53, %v10896_v49  ;;  %v1287_v61 = vsel %vm1271_vm4, %v1258_v55, -inf }
 0x668   :  { %v8095_v59 = vpop.f32.mrf.mxu0 }
 0x669   :  { %v1284_v57 = vsel %vm1271_vm4, %v1253_v54, -inf  ;;  %v1268_v60 = vadd.f32 %v8095_v59, %v10908_v58 }
 0x66a   :  { %1282 = vmax.xlane.f32.xlu0 %v1281_v56  ;;  %1285 = vmax.xlane.f32.xlu1 %v1284_v57  ;;  %v1262_v63 = vpop.f32.mrf.mxu0 }
 0x66b   :  { %v1293_v62 = vsel %vm1271_vm4, %v1268_v60, -inf  ;;  %v10925_v1 = vadd.f32 %v1262_v63, %v10922_v0 }
 0x66d   :  { %v1290_v2 = vsel %vm1271_vm4, %v10925_v1, -inf }
 0x66e   :  { %1288 = vmax.xlane.f32.xlu0 %v1287_v61 }
 0x672   :  { %1294 = vmax.xlane.f32.xlu0 %v1293_v62 }
 0x67b   :  { %1374 = vrot.lane.b32.xlu1 %v10822_v22, %s10304_s24 }
 0x67f   :  { %1370 = vrot.lane.b32.xlu1 %v10820_v21, %s10304_s24 }
 0x688   :  { %1372 = vrot.lane.b32.xlu0 %v10826_v23, %s10304_s24 }
 0x68c   :  { %1366 = vrot.lane.b32.xlu0 %v10834_v25, %s10304_s24 }
 0x6a3   :  { %1291 = vmax.xlane.f32.xlu1 %v1290_v2 }
 0x6b4   :  { %1368 = vrot.lane.b32.xlu1 %v10832_v24, %s10304_s24 }
 0x6b8   :  { %1364 = vrot.lane.b32.xlu1 %v10840_v26, %s10304_s24 }
 0x6e9   :  { %v1277_v3 = vpop.xlane.xlu1 %1276 }
 0x6ea   :  { %v1297_v4 = vsub.f32 %v1238_v38, %v1277_v3 }
 0x6eb   :  { %v1274_v5 = vpop.xlane.xlu0 %1273 }
 0x6ec   :  { %v1306_v6 = vmul.f32 1.442695, %v1297_v4  ;;  %v1296_v7 = vsub.f32 %v1233_v40, %v1274_v5 }
 0x6ee   :  { %8840 = vpow2.f32 %v1306_v6  ;;  %v1304_v8 = vmul.f32 1.442695, %v1296_v7 }
 0x6ef   :  { %v1280_v9 = vpop.xlane.xlu0 %1279 }
 0x6f0   :  { %8842 = vpow2.f32 %v1304_v8  ;;  %v1298_v10 = vsub.f32 %v1243_v47, %v1280_v9 }
 0x6f2   :  { %v1308_v11 = vmul.f32 1.442695, %v1298_v10 }
 0x6f3   :  { %v1283_v12 = vpop.xlane.xlu0 %1282  ;;  %v1286_v13 = vpop.xlane.xlu1 %1285 }
 0x6f4   :  { %8844 = vpow2.f32 %v1308_v11  ;;  %v1299_v16 = vsub.f32 %v1248_v50, %v1283_v12  ;;  %v1300_v17 = vsub.f32 %v1253_v54, %v1286_v13 }
 0x6f6   :  { %v1310_v19 = vmul.f32 1.442695, %v1299_v16  ;;  %v1312_v21 = vmul.f32 1.442695, %v1300_v17 }
 0x6f7   :  { %v1289_v22 = vpop.xlane.xlu0 %1288  ;;  %v1375_v23 = vpop.permute.xlu1 %1374 }
 0x6f8   :  { %8846 = vpow2.f32 %v1310_v19  ;;  %v1301_v24 = vsub.f32 %v1258_v55, %v1289_v22  ;;  %8096 = vmatprep.subr.mxu1 %v1375_v23 }
 0x6f9   :  { %8848 = vpow2.f32 %v1312_v21  ;;  %8097 = vmatpush3.msra.mxu1 %v1375_v23 }
 0x6fa   :  { %v1314_v25 = vmul.f32 1.442695, %v1301_v24 }
 0x6fb   :  { %v10933_v26 = vpop.eup %8840  ;;  %v1295_v27 = vpop.xlane.xlu0 %1294 }
 0x6fc   :  { %8850 = vpow2.f32 %v1314_v25  ;;  %v1303_v28 = vsub.f32 %v1268_v60, %v1295_v27  ;;  %v1323_v29 = vsel %vm1271_vm4, %v10933_v26, 0.0  ;;  %v1371_v36 = vpop.permute.xlu1 %1370  ;;  %v1548_v25 = vld [vmem:[%s13144_s1 + $0x18] sm:$0xff]  ;;  %v1546_v27 = vld [vmem:[%s13144_s1 + $0x8] sm:$0xff] }
 0x6fd   :  { %v8843_v30 = vpop.eup %8842  ;;  %1324 = vadd.xlane.f32.xlu0 %v1323_v29 }
 0x6fe   :  { %v1318_v31 = vmul.f32 1.442695, %v1303_v28  ;;  %v1320_v32 = vsel %vm1271_vm4, %v8843_v30, 0.0  ;;  %v1545_v28 = vld [vmem:[%s13144_s1] sm:$0xff] }
 0x6ff   :  { %v1373_v33 = vpop.permute.xlu0 %1372  ;;  %1321 = vadd.xlane.f32.xlu1 %v1320_v32 }
 0x700   :  { %8852 = vpow2.f32 %v1318_v31  ;;  %8098 = vmatprep.subr.mxu1 %v1373_v33 }
 0x701   :  { %v10938_v34 = vpop.eup %8844  ;;  %8099 = vmatpush3.msra.mxu1 %v1373_v33 }
 0x702   :  { %8100 = vmatprep.subr.mxu1 %v1371_v36  ;;  %v1326_v38 = vsel %vm1271_vm4, %v10938_v34, 0.0 }
 0x703   :  { %1327 = vadd.xlane.f32.xlu1 %v1326_v38  ;;  %8101 = vmatpush3.msra.mxu1 %v1371_v36  ;;  %v1367_v55 = vpop.permute.xlu0 %1366 }
 0x705   :  { %v10942_v39 = vpop.eup %8846 }
 0x706   :  { %v10944_v40 = vpop.eup %8848  ;;  %v1329_v41 = vsel %vm1271_vm4, %v10942_v39, 0.0 }
 0x707   :  { %1330 = vadd.xlane.f32.xlu0 %v1329_v41  ;;  %v1332_v42 = vsel %vm1271_vm4, %v10944_v40, 0.0 }
 0x708   :  { %1333 = vadd.xlane.f32.xlu1 %v1332_v42 }
 0x709   :  { %v10950_v44 = vpop.eup %8850 }
 0x70a   :  { %v1335_v46 = vsel %vm1271_vm4, %v10950_v44, 0.0 }
 0x70b   :  { %1336 = vadd.xlane.f32.xlu0 %v1335_v46 }
 0x70d   :  { %v10954_v47 = vpop.eup %8852 }
 0x70e   :  { %v1341_v48 = vsel %vm1271_vm4, %v10954_v47, 0.0 }
 0x70f   :  { %1342 = vadd.xlane.f32.xlu0 %v1341_v48 }
 0x725   :  { %1362 = vrot.lane.b32.xlu0 %v10802_v18, %s10304_s24 }
 0x72c   :  { %v1292_v50 = vpop.xlane.xlu1 %1291 }
 0x72d   :  { %v1302_v51 = vsub.f32 %v10925_v1, %v1292_v50 }
 0x72f   :  { %v1316_v53 = vmul.f32 1.442695, %v1302_v51 }
 0x730   :  { %v1369_v54 = vpop.permute.xlu1 %1368 }
 0x731   :  { %8854 = vpow2.f32 %v1316_v53  ;;  %8102 = vmatprep.subr.mxu1 %v1369_v54 }
 0x732   :  { %8103 = vmatpush3.msra.mxu1 %v1369_v54 }
 0x733   :  { %8104 = vmatprep.subr.mxu1 %v1367_v55 }
 0x734   :  { %8105 = vmatpush3.msra.mxu1 %v1367_v55  ;;  %v1365_v56 = vpop.permute.xlu1 %1364  ;;  %v7494_v55 = vld [vmem:[#allocation7] ss:$0 sm:$0xff] }
 0x735   :  { %8106 = vmatprep.subr.mxu1 %v1365_v56 }
 0x736   :  { %8107 = vmatpush3.msra.mxu1 %v1365_v56 }
 0x73e   :  { %v8855_v57 = vpop.eup %8854 }
 0x73f   :  { %v1338_v59 = vsel %vm1271_vm4, %v8855_v57, 0.0 }
 0x740   :  { %1339 = vadd.xlane.f32.xlu1 %v1338_v59 }
 0x751   :  { %1360 = vrot.lane.b32.xlu1 %v10804_v20, %s10304_s24 }
 0x786   :  { %v1325_v60 = vpop.xlane.xlu0 %1324 }
 0x788   :  { %v1322_v18 = vpop.xlane.xlu1 %1321 }
 0x789   :  { %8856 = vrcp.f32 %v1322_v18 }
 0x78a   :  { %8858 = vrcp.f32 %v1325_v60 }
 0x78c   :  { %v1328_v4 = vpop.xlane.xlu1 %1327 }
 0x78d   :  { %8860 = vrcp.f32 %v1328_v4 }
 0x790   :  { %v1331_v61 = vpop.xlane.xlu0 %1330 }
 0x791   :  { %v1334_v5 = vpop.xlane.xlu1 %1333  ;;  %8862 = vrcp.f32 %v1331_v61 }
 0x792   :  { %8864 = vrcp.f32 %v1334_v5 }
 0x794   :  { %v1337_v62 = vpop.xlane.xlu0 %1336 }
 0x795   :  { %8866 = vrcp.f32 %v1337_v62 }
 0x796   :  { %v8857_v63 = vpop.eup %8856 }
 0x797   :  { %v1345_v1 = vmul.f32 %v8857_v63, %v8843_v30  ;;  %v8859_v6 = vpop.eup %8858 }
 0x798   :  { %v1343_v2 = vpop.xlane.xlu0 %1342  ;;  %v1347_v9 = vmul.f32 %v8859_v6, %v10933_v26  ;;  %v1547_v26 = vld [vmem:[%s13144_s1 + $0x10] sm:$0xff]  ;;  %s10314_s1 = smov 110  }
 0x799   :  { %8112 = vmatprep.mubr.msk.f32.mxu1 %vm1271_vm4, %v1345_v1  ;;  %8868 = vrcp.f32 %v1343_v2 }
 0x79a   :  { %v8861_v7 = vpop.eup %8860 }
 0x79b   :  { %v1349_v11 = vmul.f32 %v8861_v7, %v10938_v34 }
 0x79c   :  { %v1363_v3 = vpop.permute.xlu0 %1362 }
 0x79d   :  { %8108 = vmatprep.subr.mxu1 %v1363_v3 }
 0x79e   :  { %8109 = vmatpush3.msra.mxu1 %v1363_v3  ;;  %v8863_v10 = vpop.eup %8862 }
 0x79f   :  { %v8865_v12 = vpop.eup %8864  ;;  %v1351_v13 = vmul.f32 %v8863_v10, %v10942_v39  ;;  %v1685_v10 = vld [vmem:[%s13145_s5 + $0x8] sm:$0xff] }
 0x7a0   :  { %v1353_v17 = vmul.f32 %v8865_v12, %v10944_v40  ;;  %v1785_v12 = vld [vmem:[%s13146_s19 + $0x38] sm:$0xff] }
 0x7a1   :  { %8146 = vmatprep.subr.mxu0 %v1785_v12 }
 0x7a2   :  { %v8867_v16 = vpop.eup %8866  ;;  %8147 = vmatpush3.msra.mxu0 %v1785_v12 }
 0x7a3   :  { %v1355_v21 = vmul.f32 %v8867_v16, %v10950_v44  ;;  %v1783_v16 = vld [vmem:[%s13146_s19 + $0x28] sm:$0xff] }
 0x7a6   :  { %v8869_v19 = vpop.eup %8868 }
 0x7a7   :  { %v1359_v24 = vmul.f32 %v8869_v19, %v10954_v47  ;;  %v1781_v19 = vld [vmem:[%s13146_s19 + $0x18] sm:$0xff] }
 0x7c9   :  { %v1340_v20 = vpop.xlane.xlu1 %1339 }
 0x7ca   :  { %8870 = vrcp.f32 %v1340_v20 }
 0x7cd   :  { %v1361_v8 = vpop.permute.xlu1 %1360 }
 0x7ce   :  { %8110 = vmatprep.subr.mxu1 %v1361_v8 }
 0x7cf   :  { %8111 = vmatpush3.msra.mxu1 %v1361_v8  ;;  %v1687_v8 = vld [vmem:[%s13145_s5 + $0x18] sm:$0xff] }
 0x7d0   :  { %8113 = vmatmul.mubr.msk.f32.vlgmr.msra.gmra.mxu1 %vm1271_vm4, %v1347_v9  ;;  %8124 = vmatprep.subr.mxu1 %v1548_v25  ;;  %v1686_v9 = vld [vmem:[%s13145_s5 + $0x10] sm:$0xff] }
 0x7d1   :  { %8115 = vmatprep.mubr.msk.f32.mxu1 %vm1271_vm4, %v1349_v11  ;;  %8125 = vmatpush3.msra.mxu1 %v1548_v25  ;;  %v1684_v11 = vld [vmem:[%s13145_s5] sm:$0xff]  ;;  %s10317_s5 = smov 107  }
 0x7d2   :  { %8126 = vmatprep.subr.mxu1 %v1547_v26 }
 0x7d3   :  { %8127 = vmatpush3.msra.mxu1 %v1547_v26 }
 0x7d4   :  { %8116 = vmatmul.mubr.msk.f32.gmra.mxu1 %vm1271_vm4, %v1351_v13  ;;  %8128 = vmatprep.subr.mxu1 %v1546_v27  ;;  %v1784_v13 = vld [vmem:[%s13146_s19 + $0x30] sm:$0xff] }
 0x7d5   :  { %8118 = vmatprep.mubr.msk.f32.mxu1 %vm1271_vm4, %v1353_v17  ;;  %8129 = vmatpush3.msra.mxu1 %v1546_v27  ;;  %v1782_v17 = vld [vmem:[%s13146_s19 + $0x20] sm:$0xff] }
 0x7d6   :  { %8130 = vmatprep.subr.mxu1 %v1545_v28  ;;  %8148 = vmatprep.subr.mxu0 %v1784_v13 }
 0x7d7   :  { %v8871_v22 = vpop.eup %8870  ;;  %8131 = vmatpush3.msra.mxu1 %v1545_v28  ;;  %8149 = vmatpush3.msra.mxu0 %v1784_v13  ;;  %v7497_v28 = vld [vmem:[#allocation9] ss:$0 sm:$0xff] }
 0x7d8   :  { %8119 = vmatmul.mubr.msk.f32.gmra.mxu1 %vm1271_vm4, %v1355_v21  ;;  %v1357_v23 = vmul.f32 %v8871_v22, %v8855_v57  ;;  %8135 = vmatprep.subr.mxu1 %v1687_v8 }
 0x7d9   :  { %8150 = vmatprep.subr.mxu0 %v1783_v16 }
 0x7da   :  { %8121 = vmatprep.mubr.msk.f32.mxu1 %vm1271_vm4, %v1357_v23  ;;  %8151 = vmatpush3.msra.mxu0 %v1783_v16 }
 0x7db   :  { %8152 = vmatprep.subr.mxu0 %v1782_v17 }
 0x7dc   :  { %8122 = vmatmul.mubr.msk.f32.gmra.mxu1 %vm1271_vm4, %v1359_v24  ;;  %8153 = vmatpush3.msra.mxu0 %v1782_v17 }
 0x7dd   :  { %8154 = vmatprep.subr.mxu0 %v1781_v19 }
 0x7de   :  { %8155 = vmatpush3.msra.mxu0 %v1781_v19 }
 0x890   :  { %v8114_v29 = vpop.f32.mrf.mxu1 }
 0x892   :  { %v1474_v30 = vpop.f32.mrf.mxu1 }
 0x894   :  { %v8117_v31 = vpop.f32.mrf.mxu1 }
 0x895   :  { %1517 = vrot.lane.b32.xlu1 %v8117_v31, %s10249_s22 }
 0x896   :  { %v1484_v32 = vpop.f32.mrf.mxu1 }
 0x897   :  { %1515 = vrot.lane.b32.xlu0 %v1484_v32, %s10249_s22 }
 0x898   :  { %v8120_v33 = vpop.f32.mrf.mxu1 }
 0x899   :  { %1525 = vrot.lane.b32.xlu1 %v8120_v33, %s10305_s2 }
 0x89a   :  { %v1494_v34 = vpop.f32.mrf.mxu1 }
 0x89b   :  { %1523 = vrot.lane.b32.xlu0 %v1494_v34, %s10305_s2 }
 0x89c   :  { %v8123_v36 = vpop.f32.mrf.mxu1 }
 0x89d   :  { %1533 = vrot.lane.b32.xlu1 %v8123_v36, %s10306_s7 }
 0x89e   :  { %v1504_v38 = vpop.f32.mrf.mxu1 }
 0x89f   :  { %1531 = vrot.lane.b32.xlu0 %v1504_v38, %s10306_s7 }
 0x907   :  { %v1518_v39 = vpop.permute.xlu1 %1517 }
 0x908   :  { %v1538_v47 = vsel %vm1133_vm3, %v8114_v29, %v1518_v39  ;;  %v1780_v39 = vld [vmem:[%s13146_s19 + $0x10] sm:$0xff] }
 0x909   :  { %v1516_v40 = vpop.permute.xlu0 %1515  ;;  %8156 = vmatprep.subr.mxu0 %v1780_v39 }
 0x90a   :  { %v1537_v44 = vsel %vm1133_vm3, %v1474_v30, %v1516_v40  ;;  %v7498_v30 = vld [vmem:[#allocation10] ss:$0 sm:$0xff]  ;;  %8157 = vmatpush3.msra.mxu0 %v1780_v39  ;;  %v1779_v40 = vld [vmem:[%s13146_s19 + $0x8] sm:$0xff] }
 0x90b   :  { %v1526_v41 = vpop.permute.xlu1 %1525  ;;  %8158 = vmatprep.subr.mxu0 %v1779_v40 }
 0x90c   :  { %v1541_v51 = vsel %vm1539_vm5, %v1538_v47, %v1526_v41  ;;  %v1778_v41 = vld [vmem:[%s13146_s19] sm:$0xff]  ;;  %8159 = vmatpush3.msra.mxu0 %v1779_v40  ;;  %s10319_s19 = smov 124  }
 0x90d   :  { %v1524_v42 = vpop.permute.xlu0 %1523  ;;  %8160 = vmatprep.subr.mxu0 %v1778_v41 }
 0x90e   :  { %v1540_v48 = vsel %vm1539_vm5, %v1537_v44, %v1524_v42  ;;  %8161 = vmatpush3.msra.mxu0 %v1778_v41  ;;  %v7499_v42 = vld [vmem:[#allocation12] ss:$0 sm:$0xff] }
 0x90f   :  { %v1534_v46 = vpop.permute.xlu1 %1533 }
 0x910   :  { %v1544_v54 = vsel %vm1542_vm6, %v1541_v51, %v1534_v46 }
 0x911   :  { %v1532_v50 = vpop.permute.xlu0 %1531 }
 0x912   :  { %v1543_v53 = vsel %vm1542_vm6, %v1540_v48, %v1532_v50 }
 0x913   :  { %8132 = vmatprep.mubr.msk.f32.mxu1 %vm1021_vm2, %v1543_v53  ;;  %v7502_v53 = vld [vmem:[#allocation13] ss:$0 sm:$0xff] }
 0x914   :  { %8133 = vmatmul.mubr.msk.f32.vlgmr.msra.gmra.mxu1 %vm1021_vm2, %v1544_v54 }
 0x915   :  { %8136 = vmatpush3.msra.mxu1 %v1687_v8  ;;  %v1921_v8 = vld [vmem:[%s13147_s10 + $0x8] sm:$0xff] }
 0x916   :  { %8137 = vmatprep.subr.mxu1 %v1686_v9 }
 0x917   :  { %8138 = vmatpush3.msra.mxu1 %v1686_v9  ;;  %v1920_v9 = vld [vmem:[%s13147_s10] sm:$0xff] }
 0x918   :  { %8139 = vmatprep.subr.mxu1 %v1685_v10 }
 0x919   :  { %8140 = vmatpush3.msra.mxu1 %v1685_v10 }
 0x91a   :  { %8141 = vmatprep.subr.mxu1 %v1684_v11 }
 0x91b   :  { %8142 = vmatpush3.msra.mxu1 %v1684_v11 }
 0x9d4   :  { %v8134_v56 = vpop.f32.mrf.mxu1 }
 0x9d5   :  { %v1634_v57 = vadd.f32 %v8134_v56, %v7494_v55 }
 0x9d6   :  { %v1628_v59 = vpop.f32.mrf.mxu1 }
 0x9d7   :  { %v1629_v18 = vadd.f32 %v7494_v55, %v1628_v59  ;;  %v1638_v60 = vadd.f32 %v1634_v57, %v10796_v15 }
 0x9d9   :  { %v1644_v61 = vsel %vm1021_vm2, %v1638_v60, 0.0  ;;  %v1637_v62 = vadd.f32 %v1629_v18, %v10794_v14 }
 0x9da   :  { %1645 = vadd.xlane.f32.xlu1 %v1644_v61 }
 0x9db   :  { %v1641_v63 = vsel %vm1021_vm2, %v1637_v62, 0.0 }
 0x9dc   :  { %1642 = vadd.xlane.f32.xlu0 %v1641_v63 }
 0xa63   :  { %v1646_v1 = vpop.xlane.xlu1 %1645 }
 0xa64   :  { %v1649_v2 = vmul.f32 0.03125, %v1646_v1 }
 0xa65   :  { %v1643_v3 = vpop.xlane.xlu0 %1642 }
 0xa66   :  { %v1648_v4 = vmul.f32 0.03125, %v1643_v3  ;;  %v1651_v5 = vsub.f32 %v1638_v60, %v1649_v2 }
 0xa68   :  { %v1650_v20 = vsub.f32 %v1637_v62, %v1648_v4  ;;  %v1653_v7 = vmul.f32 %v1651_v5, %v1651_v5 }
 0xa6a   :  { %v1652_v6 = vmul.f32 %v1650_v20, %v1650_v20  ;;  %v1657_v14 = vsel %vm1021_vm2, %v1653_v7, 0.0  ;;  %v1923_v7 = vld [vmem:[%s13147_s10 + $0x18] sm:$0xff] }
 0xa6b   :  { %8165 = vmatprep.subr.mxu1 %v1923_v7 }
 0xa6c   :  { %v1654_v15 = vsel %vm1021_vm2, %v1652_v6, 0.0 }
 0xa6d   :  { %1655 = vadd.xlane.f32.xlu0 %v1654_v15 }
 0xa71   :  { %1658 = vadd.xlane.f32.xlu0 %v1657_v14  ;;  %v1922_v14 = vld [vmem:[%s13147_s10 + $0x10] sm:$0xff]  ;;  %s10320_s10 = smov 3  }
 0xaf6   :  { %v1656_v21 = vpop.xlane.xlu0 %1655 }
 0xaf7   :  { %v1660_v22 = vmul.f32 0.03125, %v1656_v21  ;;  %v7505_v21 = vld [vmem:[#allocation15] ss:$0 sm:$0xff] }
 0xaf9   :  { %v1662_v23 = vadd.f32 1e-05, %v1660_v22 }
 0xafa   :  { %v1659_v24 = vpop.xlane.xlu0 %1658 }
 0xafb   :  { %8872 = vrsqrt.f32 %v1662_v23  ;;  %v1661_v25 = vmul.f32 0.03125, %v1659_v24 }
 0xafd   :  { %v1663_v26 = vadd.f32 1e-05, %v1661_v25 }
 0xaff   :  { %8874 = vrsqrt.f32 %v1663_v26  ;;  %v7506_v26 = vld [vmem:[#allocation16] ss:$0 sm:$0xff] }
 0xb08   :  { %v8873_v27 = vpop.eup %8872 }
 0xb09   :  { %v1666_v29 = vmul.f32 %v8873_v27, %v1650_v20 }
 0xb0b   :  { %v1674_v31 = vmul.f32 %v7497_v28, %v1666_v29 }
 0xb0c   :  { %v8875_v32 = vpop.eup %8874 }
 0xb0d   :  { %v1667_v33 = vmul.f32 %v8875_v32, %v1651_v5  ;;  %v1682_v34 = vadd.f32 %v7498_v30, %v1674_v31 }
 0xb0f   :  { %v1675_v36 = vmul.f32 %v7497_v28, %v1667_v33  ;;  %8143 = vmatprep.mubr.msk.f32.mxu1 %vm1021_vm2, %v1682_v34 }
 0xb11   :  { %v1683_v38 = vadd.f32 %v7498_v30, %v1675_v36  ;;  %v7507_v30 = vld [vmem:[#allocation18] ss:$0 sm:$0xff] }
 0xb13   :  { %8144 = vmatmul.mubr.msk.f32.vlgmr.msra.gmra.mxu1 %vm1021_vm2, %v1683_v38 }
 0xb14   :  { %8166 = vmatpush3.msra.mxu1 %v1923_v7 }
 0xb15   :  { %8167 = vmatprep.subr.mxu1 %v1922_v14 }
 0xb16   :  { %8168 = vmatpush3.msra.mxu1 %v1922_v14 }
 0xb17   :  { %8169 = vmatprep.subr.mxu1 %v1921_v8 }
 0xb18   :  { %8170 = vmatpush3.msra.mxu1 %v1921_v8 }
 0xb19   :  { %8171 = vmatprep.subr.mxu1 %v1920_v9 }
 0xb1a   :  { %8172 = vmatpush3.msra.mxu1 %v1920_v9 }
 0xbd3   :  { %v8145_v44 = vpop.f32.mrf.mxu1 }
 0xbd4   :  { %v1773_v46 = vadd.f32 %v8145_v44, %v7499_v42 }
 0xbd5   :  { %v1767_v47 = vpop.f32.mrf.mxu1 }
 0xbd6   :  { %v1768_v48 = vadd.f32 %v7499_v42, %v1767_v47  ;;  %v1777_v51 = vmax.f32 %v1773_v46, 0.0 }
 0xbd8   :  { %v1776_v50 = vmax.f32 %v1768_v48, 0.0 }
 0xbda   :  { %8162 = vmatprep.mubr.msk.f32.mxu0 %vm1271_vm4, %v1776_v50 }
 0xbdb   :  { %8163 = vmatmul.mubr.msk.f32.vlgmr.msra.gmra.mxu0 %vm1271_vm4, %v1777_v51 }
 0xc9b   :  { %v8164_v54 = vpop.f32.mrf.mxu0 }
 0xc9c   :  { %v1871_v55 = vadd.f32 %v8164_v54, %v7502_v53 }
 0xc9d   :  { %v1865_v56 = vpop.f32.mrf.mxu0 }
 0xc9e   :  { %v1866_v57 = vadd.f32 %v7502_v53, %v1865_v56  ;;  %v1875_v59 = vadd.f32 %v1871_v55, %v1683_v38 }
 0xca0   :  { %v1881_v18 = vsel %vm1021_vm2, %v1875_v59, 0.0  ;;  %v1874_v60 = vadd.f32 %v1866_v57, %v1682_v34 }
 0xca1   :  { %1882 = vadd.xlane.f32.xlu0 %v1881_v18 }
 0xca2   :  { %v1878_v61 = vsel %vm1021_vm2, %v1874_v60, 0.0 }
 0xca3   :  { %1879 = vadd.xlane.f32.xlu1 %v1878_v61 }
 0xd2a   :  { %v1883_v62 = vpop.xlane.xlu0 %1882 }
 0xd2b   :  { %v1885_v63 = vmul.f32 0.03125, %v1883_v62 }
 0xd2c   :  { %v1880_v1 = vpop.xlane.xlu1 %1879 }
 0xd2d   :  { %v1887_v2 = vsub.f32 %v1875_v59, %v1885_v63  ;;  %v1884_v3 = vmul.f32 0.03125, %v1880_v1 }
 0xd2f   :  { %v1886_v4 = vsub.f32 %v1874_v60, %v1884_v3  ;;  %v1889_v5 = vmul.f32 %v1887_v2, %v1887_v2 }
 0xd31   :  { %v1893_v20 = vsel %vm1021_vm2, %v1889_v5, 0.0  ;;  %v1888_v6 = vmul.f32 %v1886_v4, %v1886_v4 }
 0xd32   :  { %1894 = vadd.xlane.f32.xlu0 %v1893_v20 }
 0xd33   :  { %v1890_v15 = vsel %vm1021_vm2, %v1888_v6, 0.0 }
 0xd34   :  { %1891 = vadd.xlane.f32.xlu1 %v1890_v15 }
 0xdbb   :  { %v1895_v10 = vpop.xlane.xlu0 %1894 }
 0xdbc   :  { %v1897_v11 = vmul.f32 0.03125, %v1895_v10 }
 0xdbd   :  { %v1892_v12 = vpop.xlane.xlu1 %1891 }
 0xdbe   :  { %v1899_v13 = vadd.f32 1e-05, %v1897_v11  ;;  %v1896_v16 = vmul.f32 0.03125, %v1892_v12 }
 0xdc0   :  { %8876 = vrsqrt.f32 %v1899_v13  ;;  %v1898_v17 = vadd.f32 1e-05, %v1896_v16 }
 0xdc2   :  { %8878 = vrsqrt.f32 %v1898_v17 }
 0xdcd   :  { %v8877_v19 = vpop.eup %8876 }
 0xdce   :  { %v1903_v22 = vmul.f32 %v8877_v19, %v1887_v2 }
 0xdcf   :  { %v8879_v23 = vpop.eup %8878 }
 0xdd0   :  { %v1902_v24 = vmul.f32 %v8879_v23, %v1886_v4  ;;  %v1911_v25 = vmul.f32 %v7505_v21, %v1903_v22 }
 0xdd2   :  { %v1910_v27 = vmul.f32 %v7505_v21, %v1902_v24  ;;  %v11028_v29 = vadd.f32 %v7506_v26, %v1911_v25 }
 0xdd4   :  { %v11026_v28 = vadd.f32 %v7506_v26, %v1910_v27 }
 0xdd6   :  { %8173 = vmatprep.mubr.msk.f32.mxu1 %vm1021_vm2, %v11026_v28 }
 0xdd7   :  { %8174 = vmatmul.mubr.msk.f32.vlgmr.msra.gmra.mxu1 %vm1021_vm2, %v11028_v29 }
 0xe97   :  { %v8175_v31 = vpop.f32.mrf.mxu1 }
 0xe98   :  { %v11034_v32 = vadd.f32 %v8175_v31, %v7507_v30 }
 0xe99   :  { %v2003_v33 = vpop.f32.mrf.mxu1 }
 0xe9a   :  { %v11036_v34 = vadd.f32 %v7507_v30, %v2003_v33  ;;  %2024 = vrot.lane.b32.xlu1 %v11034_v32, %s10301_s6 }
 0xe9c   :  { %2022 = vrot.lane.b32.xlu0 %v11036_v34, %s10301_s6  ;;  %8192 = vmatprep.mubr.msk.f32.mxu0 %vm1133_vm3, %v11036_v34 }
 0xe9e   :  { %2020 = vrot.lane.b32.xlu1 %v11034_v32, %s10300_s14 }
 0xea0   :  { %2016 = vrot.lane.b32.xlu0 %v11034_v32, %s10302_s17 }
 0xea2   :  { %2018 = vrot.lane.b32.xlu1 %v11036_v34, %s10300_s14 }
 0xea6   :  { %2014 = vrot.lane.b32.xlu1 %v11036_v34, %s10302_s17 }
 0xf0c   :  { %v11052_v36 = vpop.permute.xlu1 %2024 }
 0xf0d   :  { %2040 = vrot.lane.b32.xlu0 %v11052_v36, %s10303_s27 }
 0xf0e   :  { %v11056_v38 = vpop.permute.xlu0 %2022 }
 0xf0f   :  { %2038 = vrot.lane.b32.xlu1 %v11056_v38, %s10303_s27 }
 0xf10   :  { %v11060_v39 = vpop.permute.xlu1 %2020 }
 0xf11   :  { %2036 = vrot.lane.b32.xlu0 %v11060_v39, %s10303_s27 }
 0xf12   :  { %v11064_v40 = vpop.permute.xlu0 %2016 }
 0xf14   :  { %v11066_v41 = vpop.permute.xlu1 %2018 }
 0xf15   :  { %2034 = vrot.lane.b32.xlu1 %v11066_v41, %s10303_s27  ;;  %2032 = vrot.lane.b32.xlu0 %v11064_v40, %s10303_s27 }
 0xf18   :  { %v11072_v42 = vpop.permute.xlu1 %2014 }
 0xf19   :  { %2030 = vrot.lane.b32.xlu1 %v11072_v42, %s10303_s27  ;;  %2028 = vrot.lane.b32.xlu0 %v11034_v32, %s10303_s27 }
 0xf1d   :  { %2026 = vrot.lane.b32.xlu1 %v11036_v34, %s10303_s27 }
 0xf7f   :  { %v2041_v44 = vpop.permute.xlu0 %2040 }
 0xf80   :  { %8176 = vmatprep.subr.msk.mxu0 %vm1133_vm3, %v2041_v44 }
 0xf81   :  { %v2039_v46 = vpop.permute.xlu1 %2038  ;;  %8177 = vmatpush3.xpose.msk.msra.mxu0 %vm1133_vm3, %v2041_v44 }
 0xf82   :  { %8178 = vmatprep.subr.msk.mxu0 %vm1133_vm3, %v2039_v46 }
 0xf83   :  { %v2037_v47 = vpop.permute.xlu0 %2036 }
 0xf85   :  { %8179 = vmatpush3.xpose.msk.msra.mxu0 %vm1133_vm3, %v2039_v46 }
 0xf86   :  { %8180 = vmatprep.subr.msk.mxu0 %vm1133_vm3, %v2037_v47 }
 0xf87   :  { %v2035_v48 = vpop.permute.xlu1 %2034  ;;  %v2033_v50 = vpop.permute.xlu0 %2032 }
 0xf89   :  { %8181 = vmatpush3.xpose.msk.msra.mxu0 %vm1133_vm3, %v2037_v47 }
 0xf8a   :  { %8182 = vmatprep.subr.msk.mxu0 %vm1133_vm3, %v2035_v48 }
 0xf8b   :  { %v2031_v51 = vpop.permute.xlu1 %2030  ;;  %v2029_v53 = vpop.permute.xlu0 %2028 }
 0xf8d   :  { %8183 = vmatpush3.xpose.msk.msra.mxu0 %vm1133_vm3, %v2035_v48 }
 0xf8e   :  { %8184 = vmatprep.subr.msk.mxu0 %vm1133_vm3, %v2033_v50 }
 0xf8f   :  { %v2027_v54 = vpop.permute.xlu1 %2026 }
 0xf91   :  { %8185 = vmatpush3.xpose.msk.msra.mxu0 %vm1133_vm3, %v2033_v50 }
 0xf92   :  { %8186 = vmatprep.subr.msk.mxu0 %vm1133_vm3, %v2031_v51 }
 0xf95   :  { %8187 = vmatpush3.xpose.msk.msra.mxu0 %vm1133_vm3, %v2031_v51 }
 0xf96   :  { %8188 = vmatprep.subr.msk.mxu0 %vm1133_vm3, %v2029_v53 }
 0xf99   :  { %8189 = vmatpush3.xpose.msk.msra.mxu0 %vm1133_vm3, %v2029_v53 }
 0xf9a   :  { %8190 = vmatprep.subr.msk.mxu0 %vm1133_vm3, %v2027_v54 }
 0xf9d   :  { %8191 = vmatpush3.xpose.msk.msra.mxu0 %vm1133_vm3, %v2027_v54 }
 0xfa0   :  { %8193 = vmatmul.mubr.msk.f32.vlgmr.msra.gmra.mxu0 %vm1133_vm3, %v11034_v32 }
 0xfa1   :  { %8195 = vmatprep.mubr.msk.f32.mxu0 %vm1133_vm3, %v11072_v42 }
 0xfa4   :  { %8196 = vmatmul.mubr.msk.f32.gmra.mxu0 %vm1133_vm3, %v11064_v40 }
 0xfa5   :  { %8198 = vmatprep.mubr.msk.f32.mxu0 %vm1133_vm3, %v11066_v41 }
 0xfa8   :  { %8199 = vmatmul.mubr.msk.f32.gmra.mxu0 %vm1133_vm3, %v11060_v39 }
 0xfa9   :  { %8201 = vmatprep.mubr.msk.f32.mxu0 %vm1133_vm3, %v11056_v38 }
 0xfac   :  { %8202 = vmatmul.mubr.msk.f32.gmra.mxu0 %vm1133_vm3, %v11052_v36 }
0x1060   :  { %v8194_v55 = vpop.f32.mrf.mxu0 }
0x1061   :  { %v2146_v56 = vadd.f32 %v8194_v55, %v10879_v35 }
0x1062   :  { %v2140_v57 = vpop.f32.mrf.mxu0 }
0x1063   :  { %v2141_v59 = vadd.f32 %v2140_v57, %v10882_v37  ;;  %v2182_v18 = vsel %vm1271_vm4, %v2146_v56, -inf }
0x1064   :  { %2183 = vmax.xlane.f32.xlu1 %v2182_v18  ;;  %v8197_v60 = vpop.f32.mrf.mxu0 }
0x1065   :  { %v2179_v61 = vsel %vm1271_vm4, %v2141_v59, -inf  ;;  %v2156_v2 = vadd.f32 %v8197_v60, %v10892_v45 }
0x1066   :  { %v2150_v62 = vpop.f32.mrf.mxu0  ;;  %2180 = vmax.xlane.f32.xlu0 %v2179_v61 }
0x1067   :  { %v2151_v63 = vadd.f32 %v2150_v62, %v10888_v43  ;;  %v2188_v20 = vsel %vm1271_vm4, %v2156_v2, -inf }
0x1068   :  { %v8200_v1 = vpop.f32.mrf.mxu0 }
0x1069   :  { %v2185_v3 = vsel %vm1271_vm4, %v2151_v63, -inf  ;;  %v2166_v37 = vadd.f32 %v8200_v1, %v10901_v52 }
0x106a   :  { %v2160_v4 = vpop.f32.mrf.mxu0  ;;  %2186 = vmax.xlane.f32.xlu0 %v2185_v3 }
0x106b   :  { %v2161_v35 = vadd.f32 %v2160_v4, %v10896_v49  ;;  %v2194_v15 = vsel %vm1271_vm4, %v2166_v37, -inf }
0x106c   :  { %v8203_v6 = vpop.f32.mrf.mxu0 }
0x106d   :  { %v2191_v5 = vsel %vm1271_vm4, %v2161_v35, -inf  ;;  %v2176_v43 = vadd.f32 %v8203_v6, %v10908_v58 }
0x106e   :  { %2192 = vmax.xlane.f32.xlu1 %v2191_v5  ;;  %2189 = vmax.xlane.f32.xlu0 %v2188_v20  ;;  %v2170_v49 = vpop.f32.mrf.mxu0 }
0x106f   :  { %v2200_v45 = vsel %vm1271_vm4, %v2176_v43, -inf  ;;  %v11133_v52 = vadd.f32 %v2170_v49, %v10922_v0 }
0x1071   :  { %v2197_v58 = vsel %vm1271_vm4, %v11133_v52, -inf }
0x1072   :  { %2195 = vmax.xlane.f32.xlu0 %v2194_v15 }
0x1076   :  { %2201 = vmax.xlane.f32.xlu0 %v2200_v45 }
0x107f   :  { %2281 = vrot.lane.b32.xlu1 %v11052_v36, %s10304_s24 }
0x1083   :  { %2277 = vrot.lane.b32.xlu1 %v11060_v39, %s10304_s24 }
0x108c   :  { %2279 = vrot.lane.b32.xlu0 %v11056_v38, %s10304_s24 }
0x1090   :  { %2273 = vrot.lane.b32.xlu0 %v11064_v40, %s10304_s24 }
0x10a7   :  { %2198 = vmax.xlane.f32.xlu1 %v2197_v58 }
0x10b8   :  { %2275 = vrot.lane.b32.xlu1 %v11066_v41, %s10304_s24 }
0x10bc   :  { %2271 = vrot.lane.b32.xlu1 %v11072_v42, %s10304_s24 }
0x10ed   :  { %v2184_v7 = vpop.xlane.xlu1 %2183 }
0x10ee   :  { %v2204_v14 = vsub.f32 %v2146_v56, %v2184_v7 }
0x10ef   :  { %v2181_v8 = vpop.xlane.xlu0 %2180 }
0x10f0   :  { %v2213_v9 = vmul.f32 1.442695, %v2204_v14  ;;  %v2203_v10 = vsub.f32 %v2141_v59, %v2181_v8 }
0x10f2   :  { %8880 = vpow2.f32 %v2213_v9  ;;  %v2211_v11 = vmul.f32 1.442695, %v2203_v10 }
0x10f3   :  { %v2187_v12 = vpop.xlane.xlu0 %2186 }
0x10f4   :  { %8882 = vpow2.f32 %v2211_v11  ;;  %v2205_v0 = vsub.f32 %v2151_v63, %v2187_v12 }
0x10f6   :  { %v2215_v13 = vmul.f32 1.442695, %v2205_v0 }
0x10f7   :  { %v2193_v16 = vpop.xlane.xlu1 %2192  ;;  %v2190_v17 = vpop.xlane.xlu0 %2189 }
0x10f8   :  { %8884 = vpow2.f32 %v2215_v13  ;;  %v2207_v19 = vsub.f32 %v2161_v35, %v2193_v16  ;;  %v2206_v21 = vsub.f32 %v2156_v2, %v2190_v17  ;;  %v2453_v17 = vld [vmem:[%s13148_s25 + $0x18] sm:$0xff] }
0x10fa   :  { %v2219_v22 = vmul.f32 1.442695, %v2207_v19  ;;  %v2217_v23 = vmul.f32 1.442695, %v2206_v21  ;;  %v2452_v19 = vld [vmem:[%s13148_s25 + $0x10] sm:$0xff]  ;;  %v2451_v21 = vld [vmem:[%s13148_s25 + $0x8] sm:$0xff] }
0x10fb   :  { %v2282_v24 = vpop.permute.xlu1 %2281  ;;  %v2196_v25 = vpop.xlane.xlu0 %2195 }
0x10fc   :  { %8886 = vpow2.f32 %v2219_v22  ;;  %v2208_v26 = vsub.f32 %v2166_v37, %v2196_v25  ;;  %8204 = vmatprep.subr.mxu1 %v2282_v24  ;;  %v2450_v22 = vld [vmem:[%s13148_s25] sm:$0xff]  ;;  %s10321_s25 = smov 116  }
0x10fd   :  { %8888 = vpow2.f32 %v2217_v23  ;;  %8205 = vmatpush3.msra.mxu1 %v2282_v24 }
0x10fe   :  { %v2221_v27 = vmul.f32 1.442695, %v2208_v26 }
0x10ff   :  { %v11141_v30 = vpop.eup %8880  ;;  %v2202_v31 = vpop.xlane.xlu0 %2201 }
0x1100   :  { %8890 = vpow2.f32 %v2221_v27  ;;  %v2210_v33 = vsub.f32 %v2176_v43, %v2202_v31  ;;  %v2230_v36 = vsel %vm1271_vm4, %v11141_v30, 0.0  ;;  %v2278_v44 = vpop.permute.xlu1 %2277 }
0x1101   :  { %v8883_v38 = vpop.eup %8882  ;;  %2231 = vadd.xlane.f32.xlu0 %v2230_v36 }
0x1102   :  { %v2225_v39 = vmul.f32 1.442695, %v2210_v33  ;;  %v2227_v40 = vsel %vm1271_vm4, %v8883_v38, 0.0 }
0x1103   :  { %2228 = vadd.xlane.f32.xlu1 %v2227_v40  ;;  %v2280_v41 = vpop.permute.xlu0 %2279 }
0x1104   :  { %8892 = vpow2.f32 %v2225_v39  ;;  %8206 = vmatprep.subr.mxu1 %v2280_v41 }
0x1105   :  { %v11146_v42 = vpop.eup %8884  ;;  %8207 = vmatpush3.msra.mxu1 %v2280_v41 }
0x1106   :  { %8208 = vmatprep.subr.mxu1 %v2278_v44  ;;  %v2233_v46 = vsel %vm1271_vm4, %v11146_v42, 0.0 }
0x1107   :  { %2234 = vadd.xlane.f32.xlu1 %v2233_v46  ;;  %8209 = vmatpush3.msra.mxu1 %v2278_v44  ;;  %v2274_v61 = vpop.permute.xlu0 %2273 }
0x1109   :  { %v11150_v47 = vpop.eup %8886 }
0x110a   :  { %v8889_v48 = vpop.eup %8888  ;;  %v2239_v50 = vsel %vm1271_vm4, %v11150_v47, 0.0 }
0x110b   :  { %2240 = vadd.xlane.f32.xlu1 %v2239_v50  ;;  %v2236_v51 = vsel %vm1271_vm4, %v8889_v48, 0.0 }
0x110c   :  { %2237 = vadd.xlane.f32.xlu0 %v2236_v51 }
0x110d   :  { %v11155_v53 = vpop.eup %8890 }
0x110e   :  { %v2242_v54 = vsel %vm1271_vm4, %v11155_v53, 0.0 }
0x1110   :  { %2243 = vadd.xlane.f32.xlu0 %v2242_v54 }
0x1111   :  { %v11159_v55 = vpop.eup %8892 }
0x1112   :  { %v2248_v56 = vsel %vm1271_vm4, %v11159_v55, 0.0 }
0x1114   :  { %2249 = vadd.xlane.f32.xlu0 %v2248_v56 }
0x112a   :  { %2269 = vrot.lane.b32.xlu0 %v11034_v32, %s10304_s24 }
0x1130   :  { %v2199_v57 = vpop.xlane.xlu1 %2198 }
0x1131   :  { %v2209_v59 = vsub.f32 %v11133_v52, %v2199_v57 }
0x1133   :  { %v2223_v18 = vmul.f32 1.442695, %v2209_v59 }
0x1134   :  { %v2276_v60 = vpop.permute.xlu1 %2275 }
0x1135   :  { %8894 = vpow2.f32 %v2223_v18  ;;  %8210 = vmatprep.subr.mxu1 %v2276_v60 }
0x1136   :  { %8211 = vmatpush3.msra.mxu1 %v2276_v60 }
0x1137   :  { %8212 = vmatprep.subr.mxu1 %v2274_v61 }
0x1138   :  { %v2272_v62 = vpop.permute.xlu1 %2271  ;;  %8213 = vmatpush3.msra.mxu1 %v2274_v61 }
0x1139   :  { %8214 = vmatprep.subr.mxu1 %v2272_v62 }
0x113a   :  { %8215 = vmatpush3.msra.mxu1 %v2272_v62 }
0x1142   :  { %v8895_v63 = vpop.eup %8894 }
0x1143   :  { %v2245_v1 = vsel %vm1271_vm4, %v8895_v63, 0.0 }
0x1144   :  { %2246 = vadd.xlane.f32.xlu1 %v2245_v1 }
0x1155   :  { %2267 = vrot.lane.b32.xlu1 %v11036_v34, %s10304_s24 }
0x118a   :  { %v2232_v2 = vpop.xlane.xlu0 %2231 }
0x118c   :  { %v2229_v32 = vpop.xlane.xlu1 %2228 }
0x118d   :  { %8896 = vrcp.f32 %v2229_v32 }
0x118e   :  { %8898 = vrcp.f32 %v2232_v2 }
0x1190   :  { %v2235_v6 = vpop.xlane.xlu1 %2234 }
0x1191   :  { %8900 = vrcp.f32 %v2235_v6  ;;  %v2588_v6 = vld [vmem:[%s13149_s11] sm:$0xff] }
0x1194   :  { %v2241_v43 = vpop.xlane.xlu1 %2240 }
0x1195   :  { %v2238_v3 = vpop.xlane.xlu0 %2237 }
0x1196   :  { %8902 = vrcp.f32 %v2238_v3 }
0x1197   :  { %8904 = vrcp.f32 %v2241_v43  ;;  %v2829_v43 = vld [vmem:[%s13150_s20 + $0x18] sm:$0xff] }
0x1199   :  { %v2244_v4 = vpop.xlane.xlu0 %2243 }
0x119a   :  { %v8897_v35 = vpop.eup %8896  ;;  %8906 = vrcp.f32 %v2244_v4 }
0x119b   :  { %v2252_v37 = vmul.f32 %v8897_v35, %v8883_v38  ;;  %v8899_v15 = vpop.eup %8898 }
0x119c   :  { %v2254_v52 = vmul.f32 %v8899_v15, %v11141_v30  ;;  %v2688_v15 = vld [vmem:[%s13151_s21 + $0x30] sm:$0xff] }
0x119d   :  { %v2250_v5 = vpop.xlane.xlu0 %2249  ;;  %8220 = vmatprep.mubr.msk.f32.mxu1 %vm1271_vm4, %v2252_v37  ;;  %v2591_v37 = vld [vmem:[%s13149_s11 + $0x18] sm:$0xff] }
0x119e   :  { %8908 = vrcp.f32 %v2250_v5  ;;  %v8901_v45 = vpop.eup %8900  ;;  %v2590_v5 = vld [vmem:[%s13149_s11 + $0x10] sm:$0xff] }
0x119f   :  { %v2256_v7 = vmul.f32 %v8901_v45, %v11146_v42  ;;  %v2687_v45 = vld [vmem:[%s13151_s21 + $0x28] sm:$0xff] }
0x11a1   :  { %v2270_v20 = vpop.permute.xlu0 %2269 }
0x11a2   :  { %8216 = vmatprep.subr.mxu1 %v2270_v20 }
0x11a3   :  { %8217 = vmatpush3.msra.mxu1 %v2270_v20  ;;  %v8903_v58 = vpop.eup %8902  ;;  %v2589_v20 = vld [vmem:[%s13149_s11 + $0x8] sm:$0xff]  ;;  %s10322_s11 = smov 122  }
0x11a4   :  { %v8905_v14 = vpop.eup %8904  ;;  %v2258_v8 = vmul.f32 %v8903_v58, %v8889_v48 }
0x11a5   :  { %v2260_v10 = vmul.f32 %v8905_v14, %v11150_v47 }
0x11a7   :  { %v8907_v9 = vpop.eup %8906 }
0x11a8   :  { %v2262_v12 = vmul.f32 %v8907_v9, %v11155_v53  ;;  %v7534_v53 = vld [vmem:[#allocation19] ss:$0 sm:$0xff] }
0x11ab   :  { %v8909_v11 = vpop.eup %8908 }
0x11ac   :  { %v2266_v16 = vmul.f32 %v8909_v11, %v11159_v55  ;;  %v7537_v11 = vld [vmem:[#allocation21] ss:$0 sm:$0xff] }
0x11cd   :  { %v2247_v34 = vpop.xlane.xlu1 %2246 }
0x11ce   :  { %8910 = vrcp.f32 %v2247_v34  ;;  %v2689_v34 = vld [vmem:[%s13151_s21 + $0x38] sm:$0xff] }
0x11cf   :  { %8254 = vmatprep.subr.mxu0 %v2689_v34 }
0x11d0   :  { %8255 = vmatpush3.msra.mxu0 %v2689_v34 }
0x11d1   :  { %v2268_v49 = vpop.permute.xlu1 %2267  ;;  %8256 = vmatprep.subr.mxu0 %v2688_v15 }
0x11d2   :  { %8218 = vmatprep.subr.mxu1 %v2268_v49  ;;  %8257 = vmatpush3.msra.mxu0 %v2688_v15 }
0x11d3   :  { %8219 = vmatpush3.msra.mxu1 %v2268_v49  ;;  %v2686_v49 = vld [vmem:[%s13151_s21 + $0x20] sm:$0xff]  ;;  %8258 = vmatprep.subr.mxu0 %v2687_v45 }
0x11d4   :  { %8221 = vmatmul.mubr.msk.f32.vlgmr.msra.gmra.mxu1 %vm1271_vm4, %v2254_v52  ;;  %8232 = vmatprep.subr.mxu1 %v2453_v17 }
0x11d5   :  { %8223 = vmatprep.mubr.msk.f32.mxu1 %vm1271_vm4, %v2256_v7  ;;  %8233 = vmatpush3.msra.mxu1 %v2453_v17  ;;  %v2824_v17 = vld [vmem:[%s13152_s4] sm:$0xff]  ;;  %s10325_s4 = smov 118  }
0x11d6   :  { %8234 = vmatprep.subr.mxu1 %v2452_v19  ;;  %8259 = vmatpush3.msra.mxu0 %v2687_v45 }
0x11d7   :  { %8235 = vmatpush3.msra.mxu1 %v2452_v19  ;;  %8260 = vmatprep.subr.mxu0 %v2686_v49 }
0x11d8   :  { %8224 = vmatmul.mubr.msk.f32.gmra.mxu1 %vm1271_vm4, %v2258_v8  ;;  %8236 = vmatprep.subr.mxu1 %v2451_v21 }
0x11d9   :  { %8226 = vmatprep.mubr.msk.f32.mxu1 %vm1271_vm4, %v2260_v10  ;;  %8237 = vmatpush3.msra.mxu1 %v2451_v21 }
0x11da   :  { %8238 = vmatprep.subr.mxu1 %v2450_v22  ;;  %8261 = vmatpush3.msra.mxu0 %v2686_v49 }
0x11db   :  { %v8911_v0 = vpop.eup %8910  ;;  %8239 = vmatpush3.msra.mxu1 %v2450_v22 }
0x11dc   :  { %8227 = vmatmul.mubr.msk.f32.gmra.mxu1 %vm1271_vm4, %v2262_v12  ;;  %v2264_v13 = vmul.f32 %v8911_v0, %v8895_v63  ;;  %8243 = vmatprep.subr.mxu1 %v2591_v37  ;;  %v7538_v0 = vld [vmem:[#allocation22] ss:$0 sm:$0xff] }
0x11de   :  { %8229 = vmatprep.mubr.msk.f32.mxu1 %vm1271_vm4, %v2264_v13 }
0x11e0   :  { %8230 = vmatmul.mubr.msk.f32.gmra.mxu1 %vm1271_vm4, %v2266_v16 }
0x1294   :  { %v8222_v23 = vpop.f32.mrf.mxu1 }
0x1296   :  { %v2381_v24 = vpop.f32.mrf.mxu1 }
0x1298   :  { %v8225_v25 = vpop.f32.mrf.mxu1 }
0x1299   :  { %2424 = vrot.lane.b32.xlu1 %v8225_v25, %s10249_s22 }
0x129a   :  { %v2391_v26 = vpop.f32.mrf.mxu1 }
0x129b   :  { %2422 = vrot.lane.b32.xlu0 %v2391_v26, %s10249_s22  ;;  %v2828_v26 = vld [vmem:[%s13150_s20 + $0x10] sm:$0xff] }
0x129c   :  { %v8228_v27 = vpop.f32.mrf.mxu1 }
0x129d   :  { %2432 = vrot.lane.b32.xlu1 %v8228_v27, %s10305_s2  ;;  %v2827_v27 = vld [vmem:[%s13150_s20 + $0x8] sm:$0xff] }
0x129e   :  { %v2401_v30 = vpop.f32.mrf.mxu1 }
0x129f   :  { %2430 = vrot.lane.b32.xlu0 %v2401_v30, %s10305_s2  ;;  %v2826_v30 = vld [vmem:[%s13150_s20] sm:$0xff]  ;;  %s10323_s20 = smov 121  }
0x12a0   :  { %v8231_v31 = vpop.f32.mrf.mxu1 }
0x12a1   :  { %2440 = vrot.lane.b32.xlu1 %v8231_v31, %s10306_s7  ;;  %v2685_v31 = vld [vmem:[%s13151_s21 + $0x18] sm:$0xff] }
0x12a2   :  { %v2411_v33 = vpop.f32.mrf.mxu1  ;;  %8262 = vmatprep.subr.mxu0 %v2685_v31 }
0x12a3   :  { %2438 = vrot.lane.b32.xlu0 %v2411_v33, %s10306_s7  ;;  %8263 = vmatpush3.msra.mxu0 %v2685_v31  ;;  %v2684_v33 = vld [vmem:[%s13151_s21 + $0x10] sm:$0xff] }
0x12a4   :  { %8264 = vmatprep.subr.mxu0 %v2684_v33  ;;  %v11363_v31 = vld [vmem:[%s13143_s26 + $0x30] sm:$0xff] }
0x12a5   :  { %8265 = vmatpush3.msra.mxu0 %v2684_v33 }
0x130b   :  { %v2425_v36 = vpop.permute.xlu1 %2424 }
0x130c   :  { %v2445_v44 = vsel %vm1133_vm3, %v8222_v23, %v2425_v36  ;;  %v9084_v23 = vld [vmem:[#allocation2] sm:$0xff]  ;;  %v2683_v36 = vld [vmem:[%s13151_s21 + $0x8] sm:$0xff] }
0x130d   :  { %v2423_v38 = vpop.permute.xlu0 %2422  ;;  %8266 = vmatprep.subr.mxu0 %v2683_v36 }
0x130e   :  { %v2444_v41 = vsel %vm1133_vm3, %v2381_v24, %v2423_v38  ;;  %v11220_v24 = vadd.f32 %v9084_v23, %v2824_v17  ;;  %v2682_v38 = vld [vmem:[%s13151_s21] sm:$0xff]  ;;  %8267 = vmatpush3.msra.mxu0 %v2683_v36  ;;  %s10324_s21 = smov 119  }
0x130f   :  { %v2433_v39 = vpop.permute.xlu1 %2432  ;;  %8268 = vmatprep.subr.mxu0 %v2682_v38 }
0x1310   :  { %v2447_v48 = vsel %vm1539_vm5, %v2445_v44, %v2433_v39  ;;  %8269 = vmatpush3.msra.mxu0 %v2682_v38  ;;  %v7539_v39 = vld [vmem:[#allocation24] ss:$0 sm:$0xff] }
0x1311   :  { %v2431_v40 = vpop.permute.xlu0 %2430 }
0x1312   :  { %v2446_v46 = vsel %vm1539_vm5, %v2444_v41, %v2431_v40 }
0x1313   :  { %v2441_v42 = vpop.permute.xlu1 %2440 }
0x1314   :  { %v2449_v51 = vsel %vm1542_vm6, %v2447_v48, %v2441_v42  ;;  %v7547_v48 = vld [vmem:[#allocation30] ss:$0 sm:$0xff] }
0x1315   :  { %v2439_v47 = vpop.permute.xlu0 %2438 }
0x1316   :  { %v2448_v50 = vsel %vm1542_vm6, %v2446_v46, %v2439_v47 }
0x1317   :  { %8240 = vmatprep.mubr.msk.f32.mxu1 %vm1021_vm2, %v2448_v50 }
0x1318   :  { %8241 = vmatmul.mubr.msk.f32.vlgmr.msra.gmra.mxu1 %vm1021_vm2, %v2449_v51 }
0x1319   :  { %8244 = vmatpush3.msra.mxu1 %v2591_v37  ;;  %v11320_v37 = vld [vmem:[%s13143_s26 + $0x8] sm:$0xff] }
0x131a   :  { %8245 = vmatprep.subr.mxu1 %v2590_v5 }
0x131b   :  { %8246 = vmatpush3.msra.mxu1 %v2590_v5 }
0x131c   :  { %8247 = vmatprep.subr.mxu1 %v2589_v20 }
0x131d   :  { %8248 = vmatpush3.msra.mxu1 %v2589_v20 }
0x131e   :  { %8249 = vmatprep.subr.mxu1 %v2588_v6 }
0x131f   :  { %8250 = vmatpush3.msra.mxu1 %v2588_v6  ;;  %v11324_v6 = vld [vmem:[%s13143_s26] sm:$0xff] }
0x1320   :  { %8273 = vmatprep.subr.mxu1 %v2829_v43 }
0x13d8   :  { %v8242_v54 = vpop.f32.mrf.mxu1 }
0x13d9   :  { %v2539_v55 = vadd.f32 %v8242_v54, %v7534_v53 }
0x13da   :  { %v2533_v56 = vpop.f32.mrf.mxu1 }
0x13db   :  { %v2534_v57 = vadd.f32 %v7534_v53, %v2533_v56  ;;  %v2543_v59 = vadd.f32 %v2539_v55, %v11028_v29 }
0x13dd   :  { %v2549_v18 = vsel %vm1021_vm2, %v2543_v59, 0.0  ;;  %v2542_v60 = vadd.f32 %v2534_v57, %v11026_v28 }
0x13de   :  { %2550 = vadd.xlane.f32.xlu1 %v2549_v18 }
0x13df   :  { %v2546_v61 = vsel %vm1021_vm2, %v2542_v60, 0.0 }
0x13e0   :  { %2547 = vadd.xlane.f32.xlu0 %v2546_v61 }
0x1467   :  { %v2551_v62 = vpop.xlane.xlu1 %2550 }
0x1468   :  { %v2553_v63 = vmul.f32 0.03125, %v2551_v62 }
0x1469   :  { %v2548_v1 = vpop.xlane.xlu0 %2547 }
0x146a   :  { %v2552_v32 = vmul.f32 0.03125, %v2548_v1  ;;  %v2555_v2 = vsub.f32 %v2543_v59, %v2553_v63 }
0x146c   :  { %v2554_v3 = vsub.f32 %v2542_v60, %v2552_v32  ;;  %v2557_v35 = vmul.f32 %v2555_v2, %v2555_v2 }
0x146e   :  { %v2556_v4 = vmul.f32 %v2554_v3, %v2554_v3  ;;  %v2561_v28 = vsel %vm1021_vm2, %v2557_v35, 0.0 }
0x1470   :  { %v2558_v29 = vsel %vm1021_vm2, %v2556_v4, 0.0 }
0x1471   :  { %2559 = vadd.xlane.f32.xlu0 %v2558_v29 }
0x1475   :  { %2562 = vadd.xlane.f32.xlu0 %v2561_v28 }
0x14fa   :  { %v2560_v52 = vpop.xlane.xlu0 %2559 }
0x14fb   :  { %v2564_v58 = vmul.f32 0.03125, %v2560_v52  ;;  %v11330_v52 = vld [vmem:[%s13143_s26 + $0x10] sm:$0xff] }
0x14fd   :  { %v2566_v7 = vadd.f32 1e-05, %v2564_v58 }
0x14fe   :  { %v2563_v14 = vpop.xlane.xlu0 %2562 }
0x14ff   :  { %8912 = vrsqrt.f32 %v2566_v7  ;;  %v2565_v8 = vmul.f32 0.03125, %v2563_v14  ;;  %v11334_v14 = vld [vmem:[%s13143_s26 + $0x18] sm:$0xff] }
0x1501   :  { %v2567_v9 = vadd.f32 1e-05, %v2565_v8 }
0x1503   :  { %8914 = vrsqrt.f32 %v2567_v9 }
0x150c   :  { %v8913_v10 = vpop.eup %8912 }
0x150d   :  { %v2570_v12 = vmul.f32 %v8913_v10, %v2554_v3 }
0x150f   :  { %v2578_v13 = vmul.f32 %v7537_v11, %v2570_v12 }
0x1510   :  { %v8915_v16 = vpop.eup %8914 }
0x1511   :  { %v2571_v19 = vmul.f32 %v8915_v16, %v2555_v2  ;;  %v11216_v21 = vadd.f32 %v7538_v0, %v2578_v13 }
0x1513   :  { %v2579_v22 = vmul.f32 %v7537_v11, %v2571_v19  ;;  %8251 = vmatprep.mubr.msk.f32.mxu1 %vm1021_vm2, %v11216_v21  ;;  %v11339_v11 = vld [vmem:[%s13143_s26 + $0x20] sm:$0xff] }
0x1515   :  { %v11222_v25 = vadd.f32 %v7538_v0, %v2579_v22  ;;  %v11343_v0 = vld [vmem:[%s13143_s26 + $0x28] sm:$0xff]  ;;  %v11349_v22 = vld [vmem:[%s13143_s26 + $0x38] sm:$0xff] }
0x1517   :  { %8252 = vmatmul.mubr.msk.f32.vlgmr.msra.gmra.mxu1 %vm1021_vm2, %v11222_v25 }
0x1518   :  { %8274 = vmatpush3.msra.mxu1 %v2829_v43  ;;  %8281 = vmatprep.mubr.msk.f32.mxu1 %vm1021_vm2, %v11220_v24 }
0x1519   :  { %8275 = vmatprep.subr.mxu1 %v2828_v26 }
0x151a   :  { %8276 = vmatpush3.msra.mxu1 %v2828_v26 }
0x151b   :  { %8277 = vmatprep.subr.mxu1 %v2827_v27 }
0x151c   :  { %8278 = vmatpush3.msra.mxu1 %v2827_v27 }
0x151d   :  { %8279 = vmatprep.subr.mxu1 %v2826_v30 }
0x151e   :  { %8280 = vmatpush3.msra.mxu1 %v2826_v30 }
0x151f   :  { %8282 = vmatmul.mubr.msk.f32.vlgmr.msra.gmra.mxu1 %vm1021_vm2, %v11220_v24 }
0x15d7   :  { %v8253_v40 = vpop.f32.mrf.mxu1 }
0x15d8   :  { %v2677_v41 = vadd.f32 %v8253_v40, %v7539_v39 }
0x15d9   :  { %v2671_v42 = vpop.f32.mrf.mxu1 }
0x15da   :  { %v2672_v44 = vadd.f32 %v7539_v39, %v2671_v42  ;;  %v2681_v47 = vmax.f32 %v2677_v41, 0.0 }
0x15dc   :  { %v2680_v46 = vmax.f32 %v2672_v44, 0.0 }
0x15de   :  { %8270 = vmatprep.mubr.msk.f32.mxu0 %vm1271_vm4, %v2680_v46 }
0x15df   :  { %v8283_v50 = vpop.f32.mrf.mxu1  ;;  %8271 = vmatmul.mubr.msk.f32.vlgmr.msra.gmra.mxu0 %vm1271_vm4, %v2681_v47 }
0x15e0   :  { %v11239_v51 = vadd.f32 %v8283_v50, %v7547_v48 }
0x15e1   :  { %v2906_v53 = vpop.f32.mrf.mxu1 }
0x15e2   :  { %v11241_v54 = vadd.f32 %v7547_v48, %v2906_v53  ;;  %2927 = vrot.lane.b32.xlu1 %v11239_v51, %s10301_s6 }
0x15e4   :  { %2925 = vrot.lane.b32.xlu0 %v11241_v54, %s10301_s6  ;;  %8300 = vmatprep.mubr.msk.f32.mxu0 %vm1133_vm3, %v11241_v54 }
0x15e6   :  { %2923 = vrot.lane.b32.xlu1 %v11239_v51, %s10300_s14 }
0x15e8   :  { %2919 = vrot.lane.b32.xlu0 %v11239_v51, %s10302_s17 }
0x15ea   :  { %2921 = vrot.lane.b32.xlu1 %v11241_v54, %s10300_s14 }
0x15ee   :  { %2917 = vrot.lane.b32.xlu1 %v11241_v54, %s10302_s17 }
0x1654   :  { %v11257_v55 = vpop.permute.xlu1 %2927 }
0x1655   :  { %2943 = vrot.lane.b32.xlu0 %v11257_v55, %s10303_s27 }
0x1656   :  { %v11261_v56 = vpop.permute.xlu0 %2925 }
0x1657   :  { %2941 = vrot.lane.b32.xlu1 %v11261_v56, %s10303_s27 }
0x1658   :  { %v11265_v57 = vpop.permute.xlu1 %2923 }
0x1659   :  { %2939 = vrot.lane.b32.xlu0 %v11265_v57, %s10303_s27 }
0x165a   :  { %v11269_v59 = vpop.permute.xlu0 %2919 }
0x165c   :  { %v11271_v18 = vpop.permute.xlu1 %2921 }
0x165d   :  { %2937 = vrot.lane.b32.xlu1 %v11271_v18, %s10303_s27  ;;  %2935 = vrot.lane.b32.xlu0 %v11269_v59, %s10303_s27 }
0x1660   :  { %v11277_v60 = vpop.permute.xlu1 %2917 }
0x1661   :  { %2933 = vrot.lane.b32.xlu1 %v11277_v60, %s10303_s27  ;;  %2931 = vrot.lane.b32.xlu0 %v11239_v51, %s10303_s27 }
0x1665   :  { %2929 = vrot.lane.b32.xlu1 %v11241_v54, %s10303_s27 }
0x169f   :  { %v11315_v29 = vpop.f32.mrf.mxu0 }
0x16a1   :  { %v11317_v35 = vpop.f32.mrf.mxu0 }
0x16c7   :  { %v2944_v61 = vpop.permute.xlu0 %2943 }
0x16c8   :  { %8284 = vmatprep.subr.msk.mxu0 %vm1133_vm3, %v2944_v61 }
0x16c9   :  { %v2942_v62 = vpop.permute.xlu1 %2941  ;;  %8285 = vmatpush3.xpose.msk.msra.mxu0 %vm1133_vm3, %v2944_v61 }
0x16ca   :  { %8286 = vmatprep.subr.msk.mxu0 %vm1133_vm3, %v2942_v62 }
0x16cb   :  { %v2940_v63 = vpop.permute.xlu0 %2939 }
0x16cd   :  { %8287 = vmatpush3.xpose.msk.msra.mxu0 %vm1133_vm3, %v2942_v62 }
0x16ce   :  { %8288 = vmatprep.subr.msk.mxu0 %vm1133_vm3, %v2940_v63 }
0x16cf   :  { %v2938_v1 = vpop.permute.xlu1 %2937  ;;  %v2936_v32 = vpop.permute.xlu0 %2935 }
0x16d1   :  { %8289 = vmatpush3.xpose.msk.msra.mxu0 %vm1133_vm3, %v2940_v63 }
0x16d2   :  { %8290 = vmatprep.subr.msk.mxu0 %vm1133_vm3, %v2938_v1 }
0x16d3   :  { %v2934_v2 = vpop.permute.xlu1 %2933  ;;  %v2932_v3 = vpop.permute.xlu0 %2931 }
0x16d5   :  { %8291 = vmatpush3.xpose.msk.msra.mxu0 %vm1133_vm3, %v2938_v1 }
0x16d6   :  { %8292 = vmatprep.subr.msk.mxu0 %vm1133_vm3, %v2936_v32 }
0x16d7   :  { %v2930_v4 = vpop.permute.xlu1 %2929 }
0x16d9   :  { %8293 = vmatpush3.xpose.msk.msra.mxu0 %vm1133_vm3, %v2936_v32 }
0x16da   :  { %8294 = vmatprep.subr.msk.mxu0 %vm1133_vm3, %v2934_v2 }
0x16dd   :  { %8295 = vmatpush3.xpose.msk.msra.mxu0 %vm1133_vm3, %v2934_v2 }
0x16de   :  { %8296 = vmatprep.subr.msk.mxu0 %vm1133_vm3, %v2932_v3 }
0x16e1   :  { %8297 = vmatpush3.xpose.msk.msra.mxu0 %vm1133_vm3, %v2932_v3 }
0x16e2   :  { %8298 = vmatprep.subr.msk.mxu0 %vm1133_vm3, %v2930_v4 }
0x16e5   :  { %8299 = vmatpush3.xpose.msk.msra.mxu0 %vm1133_vm3, %v2930_v4 }
0x16e8   :  { %8301 = vmatmul.mubr.msk.f32.vlgmr.msra.gmra.mxu0 %vm1133_vm3, %v11239_v51 }
0x16e9   :  { %8303 = vmatprep.mubr.msk.f32.mxu0 %vm1133_vm3, %v11277_v60 }
0x16ec   :  { %8304 = vmatmul.mubr.msk.f32.gmra.mxu0 %vm1133_vm3, %v11269_v59 }
0x16ed   :  { %8306 = vmatprep.mubr.msk.f32.mxu0 %vm1133_vm3, %v11271_v18 }
0x16f0   :  { %8307 = vmatmul.mubr.msk.f32.gmra.mxu0 %vm1133_vm3, %v11265_v57 }
0x16f1   :  { %8309 = vmatprep.mubr.msk.f32.mxu0 %vm1133_vm3, %v11261_v56 }
0x16f4   :  { %8310 = vmatmul.mubr.msk.f32.gmra.mxu0 %vm1133_vm3, %v11257_v55 }
0x17a8   :  { %v8302_v28 = vpop.f32.mrf.mxu0 }
0x17a9   :  { %v3049_v5 = vadd.f32 %v11320_v37, %v8302_v28 }
0x17aa   :  { %v3043_v20 = vpop.f32.mrf.mxu0 }
0x17ab   :  { %v3044_v43 = vadd.f32 %v11324_v6, %v3043_v20  ;;  %v3085_v34 = vsel %vm1271_vm4, %v3049_v5, -inf }
0x17ac   :  { %3086 = vmax.xlane.f32.xlu1 %v3085_v34  ;;  %v8305_v15 = vpop.f32.mrf.mxu0 }
0x17ad   :  { %v3082_v45 = vsel %vm1271_vm4, %v3044_v43, -inf  ;;  %v3059_v8 = vadd.f32 %v11334_v14, %v8305_v15 }
0x17ae   :  { %v3053_v49 = vpop.f32.mrf.mxu0  ;;  %3083 = vmax.xlane.f32.xlu0 %v3082_v45 }
0x17af   :  { %v3054_v58 = vadd.f32 %v11330_v52, %v3053_v49  ;;  %v3091_v17 = vsel %vm1271_vm4, %v3059_v8, -inf }
0x17b0   :  { %v8308_v7 = vpop.f32.mrf.mxu0 }
0x17b1   :  { %v3088_v9 = vsel %vm1271_vm4, %v3054_v58, -inf  ;;  %v3069_v13 = vadd.f32 %v11343_v0, %v8308_v7 }
0x17b2   :  { %v3063_v10 = vpop.f32.mrf.mxu0  ;;  %3089 = vmax.xlane.f32.xlu0 %v3088_v9 }
0x17b3   :  { %v3064_v12 = vadd.f32 %v11339_v11, %v3063_v10  ;;  %v3097_v26 = vsel %vm1271_vm4, %v3069_v13, -inf }
0x17b4   :  { %v8311_v19 = vpop.f32.mrf.mxu0 }
0x17b5   :  { %v3094_v16 = vsel %vm1271_vm4, %v3064_v12, -inf  ;;  %v3079_v23 = vadd.f32 %v11349_v22, %v8311_v19 }
0x17b6   :  { %3095 = vmax.xlane.f32.xlu1 %v3094_v16  ;;  %3092 = vmax.xlane.f32.xlu0 %v3091_v17  ;;  %v3073_v30 = vpop.f32.mrf.mxu0 }
0x17b7   :  { %v3103_v27 = vsel %vm1271_vm4, %v3079_v23, -inf  ;;  %v11366_v33 = vadd.f32 %v11363_v31, %v3073_v30 }
0x17b9   :  { %v3100_v36 = vsel %vm1271_vm4, %v11366_v33, -inf }
0x17ba   :  { %3098 = vmax.xlane.f32.xlu0 %v3097_v26 }
0x17be   :  { %3104 = vmax.xlane.f32.xlu0 %v3103_v27 }
0x17c7   :  { %3184 = vrot.lane.b32.xlu1 %v11257_v55, %s10304_s24 }
0x17cb   :  { %3180 = vrot.lane.b32.xlu1 %v11265_v57, %s10304_s24 }
0x17d4   :  { %3182 = vrot.lane.b32.xlu0 %v11261_v56, %s10304_s24 }
0x17d8   :  { %3176 = vrot.lane.b32.xlu0 %v11269_v59, %s10304_s24 }
0x17ef   :  { %3101 = vmax.xlane.f32.xlu1 %v3100_v36 }
0x1800   :  { %3178 = vrot.lane.b32.xlu1 %v11271_v18, %s10304_s24 }
0x1804   :  { %3174 = vrot.lane.b32.xlu1 %v11277_v60, %s10304_s24 }
0x1835   :  { %v3087_v38 = vpop.xlane.xlu1 %3086 }
0x1836   :  { %v3107_v39 = vsub.f32 %v3049_v5, %v3087_v38 }
0x1837   :  { %v3084_v40 = vpop.xlane.xlu0 %3083 }
0x1838   :  { %v3116_v41 = vmul.f32 1.442695, %v3107_v39  ;;  %v3106_v42 = vsub.f32 %v3044_v43, %v3084_v40 }
0x183a   :  { %8916 = vpow2.f32 %v3116_v41  ;;  %v3114_v44 = vmul.f32 1.442695, %v3106_v42 }
0x183b   :  { %v3090_v46 = vpop.xlane.xlu0 %3089 }
0x183c   :  { %8918 = vpow2.f32 %v3114_v44  ;;  %v3108_v47 = vsub.f32 %v3054_v58, %v3090_v46 }
0x183e   :  { %v3118_v48 = vmul.f32 1.442695, %v3108_v47 }
0x183f   :  { %v3096_v50 = vpop.xlane.xlu1 %3095  ;;  %v3093_v53 = vpop.xlane.xlu0 %3092 }
0x1840   :  { %8920 = vpow2.f32 %v3118_v48  ;;  %v3110_v55 = vsub.f32 %v3064_v12, %v3096_v50  ;;  %v3109_v56 = vsub.f32 %v3059_v8, %v3093_v53 }
0x1842   :  { %v3122_v57 = vmul.f32 1.442695, %v3110_v55  ;;  %v3120_v59 = vmul.f32 1.442695, %v3109_v56 }
0x1843   :  { %v3185_v18 = vpop.permute.xlu1 %3184  ;;  %v3099_v60 = vpop.xlane.xlu0 %3098 }
0x1844   :  { %8922 = vpow2.f32 %v3122_v57  ;;  %v3111_v61 = vsub.f32 %v3069_v13, %v3099_v60  ;;  %8312 = vmatprep.subr.mxu1 %v3185_v18 }
0x1845   :  { %8924 = vpow2.f32 %v3120_v59  ;;  %8313 = vmatpush3.msra.mxu1 %v3185_v18 }
0x1846   :  { %v3124_v62 = vmul.f32 1.442695, %v3111_v61 }
0x1847   :  { %v11374_v63 = vpop.eup %8916  ;;  %v3105_v1 = vpop.xlane.xlu0 %3104 }
0x1848   :  { %8926 = vpow2.f32 %v3124_v62  ;;  %v3113_v32 = vsub.f32 %v3079_v23, %v3105_v1  ;;  %v3133_v2 = vsel %vm1271_vm4, %v11374_v63, 0.0  ;;  %v3181_v43 = vpop.permute.xlu1 %3180 }
0x1849   :  { %v8919_v3 = vpop.eup %8918  ;;  %3134 = vadd.xlane.f32.xlu0 %v3133_v2  ;;  %v3355_v2 = vld [vmem:[%s13153_s0 + $0x10] sm:$0xff] }
0x184a   :  { %v3128_v4 = vmul.f32 1.442695, %v3113_v32  ;;  %v3130_v28 = vsel %vm1271_vm4, %v8919_v3, 0.0  ;;  %v3356_v32 = vld [vmem:[%s13153_s0 + $0x18] sm:$0xff] }
0x184b   :  { %3131 = vadd.xlane.f32.xlu1 %v3130_v28  ;;  %v3183_v5 = vpop.permute.xlu0 %3182 }
0x184c   :  { %8928 = vpow2.f32 %v3128_v4  ;;  %8314 = vmatprep.subr.mxu1 %v3183_v5  ;;  %v3353_v4 = vld [vmem:[%s13153_s0] sm:$0xff] }
0x184d   :  { %v11379_v20 = vpop.eup %8920  ;;  %8315 = vmatpush3.msra.mxu1 %v3183_v5 }
0x184e   :  { %8316 = vmatprep.subr.mxu1 %v3181_v43  ;;  %v3136_v34 = vsel %vm1271_vm4, %v11379_v20, 0.0 }
0x184f   :  { %3137 = vadd.xlane.f32.xlu1 %v3136_v34  ;;  %8317 = vmatpush3.msra.mxu1 %v3181_v43  ;;  %v3177_v19 = vpop.permute.xlu0 %3176 }
0x1851   :  { %v11383_v15 = vpop.eup %8922 }
0x1852   :  { %v8925_v45 = vpop.eup %8924  ;;  %v3142_v49 = vsel %vm1271_vm4, %v11383_v15, 0.0 }
0x1853   :  { %3143 = vadd.xlane.f32.xlu1 %v3142_v49  ;;  %v3139_v58 = vsel %vm1271_vm4, %v8925_v45, 0.0 }
0x1854   :  { %3140 = vadd.xlane.f32.xlu0 %v3139_v58  ;;  %v7542_v58 = vld [vmem:[#allocation25] ss:$0 sm:$0xff] }
0x1855   :  { %v11388_v7 = vpop.eup %8926 }
0x1856   :  { %v3145_v8 = vsel %vm1271_vm4, %v11388_v7, 0.0 }
0x1858   :  { %3146 = vadd.xlane.f32.xlu0 %v3145_v8  ;;  %v2775_v8 = vadd.f32 %v11315_v29, %v7542_v58 }
0x1859   :  { %v11392_v9 = vpop.eup %8928 }
0x185a   :  { %v3151_v10 = vsel %vm1271_vm4, %v11392_v9, 0.0 }
0x185c   :  { %3152 = vadd.xlane.f32.xlu0 %v3151_v10  ;;  %v2779_v10 = vadd.f32 %v2775_v8, %v11222_v25 }
0x1872   :  { %3172 = vrot.lane.b32.xlu0 %v11239_v51, %s10304_s24 }
0x1878   :  { %v3102_v12 = vpop.xlane.xlu1 %3101 }
0x1879   :  { %v3112_v13 = vsub.f32 %v11366_v33, %v3102_v12 }
0x187b   :  { %v3126_v16 = vmul.f32 1.442695, %v3112_v13  ;;  %v2785_v13 = vsel %vm1021_vm2, %v2779_v10, 0.0 }
0x187c   :  { %v3179_v17 = vpop.permute.xlu1 %3178 }
0x187d   :  { %8930 = vpow2.f32 %v3126_v16  ;;  %8318 = vmatprep.subr.mxu1 %v3179_v17 }
0x187e   :  { %8319 = vmatpush3.msra.mxu1 %v3179_v17 }
0x187f   :  { %8320 = vmatprep.subr.mxu1 %v3177_v19 }
0x1880   :  { %v3175_v23 = vpop.permute.xlu1 %3174  ;;  %8321 = vmatpush3.msra.mxu1 %v3177_v19 }
0x1881   :  { %8322 = vmatprep.subr.mxu1 %v3175_v23 }
0x1882   :  { %8323 = vmatpush3.msra.mxu1 %v3175_v23 }
0x188a   :  { %v8931_v26 = vpop.eup %8930 }
0x188b   :  { %v3148_v27 = vsel %vm1271_vm4, %v8931_v26, 0.0 }
0x188c   :  { %3149 = vadd.xlane.f32.xlu1 %v3148_v27 }
0x189d   :  { %3170 = vrot.lane.b32.xlu1 %v11241_v54, %s10304_s24 }
0x18d2   :  { %v3135_v30 = vpop.xlane.xlu0 %3134 }
0x18d4   :  { %v3132_v51 = vpop.xlane.xlu1 %3131 }
0x18d5   :  { %8932 = vrcp.f32 %v3132_v51 }
0x18d6   :  { %8934 = vrcp.f32 %v3135_v30 }
0x18d8   :  { %v3138_v42 = vpop.xlane.xlu1 %3137 }
0x18d9   :  { %8936 = vrcp.f32 %v3138_v42 }
0x18dc   :  { %v3144_v44 = vpop.xlane.xlu1 %3143 }
0x18dd   :  { %v3141_v33 = vpop.xlane.xlu0 %3140 }
0x18de   :  { %8938 = vrcp.f32 %v3141_v33 }
0x18df   :  { %8940 = vrcp.f32 %v3144_v44  ;;  %v7574_v44 = vld [vmem:[#allocation31] ss:$0 sm:$0xff] }
0x18e1   :  { %v3147_v36 = vpop.xlane.xlu0 %3146 }
0x18e2   :  { %v8933_v38 = vpop.eup %8932  ;;  %8942 = vrcp.f32 %v3147_v36 }
0x18e3   :  { %v3155_v39 = vmul.f32 %v8933_v38, %v8919_v3  ;;  %v8935_v46 = vpop.eup %8934  ;;  %v3354_v3 = vld [vmem:[%s13153_s0 + $0x8] sm:$0xff]  ;;  %s10326_s0 = smov 117  }
0x18e4   :  { %v3157_v50 = vmul.f32 %v8935_v46, %v11374_v63 }
0x18e5   :  { %v3153_v40 = vpop.xlane.xlu0 %3152  ;;  %8328 = vmatprep.mubr.msk.f32.mxu1 %vm1271_vm4, %v3155_v39 }
0x18e6   :  { %8944 = vrcp.f32 %v3153_v40  ;;  %v8937_v47 = vpop.eup %8936 }
0x18e7   :  { %v3159_v55 = vmul.f32 %v8937_v47, %v11379_v20 }
0x18e9   :  { %v3173_v41 = vpop.permute.xlu0 %3172 }
0x18ea   :  { %8324 = vmatprep.subr.mxu1 %v3173_v41 }
0x18eb   :  { %8325 = vmatpush3.msra.mxu1 %v3173_v41  ;;  %v8939_v53 = vpop.eup %8938 }
0x18ec   :  { %v8941_v56 = vpop.eup %8940  ;;  %v3161_v57 = vmul.f32 %v8939_v53, %v8925_v45 }
0x18ed   :  { %v3163_v18 = vmul.f32 %v8941_v56, %v11383_v15 }
0x18ef   :  { %v8943_v59 = vpop.eup %8942 }
0x18f0   :  { %v3165_v61 = vmul.f32 %v8943_v59, %v11388_v7  ;;  %v2770_v7 = vadd.f32 %v7542_v58, %v11317_v35 }
0x18f3   :  { %v8945_v60 = vpop.eup %8944 }
0x18f4   :  { %v3169_v1 = vmul.f32 %v8945_v60, %v11392_v9  ;;  %v2778_v9 = vadd.f32 %v2770_v7, %v11216_v21 }
0x18f6   :  { %v2782_v12 = vsel %vm1021_vm2, %v2778_v9, 0.0 }
0x1915   :  { %v3150_v54 = vpop.xlane.xlu1 %3149 }
0x1916   :  { %8946 = vrcp.f32 %v3150_v54 }
0x1919   :  { %v3171_v48 = vpop.permute.xlu1 %3170 }
0x191a   :  { %8326 = vmatprep.subr.mxu1 %v3171_v48 }
0x191b   :  { %8327 = vmatpush3.msra.mxu1 %v3171_v48 }
0x191c   :  { %8329 = vmatmul.mubr.msk.f32.vlgmr.msra.gmra.mxu1 %vm1271_vm4, %v3157_v50  ;;  %8340 = vmatprep.subr.mxu1 %v3356_v32 }
0x191d   :  { %8331 = vmatprep.mubr.msk.f32.mxu1 %vm1271_vm4, %v3159_v55  ;;  %8341 = vmatpush3.msra.mxu1 %v3356_v32 }
0x191e   :  { %8342 = vmatprep.subr.mxu1 %v3355_v2 }
0x191f   :  { %8343 = vmatpush3.msra.mxu1 %v3355_v2 }
0x1920   :  { %8332 = vmatmul.mubr.msk.f32.gmra.mxu1 %vm1271_vm4, %v3161_v57  ;;  %8344 = vmatprep.subr.mxu1 %v3354_v3 }
0x1921   :  { %8334 = vmatprep.mubr.msk.f32.mxu1 %vm1271_vm4, %v3163_v18  ;;  %8345 = vmatpush3.msra.mxu1 %v3354_v3 }
0x1922   :  { %8346 = vmatprep.subr.mxu1 %v3353_v4 }
0x1923   :  { %v8947_v62 = vpop.eup %8946  ;;  %8347 = vmatpush3.msra.mxu1 %v3353_v4  ;;  %v3586_v4 = vld [vmem:[%s13154_s12 + $0x18] sm:$0xff] }
0x1924   :  { %8335 = vmatmul.mubr.msk.f32.gmra.mxu1 %vm1271_vm4, %v3165_v61  ;;  %v3167_v63 = vmul.f32 %v8947_v62, %v8931_v26  ;;  %8362 = vmatprep.subr.mxu0 %v3586_v4 }
0x1925   :  { %8363 = vmatpush3.msra.mxu0 %v3586_v4 }
0x1926   :  { %8337 = vmatprep.mubr.msk.f32.mxu1 %vm1271_vm4, %v3167_v63 }
0x1928   :  { %8338 = vmatmul.mubr.msk.f32.gmra.mxu1 %vm1271_vm4, %v3169_v1  ;;  %v7545_v1 = vld [vmem:[#allocation27] ss:$0 sm:$0xff] }
0x19dc   :  { %v8330_v28 = vpop.f32.mrf.mxu1 }
0x19de   :  { %v3284_v5 = vpop.f32.mrf.mxu1 }
0x19e0   :  { %v8333_v20 = vpop.f32.mrf.mxu1 }
0x19e1   :  { %3327 = vrot.lane.b32.xlu1 %v8333_v20, %s10249_s22  ;;  %v3583_v20 = vld [vmem:[%s13154_s12] sm:$0xff] }
0x19e2   :  { %v3294_v43 = vpop.f32.mrf.mxu1 }
0x19e3   :  { %3325 = vrot.lane.b32.xlu0 %v3294_v43, %s10249_s22 }
0x19e4   :  { %v8336_v34 = vpop.f32.mrf.mxu1 }
0x19e5   :  { %3335 = vrot.lane.b32.xlu1 %v8336_v34, %s10305_s2 }
0x19e6   :  { %v3304_v15 = vpop.f32.mrf.mxu1 }
0x19e7   :  { %3333 = vrot.lane.b32.xlu0 %v3304_v15, %s10305_s2 }
0x19e8   :  { %v8339_v45 = vpop.f32.mrf.mxu1 }
0x19e9   :  { %3343 = vrot.lane.b32.xlu1 %v8339_v45, %s10306_s7 }
0x19ea   :  { %v3314_v49 = vpop.f32.mrf.mxu1 }
0x19eb   :  { %3341 = vrot.lane.b32.xlu0 %v3314_v49, %s10306_s7 }
0x1a0a   :  { %2783 = vadd.xlane.f32.xlu0 %v2782_v12 }
0x1a0d   :  { %2786 = vadd.xlane.f32.xlu1 %v2785_v13 }
0x1a53   :  { %v3328_v16 = vpop.permute.xlu1 %3327 }
0x1a54   :  { %v3348_v35 = vsel %vm1133_vm3, %v8330_v28, %v3328_v16  ;;  %v3585_v28 = vld [vmem:[%s13154_s12 + $0x10] sm:$0xff] }
0x1a55   :  { %v3326_v17 = vpop.permute.xlu0 %3325  ;;  %8364 = vmatprep.subr.mxu0 %v3585_v28 }
0x1a56   :  { %v3347_v26 = vsel %vm1133_vm3, %v3284_v5, %v3326_v17  ;;  %8365 = vmatpush3.msra.mxu0 %v3585_v28  ;;  %v3584_v5 = vld [vmem:[%s13154_s12 + $0x8] sm:$0xff]  ;;  %s10327_s12 = smov 115  }
0x1a57   :  { %v3336_v19 = vpop.permute.xlu1 %3335  ;;  %8366 = vmatprep.subr.mxu0 %v3584_v5 }
0x1a58   :  { %v3350_v25 = vsel %vm1539_vm5, %v3348_v35, %v3336_v19  ;;  %8367 = vmatpush3.msra.mxu0 %v3584_v5  ;;  %v3494_v19 = vld [vmem:[%s13155_s15 + $0x18] sm:$0xff] }
0x1a59   :  { %v3334_v23 = vpop.permute.xlu0 %3333  ;;  %8368 = vmatprep.subr.mxu0 %v3583_v20  ;;  %8351 = vmatprep.subr.mxu1 %v3494_v19 }
0x1a5a   :  { %v3349_v29 = vsel %vm1539_vm5, %v3347_v26, %v3334_v23  ;;  %8369 = vmatpush3.msra.mxu0 %v3583_v20  ;;  %v3493_v23 = vld [vmem:[%s13155_s15 + $0x10] sm:$0xff] }
0x1a5b   :  { %v3344_v27 = vpop.permute.xlu1 %3343 }
0x1a5c   :  { %v3352_v30 = vsel %vm1542_vm6, %v3350_v25, %v3344_v27  ;;  %v3492_v27 = vld [vmem:[%s13155_s15 + $0x8] sm:$0xff] }
0x1a5d   :  { %v3342_v21 = vpop.permute.xlu0 %3341 }
0x1a5e   :  { %v3351_v51 = vsel %vm1542_vm6, %v3349_v29, %v3342_v21  ;;  %v3491_v21 = vld [vmem:[%s13155_s15] sm:$0xff]  ;;  %s10328_s15 = smov 114  }
0x1a5f   :  { %8348 = vmatprep.mubr.msk.f32.mxu1 %vm1021_vm2, %v3351_v51 }
0x1a60   :  { %8349 = vmatmul.mubr.msk.f32.vlgmr.msra.gmra.mxu1 %vm1021_vm2, %v3352_v30 }
0x1a61   :  { %8352 = vmatpush3.msra.mxu1 %v3494_v19 }
0x1a62   :  { %8353 = vmatprep.subr.mxu1 %v3493_v23 }
0x1a63   :  { %8354 = vmatpush3.msra.mxu1 %v3493_v23 }
0x1a64   :  { %8355 = vmatprep.subr.mxu1 %v3492_v27 }
0x1a65   :  { %8356 = vmatpush3.msra.mxu1 %v3492_v27 }
0x1a66   :  { %8357 = vmatprep.subr.mxu1 %v3491_v21 }
0x1a67   :  { %8358 = vmatpush3.msra.mxu1 %v3491_v21 }
0x1a93   :  { %v2784_v33 = vpop.xlane.xlu0 %2783 }
0x1a94   :  { %v2788_v36 = vmul.f32 0.03125, %v2784_v33 }
0x1a96   :  { %v2790_v38 = vsub.f32 %v2778_v9, %v2788_v36  ;;  %v2787_v41 = vpop.xlane.xlu1 %2786 }
0x1a97   :  { %v2789_v46 = vmul.f32 0.03125, %v2787_v41 }
0x1a98   :  { %v2792_v39 = vmul.f32 %v2790_v38, %v2790_v38 }
0x1a99   :  { %v2791_v56 = vsub.f32 %v2779_v10, %v2789_v46 }
0x1a9a   :  { %v2794_v40 = vsel %vm1021_vm2, %v2792_v39, 0.0 }
0x1a9b   :  { %2795 = vadd.xlane.f32.xlu1 %v2794_v40  ;;  %v2793_v61 = vmul.f32 %v2791_v56, %v2791_v56  ;;  %v7577_v40 = vld [vmem:[#allocation33] ss:$0 sm:$0xff] }
0x1a9d   :  { %v2797_v62 = vsel %vm1021_vm2, %v2793_v61, 0.0 }
0x1b20   :  { %v8350_v42 = vpop.f32.mrf.mxu1 }
0x1b21   :  { %v3442_v47 = vadd.f32 %v8350_v42, %v7574_v44  ;;  %v7578_v42 = vld [vmem:[#allocation34] ss:$0 sm:$0xff] }
0x1b22   :  { %v3436_v54 = vpop.f32.mrf.mxu1 }
0x1b23   :  { %v3437_v48 = vadd.f32 %v7574_v44, %v3436_v54  ;;  %v3446_v57 = vadd.f32 %v3442_v47, %v11220_v24 }
0x1b24   :  { %v2796_v50 = vpop.xlane.xlu1 %2795 }
0x1b25   :  { %v3445_v53 = vadd.f32 %v3437_v48, %v11220_v24  ;;  %v2800_v55 = vmul.f32 0.03125, %v2796_v50  ;;  %v3452_v60 = vsel %vm1021_vm2, %v3446_v57, 0.0  ;;  %v7546_v24 = vld [vmem:[#allocation28] ss:$0 sm:$0xff] }
0x1b27   :  { %v2802_v59 = vadd.f32 1e-05, %v2800_v55  ;;  %v3449_v18 = vsel %vm1021_vm2, %v3445_v53, 0.0 }
0x1b28   :  { %3450 = vadd.xlane.f32.xlu0 %v3449_v18 }
0x1b29   :  { %8948 = vrsqrt.f32 %v2802_v59 }
0x1b2c   :  { %3453 = vadd.xlane.f32.xlu0 %v3452_v60 }
0x1b30   :  { %2798 = vadd.xlane.f32.xlu0 %v2797_v62 }
0x1b36   :  { %v8949_v63 = vpop.eup %8948 }
0x1b37   :  { %v2806_v32 = vmul.f32 %v8949_v63, %v2790_v38 }
0x1b39   :  { %v2814_v2 = vmul.f32 %v7545_v1, %v2806_v32  ;;  %v7579_v32 = vld [vmem:[#allocation36] ss:$0 sm:$0xff] }
0x1b3b   :  { %v11445_v3 = vadd.f32 %v7546_v24, %v2814_v2 }
0x1b3d   :  { %8370 = vmatprep.mubr.msk.f32.mxu0 %vm1021_vm2, %v11445_v3 }
0x1bb1   :  { %v3451_v43 = vpop.xlane.xlu0 %3450 }
0x1bb2   :  { %v3455_v34 = vmul.f32 0.03125, %v3451_v43 }
0x1bb4   :  { %v3457_v15 = vsub.f32 %v3445_v53, %v3455_v34  ;;  %v7582_v53 = vld [vmem:[#allocation37] ss:$0 sm:$0xff] }
0x1bb5   :  { %v3454_v45 = vpop.xlane.xlu0 %3453 }
0x1bb6   :  { %v3456_v49 = vmul.f32 0.03125, %v3454_v45  ;;  %v3459_v58 = vmul.f32 %v3457_v15, %v3457_v15 }
0x1bb8   :  { %v3458_v7 = vsub.f32 %v3446_v57, %v3456_v49  ;;  %v3461_v8 = vsel %vm1021_vm2, %v3459_v58, 0.0 }
0x1bb9   :  { %3462 = vadd.xlane.f32.xlu1 %v3461_v8  ;;  %v2799_v9 = vpop.xlane.xlu0 %2798 }
0x1bba   :  { %v2801_v10 = vmul.f32 0.03125, %v2799_v9  ;;  %v3460_v12 = vmul.f32 %v3458_v7, %v3458_v7 }
0x1bbc   :  { %v2803_v13 = vadd.f32 1e-05, %v2801_v10  ;;  %v3464_v16 = vsel %vm1021_vm2, %v3460_v12, 0.0 }
0x1bbd   :  { %3465 = vadd.xlane.f32.xlu0 %v3464_v16 }
0x1bbe   :  { %8950 = vrsqrt.f32 %v2803_v13 }
0x1bcb   :  { %v8951_v17 = vpop.eup %8950 }
0x1bcc   :  { %v2807_v26 = vmul.f32 %v8951_v17, %v2791_v56 }
0x1bce   :  { %v2815_v35 = vmul.f32 %v7545_v1, %v2807_v26 }
0x1bd0   :  { %v11458_v29 = vadd.f32 %v7546_v24, %v2815_v35 }
0x1bd2   :  { %8371 = vmatmul.mubr.msk.f32.vlgmr.msra.gmra.mxu0 %vm1021_vm2, %v11458_v29 }
0x1c42   :  { %v3463_v25 = vpop.xlane.xlu1 %3462 }
0x1c43   :  { %v3467_v51 = vmul.f32 0.03125, %v3463_v25 }
0x1c45   :  { %v3469_v30 = vadd.f32 1e-05, %v3467_v51 }
0x1c46   :  { %v3466_v33 = vpop.xlane.xlu0 %3465 }
0x1c47   :  { %8952 = vrsqrt.f32 %v3469_v30  ;;  %v3468_v36 = vmul.f32 0.03125, %v3466_v33 }
0x1c49   :  { %v3470_v38 = vadd.f32 1e-05, %v3468_v36 }
0x1c4b   :  { %8954 = vrsqrt.f32 %v3470_v38 }
0x1c54   :  { %v8953_v39 = vpop.eup %8952 }
0x1c55   :  { %v3473_v41 = vmul.f32 %v8953_v39, %v3457_v15 }
0x1c57   :  { %v3481_v44 = vmul.f32 %v7577_v40, %v3473_v41 }
0x1c58   :  { %v8955_v54 = vpop.eup %8954 }
0x1c59   :  { %v3474_v46 = vmul.f32 %v8955_v54, %v3458_v7  ;;  %v11463_v47 = vadd.f32 %v7578_v42, %v3481_v44 }
0x1c5b   :  { %v3482_v48 = vmul.f32 %v7577_v40, %v3474_v46  ;;  %8359 = vmatprep.mubr.msk.f32.mxu1 %vm1021_vm2, %v11463_v47 }
0x1c5d   :  { %v11467_v50 = vadd.f32 %v7578_v42, %v3482_v48 }
0x1c5f   :  { %8360 = vmatmul.mubr.msk.f32.vlgmr.msra.gmra.mxu1 %vm1021_vm2, %v11467_v50 }
0x1c92   :  { %v8372_v55 = vpop.f32.mrf.mxu0 }
0x1c93   :  { %v11471_v56 = vadd.f32 %v8372_v55, %v7582_v53 }
0x1c94   :  { %v3666_v57 = vpop.f32.mrf.mxu0 }
0x1c95   :  { %v11473_v59 = vadd.f32 %v7582_v53, %v3666_v57  ;;  %3701 = vrot.lane.b32.xlu1 %v11471_v56, %s10301_s6 }
0x1c97   :  { %3699 = vrot.lane.b32.xlu0 %v11473_v59, %s10301_s6 }
0x1c99   :  { %3697 = vrot.lane.b32.xlu1 %v11471_v56, %s10300_s14 }
0x1c9b   :  { %3693 = vrot.lane.b32.xlu0 %v11471_v56, %s10302_s17 }
0x1c9d   :  { %3695 = vrot.lane.b32.xlu1 %v11473_v59, %s10300_s14 }
0x1ca1   :  { %3691 = vrot.lane.b32.xlu1 %v11473_v59, %s10302_s17 }
0x1d07   :  { %v11487_v18 = vpop.permute.xlu1 %3701 }
0x1d08   :  { %8373 = vmatprep.subr.msk.mxu1 %vm1133_vm3, %v11487_v18 }
0x1d09   :  { %8374 = vmatpush3.xpose.msk.msra.mxu1 %vm1133_vm3, %v11487_v18  ;;  %v11493_v60 = vpop.permute.xlu0 %3699 }
0x1d0a   :  { %8375 = vmatprep.subr.msk.mxu1 %vm1133_vm3, %v11493_v60 }
0x1d0b   :  { %v11497_v61 = vpop.permute.xlu1 %3697 }
0x1d0d   :  { %8376 = vmatpush3.xpose.msk.msra.mxu1 %vm1133_vm3, %v11493_v60  ;;  %v11509_v63 = vpop.permute.xlu0 %3693 }
0x1d0e   :  { %8377 = vmatprep.subr.msk.mxu1 %vm1133_vm3, %v11497_v61 }
0x1d0f   :  { %v11503_v62 = vpop.permute.xlu1 %3695 }
0x1d11   :  { %8378 = vmatpush3.xpose.msk.msra.mxu1 %vm1133_vm3, %v11497_v61 }
0x1d12   :  { %8379 = vmatprep.subr.msk.mxu1 %vm1133_vm3, %v11503_v62 }
0x1d13   :  { %v11515_v1 = vpop.permute.xlu1 %3691 }
0x1d15   :  { %8380 = vmatpush3.xpose.msk.msra.mxu1 %vm1133_vm3, %v11503_v62 }
0x1d16   :  { %8381 = vmatprep.subr.msk.mxu1 %vm1133_vm3, %v11509_v63 }
0x1d19   :  { %8382 = vmatpush3.xpose.msk.msra.mxu1 %vm1133_vm3, %v11509_v63 }
0x1d1a   :  { %8383 = vmatprep.subr.msk.mxu1 %vm1133_vm3, %v11515_v1 }
0x1d1d   :  { %8384 = vmatpush3.xpose.msk.msra.mxu1 %vm1133_vm3, %v11515_v1 }
0x1d1e   :  { %8385 = vmatprep.subr.msk.mxu1 %vm1133_vm3, %v11471_v56 }
0x1d1f   :  { %v8361_v24 = vpop.f32.mrf.mxu1 }
0x1d20   :  { %v3580_v2 = vadd.f32 %v8361_v24, %v7579_v32 }
0x1d21   :  { %v3574_v4 = vpop.f32.mrf.mxu1  ;;  %8386 = vmatpush3.xpose.msk.msra.mxu1 %vm1133_vm3, %v11471_v56 }
0x1d22   :  { %v3575_v28 = vadd.f32 %v7579_v32, %v3574_v4  ;;  %3679 = vrot.lane.b32.xlu1 %v3580_v2, %s10302_s17  ;;  %8387 = vmatprep.subr.msk.mxu1 %vm1133_vm3, %v11473_v59 }
0x1d24   :  { %3677 = vrot.lane.b32.xlu0 %v3575_v28, %s10302_s17  ;;  %8389 = vmatprep.mubr.msk.f32.mxu1 %vm1133_vm3, %v3575_v28 }
0x1d25   :  { %8388 = vmatpush3.xpose.msk.msra.mxu1 %vm1133_vm3, %v11473_v59 }
0x1d26   :  { %3683 = vrot.lane.b32.xlu1 %v3580_v2, %s10300_s14 }
0x1d28   :  { %3681 = vrot.lane.b32.xlu0 %v3575_v28, %s10300_s14  ;;  %8390 = vmatmul.mubr.msk.f32.vlgmr.msra.gmra.mxu1 %vm1133_vm3, %v3580_v2 }
0x1d2a   :  { %3687 = vrot.lane.b32.xlu1 %v3580_v2, %s10301_s6 }
0x1d2c   :  { %3685 = vrot.lane.b32.xlu0 %v3575_v28, %s10301_s6 }
0x1d94   :  { %v3680_v5 = vpop.permute.xlu1 %3679 }
0x1d96   :  { %v3678_v20 = vpop.permute.xlu0 %3677 }
0x1d97   :  { %8392 = vmatprep.mubr.msk.f32.mxu1 %vm1133_vm3, %v3678_v20 }
0x1d98   :  { %8393 = vmatmul.mubr.msk.f32.gmra.mxu1 %vm1133_vm3, %v3680_v5  ;;  %v3684_v43 = vpop.permute.xlu1 %3683 }
0x1d9a   :  { %v3682_v34 = vpop.permute.xlu0 %3681 }
0x1d9b   :  { %8395 = vmatprep.mubr.msk.f32.mxu1 %vm1133_vm3, %v3682_v34 }
0x1d9c   :  { %8396 = vmatmul.mubr.msk.f32.gmra.mxu1 %vm1133_vm3, %v3684_v43  ;;  %v3688_v45 = vpop.permute.xlu1 %3687 }
0x1d9e   :  { %v3686_v15 = vpop.permute.xlu0 %3685 }
0x1d9f   :  { %8398 = vmatprep.mubr.msk.f32.mxu1 %vm1133_vm3, %v3686_v15 }
0x1da0   :  { %8399 = vmatmul.mubr.msk.f32.gmra.mxu1 %vm1133_vm3, %v3688_v45 }
0x1de8   :  { %v8391_v49 = vpop.f32.mrf.mxu1 }
0x1de9   :  { %v3807_v58 = vadd.f32 %v11320_v37, %v8391_v49 }
0x1dea   :  { %v3801_v7 = vpop.f32.mrf.mxu1 }
0x1deb   :  { %v3802_v8 = vadd.f32 %v11324_v6, %v3801_v7  ;;  %v3843_v9 = vsel %vm1271_vm4, %v3807_v58, -inf }
0x1dec   :  { %3844 = vmax.xlane.f32.xlu1 %v3843_v9 }
0x1ded   :  { %v3840_v10 = vsel %vm1271_vm4, %v3802_v8, -inf }
0x1dee   :  { %3841 = vmax.xlane.f32.xlu0 %v3840_v10 }
0x1e58   :  { %v8394_v12 = vpop.f32.mrf.mxu1 }
0x1e59   :  { %v3817_v19 = vadd.f32 %v11334_v14, %v8394_v12 }
0x1e5a   :  { %v3811_v13 = vpop.f32.mrf.mxu1 }
0x1e5b   :  { %v3812_v16 = vadd.f32 %v11330_v52, %v3811_v13  ;;  %v3849_v27 = vsel %vm1271_vm4, %v3817_v19, -inf }
0x1e5c   :  { %v8397_v17 = vpop.f32.mrf.mxu1 }
0x1e5d   :  { %v3846_v23 = vsel %vm1271_vm4, %v3812_v16, -inf  ;;  %v3827_v6 = vadd.f32 %v11343_v0, %v8397_v17 }
0x1e5e   :  { %3847 = vmax.xlane.f32.xlu0 %v3846_v23  ;;  %v3821_v37 = vpop.f32.mrf.mxu1 }
0x1e5f   :  { %v3822_v26 = vadd.f32 %v11339_v11, %v3821_v37  ;;  %v3855_v25 = vsel %vm1271_vm4, %v3827_v6, -inf }
0x1e60   :  { %v8400_v21 = vpop.f32.mrf.mxu1 }
0x1e61   :  { %v3852_v35 = vsel %vm1271_vm4, %v3822_v26, -inf  ;;  %v3837_v52 = vadd.f32 %v11349_v22, %v8400_v21 }
0x1e62   :  { %3850 = vmax.xlane.f32.xlu0 %v3849_v27  ;;  %3853 = vmax.xlane.f32.xlu1 %v3852_v35  ;;  %v3831_v51 = vpop.f32.mrf.mxu1 }
0x1e63   :  { %v3861_v14 = vsel %vm1271_vm4, %v3837_v52, -inf  ;;  %v3832_v30 = vadd.f32 %v11363_v31, %v3831_v51 }
0x1e65   :  { %v3858_v33 = vsel %vm1271_vm4, %v3832_v30, -inf }
0x1e66   :  { %3856 = vmax.xlane.f32.xlu0 %v3855_v25 }
0x1e6a   :  { %3862 = vmax.xlane.f32.xlu0 %v3861_v14 }
0x1e73   :  { %3942 = vrot.lane.b32.xlu1 %v11487_v18, %s10303_s27 }
0x1e75   :  { %v3845_v11 = vpop.xlane.xlu1 %3844 }
0x1e76   :  { %v3865_v0 = vsub.f32 %v3807_v58, %v3845_v11 }
0x1e77   :  { %3938 = vrot.lane.b32.xlu1 %v11497_v61, %s10303_s27  ;;  %v3842_v39 = vpop.xlane.xlu0 %3841 }
0x1e78   :  { %v3874_v22 = vmul.f32 1.442695, %v3865_v0  ;;  %v3864_v40 = vsub.f32 %v3802_v8, %v3842_v39 }
0x1e7a   :  { %8956 = vpow2.f32 %v3874_v22  ;;  %v3872_v41 = vmul.f32 1.442695, %v3864_v40 }
0x1e7c   :  { %8958 = vpow2.f32 %v3872_v41 }
0x1e80   :  { %3940 = vrot.lane.b32.xlu0 %v11493_v60, %s10303_s27 }
0x1e84   :  { %3934 = vrot.lane.b32.xlu0 %v11509_v63, %s10303_s27 }
0x1e87   :  { %v11569_v36 = vpop.eup %8956 }
0x1e88   :  { %v3891_v38 = vsel %vm1271_vm4, %v11569_v36, 0.0 }
0x1e89   :  { %v11577_v31 = vpop.eup %8958 }
0x1e8a   :  { %v3888_v42 = vsel %vm1271_vm4, %v11577_v31, 0.0 }
0x1e9b   :  { %3859 = vmax.xlane.f32.xlu1 %v3858_v33 }
0x1ea3   :  { %3892 = vadd.xlane.f32.xlu0 %v3891_v38 }
0x1eac   :  { %3936 = vrot.lane.b32.xlu1 %v11503_v62, %s10303_s27 }
0x1eb0   :  { %3932 = vrot.lane.b32.xlu1 %v11515_v1, %s10303_s27 }
0x1ed4   :  { %3889 = vadd.xlane.f32.xlu1 %v3888_v42 }
0x1ee7   :  { %v3848_v44 = vpop.xlane.xlu0 %3847 }
0x1ee8   :  { %v3866_v54 = vsub.f32 %v3812_v16, %v3848_v44 }
0x1eea   :  { %v3876_v46 = vmul.f32 1.442695, %v3866_v54 }
0x1eeb   :  { %v3854_v48 = vpop.xlane.xlu1 %3853  ;;  %v3851_v53 = vpop.xlane.xlu0 %3850 }
0x1eec   :  { %8960 = vpow2.f32 %v3876_v46  ;;  %v3868_v55 = vsub.f32 %v3822_v26, %v3854_v48  ;;  %v3867_v57 = vsub.f32 %v3817_v19, %v3851_v53  ;;  %v4114_v46 = vld [vmem:[#allocation39 + $0x18] sm:$0xff]  ;;  %v4113_v48 = vld [vmem:[#allocation39 + $0x10] sm:$0xff]  ;;  %v4112_v53 = vld [vmem:[#allocation39 + $0x8] sm:$0xff] }
0x1eee   :  { %v3880_v18 = vmul.f32 1.442695, %v3868_v55  ;;  %v3878_v60 = vmul.f32 1.442695, %v3867_v57  ;;  %v4111_v55 = vld [vmem:[#allocation39] sm:$0xff] }
0x1eef   :  { %v3943_v61 = vpop.permute.xlu1 %3942  ;;  %v3857_v62 = vpop.xlane.xlu0 %3856 }
0x1ef0   :  { %8962 = vpow2.f32 %v3880_v18  ;;  %v3869_v63 = vsub.f32 %v3827_v6, %v3857_v62  ;;  %8401 = vmatprep.subr.mxu0 %v3943_v61 }
0x1ef1   :  { %8964 = vpow2.f32 %v3878_v60  ;;  %8402 = vmatpush3.msra.mxu0 %v3943_v61 }
0x1ef2   :  { %v3882_v1 = vmul.f32 1.442695, %v3869_v63 }
0x1ef3   :  { %v3863_v32 = vpop.xlane.xlu0 %3862  ;;  %v3939_v5 = vpop.permute.xlu1 %3938 }
0x1ef4   :  { %8966 = vpow2.f32 %v3882_v1  ;;  %v3871_v24 = vsub.f32 %v3837_v52, %v3863_v32 }
0x1ef6   :  { %v3886_v2 = vmul.f32 1.442695, %v3871_v24 }
0x1ef7   :  { %v3941_v4 = vpop.permute.xlu0 %3940 }
0x1ef8   :  { %8968 = vpow2.f32 %v3886_v2  ;;  %8403 = vmatprep.subr.mxu0 %v3941_v4 }
0x1ef9   :  { %v11581_v28 = vpop.eup %8960  ;;  %8404 = vmatpush3.msra.mxu0 %v3941_v4 }
0x1efa   :  { %8405 = vmatprep.subr.mxu0 %v3939_v5  ;;  %v3894_v20 = vsel %vm1271_vm4, %v11581_v28, 0.0 }
0x1efb   :  { %3895 = vadd.xlane.f32.xlu1 %v3894_v20  ;;  %8406 = vmatpush3.msra.mxu0 %v3939_v5  ;;  %v3935_v16 = vpop.permute.xlu0 %3934 }
0x1efd   :  { %v11585_v43 = vpop.eup %8962 }
0x1efe   :  { %v8965_v34 = vpop.eup %8964  ;;  %v3900_v15 = vsel %vm1271_vm4, %v11585_v43, 0.0 }
0x1eff   :  { %3901 = vadd.xlane.f32.xlu1 %v3900_v15  ;;  %v3897_v45 = vsel %vm1271_vm4, %v8965_v34, 0.0 }
0x1f00   :  { %3898 = vadd.xlane.f32.xlu0 %v3897_v45 }
0x1f01   :  { %v11590_v49 = vpop.eup %8966 }
0x1f02   :  { %v3903_v58 = vsel %vm1271_vm4, %v11590_v49, 0.0 }
0x1f04   :  { %3904 = vadd.xlane.f32.xlu0 %v3903_v58 }
0x1f05   :  { %v11594_v7 = vpop.eup %8968 }
0x1f06   :  { %v3909_v8 = vsel %vm1271_vm4, %v11594_v7, 0.0 }
0x1f08   :  { %3910 = vadd.xlane.f32.xlu0 %v3909_v8 }
0x1f1e   :  { %3930 = vrot.lane.b32.xlu0 %v11471_v56, %s10303_s27 }
0x1f24   :  { %v3860_v9 = vpop.xlane.xlu1 %3859 }
0x1f25   :  { %v3870_v10 = vsub.f32 %v3832_v30, %v3860_v9 }
0x1f27   :  { %v3884_v12 = vmul.f32 1.442695, %v3870_v10 }
0x1f28   :  { %v3937_v13 = vpop.permute.xlu1 %3936 }
0x1f29   :  { %8970 = vpow2.f32 %v3884_v12  ;;  %8407 = vmatprep.subr.mxu0 %v3937_v13 }
0x1f2a   :  { %8408 = vmatpush3.msra.mxu0 %v3937_v13 }
0x1f2b   :  { %8409 = vmatprep.subr.mxu0 %v3935_v16 }
0x1f2c   :  { %v3933_v17 = vpop.permute.xlu1 %3932  ;;  %8410 = vmatpush3.msra.mxu0 %v3935_v16  ;;  %v3893_v6 = vpop.xlane.xlu0 %3892 }
0x1f2d   :  { %8411 = vmatprep.subr.mxu0 %v3933_v17 }
0x1f2e   :  { %8412 = vmatpush3.msra.mxu0 %v3933_v17 }
0x1f36   :  { %v8971_v19 = vpop.eup %8970 }
0x1f37   :  { %v3906_v23 = vsel %vm1271_vm4, %v8971_v19, 0.0 }
0x1f38   :  { %3907 = vadd.xlane.f32.xlu1 %v3906_v23 }
0x1f49   :  { %3928 = vrot.lane.b32.xlu1 %v11473_v59, %s10303_s27 }
0x1f5d   :  { %v3890_v56 = vpop.xlane.xlu1 %3889 }
0x1f5e   :  { %8972 = vrcp.f32 %v3890_v56 }
0x1f5f   :  { %8974 = vrcp.f32 %v3893_v6 }
0x1f6b   :  { %v8973_v37 = vpop.eup %8972 }
0x1f6c   :  { %v3913_v26 = vmul.f32 %v8973_v37, %v11577_v31  ;;  %v8975_v11 = vpop.eup %8974 }
0x1f6d   :  { %v3915_v51 = vmul.f32 %v8975_v11, %v11569_v36  ;;  %v4350_v11 = vld [vmem:[%s13157_s16 + $0x38] sm:$0xff] }
0x1f6e   :  { %8417 = vmatprep.mubr.msk.f32.mxu0 %vm1271_vm4, %v3913_v26  ;;  %8451 = vmatprep.subr.mxu1 %v4350_v11 }
0x1f6f   :  { %8452 = vmatpush3.msra.mxu1 %v4350_v11 }
0x1f84   :  { %v3896_v25 = vpop.xlane.xlu1 %3895 }
0x1f85   :  { %8976 = vrcp.f32 %v3896_v25  ;;  %v4251_v25 = vld [vmem:[%s13156_s13 + $0x10] sm:$0xff] }
0x1f88   :  { %v3902_v14 = vpop.xlane.xlu1 %3901 }
0x1f89   :  { %v3899_v27 = vpop.xlane.xlu0 %3898 }
0x1f8a   :  { %8978 = vrcp.f32 %v3899_v27 }
0x1f8b   :  { %8980 = vrcp.f32 %v3902_v14  ;;  %v4250_v14 = vld [vmem:[%s13156_s13 + $0x8] sm:$0xff] }
0x1f8d   :  { %v3905_v35 = vpop.xlane.xlu0 %3904 }
0x1f8e   :  { %8982 = vrcp.f32 %v3905_v35 }
0x1f91   :  { %v3911_v21 = vpop.xlane.xlu0 %3910 }
0x1f92   :  { %8984 = vrcp.f32 %v3911_v21  ;;  %v8977_v0 = vpop.eup %8976 }
0x1f93   :  { %v3917_v33 = vmul.f32 %v8977_v0, %v11581_v28  ;;  %v4349_v0 = vld [vmem:[%s13157_s16 + $0x30] sm:$0xff] }
0x1f94   :  { %8453 = vmatprep.subr.mxu1 %v4349_v0 }
0x1f95   :  { %v3931_v52 = vpop.permute.xlu0 %3930  ;;  %8454 = vmatpush3.msra.mxu1 %v4349_v0 }
0x1f96   :  { %8413 = vmatprep.subr.mxu0 %v3931_v52 }
0x1f97   :  { %8414 = vmatpush3.msra.mxu0 %v3931_v52  ;;  %v8979_v30 = vpop.eup %8978  ;;  %v4252_v52 = vld [vmem:[%s13156_s13 + $0x18] sm:$0xff] }
0x1f98   :  { %v8981_v38 = vpop.eup %8980  ;;  %v3919_v39 = vmul.f32 %v8979_v30, %v8965_v34  ;;  %v4346_v30 = vld [vmem:[%s13157_s16 + $0x18] sm:$0xff] }
0x1f99   :  { %v3921_v41 = vmul.f32 %v8981_v38, %v11585_v43 }
0x1f9b   :  { %v8983_v40 = vpop.eup %8982 }
0x1f9c   :  { %v3923_v36 = vmul.f32 %v8983_v40, %v11590_v49 }
0x1f9f   :  { %v8985_v31 = vpop.eup %8984 }
0x1fa0   :  { %v3927_v54 = vmul.f32 %v8985_v31, %v11594_v7  ;;  %v7609_v7 = vld [vmem:[#allocation40] ss:$0 sm:$0xff] }
0x1fc1   :  { %v3908_v59 = vpop.xlane.xlu1 %3907 }
0x1fc2   :  { %8986 = vrcp.f32 %v3908_v59  ;;  %v4249_v59 = vld [vmem:[%s13156_s13] sm:$0xff]  ;;  %s10330_s13 = smov 5  }
0x1fc5   :  { %v3929_v22 = vpop.permute.xlu1 %3928 }
0x1fc6   :  { %8415 = vmatprep.subr.mxu0 %v3929_v22 }
0x1fc7   :  { %8416 = vmatpush3.msra.mxu0 %v3929_v22  ;;  %v4348_v22 = vld [vmem:[%s13157_s16 + $0x28] sm:$0xff] }
0x1fc8   :  { %8418 = vmatmul.mubr.msk.f32.vlgmr.msra.gmra.mxu0 %vm1271_vm4, %v3915_v51  ;;  %8429 = vmatprep.subr.mxu0 %v4114_v46  ;;  %v4347_v51 = vld [vmem:[%s13157_s16 + $0x20] sm:$0xff] }
0x1fc9   :  { %8420 = vmatprep.mubr.msk.f32.mxu0 %vm1271_vm4, %v3917_v33  ;;  %8430 = vmatpush3.msra.mxu0 %v4114_v46 }
0x1fca   :  { %8431 = vmatprep.subr.mxu0 %v4113_v48  ;;  %8455 = vmatprep.subr.mxu1 %v4348_v22 }
0x1fcb   :  { %8432 = vmatpush3.msra.mxu0 %v4113_v48  ;;  %8456 = vmatpush3.msra.mxu1 %v4348_v22 }
0x1fcc   :  { %8421 = vmatmul.mubr.msk.f32.gmra.mxu0 %vm1271_vm4, %v3919_v39  ;;  %8433 = vmatprep.subr.mxu0 %v4112_v53 }
0x1fcd   :  { %8423 = vmatprep.mubr.msk.f32.mxu0 %vm1271_vm4, %v3921_v41  ;;  %8434 = vmatpush3.msra.mxu0 %v4112_v53 }
0x1fce   :  { %8435 = vmatprep.subr.mxu0 %v4111_v55  ;;  %8457 = vmatprep.subr.mxu1 %v4347_v51 }
0x1fcf   :  { %v8987_v42 = vpop.eup %8986  ;;  %8436 = vmatpush3.msra.mxu0 %v4111_v55  ;;  %8458 = vmatpush3.msra.mxu1 %v4347_v51 }
0x1fd0   :  { %8424 = vmatmul.mubr.msk.f32.gmra.mxu0 %vm1271_vm4, %v3923_v36  ;;  %v3925_v44 = vmul.f32 %v8987_v42, %v8971_v19  ;;  %8440 = vmatprep.subr.mxu0 %v4252_v52  ;;  %v7612_v42 = vld [vmem:[#allocation42] ss:$0 sm:$0xff] }
0x1fd1   :  { %8459 = vmatprep.subr.mxu1 %v4346_v30 }
0x1fd2   :  { %8426 = vmatprep.mubr.msk.f32.mxu0 %vm1271_vm4, %v3925_v44  ;;  %8460 = vmatpush3.msra.mxu1 %v4346_v30  ;;  %v7621_v30 = vld [vmem:[#allocation49] ss:$0 sm:$0xff] }
0x1fd4   :  { %8427 = vmatmul.mubr.msk.f32.gmra.mxu0 %vm1271_vm4, %v3927_v54  ;;  %v7613_v54 = vld [vmem:[#allocation43] ss:$0 sm:$0xff] }
0x2088   :  { %v8419_v57 = vpop.f32.mrf.mxu0 }
0x208a   :  { %v4042_v18 = vpop.f32.mrf.mxu0 }
0x208c   :  { %v8422_v60 = vpop.f32.mrf.mxu0 }
0x208d   :  { %4085 = vrot.lane.b32.xlu1 %v8422_v60, %s10249_s22  ;;  %v4345_v60 = vld [vmem:[%s13157_s16 + $0x10] sm:$0xff] }
0x208e   :  { %v4052_v61 = vpop.f32.mrf.mxu0  ;;  %8461 = vmatprep.subr.mxu1 %v4345_v60 }
0x208f   :  { %4083 = vrot.lane.b32.xlu0 %v4052_v61, %s10249_s22  ;;  %8462 = vmatpush3.msra.mxu1 %v4345_v60  ;;  %v4344_v61 = vld [vmem:[%s13157_s16 + $0x8] sm:$0xff] }
0x2090   :  { %v8425_v62 = vpop.f32.mrf.mxu0  ;;  %8463 = vmatprep.subr.mxu1 %v4344_v61 }
0x2091   :  { %4093 = vrot.lane.b32.xlu1 %v8425_v62, %s10305_s2  ;;  %v4343_v62 = vld [vmem:[%s13157_s16] sm:$0xff]  ;;  %8464 = vmatpush3.msra.mxu1 %v4344_v61  ;;  %s10331_s16 = smov 6  }
0x2092   :  { %v4062_v63 = vpop.f32.mrf.mxu0  ;;  %8465 = vmatprep.subr.mxu1 %v4343_v62 }
0x2093   :  { %4091 = vrot.lane.b32.xlu0 %v4062_v63, %s10305_s2  ;;  %8466 = vmatpush3.msra.mxu1 %v4343_v62  ;;  %v7614_v63 = vld [vmem:[#allocation45] ss:$0 sm:$0xff] }
0x2094   :  { %v8428_v1 = vpop.f32.mrf.mxu0 }
0x2095   :  { %4101 = vrot.lane.b32.xlu1 %v8428_v1, %s10306_s7 }
0x2096   :  { %v4072_v32 = vpop.f32.mrf.mxu0 }
0x2097   :  { %4099 = vrot.lane.b32.xlu0 %v4072_v32, %s10306_s7 }
0x20ff   :  { %v4086_v24 = vpop.permute.xlu1 %4085 }
0x2100   :  { %v4106_v43 = vsel %vm1133_vm3, %v8419_v57, %v4086_v24 }
0x2101   :  { %v4084_v2 = vpop.permute.xlu0 %4083 }
0x2102   :  { %v4105_v5 = vsel %vm1133_vm3, %v4042_v18, %v4084_v2 }
0x2103   :  { %v4094_v4 = vpop.permute.xlu1 %4093 }
0x2104   :  { %v4108_v45 = vsel %vm1539_vm5, %v4106_v43, %v4094_v4 }
0x2105   :  { %v4092_v28 = vpop.permute.xlu0 %4091 }
0x2106   :  { %v4107_v34 = vsel %vm1539_vm5, %v4105_v5, %v4092_v28  ;;  %v7617_v5 = vld [vmem:[#allocation46] ss:$0 sm:$0xff] }
0x2107   :  { %v4102_v20 = vpop.permute.xlu1 %4101 }
0x2108   :  { %v4110_v58 = vsel %vm1542_vm6, %v4108_v45, %v4102_v20 }
0x2109   :  { %v4100_v15 = vpop.permute.xlu0 %4099 }
0x210a   :  { %v4109_v49 = vsel %vm1542_vm6, %v4107_v34, %v4100_v15 }
0x210b   :  { %8437 = vmatprep.mubr.msk.f32.mxu0 %vm1021_vm2, %v4109_v49 }
0x210c   :  { %8438 = vmatmul.mubr.msk.f32.vlgmr.msra.gmra.mxu0 %vm1021_vm2, %v4110_v58 }
0x210d   :  { %8441 = vmatpush3.msra.mxu0 %v4252_v52 }
0x210e   :  { %8442 = vmatprep.subr.mxu0 %v4251_v25 }
0x210f   :  { %8443 = vmatpush3.msra.mxu0 %v4251_v25 }
0x2110   :  { %8444 = vmatprep.subr.mxu0 %v4250_v14 }
0x2111   :  { %8445 = vmatpush3.msra.mxu0 %v4250_v14 }
0x2112   :  { %8446 = vmatprep.subr.mxu0 %v4249_v59 }
0x2113   :  { %8447 = vmatpush3.msra.mxu0 %v4249_v59  ;;  %v7620_v59 = vld [vmem:[#allocation48] ss:$0 sm:$0xff] }
0x21cc   :  { %v8439_v8 = vpop.f32.mrf.mxu0 }
0x21cd   :  { %v4200_v9 = vadd.f32 %v8439_v8, %v7609_v7 }
0x21ce   :  { %v4194_v10 = vpop.f32.mrf.mxu0 }
0x21cf   :  { %v4204_v12 = vadd.f32 %v4200_v9, %v11467_v50  ;;  %v4195_v13 = vadd.f32 %v7609_v7, %v4194_v10 }
0x21d1   :  { %v4203_v16 = vadd.f32 %v4195_v13, %v11463_v47  ;;  %v4210_v17 = vsel %vm1021_vm2, %v4204_v12, 0.0 }
0x21d2   :  { %4211 = vadd.xlane.f32.xlu1 %v4210_v17 }
0x21d3   :  { %v4207_v19 = vsel %vm1021_vm2, %v4203_v16, 0.0 }
0x21d4   :  { %4208 = vadd.xlane.f32.xlu0 %v4207_v19 }
0x225b   :  { %v4212_v23 = vpop.xlane.xlu1 %4211 }
0x225c   :  { %v4214_v56 = vmul.f32 0.03125, %v4212_v23 }
0x225d   :  { %v4209_v37 = vpop.xlane.xlu0 %4208 }
0x225e   :  { %v4213_v26 = vmul.f32 0.03125, %v4209_v37  ;;  %v4216_v6 = vsub.f32 %v4204_v12, %v4214_v56  ;;  %v4488_v37 = vld [vmem:[%s13158_s23 + $0x18] sm:$0xff] }
0x225f   :  { %8470 = vmatprep.subr.mxu0 %v4488_v37 }
0x2260   :  { %v4215_v27 = vsub.f32 %v4203_v16, %v4213_v26  ;;  %v4218_v47 = vmul.f32 %v4216_v6, %v4216_v6  ;;  %v4487_v26 = vld [vmem:[%s13158_s23 + $0x10] sm:$0xff] }
0x2262   :  { %v4217_v50 = vmul.f32 %v4215_v27, %v4215_v27  ;;  %v4222_v21 = vsel %vm1021_vm2, %v4218_v47, 0.0 }
0x2264   :  { %v4219_v35 = vsel %vm1021_vm2, %v4217_v50, 0.0 }
0x2265   :  { %4220 = vadd.xlane.f32.xlu0 %v4219_v35 }
0x2269   :  { %4223 = vadd.xlane.f32.xlu0 %v4222_v21 }
0x22ee   :  { %v4221_v33 = vpop.xlane.xlu0 %4220 }
0x22ef   :  { %v4225_v38 = vmul.f32 0.03125, %v4221_v33 }
0x22f1   :  { %v4227_v39 = vadd.f32 1e-05, %v4225_v38 }
0x22f2   :  { %v4224_v40 = vpop.xlane.xlu0 %4223 }
0x22f3   :  { %8988 = vrsqrt.f32 %v4227_v39  ;;  %v4226_v41 = vmul.f32 0.03125, %v4224_v40  ;;  %v7622_v40 = vld [vmem:[#allocation51] ss:$0 sm:$0xff] }
0x22f5   :  { %v4228_v31 = vadd.f32 1e-05, %v4226_v41 }
0x22f7   :  { %8990 = vrsqrt.f32 %v4228_v31 }
0x2300   :  { %v8989_v36 = vpop.eup %8988 }
0x2301   :  { %v4231_v44 = vmul.f32 %v8989_v36, %v4215_v27  ;;  %v4485_v27 = vld [vmem:[%s13158_s23] sm:$0xff] }
0x2303   :  { %v4239_v46 = vmul.f32 %v7612_v42, %v4231_v44 }
0x2304   :  { %v8991_v48 = vpop.eup %8990 }
0x2305   :  { %v4232_v53 = vmul.f32 %v8991_v48, %v4216_v6  ;;  %v4247_v55 = vadd.f32 %v7613_v54, %v4239_v46  ;;  %v4486_v6 = vld [vmem:[%s13158_s23 + $0x8] sm:$0xff]  ;;  %s10332_s23 = smov 7  }
0x2307   :  { %v4240_v57 = vmul.f32 %v7612_v42, %v4232_v53  ;;  %8448 = vmatprep.mubr.msk.f32.mxu0 %vm1021_vm2, %v4247_v55 }
0x2309   :  { %v4248_v18 = vadd.f32 %v7613_v54, %v4240_v57 }
0x230b   :  { %8449 = vmatmul.mubr.msk.f32.vlgmr.msra.gmra.mxu0 %vm1021_vm2, %v4248_v18 }
0x230c   :  { %8471 = vmatpush3.msra.mxu0 %v4488_v37 }
0x230d   :  { %8472 = vmatprep.subr.mxu0 %v4487_v26 }
0x230e   :  { %8473 = vmatpush3.msra.mxu0 %v4487_v26 }
0x230f   :  { %8474 = vmatprep.subr.mxu0 %v4486_v6 }
0x2310   :  { %8475 = vmatpush3.msra.mxu0 %v4486_v6 }
0x2311   :  { %8476 = vmatprep.subr.mxu0 %v4485_v27 }
0x2312   :  { %8477 = vmatpush3.msra.mxu0 %v4485_v27  ;;  %v11779_v27 = vld [vmem:[%s13143_s26 + $0x38] sm:$0xff] }
0x23cb   :  { %v8450_v1 = vpop.f32.mrf.mxu0 }
0x23cc   :  { %v4338_v32 = vadd.f32 %v8450_v1, %v7614_v63 }
0x23cd   :  { %v4332_v24 = vpop.f32.mrf.mxu0 }
0x23ce   :  { %v4333_v2 = vadd.f32 %v7614_v63, %v4332_v24  ;;  %v4342_v28 = vmax.f32 %v4338_v32, 0.0  ;;  %v5248_v24 = vld [vmem:[#allocation61 + $0x18] sm:$0xff] }
0x23d0   :  { %v4341_v4 = vmax.f32 %v4333_v2, 0.0  ;;  %v5247_v2 = vld [vmem:[#allocation61 + $0x10] sm:$0xff] }
0x23d2   :  { %8467 = vmatprep.mubr.msk.f32.mxu1 %vm1271_vm4, %v4341_v4  ;;  %v5246_v4 = vld [vmem:[#allocation61 + $0x8] sm:$0xff] }
0x23d3   :  { %8468 = vmatmul.mubr.msk.f32.vlgmr.msra.gmra.mxu1 %vm1271_vm4, %v4342_v28  ;;  %v5245_v28 = vld [vmem:[#allocation61] sm:$0xff] }
0x2493   :  { %v8469_v20 = vpop.f32.mrf.mxu1 }
0x2494   :  { %v4436_v43 = vadd.f32 %v8469_v20, %v7617_v5  ;;  %v11750_v20 = vld [vmem:[%s13143_s26 + $0x8] sm:$0xff] }
0x2495   :  { %v4430_v34 = vpop.f32.mrf.mxu1 }
0x2496   :  { %v4440_v15 = vadd.f32 %v4436_v43, %v4248_v18  ;;  %v4431_v45 = vadd.f32 %v7617_v5, %v4430_v34 }
0x2498   :  { %v4439_v49 = vadd.f32 %v4431_v45, %v4247_v55  ;;  %v4446_v58 = vsel %vm1021_vm2, %v4440_v15, 0.0 }
0x2499   :  { %4447 = vadd.xlane.f32.xlu0 %v4446_v58 }
0x249a   :  { %v4443_v7 = vsel %vm1021_vm2, %v4439_v49, 0.0 }
0x249b   :  { %4444 = vadd.xlane.f32.xlu1 %v4443_v7  ;;  %v11760_v7 = vld [vmem:[%s13143_s26 + $0x10] sm:$0xff] }
0x2522   :  { %v4448_v8 = vpop.xlane.xlu0 %4447 }
0x2523   :  { %v4450_v9 = vmul.f32 0.03125, %v4448_v8 }
0x2524   :  { %v4445_v10 = vpop.xlane.xlu1 %4444 }
0x2525   :  { %v4452_v12 = vsub.f32 %v4440_v15, %v4450_v9  ;;  %v4449_v13 = vmul.f32 0.03125, %v4445_v10  ;;  %v11754_v15 = vld [vmem:[%s13143_s26] sm:$0xff]  ;;  %v11764_v10 = vld [vmem:[%s13143_s26 + $0x18] sm:$0xff] }
0x2527   :  { %v4451_v16 = vsub.f32 %v4439_v49, %v4449_v13  ;;  %v4454_v17 = vmul.f32 %v4452_v12, %v4452_v12 }
0x2529   :  { %v4458_v19 = vsel %vm1021_vm2, %v4454_v17, 0.0  ;;  %v4453_v23 = vmul.f32 %v4451_v16, %v4451_v16  ;;  %v11769_v17 = vld [vmem:[%s13143_s26 + $0x20] sm:$0xff] }
0x252a   :  { %4459 = vadd.xlane.f32.xlu0 %v4458_v19 }
0x252b   :  { %v4455_v56 = vsel %vm1021_vm2, %v4453_v23, 0.0  ;;  %v11773_v23 = vld [vmem:[%s13143_s26 + $0x28] sm:$0xff] }
0x252c   :  { %4456 = vadd.xlane.f32.xlu1 %v4455_v56 }
0x25b3   :  { %v4460_v50 = vpop.xlane.xlu0 %4459 }
0x25b4   :  { %v4462_v35 = vmul.f32 0.03125, %v4460_v50 }
0x25b5   :  { %v4457_v47 = vpop.xlane.xlu1 %4456 }
0x25b6   :  { %v4464_v21 = vadd.f32 1e-05, %v4462_v35  ;;  %v4461_v52 = vmul.f32 0.03125, %v4457_v47 }
0x25b8   :  { %8992 = vrsqrt.f32 %v4464_v21  ;;  %v4463_v25 = vadd.f32 1e-05, %v4461_v52  ;;  %v11793_v52 = vld [vmem:[%s13143_s26 + $0x30] sm:$0xff]  ;;  %s10312_s26 = smov 108  }
0x25ba   :  { %8994 = vrsqrt.f32 %v4463_v25 }
0x25c5   :  { %v8993_v14 = vpop.eup %8992 }
0x25c6   :  { %v4468_v11 = vmul.f32 %v8993_v14, %v4452_v12 }
0x25c7   :  { %v8995_v0 = vpop.eup %8994 }
0x25c8   :  { %v4467_v22 = vmul.f32 %v8995_v0, %v4451_v16  ;;  %v4476_v51 = vmul.f32 %v7620_v59, %v4468_v11 }
0x25ca   :  { %v4475_v33 = vmul.f32 %v7620_v59, %v4467_v22  ;;  %v11663_v39 = vadd.f32 %v7621_v30, %v4476_v51 }
0x25cc   :  { %v11661_v38 = vadd.f32 %v7621_v30, %v4475_v33 }
0x25ce   :  { %8478 = vmatprep.mubr.msk.f32.mxu0 %vm1021_vm2, %v11661_v38 }
0x25cf   :  { %8479 = vmatmul.mubr.msk.f32.vlgmr.msra.gmra.mxu0 %vm1021_vm2, %v11663_v39 }
0x268f   :  { %v8480_v41 = vpop.f32.mrf.mxu0 }
0x2690   :  { %v11669_v31 = vadd.f32 %v8480_v41, %v7622_v40 }
0x2691   :  { %v4568_v36 = vpop.f32.mrf.mxu0 }
0x2692   :  { %v11671_v42 = vadd.f32 %v7622_v40, %v4568_v36  ;;  %4589 = vrot.lane.b32.xlu1 %v11669_v31, %s10301_s6 }
0x2694   :  { %4587 = vrot.lane.b32.xlu0 %v11671_v42, %s10301_s6  ;;  %8497 = vmatprep.mubr.msk.f32.mxu1 %vm1133_vm3, %v11671_v42 }
0x2696   :  { %4585 = vrot.lane.b32.xlu1 %v11669_v31, %s10300_s14 }
0x2698   :  { %4581 = vrot.lane.b32.xlu0 %v11669_v31, %s10302_s17 }
0x269a   :  { %4583 = vrot.lane.b32.xlu1 %v11671_v42, %s10300_s14 }
0x269e   :  { %4579 = vrot.lane.b32.xlu1 %v11671_v42, %s10302_s17 }
0x2704   :  { %v11687_v44 = vpop.permute.xlu1 %4589 }
0x2705   :  { %4605 = vrot.lane.b32.xlu0 %v11687_v44, %s10303_s27 }
0x2706   :  { %v11691_v54 = vpop.permute.xlu0 %4587 }
0x2707   :  { %4603 = vrot.lane.b32.xlu1 %v11691_v54, %s10303_s27 }
0x2708   :  { %v11695_v46 = vpop.permute.xlu1 %4585 }
0x2709   :  { %4601 = vrot.lane.b32.xlu0 %v11695_v46, %s10303_s27 }
0x270a   :  { %v11699_v48 = vpop.permute.xlu0 %4581 }
0x270c   :  { %v11701_v53 = vpop.permute.xlu1 %4583 }
0x270d   :  { %4599 = vrot.lane.b32.xlu1 %v11701_v53, %s10303_s27  ;;  %4597 = vrot.lane.b32.xlu0 %v11699_v48, %s10303_s27 }
0x2710   :  { %v11707_v55 = vpop.permute.xlu1 %4579 }
0x2711   :  { %4595 = vrot.lane.b32.xlu1 %v11707_v55, %s10303_s27  ;;  %4593 = vrot.lane.b32.xlu0 %v11669_v31, %s10303_s27 }
0x2715   :  { %4591 = vrot.lane.b32.xlu1 %v11671_v42, %s10303_s27 }
0x2777   :  { %v4606_v57 = vpop.permute.xlu0 %4605 }
0x2778   :  { %8481 = vmatprep.subr.msk.mxu1 %vm1133_vm3, %v4606_v57 }
0x2779   :  { %v4604_v18 = vpop.permute.xlu1 %4603  ;;  %8482 = vmatpush3.xpose.msk.msra.mxu1 %vm1133_vm3, %v4606_v57 }
0x277a   :  { %8483 = vmatprep.subr.msk.mxu1 %vm1133_vm3, %v4604_v18 }
0x277b   :  { %v4602_v60 = vpop.permute.xlu0 %4601 }
0x277d   :  { %8484 = vmatpush3.xpose.msk.msra.mxu1 %vm1133_vm3, %v4604_v18 }
0x277e   :  { %8485 = vmatprep.subr.msk.mxu1 %vm1133_vm3, %v4602_v60 }
0x277f   :  { %v4600_v61 = vpop.permute.xlu1 %4599  ;;  %v4598_v62 = vpop.permute.xlu0 %4597 }
0x2781   :  { %8486 = vmatpush3.xpose.msk.msra.mxu1 %vm1133_vm3, %v4602_v60 }
0x2782   :  { %8487 = vmatprep.subr.msk.mxu1 %vm1133_vm3, %v4600_v61 }
0x2783   :  { %v4596_v63 = vpop.permute.xlu1 %4595  ;;  %v4594_v1 = vpop.permute.xlu0 %4593 }
0x2785   :  { %8488 = vmatpush3.xpose.msk.msra.mxu1 %vm1133_vm3, %v4600_v61 }
0x2786   :  { %8489 = vmatprep.subr.msk.mxu1 %vm1133_vm3, %v4598_v62 }
0x2787   :  { %v4592_v32 = vpop.permute.xlu1 %4591 }
0x2789   :  { %8490 = vmatpush3.xpose.msk.msra.mxu1 %vm1133_vm3, %v4598_v62 }
0x278a   :  { %8491 = vmatprep.subr.msk.mxu1 %vm1133_vm3, %v4596_v63 }
0x278d   :  { %8492 = vmatpush3.xpose.msk.msra.mxu1 %vm1133_vm3, %v4596_v63 }
0x278e   :  { %8493 = vmatprep.subr.msk.mxu1 %vm1133_vm3, %v4594_v1 }
0x2791   :  { %8494 = vmatpush3.xpose.msk.msra.mxu1 %vm1133_vm3, %v4594_v1 }
0x2792   :  { %8495 = vmatprep.subr.msk.mxu1 %vm1133_vm3, %v4592_v32 }
0x2795   :  { %8496 = vmatpush3.xpose.msk.msra.mxu1 %vm1133_vm3, %v4592_v32 }
0x2796   :  { %8559 = vmatprep.subr.mxu1 %v5248_v24 }
0x2798   :  { %8498 = vmatmul.mubr.msk.f32.vlgmr.msra.gmra.mxu1 %vm1133_vm3, %v11669_v31 }
0x2799   :  { %8500 = vmatprep.mubr.msk.f32.mxu1 %vm1133_vm3, %v11707_v55  ;;  %8560 = vmatpush3.msra.mxu1 %v5248_v24 }
0x279a   :  { %8561 = vmatprep.subr.mxu1 %v5247_v2 }
0x279b   :  { %8562 = vmatpush3.msra.mxu1 %v5247_v2 }
0x279c   :  { %8501 = vmatmul.mubr.msk.f32.gmra.mxu1 %vm1133_vm3, %v11699_v48  ;;  %8563 = vmatprep.subr.mxu1 %v5246_v4 }
0x279d   :  { %8503 = vmatprep.mubr.msk.f32.mxu1 %vm1133_vm3, %v11701_v53  ;;  %8564 = vmatpush3.msra.mxu1 %v5246_v4 }
0x279e   :  { %8565 = vmatprep.subr.mxu1 %v5245_v28 }
0x279f   :  { %8566 = vmatpush3.msra.mxu1 %v5245_v28 }
0x27a0   :  { %8504 = vmatmul.mubr.msk.f32.gmra.mxu1 %vm1133_vm3, %v11695_v46 }
0x27a1   :  { %8506 = vmatprep.mubr.msk.f32.mxu1 %vm1133_vm3, %v11691_v54 }
0x27a4   :  { %8507 = vmatmul.mubr.msk.f32.gmra.mxu1 %vm1133_vm3, %v11687_v44 }
0x27a5   :  { %8567 = vmatprep.mubr.msk.f32.mxu1 %vm1021_vm2, %v11445_v3 }
0x27a8   :  { %8568 = vmatmul.mubr.msk.f32.vlgmr.msra.gmra.mxu1 %vm1021_vm2, %v11458_v29 }
0x2858   :  { %v8499_v5 = vpop.f32.mrf.mxu1 }
0x2859   :  { %v4711_v43 = vadd.f32 %v11750_v20, %v8499_v5 }
0x285a   :  { %v4705_v34 = vpop.f32.mrf.mxu1 }
0x285b   :  { %v4706_v45 = vadd.f32 %v11754_v15, %v4705_v34  ;;  %v4747_v49 = vsel %vm1271_vm4, %v4711_v43, -inf }
0x285c   :  { %4748 = vmax.xlane.f32.xlu1 %v4747_v49  ;;  %v8502_v3 = vpop.f32.mrf.mxu1 }
0x285d   :  { %v4744_v58 = vsel %vm1271_vm4, %v4706_v45, -inf  ;;  %v4721_v12 = vadd.f32 %v11764_v10, %v8502_v3 }
0x285e   :  { %v4715_v29 = vpop.f32.mrf.mxu1  ;;  %4745 = vmax.xlane.f32.xlu0 %v4744_v58 }
0x285f   :  { %v4716_v8 = vadd.f32 %v11760_v7, %v4715_v29  ;;  %v4753_v26 = vsel %vm1271_vm4, %v4721_v12, -inf }
0x2860   :  { %v8505_v9 = vpop.f32.mrf.mxu1 }
0x2861   :  { %v4750_v13 = vsel %vm1271_vm4, %v4716_v8, -inf  ;;  %v4731_v56 = vadd.f32 %v11773_v23, %v8505_v9 }
0x2862   :  { %v4725_v16 = vpop.f32.mrf.mxu1  ;;  %4751 = vmax.xlane.f32.xlu0 %v4750_v13 }
0x2863   :  { %v4726_v19 = vadd.f32 %v11769_v17, %v4725_v16  ;;  %v4759_v35 = vsel %vm1271_vm4, %v4731_v56, -inf }
0x2864   :  { %v8508_v6 = vpop.f32.mrf.mxu1 }
0x2865   :  { %v4756_v37 = vsel %vm1271_vm4, %v4726_v19, -inf  ;;  %v4741_v50 = vadd.f32 %v11779_v27, %v8508_v6 }
0x2866   :  { %4757 = vmax.xlane.f32.xlu1 %v4756_v37  ;;  %4754 = vmax.xlane.f32.xlu0 %v4753_v26  ;;  %v4735_v21 = vpop.f32.mrf.mxu1 }
0x2867   :  { %v4765_v47 = vsel %vm1271_vm4, %v4741_v50, -inf  ;;  %v11796_v25 = vadd.f32 %v11793_v52, %v4735_v21 }
0x2869   :  { %v4762_v14 = vsel %vm1271_vm4, %v11796_v25, -inf }
0x286a   :  { %4760 = vmax.xlane.f32.xlu0 %v4759_v35 }
0x286e   :  { %4766 = vmax.xlane.f32.xlu0 %v4765_v47 }
0x2877   :  { %4846 = vrot.lane.b32.xlu1 %v11687_v44, %s10304_s24 }
0x287b   :  { %4842 = vrot.lane.b32.xlu1 %v11695_v46, %s10304_s24 }
0x2884   :  { %4844 = vrot.lane.b32.xlu0 %v11691_v54, %s10304_s24 }
0x2888   :  { %4838 = vrot.lane.b32.xlu0 %v11699_v48, %s10304_s24 }
0x289f   :  { %4763 = vmax.xlane.f32.xlu1 %v4762_v14 }
0x28b0   :  { %4840 = vrot.lane.b32.xlu1 %v11701_v53, %s10304_s24 }
0x28b4   :  { %4836 = vrot.lane.b32.xlu1 %v11707_v55, %s10304_s24 }
0x28e5   :  { %v4749_v59 = vpop.xlane.xlu1 %4748 }
0x28e6   :  { %v4769_v11 = vsub.f32 %v4711_v43, %v4749_v59 }
0x28e7   :  { %v4746_v0 = vpop.xlane.xlu0 %4745 }
0x28e8   :  { %v4778_v22 = vmul.f32 1.442695, %v4769_v11  ;;  %v4768_v51 = vsub.f32 %v4706_v45, %v4746_v0 }
0x28ea   :  { %8996 = vpow2.f32 %v4778_v22  ;;  %v4776_v30 = vmul.f32 1.442695, %v4768_v51 }
0x28eb   :  { %v4752_v33 = vpop.xlane.xlu0 %4751 }
0x28ec   :  { %8998 = vpow2.f32 %v4776_v30  ;;  %v4770_v40 = vsub.f32 %v4716_v8, %v4752_v33 }
0x28ee   :  { %v4780_v41 = vmul.f32 1.442695, %v4770_v40 }
0x28ef   :  { %v4758_v36 = vpop.xlane.xlu1 %4757  ;;  %v4755_v44 = vpop.xlane.xlu0 %4754 }
0x28f0   :  { %9000 = vpow2.f32 %v4780_v41  ;;  %v4772_v54 = vsub.f32 %v4726_v19, %v4758_v36  ;;  %v4771_v46 = vsub.f32 %v4721_v12, %v4755_v44 }
0x28f2   :  { %v4784_v48 = vmul.f32 1.442695, %v4772_v54  ;;  %v4782_v53 = vmul.f32 1.442695, %v4771_v46 }
0x28f3   :  { %v4847_v57 = vpop.permute.xlu1 %4846  ;;  %v4761_v55 = vpop.xlane.xlu0 %4760 }
0x28f4   :  { %9002 = vpow2.f32 %v4784_v48  ;;  %v4773_v18 = vsub.f32 %v4731_v56, %v4761_v55  ;;  %8509 = vmatprep.subr.mxu0 %v4847_v57 }
0x28f5   :  { %9004 = vpow2.f32 %v4782_v53  ;;  %8510 = vmatpush3.msra.mxu0 %v4847_v57 }
0x28f6   :  { %v4786_v60 = vmul.f32 1.442695, %v4773_v18 }
0x28f7   :  { %v11804_v61 = vpop.eup %8996  ;;  %v4767_v62 = vpop.xlane.xlu0 %4766 }
0x28f8   :  { %9006 = vpow2.f32 %v4786_v60  ;;  %v4775_v63 = vsub.f32 %v4741_v50, %v4767_v62  ;;  %v4795_v1 = vsel %vm1271_vm4, %v11804_v61, 0.0  ;;  %v4843_v5 = vpop.permute.xlu1 %4842  ;;  %v5018_v60 = vld [vmem:[#allocation52 + $0x18] sm:$0xff]  ;;  %v5016_v62 = vld [vmem:[#allocation52 + $0x8] sm:$0xff] }
0x28f9   :  { %v8999_v32 = vpop.eup %8998  ;;  %4796 = vadd.xlane.f32.xlu0 %v4795_v1 }
0x28fa   :  { %v4790_v24 = vmul.f32 1.442695, %v4775_v63  ;;  %v4792_v2 = vsel %vm1271_vm4, %v8999_v32, 0.0  ;;  %v5015_v63 = vld [vmem:[#allocation52] sm:$0xff] }
0x28fb   :  { %4793 = vadd.xlane.f32.xlu1 %v4792_v2  ;;  %v4845_v4 = vpop.permute.xlu0 %4844 }
0x28fc   :  { %9008 = vpow2.f32 %v4790_v24  ;;  %8511 = vmatprep.subr.mxu0 %v4845_v4 }
0x28fd   :  { %v11809_v28 = vpop.eup %9000  ;;  %8512 = vmatpush3.msra.mxu0 %v4845_v4 }
0x28fe   :  { %8513 = vmatprep.subr.mxu0 %v4843_v5  ;;  %v4798_v43 = vsel %vm1271_vm4, %v11809_v28, 0.0 }
0x28ff   :  { %4799 = vadd.xlane.f32.xlu1 %v4798_v43  ;;  %8514 = vmatpush3.msra.mxu0 %v4843_v5  ;;  %v4839_v56 = vpop.permute.xlu0 %4838 }
0x2901   :  { %v11813_v34 = vpop.eup %9002 }
0x2902   :  { %v9005_v45 = vpop.eup %9004  ;;  %v4804_v49 = vsel %vm1271_vm4, %v11813_v34, 0.0 }
0x2903   :  { %4805 = vadd.xlane.f32.xlu1 %v4804_v49  ;;  %v4801_v3 = vsel %vm1271_vm4, %v9005_v45, 0.0 }
0x2904   :  { %4802 = vadd.xlane.f32.xlu0 %v4801_v3 }
0x2905   :  { %v11818_v58 = vpop.eup %9006 }
0x2906   :  { %v4807_v29 = vsel %vm1271_vm4, %v11818_v58, 0.0 }
0x2908   :  { %4808 = vadd.xlane.f32.xlu0 %v4807_v29 }
0x2909   :  { %v11822_v8 = vpop.eup %9008 }
0x290a   :  { %v4813_v9 = vsel %vm1271_vm4, %v11822_v8, 0.0 }
0x290c   :  { %4814 = vadd.xlane.f32.xlu0 %v4813_v9 }
0x2922   :  { %4834 = vrot.lane.b32.xlu0 %v11669_v31, %s10304_s24 }
0x2928   :  { %v4764_v12 = vpop.xlane.xlu1 %4763 }
0x2929   :  { %v4774_v13 = vsub.f32 %v11796_v25, %v4764_v12 }
0x292b   :  { %v4788_v16 = vmul.f32 1.442695, %v4774_v13 }
0x292c   :  { %v4841_v19 = vpop.permute.xlu1 %4840 }
0x292d   :  { %9010 = vpow2.f32 %v4788_v16  ;;  %8515 = vmatprep.subr.mxu0 %v4841_v19 }
0x292e   :  { %8516 = vmatpush3.msra.mxu0 %v4841_v19 }
0x292f   :  { %8517 = vmatprep.subr.mxu0 %v4839_v56 }
0x2930   :  { %v4837_v37 = vpop.permute.xlu1 %4836  ;;  %8518 = vmatpush3.msra.mxu0 %v4839_v56  ;;  %v5156_v56 = vld [vmem:[#allocation58 + $0x18] sm:$0xff] }
0x2931   :  { %8519 = vmatprep.subr.mxu0 %v4837_v37 }
0x2932   :  { %8520 = vmatpush3.msra.mxu0 %v4837_v37  ;;  %v5155_v37 = vld [vmem:[#allocation58 + $0x10] sm:$0xff] }
0x293a   :  { %v9011_v26 = vpop.eup %9010 }
0x293b   :  { %v4810_v6 = vsel %vm1271_vm4, %v9011_v26, 0.0 }
0x293c   :  { %4811 = vadd.xlane.f32.xlu1 %v4810_v6 }
0x294d   :  { %4832 = vrot.lane.b32.xlu1 %v11671_v42, %s10304_s24  ;;  %s10313_s24 = smov 109  }
0x2982   :  { %v4797_v50 = vpop.xlane.xlu0 %4796 }
0x2984   :  { %v4794_v31 = vpop.xlane.xlu1 %4793 }
0x2985   :  { %9012 = vrcp.f32 %v4794_v31 }
0x2986   :  { %9014 = vrcp.f32 %v4797_v50 }
0x2988   :  { %v4800_v11 = vpop.xlane.xlu1 %4799 }
0x2989   :  { %9016 = vrcp.f32 %v4800_v11  ;;  %v8569_v11 = vpop.f32.mrf.mxu1 }
0x298c   :  { %v4806_v0 = vpop.xlane.xlu1 %4805 }
0x298d   :  { %v4803_v35 = vpop.xlane.xlu0 %4802 }
0x298e   :  { %9018 = vrcp.f32 %v4803_v35 }
0x298f   :  { %9020 = vrcp.f32 %v4806_v0  ;;  %v7657_v0 = vld [vmem:[#allocation63] ss:$0 sm:$0xff] }
0x2991   :  { %v4809_v47 = vpop.xlane.xlu0 %4808 }
0x2992   :  { %v9013_v21 = vpop.eup %9012  ;;  %9022 = vrcp.f32 %v4809_v47 }
0x2993   :  { %v4817_v25 = vmul.f32 %v9013_v21, %v8999_v32  ;;  %v9015_v22 = vpop.eup %9014 }
0x2994   :  { %v4819_v33 = vmul.f32 %v9015_v22, %v11804_v61  ;;  %v5017_v61 = vld [vmem:[#allocation52 + $0x10] sm:$0xff]  ;;  %v11863_v22 = vadd.f32 %v8569_v11, %v7657_v0 }
0x2995   :  { %v4815_v14 = vpop.xlane.xlu0 %4814  ;;  %8525 = vmatprep.mubr.msk.f32.mxu0 %vm1271_vm4, %v4817_v25 }
0x2996   :  { %9024 = vrcp.f32 %v4815_v14  ;;  %v9017_v51 = vpop.eup %9016 }
0x2997   :  { %v4821_v41 = vmul.f32 %v9017_v51, %v11809_v28 }
0x2999   :  { %v4835_v59 = vpop.permute.xlu0 %4834 }
0x299a   :  { %8521 = vmatprep.subr.mxu0 %v4835_v59 }
0x299b   :  { %8522 = vmatpush3.msra.mxu0 %v4835_v59  ;;  %v9019_v40 = vpop.eup %9018  ;;  %v5154_v59 = vld [vmem:[#allocation58 + $0x8] sm:$0xff] }
0x299c   :  { %v9021_v36 = vpop.eup %9020  ;;  %v4823_v44 = vmul.f32 %v9019_v40, %v9005_v45 }
0x299d   :  { %v4825_v46 = vmul.f32 %v9021_v36, %v11813_v34 }
0x299f   :  { %v9023_v54 = vpop.eup %9022 }
0x29a0   :  { %v4827_v53 = vmul.f32 %v9023_v54, %v11818_v58 }
0x29a3   :  { %v9025_v48 = vpop.eup %9024 }
0x29a4   :  { %v4831_v18 = vmul.f32 %v9025_v48, %v11822_v8 }
0x29c5   :  { %v4812_v42 = vpop.xlane.xlu1 %4811 }
0x29c6   :  { %9026 = vrcp.f32 %v4812_v42  ;;  %v5153_v42 = vld [vmem:[#allocation58] sm:$0xff] }
0x29c9   :  { %v4833_v30 = vpop.permute.xlu1 %4832 }
0x29ca   :  { %8523 = vmatprep.subr.mxu0 %v4833_v30 }
0x29cb   :  { %8524 = vmatpush3.msra.mxu0 %v4833_v30 }
0x29cc   :  { %8526 = vmatmul.mubr.msk.f32.vlgmr.msra.gmra.mxu0 %vm1271_vm4, %v4819_v33  ;;  %8537 = vmatprep.subr.mxu0 %v5018_v60 }
0x29cd   :  { %8528 = vmatprep.mubr.msk.f32.mxu0 %vm1271_vm4, %v4821_v41  ;;  %8538 = vmatpush3.msra.mxu0 %v5018_v60 }
0x29ce   :  { %8539 = vmatprep.subr.mxu0 %v5017_v61 }
0x29cf   :  { %8540 = vmatpush3.msra.mxu0 %v5017_v61 }
0x29d0   :  { %8529 = vmatmul.mubr.msk.f32.gmra.mxu0 %vm1271_vm4, %v4823_v44  ;;  %8541 = vmatprep.subr.mxu0 %v5016_v62 }
0x29d1   :  { %8531 = vmatprep.mubr.msk.f32.mxu0 %vm1271_vm4, %v4825_v46  ;;  %8542 = vmatpush3.msra.mxu0 %v5016_v62 }
0x29d2   :  { %8543 = vmatprep.subr.mxu0 %v5015_v63 }
0x29d3   :  { %v9027_v57 = vpop.eup %9026  ;;  %8544 = vmatpush3.msra.mxu0 %v5015_v63 }
0x29d4   :  { %8532 = vmatmul.mubr.msk.f32.gmra.mxu0 %vm1271_vm4, %v4827_v53  ;;  %v4829_v55 = vmul.f32 %v9027_v57, %v9011_v26  ;;  %8548 = vmatprep.subr.mxu0 %v5156_v56  ;;  %v7649_v26 = vld [vmem:[#allocation54] ss:$0 sm:$0xff] }
0x29d6   :  { %8534 = vmatprep.mubr.msk.f32.mxu0 %vm1271_vm4, %v4829_v55 }
0x29d8   :  { %8535 = vmatmul.mubr.msk.f32.gmra.mxu0 %vm1271_vm4, %v4831_v18 }
0x2a8c   :  { %v8527_v1 = vpop.f32.mrf.mxu0 }
0x2a8e   :  { %v4946_v32 = vpop.f32.mrf.mxu0 }
0x2a90   :  { %v8530_v24 = vpop.f32.mrf.mxu0 }
0x2a91   :  { %4989 = vrot.lane.b32.xlu1 %v8530_v24, %s10249_s22  ;;  %v7653_v24 = vld [vmem:[#allocation57] ss:$0 sm:$0xff] }
0x2a92   :  { %v4956_v2 = vpop.f32.mrf.mxu0 }
0x2a93   :  { %4987 = vrot.lane.b32.xlu0 %v4956_v2, %s10249_s22 }
0x2a94   :  { %v8533_v4 = vpop.f32.mrf.mxu0 }
0x2a95   :  { %4997 = vrot.lane.b32.xlu1 %v8533_v4, %s10305_s2 }
0x2a96   :  { %v4966_v28 = vpop.f32.mrf.mxu0 }
0x2a97   :  { %4995 = vrot.lane.b32.xlu0 %v4966_v28, %s10305_s2 }
0x2a98   :  { %v8536_v5 = vpop.f32.mrf.mxu0 }
0x2a99   :  { %5005 = vrot.lane.b32.xlu1 %v8536_v5, %s10306_s7 }
0x2a9a   :  { %v4976_v43 = vpop.f32.mrf.mxu0 }
0x2a9b   :  { %5003 = vrot.lane.b32.xlu0 %v4976_v43, %s10306_s7 }
0x2b03   :  { %v4990_v34 = vpop.permute.xlu1 %4989 }
0x2b04   :  { %v5010_v8 = vsel %vm1133_vm3, %v8527_v1, %v4990_v34  ;;  %v7652_v1 = vld [vmem:[#allocation55] ss:$0 sm:$0xff] }
0x2b05   :  { %v4988_v45 = vpop.permute.xlu0 %4987 }
0x2b06   :  { %v5009_v58 = vsel %vm1133_vm3, %v4946_v32, %v4988_v45 }
0x2b07   :  { %v4998_v49 = vpop.permute.xlu1 %4997 }
0x2b08   :  { %v5012_v13 = vsel %vm1539_vm5, %v5010_v8, %v4998_v49  ;;  %v7654_v8 = vld [vmem:[#allocation60] ss:$0 sm:$0xff] }
0x2b09   :  { %v4996_v3 = vpop.permute.xlu0 %4995 }
0x2b0a   :  { %v5011_v9 = vsel %vm1539_vm5, %v5009_v58, %v4996_v3 }
0x2b0b   :  { %v5006_v29 = vpop.permute.xlu1 %5005 }
0x2b0c   :  { %v5014_v19 = vsel %vm1542_vm6, %v5012_v13, %v5006_v29 }
0x2b0d   :  { %v5004_v12 = vpop.permute.xlu0 %5003 }
0x2b0e   :  { %v5013_v16 = vsel %vm1542_vm6, %v5011_v9, %v5004_v12 }
0x2b0f   :  { %8545 = vmatprep.mubr.msk.f32.mxu0 %vm1021_vm2, %v5013_v16 }
0x2b10   :  { %8546 = vmatmul.mubr.msk.f32.vlgmr.msra.gmra.mxu0 %vm1021_vm2, %v5014_v19 }
0x2b11   :  { %8549 = vmatpush3.msra.mxu0 %v5156_v56 }
0x2b12   :  { %8550 = vmatprep.subr.mxu0 %v5155_v37 }
0x2b13   :  { %8551 = vmatpush3.msra.mxu0 %v5155_v37 }
0x2b14   :  { %8552 = vmatprep.subr.mxu0 %v5154_v59 }
0x2b15   :  { %8553 = vmatpush3.msra.mxu0 %v5154_v59 }
0x2b16   :  { %8554 = vmatprep.subr.mxu0 %v5153_v42 }
0x2b17   :  { %8555 = vmatpush3.msra.mxu0 %v5153_v42 }
0x2bd0   :  { %v8547_v6 = vpop.f32.mrf.mxu0 }
0x2bd1   :  { %v5104_v31 = vadd.f32 %v8547_v6, %v7649_v26 }
0x2bd2   :  { %v5098_v50 = vpop.f32.mrf.mxu0 }
0x2bd3   :  { %v5108_v35 = vadd.f32 %v5104_v31, %v11663_v39  ;;  %v5099_v47 = vadd.f32 %v7649_v26, %v5098_v50 }
0x2bd5   :  { %v5107_v21 = vadd.f32 %v5099_v47, %v11661_v38  ;;  %v5114_v25 = vsel %vm1021_vm2, %v5108_v35, 0.0  ;;  %v5322_v38 = vpop.f32.mrf.mxu1 }
0x2bd6   :  { %5115 = vadd.xlane.f32.xlu1 %v5114_v25  ;;  %v11869_v39 = vadd.f32 %v7657_v0, %v5322_v38 }
0x2bd7   :  { %v5111_v14 = vsel %vm1021_vm2, %v5107_v21, 0.0 }
0x2bd8   :  { %5112 = vadd.xlane.f32.xlu0 %v5111_v14 }
0x2be7   :  { %5357 = vrot.lane.b32.xlu1 %v11863_v22, %s10301_s6 }
0x2beb   :  { %5353 = vrot.lane.b32.xlu1 %v11863_v22, %s10300_s14 }
0x2bef   :  { %5351 = vrot.lane.b32.xlu1 %v11869_v39, %s10300_s14 }
0x2bf3   :  { %5347 = vrot.lane.b32.xlu1 %v11869_v39, %s10302_s17 }
0x2c5f   :  { %v5116_v51 = vpop.xlane.xlu1 %5115 }
0x2c60   :  { %v5118_v30 = vmul.f32 0.03125, %v5116_v51 }
0x2c61   :  { %v5113_v33 = vpop.xlane.xlu0 %5112 }
0x2c62   :  { %v5117_v40 = vmul.f32 0.03125, %v5113_v33  ;;  %v5120_v36 = vsub.f32 %v5108_v35, %v5118_v30 }
0x2c63   :  { %v11875_v41 = vpop.permute.xlu1 %5357 }
0x2c64   :  { %v5119_v44 = vsub.f32 %v5107_v21, %v5117_v40  ;;  %8570 = vmatprep.subr.msk.mxu0 %vm1133_vm3, %v11875_v41  ;;  %v5122_v48 = vmul.f32 %v5120_v36, %v5120_v36 }
0x2c66   :  { %v5121_v54 = vmul.f32 %v5119_v44, %v5119_v44  ;;  %v5126_v53 = vsel %vm1021_vm2, %v5122_v48, 0.0 }
0x2c67   :  { %v11899_v49 = vpop.permute.xlu1 %5353 }
0x2c68   :  { %v5123_v46 = vsel %vm1021_vm2, %v5121_v54, 0.0 }
0x2c69   :  { %5124 = vadd.xlane.f32.xlu0 %v5123_v46 }
0x2c6b   :  { %v11905_v3 = vpop.permute.xlu1 %5351 }
0x2c6d   :  { %5127 = vadd.xlane.f32.xlu0 %v5126_v53 }
0x2c6f   :  { %v11917_v29 = vpop.permute.xlu1 %5347 }
0x2c83   :  { %5355 = vrot.lane.b32.xlu0 %v11869_v39, %s10301_s6 }
0x2c87   :  { %5349 = vrot.lane.b32.xlu0 %v11863_v22, %s10302_s17 }
0x2cf2   :  { %v5125_v57 = vpop.xlane.xlu0 %5124 }
0x2cf3   :  { %v5129_v55 = vmul.f32 0.03125, %v5125_v57 }
0x2cf5   :  { %v5131_v18 = vadd.f32 1e-05, %v5129_v55 }
0x2cf6   :  { %v5128_v60 = vpop.xlane.xlu0 %5127 }
0x2cf7   :  { %9028 = vrsqrt.f32 %v5131_v18  ;;  %v5130_v61 = vmul.f32 0.03125, %v5128_v60 }
0x2cf9   :  { %v5132_v62 = vadd.f32 1e-05, %v5130_v61 }
0x2cfa   :  { %v11893_v45 = vpop.permute.xlu0 %5355 }
0x2cfb   :  { %9030 = vrsqrt.f32 %v5132_v62 }
0x2cfe   :  { %v11911_v58 = vpop.permute.xlu0 %5349 }
0x2d04   :  { %v9029_v63 = vpop.eup %9028 }
0x2d05   :  { %v5135_v32 = vmul.f32 %v9029_v63, %v5119_v44 }
0x2d07   :  { %v5143_v2 = vmul.f32 %v7652_v1, %v5135_v32 }
0x2d08   :  { %v9031_v4 = vpop.eup %9030 }
0x2d09   :  { %v5136_v28 = vmul.f32 %v9031_v4, %v5120_v36  ;;  %v11885_v5 = vadd.f32 %v7653_v24, %v5143_v2 }
0x2d0b   :  { %v5144_v43 = vmul.f32 %v7652_v1, %v5136_v28  ;;  %8556 = vmatprep.mubr.msk.f32.mxu0 %vm1021_vm2, %v11885_v5 }
0x2d0d   :  { %v11889_v34 = vadd.f32 %v7653_v24, %v5144_v43 }
0x2d0f   :  { %8557 = vmatmul.mubr.msk.f32.vlgmr.msra.gmra.mxu0 %vm1021_vm2, %v11889_v34 }
0x2d10   :  { %8571 = vmatpush3.xpose.msk.msra.mxu0 %vm1133_vm3, %v11875_v41 }
0x2d11   :  { %8572 = vmatprep.subr.msk.mxu0 %vm1133_vm3, %v11893_v45 }
0x2d14   :  { %8573 = vmatpush3.xpose.msk.msra.mxu0 %vm1133_vm3, %v11893_v45 }
0x2d15   :  { %8574 = vmatprep.subr.msk.mxu0 %vm1133_vm3, %v11899_v49 }
0x2d18   :  { %8575 = vmatpush3.xpose.msk.msra.mxu0 %vm1133_vm3, %v11899_v49 }
0x2d19   :  { %8576 = vmatprep.subr.msk.mxu0 %vm1133_vm3, %v11905_v3 }
0x2d1c   :  { %8577 = vmatpush3.xpose.msk.msra.mxu0 %vm1133_vm3, %v11905_v3 }
0x2d1d   :  { %8578 = vmatprep.subr.msk.mxu0 %vm1133_vm3, %v11911_v58 }
0x2d20   :  { %8579 = vmatpush3.xpose.msk.msra.mxu0 %vm1133_vm3, %v11911_v58 }
0x2d21   :  { %8580 = vmatprep.subr.msk.mxu0 %vm1133_vm3, %v11917_v29 }
0x2d24   :  { %8581 = vmatpush3.xpose.msk.msra.mxu0 %vm1133_vm3, %v11917_v29 }
0x2d25   :  { %8582 = vmatprep.subr.msk.mxu0 %vm1133_vm3, %v11863_v22 }
0x2d28   :  { %8583 = vmatpush3.xpose.msk.msra.mxu0 %vm1133_vm3, %v11863_v22 }
0x2d29   :  { %8584 = vmatprep.subr.msk.mxu0 %vm1133_vm3, %v11869_v39 }
0x2d2c   :  { %8585 = vmatpush3.xpose.msk.msra.mxu0 %vm1133_vm3, %v11869_v39 }
0x2dcf   :  { %v8558_v9 = vpop.f32.mrf.mxu0 }
0x2dd0   :  { %v5242_v12 = vadd.f32 %v8558_v9, %v7654_v8 }
0x2dd1   :  { %v5236_v13 = vpop.f32.mrf.mxu0 }
0x2dd2   :  { %v5237_v16 = vadd.f32 %v7654_v8, %v5236_v13  ;;  %5335 = vrot.lane.b32.xlu1 %v5242_v12, %s10302_s17 }
0x2dd4   :  { %5333 = vrot.lane.b32.xlu0 %v5237_v16, %s10302_s17  ;;  %8586 = vmatprep.mubr.msk.f32.mxu0 %vm1133_vm3, %v5237_v16 }
0x2dd5   :  { %8587 = vmatmul.mubr.msk.f32.vlgmr.msra.gmra.mxu0 %vm1133_vm3, %v5242_v12 }
0x2dd6   :  { %5339 = vrot.lane.b32.xlu1 %v5242_v12, %s10300_s14 }
0x2dd8   :  { %5337 = vrot.lane.b32.xlu0 %v5237_v16, %s10300_s14 }
0x2dda   :  { %5343 = vrot.lane.b32.xlu1 %v5242_v12, %s10301_s6 }
0x2ddc   :  { %5341 = vrot.lane.b32.xlu0 %v5237_v16, %s10301_s6  ;;  %s10309_s6 = smov 125  }
0x2e44   :  { %v5336_v19 = vpop.permute.xlu1 %5335 }
0x2e46   :  { %v5334_v56 = vpop.permute.xlu0 %5333 }
0x2e47   :  { %8589 = vmatprep.mubr.msk.f32.mxu0 %vm1133_vm3, %v5334_v56 }
0x2e48   :  { %8590 = vmatmul.mubr.msk.f32.gmra.mxu0 %vm1133_vm3, %v5336_v19  ;;  %v5340_v37 = vpop.permute.xlu1 %5339 }
0x2e4a   :  { %v5338_v26 = vpop.permute.xlu0 %5337 }
0x2e4b   :  { %8592 = vmatprep.mubr.msk.f32.mxu0 %vm1133_vm3, %v5338_v26 }
0x2e4c   :  { %8593 = vmatmul.mubr.msk.f32.gmra.mxu0 %vm1133_vm3, %v5340_v37  ;;  %v5344_v31 = vpop.permute.xlu1 %5343 }
0x2e4e   :  { %v5342_v6 = vpop.permute.xlu0 %5341 }
0x2e4f   :  { %8595 = vmatprep.mubr.msk.f32.mxu0 %vm1133_vm3, %v5342_v6 }
0x2e50   :  { %8596 = vmatmul.mubr.msk.f32.gmra.mxu0 %vm1133_vm3, %v5344_v31 }
0x2e95   :  { %v8588_v50 = vpop.f32.mrf.mxu0 }
0x2e96   :  { %v5463_v35 = vadd.f32 %v11750_v20, %v8588_v50 }
0x2e97   :  { %v5457_v47 = vpop.f32.mrf.mxu0 }
0x2e98   :  { %v5458_v21 = vadd.f32 %v11754_v15, %v5457_v47  ;;  %v5499_v25 = vsel %vm1271_vm4, %v5463_v35, -inf }
0x2e99   :  { %5500 = vmax.xlane.f32.xlu1 %v5499_v25 }
0x2e9a   :  { %v5496_v14 = vsel %vm1271_vm4, %v5458_v21, -inf }
0x2e9b   :  { %5497 = vmax.xlane.f32.xlu0 %v5496_v14 }
0x2f08   :  { %v8591_v59 = vpop.f32.mrf.mxu0 }
0x2f09   :  { %v5473_v38 = vadd.f32 %v11764_v10, %v8591_v59 }
0x2f0a   :  { %v5467_v11 = vpop.f32.mrf.mxu0 }
0x2f0b   :  { %v5468_v0 = vadd.f32 %v11760_v7, %v5467_v11  ;;  %v5505_v33 = vsel %vm1271_vm4, %v5473_v38, -inf }
0x2f0c   :  { %v8594_v42 = vpop.f32.mrf.mxu0 }
0x2f0d   :  { %v5502_v51 = vsel %vm1271_vm4, %v5468_v0, -inf  ;;  %v5483_v15 = vadd.f32 %v11773_v23, %v8594_v42 }
0x2f0e   :  { %5503 = vmax.xlane.f32.xlu0 %v5502_v51  ;;  %v5477_v20 = vpop.f32.mrf.mxu0 }
0x2f0f   :  { %v5478_v30 = vadd.f32 %v11769_v17, %v5477_v20  ;;  %v5511_v44 = vsel %vm1271_vm4, %v5483_v15, -inf }
0x2f10   :  { %v8597_v36 = vpop.f32.mrf.mxu0 }
0x2f11   :  { %v5508_v40 = vsel %vm1271_vm4, %v5478_v30, -inf  ;;  %v5493_v7 = vadd.f32 %v11779_v27, %v8597_v36 }
0x2f12   :  { %5506 = vmax.xlane.f32.xlu0 %v5505_v33  ;;  %5509 = vmax.xlane.f32.xlu1 %v5508_v40  ;;  %v5487_v54 = vpop.f32.mrf.mxu0 }
0x2f13   :  { %v5517_v10 = vsel %vm1271_vm4, %v5493_v7, -inf  ;;  %v5488_v46 = vadd.f32 %v11793_v52, %v5487_v54 }
0x2f15   :  { %v5514_v48 = vsel %vm1271_vm4, %v5488_v46, -inf }
0x2f16   :  { %5512 = vmax.xlane.f32.xlu0 %v5511_v44 }
0x2f1a   :  { %5518 = vmax.xlane.f32.xlu0 %v5517_v10 }
0x2f22   :  { %v5501_v17 = vpop.xlane.xlu1 %5500 }
0x2f23   :  { %5598 = vrot.lane.b32.xlu1 %v11875_v41, %s10303_s27  ;;  %v5521_v23 = vsub.f32 %v5463_v35, %v5501_v17 }
0x2f24   :  { %v5498_v57 = vpop.xlane.xlu0 %5497 }
0x2f25   :  { %v5530_v27 = vmul.f32 1.442695, %v5521_v23  ;;  %v5520_v55 = vsub.f32 %v5458_v21, %v5498_v57 }
0x2f27   :  { %5594 = vrot.lane.b32.xlu1 %v11899_v49, %s10303_s27  ;;  %9032 = vpow2.f32 %v5530_v27  ;;  %v5528_v18 = vmul.f32 1.442695, %v5520_v55 }
0x2f29   :  { %9034 = vpow2.f32 %v5528_v18 }
0x2f30   :  { %5596 = vrot.lane.b32.xlu0 %v11893_v45, %s10303_s27 }
0x2f34   :  { %5590 = vrot.lane.b32.xlu0 %v11911_v58, %s10303_s27  ;;  %v11971_v41 = vpop.eup %9032 }
0x2f35   :  { %v5547_v53 = vsel %vm1271_vm4, %v11971_v41, 0.0 }
0x2f36   :  { %v11979_v52 = vpop.eup %9034 }
0x2f37   :  { %v5544_v60 = vsel %vm1271_vm4, %v11979_v52, 0.0 }
0x2f4b   :  { %5515 = vmax.xlane.f32.xlu1 %v5514_v48 }
0x2f53   :  { %5548 = vadd.xlane.f32.xlu0 %v5547_v53 }
0x2f5c   :  { %5592 = vrot.lane.b32.xlu1 %v11905_v3, %s10303_s27 }
0x2f60   :  { %5588 = vrot.lane.b32.xlu1 %v11917_v29, %s10303_s27 }
0x2f84   :  { %5545 = vadd.xlane.f32.xlu1 %v5544_v60 }
0x2f97   :  { %v5504_v61 = vpop.xlane.xlu0 %5503 }
0x2f98   :  { %v5522_v62 = vsub.f32 %v5468_v0, %v5504_v61  ;;  %v5770_v61 = vld [vmem:[#allocation64 + $0x18] sm:$0xff] }
0x2f9a   :  { %v5532_v63 = vmul.f32 1.442695, %v5522_v62  ;;  %v5769_v62 = vld [vmem:[#allocation64 + $0x10] sm:$0xff] }
0x2f9b   :  { %v5510_v1 = vpop.xlane.xlu1 %5509  ;;  %v5507_v32 = vpop.xlane.xlu0 %5506 }
0x2f9c   :  { %9036 = vpow2.f32 %v5532_v63  ;;  %v5524_v24 = vsub.f32 %v5478_v30, %v5510_v1  ;;  %v5523_v2 = vsub.f32 %v5473_v38, %v5507_v32  ;;  %v5768_v63 = vld [vmem:[#allocation64 + $0x8] sm:$0xff]  ;;  %v5767_v1 = vld [vmem:[#allocation64] sm:$0xff] }
0x2f9e   :  { %v5536_v4 = vmul.f32 1.442695, %v5524_v24  ;;  %v5534_v28 = vmul.f32 1.442695, %v5523_v2 }
0x2f9f   :  { %v5599_v43 = vpop.permute.xlu1 %5598  ;;  %v5513_v45 = vpop.xlane.xlu0 %5512 }
0x2fa0   :  { %9038 = vpow2.f32 %v5536_v4  ;;  %v5525_v49 = vsub.f32 %v5483_v15, %v5513_v45  ;;  %8598 = vmatprep.subr.mxu1 %v5599_v43 }
0x2fa1   :  { %9040 = vpow2.f32 %v5534_v28  ;;  %8599 = vmatpush3.msra.mxu1 %v5599_v43 }
0x2fa2   :  { %v5538_v3 = vmul.f32 1.442695, %v5525_v49 }
0x2fa3   :  { %v5519_v58 = vpop.xlane.xlu0 %5518  ;;  %v5595_v13 = vpop.permute.xlu1 %5594 }
0x2fa4   :  { %9042 = vpow2.f32 %v5538_v3  ;;  %v5527_v29 = vsub.f32 %v5493_v7, %v5519_v58 }
0x2fa6   :  { %v5542_v8 = vmul.f32 1.442695, %v5527_v29 }
0x2fa7   :  { %v5597_v9 = vpop.permute.xlu0 %5596 }
0x2fa8   :  { %9044 = vpow2.f32 %v5542_v8  ;;  %8600 = vmatprep.subr.mxu1 %v5597_v9 }
0x2fa9   :  { %v11983_v12 = vpop.eup %9036  ;;  %8601 = vmatpush3.msra.mxu1 %v5597_v9 }
0x2faa   :  { %8602 = vmatprep.subr.mxu1 %v5595_v13  ;;  %v5550_v16 = vsel %vm1271_vm4, %v11983_v12, 0.0 }
0x2fab   :  { %5551 = vadd.xlane.f32.xlu1 %v5550_v16  ;;  %8603 = vmatpush3.msra.mxu1 %v5595_v13  ;;  %v5591_v59 = vpop.permute.xlu0 %5590 }
0x2fad   :  { %v11987_v19 = vpop.eup %9038 }
0x2fae   :  { %v9041_v56 = vpop.eup %9040  ;;  %v5556_v37 = vsel %vm1271_vm4, %v11987_v19, 0.0 }
0x2faf   :  { %5557 = vadd.xlane.f32.xlu1 %v5556_v37  ;;  %v5553_v26 = vsel %vm1271_vm4, %v9041_v56, 0.0 }
0x2fb0   :  { %5554 = vadd.xlane.f32.xlu0 %v5553_v26 }
0x2fb1   :  { %v11992_v6 = vpop.eup %9042 }
0x2fb2   :  { %v5559_v31 = vsel %vm1271_vm4, %v11992_v6, 0.0 }
0x2fb4   :  { %5560 = vadd.xlane.f32.xlu0 %v5559_v31 }
0x2fb5   :  { %v11996_v50 = vpop.eup %9044 }
0x2fb6   :  { %v5565_v35 = vsel %vm1271_vm4, %v11996_v50, 0.0 }
0x2fb8   :  { %5566 = vadd.xlane.f32.xlu0 %v5565_v35 }
0x2fce   :  { %5586 = vrot.lane.b32.xlu0 %v11863_v22, %s10303_s27 }
0x2fd4   :  { %v5516_v47 = vpop.xlane.xlu1 %5515 }
0x2fd5   :  { %v5526_v21 = vsub.f32 %v5488_v46, %v5516_v47 }
0x2fd7   :  { %v5540_v25 = vmul.f32 1.442695, %v5526_v21 }
0x2fd8   :  { %v5593_v14 = vpop.permute.xlu1 %5592 }
0x2fd9   :  { %9046 = vpow2.f32 %v5540_v25  ;;  %8604 = vmatprep.subr.mxu1 %v5593_v14 }
0x2fda   :  { %8605 = vmatpush3.msra.mxu1 %v5593_v14 }
0x2fdb   :  { %8606 = vmatprep.subr.mxu1 %v5591_v59 }
0x2fdc   :  { %v5589_v11 = vpop.permute.xlu1 %5588  ;;  %8607 = vmatpush3.msra.mxu1 %v5591_v59  ;;  %v5549_v20 = vpop.xlane.xlu0 %5548 }
0x2fdd   :  { %8608 = vmatprep.subr.mxu1 %v5589_v11 }
0x2fde   :  { %8609 = vmatpush3.msra.mxu1 %v5589_v11 }
0x2fe6   :  { %v9047_v0 = vpop.eup %9046 }
0x2fe7   :  { %v5562_v42 = vsel %vm1271_vm4, %v9047_v0, 0.0 }
0x2fe8   :  { %5563 = vadd.xlane.f32.xlu1 %v5562_v42 }
0x2ff9   :  { %5584 = vrot.lane.b32.xlu1 %v11869_v39, %s10303_s27  ;;  %s10311_s27 = smov 1  }
0x300d   :  { %v5546_v22 = vpop.xlane.xlu1 %5545 }
0x300e   :  { %9048 = vrcp.f32 %v5546_v22 }
0x300f   :  { %9050 = vrcp.f32 %v5549_v20 }
0x301b   :  { %v9049_v38 = vpop.eup %9048 }
0x301c   :  { %v5569_v51 = vmul.f32 %v9049_v38, %v11979_v52  ;;  %v9051_v44 = vpop.eup %9050 }
0x301d   :  { %v5571_v23 = vmul.f32 %v9051_v44, %v11971_v41  ;;  %v6004_v44 = vld [vmem:[%s13159_s18 + $0x28] sm:$0xff] }
0x301e   :  { %8614 = vmatprep.mubr.msk.f32.mxu1 %vm1271_vm4, %v5569_v51 }
0x3034   :  { %v5552_v36 = vpop.xlane.xlu1 %5551 }
0x3035   :  { %9052 = vrcp.f32 %v5552_v36  ;;  %v5905_v36 = vld [vmem:[#allocation70] sm:$0xff] }
0x3038   :  { %v5558_v7 = vpop.xlane.xlu1 %5557 }
0x3039   :  { %v5555_v30 = vpop.xlane.xlu0 %5554 }
0x303a   :  { %9054 = vrcp.f32 %v5555_v30 }
0x303b   :  { %9056 = vrcp.f32 %v5558_v7  ;;  %v6006_v7 = vld [vmem:[%s13159_s18 + $0x38] sm:$0xff] }
0x303c   :  { %8648 = vmatprep.subr.mxu0 %v6006_v7 }
0x303d   :  { %v5561_v15 = vpop.xlane.xlu0 %5560  ;;  %8649 = vmatpush3.msra.mxu0 %v6006_v7 }
0x303e   :  { %9058 = vrcp.f32 %v5561_v15 }
0x3041   :  { %v5567_v33 = vpop.xlane.xlu0 %5566 }
0x3042   :  { %9060 = vrcp.f32 %v5567_v33  ;;  %v9053_v10 = vpop.eup %9052  ;;  %v5907_v33 = vld [vmem:[#allocation70 + $0x10] sm:$0xff] }
0x3043   :  { %v5573_v54 = vmul.f32 %v9053_v10, %v11983_v12  ;;  %v6003_v10 = vld [vmem:[%s13159_s18 + $0x20] sm:$0xff] }
0x3045   :  { %v5587_v40 = vpop.permute.xlu0 %5586 }
0x3046   :  { %8610 = vmatprep.subr.mxu1 %v5587_v40 }
0x3047   :  { %8611 = vmatpush3.msra.mxu1 %v5587_v40  ;;  %v9055_v27 = vpop.eup %9054  ;;  %v5906_v40 = vld [vmem:[#allocation70 + $0x8] sm:$0xff] }
0x3048   :  { %v9057_v46 = vpop.eup %9056  ;;  %v5575_v48 = vmul.f32 %v9055_v27, %v9041_v56 }
0x3049   :  { %v5577_v57 = vmul.f32 %v9057_v46, %v11987_v19 }
0x304b   :  { %v9059_v53 = vpop.eup %9058 }
0x304c   :  { %v5579_v41 = vmul.f32 %v9059_v53, %v11992_v6  ;;  %v7684_v6 = vld [vmem:[#allocation66] ss:$0 sm:$0xff] }
0x304f   :  { %v9061_v55 = vpop.eup %9060 }
0x3050   :  { %v5583_v60 = vmul.f32 %v9061_v55, %v11996_v50  ;;  %v7687_v55 = vld [vmem:[#allocation67] ss:$0 sm:$0xff] }
0x3071   :  { %v5564_v39 = vpop.xlane.xlu1 %5563 }
0x3072   :  { %9062 = vrcp.f32 %v5564_v39  ;;  %v6005_v39 = vld [vmem:[%s13159_s18 + $0x30] sm:$0xff] }
0x3073   :  { %8650 = vmatprep.subr.mxu0 %v6005_v39 }
0x3074   :  { %8651 = vmatpush3.msra.mxu0 %v6005_v39 }
0x3075   :  { %v5585_v17 = vpop.permute.xlu1 %5584  ;;  %8652 = vmatprep.subr.mxu0 %v6004_v44 }
0x3076   :  { %8612 = vmatprep.subr.mxu1 %v5585_v17  ;;  %8653 = vmatpush3.msra.mxu0 %v6004_v44  ;;  %v7696_v44 = vld [vmem:[#allocation76] ss:$0 sm:$0xff] }
0x3077   :  { %8613 = vmatpush3.msra.mxu1 %v5585_v17  ;;  %v6002_v17 = vld [vmem:[%s13159_s18 + $0x18] sm:$0xff]  ;;  %8654 = vmatprep.subr.mxu0 %v6003_v10 }
0x3078   :  { %8615 = vmatmul.mubr.msk.f32.vlgmr.msra.gmra.mxu1 %vm1271_vm4, %v5571_v23  ;;  %8626 = vmatprep.subr.mxu1 %v5770_v61 }
0x3079   :  { %8617 = vmatprep.mubr.msk.f32.mxu1 %vm1271_vm4, %v5573_v54  ;;  %8627 = vmatpush3.msra.mxu1 %v5770_v61 }
0x307a   :  { %8628 = vmatprep.subr.mxu1 %v5769_v62  ;;  %8655 = vmatpush3.msra.mxu0 %v6003_v10 }
0x307b   :  { %8629 = vmatpush3.msra.mxu1 %v5769_v62  ;;  %8656 = vmatprep.subr.mxu0 %v6002_v17 }
0x307c   :  { %8618 = vmatmul.mubr.msk.f32.gmra.mxu1 %vm1271_vm4, %v5575_v48  ;;  %8630 = vmatprep.subr.mxu1 %v5768_v63 }
0x307d   :  { %8620 = vmatprep.mubr.msk.f32.mxu1 %vm1271_vm4, %v5577_v57  ;;  %8631 = vmatpush3.msra.mxu1 %v5768_v63 }
0x307e   :  { %8632 = vmatprep.subr.mxu1 %v5767_v1  ;;  %8657 = vmatpush3.msra.mxu0 %v6002_v17 }
0x307f   :  { %v9063_v18 = vpop.eup %9062  ;;  %8633 = vmatpush3.msra.mxu1 %v5767_v1 }
0x3080   :  { %8621 = vmatmul.mubr.msk.f32.gmra.mxu1 %vm1271_vm4, %v5579_v41  ;;  %v5581_v52 = vmul.f32 %v9063_v18, %v9047_v0  ;;  %v7688_v18 = vld [vmem:[#allocation69] ss:$0 sm:$0xff] }
0x3082   :  { %8623 = vmatprep.mubr.msk.f32.mxu1 %vm1271_vm4, %v5581_v52 }
0x3084   :  { %8624 = vmatmul.mubr.msk.f32.gmra.mxu1 %vm1271_vm4, %v5583_v60 }
0x3138   :  { %v8616_v32 = vpop.f32.mrf.mxu1 }
0x313a   :  { %v5698_v24 = vpop.f32.mrf.mxu1 }
0x313c   :  { %v8619_v2 = vpop.f32.mrf.mxu1 }
0x313d   :  { %5741 = vrot.lane.b32.xlu1 %v8619_v2, %s10249_s22  ;;  %v5999_v2 = vld [vmem:[%s13159_s18] sm:$0xff] }
0x313e   :  { %v5708_v4 = vpop.f32.mrf.mxu1 }
0x313f   :  { %5739 = vrot.lane.b32.xlu0 %v5708_v4, %s10249_s22  ;;  %v7689_v4 = vld [vmem:[#allocation72] ss:$0 sm:$0xff] }
0x3140   :  { %v8622_v28 = vpop.f32.mrf.mxu1 }
0x3141   :  { %5749 = vrot.lane.b32.xlu1 %v8622_v28, %s10305_s2 }
0x3142   :  { %v5718_v43 = vpop.f32.mrf.mxu1 }
0x3143   :  { %5747 = vrot.lane.b32.xlu0 %v5718_v43, %s10305_s2  ;;  %s10315_s2 = smov 111  }
0x3144   :  { %v8625_v45 = vpop.f32.mrf.mxu1 }
0x3145   :  { %5757 = vrot.lane.b32.xlu1 %v8625_v45, %s10306_s7 }
0x3146   :  { %v5728_v49 = vpop.f32.mrf.mxu1 }
0x3147   :  { %5755 = vrot.lane.b32.xlu0 %v5728_v49, %s10306_s7  ;;  %s10316_s7 = smov 113  }
0x31af   :  { %v5742_v3 = vpop.permute.xlu1 %5741 }
0x31b0   :  { %v5762_v13 = vsel %vm1133_vm3, %v8616_v32, %v5742_v3  ;;  %v6001_v32 = vld [vmem:[%s13159_s18 + $0x10] sm:$0xff] }
0x31b1   :  { %v5740_v58 = vpop.permute.xlu0 %5739  ;;  %8658 = vmatprep.subr.mxu0 %v6001_v32 }
0x31b2   :  { %v5761_v9 = vsel %vm1133_vm3, %v5698_v24, %v5740_v58  ;;  %8659 = vmatpush3.msra.mxu0 %v6001_v32  ;;  %v6000_v24 = vld [vmem:[%s13159_s18 + $0x8] sm:$0xff]  ;;  %s10334_s18 = smov 9   ;;  %vm7286_vm3 = vcmask 48168  }
0x31b3   :  { %v5750_v29 = vpop.permute.xlu1 %5749  ;;  %8660 = vmatprep.subr.mxu0 %v6000_v24 }
0x31b4   :  { %v5764_v56 = vsel %vm1539_vm5, %v5762_v13, %v5750_v29  ;;  %8661 = vmatpush3.msra.mxu0 %v6000_v24  ;;  %v7692_v29 = vld [vmem:[#allocation73] ss:$0 sm:$0xff] }
0x31b5   :  { %v5748_v8 = vpop.permute.xlu0 %5747  ;;  %8662 = vmatprep.subr.mxu0 %v5999_v2 }
0x31b6   :  { %v5763_v16 = vsel %vm1539_vm5, %v5761_v9, %v5748_v8  ;;  %8663 = vmatpush3.msra.mxu0 %v5999_v2  ;;  %vm7308_vm5 = vcmask 64568  }
0x31b7   :  { %v5758_v12 = vpop.permute.xlu1 %5757 }
0x31b8   :  { %v5766_v26 = vsel %vm1542_vm6, %v5764_v56, %v5758_v12 }
0x31b9   :  { %v5756_v19 = vpop.permute.xlu0 %5755 }
0x31ba   :  { %v5765_v37 = vsel %vm1542_vm6, %v5763_v16, %v5756_v19  ;;  %vm7319_vm6 = vcmask 72768  }
0x31bb   :  { %8634 = vmatprep.mubr.msk.f32.mxu1 %vm1021_vm2, %v5765_v37 }
0x31bc   :  { %8635 = vmatmul.mubr.msk.f32.vlgmr.msra.gmra.mxu1 %vm1021_vm2, %v5766_v26 }
0x327c   :  { %v8636_v31 = vpop.f32.mrf.mxu1 }
0x327d   :  { %v5856_v50 = vadd.f32 %v8636_v31, %v7684_v6 }
0x327e   :  { %v5850_v35 = vpop.f32.mrf.mxu1 }
0x327f   :  { %v5860_v47 = vadd.f32 %v5856_v50, %v11889_v34  ;;  %v5851_v21 = vadd.f32 %v7684_v6, %v5850_v35  ;;  %v5908_v34 = vld [vmem:[#allocation70 + $0x18] sm:$0xff] }
0x3280   :  { %8637 = vmatprep.subr.mxu1 %v5908_v34 }
0x3281   :  { %v5859_v25 = vadd.f32 %v5851_v21, %v11885_v5  ;;  %v5866_v14 = vsel %vm1021_vm2, %v5860_v47, 0.0  ;;  %8638 = vmatpush3.msra.mxu1 %v5908_v34 }
0x3282   :  { %5867 = vadd.xlane.f32.xlu1 %v5866_v14  ;;  %8639 = vmatprep.subr.mxu1 %v5907_v33 }
0x3283   :  { %v5863_v59 = vsel %vm1021_vm2, %v5859_v25, 0.0  ;;  %8640 = vmatpush3.msra.mxu1 %v5907_v33  ;;  %v7695_v33 = vld [vmem:[#allocation75] ss:$0 sm:$0xff] }
0x3284   :  { %5864 = vadd.xlane.f32.xlu0 %v5863_v59  ;;  %8641 = vmatprep.subr.mxu1 %v5906_v40 }
0x3285   :  { %8642 = vmatpush3.msra.mxu1 %v5906_v40 }
0x3286   :  { %8643 = vmatprep.subr.mxu1 %v5905_v36 }
0x3287   :  { %8644 = vmatpush3.msra.mxu1 %v5905_v36 }
0x330b   :  { %v5868_v11 = vpop.xlane.xlu1 %5867 }
0x330c   :  { %v5870_v0 = vmul.f32 0.03125, %v5868_v11  ;;  %v6144_v11 = vld [vmem:[%s13160_s9 + $0x18] sm:$0xff] }
0x330d   :  { %v5865_v42 = vpop.xlane.xlu0 %5864  ;;  %8667 = vmatprep.subr.mxu1 %v6144_v11 }
0x330e   :  { %v5869_v22 = vmul.f32 0.03125, %v5865_v42  ;;  %v5872_v38 = vsub.f32 %v5860_v47, %v5870_v0  ;;  %v6143_v0 = vld [vmem:[%s13160_s9 + $0x10] sm:$0xff]  ;;  %v6142_v42 = vld [vmem:[%s13160_s9 + $0x8] sm:$0xff] }
0x3310   :  { %v5871_v51 = vsub.f32 %v5859_v25, %v5869_v22  ;;  %v5874_v15 = vmul.f32 %v5872_v38, %v5872_v38  ;;  %v6141_v22 = vld [vmem:[%s13160_s9] sm:$0xff] }
0x3312   :  { %v5873_v20 = vmul.f32 %v5871_v51, %v5871_v51  ;;  %v5878_v5 = vsel %vm1021_vm2, %v5874_v15, 0.0 }
0x3314   :  { %v5875_v30 = vsel %vm1021_vm2, %v5873_v20, 0.0 }
0x3315   :  { %5876 = vadd.xlane.f32.xlu0 %v5875_v30 }
0x3319   :  { %5879 = vadd.xlane.f32.xlu0 %v5878_v5 }
0x339e   :  { %v5877_v23 = vpop.xlane.xlu0 %5876 }
0x339f   :  { %v5881_v27 = vmul.f32 0.03125, %v5877_v23 }
0x33a1   :  { %v5883_v54 = vadd.f32 1e-05, %v5881_v27  ;;  %v7697_v27 = vld [vmem:[#allocation78] ss:$0 sm:$0xff] }
0x33a2   :  { %v5880_v46 = vpop.xlane.xlu0 %5879 }
0x33a3   :  { %9064 = vrsqrt.f32 %v5883_v54  ;;  %v5882_v48 = vmul.f32 0.03125, %v5880_v46 }
0x33a5   :  { %v5884_v53 = vadd.f32 1e-05, %v5882_v48 }
0x33a7   :  { %9066 = vrsqrt.f32 %v5884_v53 }
0x33b0   :  { %v9065_v57 = vpop.eup %9064 }
0x33b1   :  { %v5887_v41 = vmul.f32 %v9065_v57, %v5871_v51 }
0x33b3   :  { %v5895_v52 = vmul.f32 %v7687_v55, %v5887_v41 }
0x33b4   :  { %v9067_v60 = vpop.eup %9066 }
0x33b5   :  { %v5888_v61 = vmul.f32 %v9067_v60, %v5872_v38  ;;  %v5903_v62 = vadd.f32 %v7688_v18, %v5895_v52 }
0x33b7   :  { %v5896_v63 = vmul.f32 %v7687_v55, %v5888_v61  ;;  %8645 = vmatprep.mubr.msk.f32.mxu1 %vm1021_vm2, %v5903_v62  ;;  %v12082_v55 = vld [vmem:[%s10703_s30] sm:$0x1]  ;;  %s10310_s30 = smov 2  }
0x33b9   :  { %v5904_v1 = vadd.f32 %v7688_v18, %v5896_v63  ;;  %v6661_v18 = vmul.f32 %v12082_v55, %v12082_v55 }
0x33bb   :  { %8646 = vmatmul.mubr.msk.f32.vlgmr.msra.gmra.mxu1 %vm1021_vm2, %v5904_v1 }
0x33bc   :  { %8668 = vmatpush3.msra.mxu1 %v6144_v11 }
0x33bd   :  { %8669 = vmatprep.subr.mxu1 %v6143_v0 }
0x33be   :  { %8670 = vmatpush3.msra.mxu1 %v6143_v0 }
0x33bf   :  { %8671 = vmatprep.subr.mxu1 %v6142_v42 }
0x33c0   :  { %8672 = vmatpush3.msra.mxu1 %v6142_v42 }
0x33c1   :  { %8673 = vmatprep.subr.mxu1 %v6141_v22 }
0x33c2   :  { %8674 = vmatpush3.msra.mxu1 %v6141_v22 }
0x347b   :  { %v8647_v28 = vpop.f32.mrf.mxu1 }
0x347c   :  { %v5994_v43 = vadd.f32 %v8647_v28, %v7689_v4 }
0x347d   :  { %v5988_v45 = vpop.f32.mrf.mxu1 }
0x347e   :  { %v5989_v49 = vadd.f32 %v7689_v4, %v5988_v45  ;;  %v5998_v58 = vmax.f32 %v5994_v43, 0.0 }
0x3480   :  { %v5997_v3 = vmax.f32 %v5989_v49, 0.0 }
0x3482   :  { %8664 = vmatprep.mubr.msk.f32.mxu0 %vm1271_vm4, %v5997_v3 }
0x3483   :  { %8665 = vmatmul.mubr.msk.f32.vlgmr.msra.gmra.mxu0 %vm1271_vm4, %v5998_v58  ;;  %vm7297_vm4 = vcmask 56368  }
0x3543   :  { %v8666_v8 = vpop.f32.mrf.mxu0 }
0x3544   :  { %v6092_v9 = vadd.f32 %v8666_v8, %v7692_v29 }
0x3545   :  { %v6086_v12 = vpop.f32.mrf.mxu0 }
0x3546   :  { %v6096_v13 = vadd.f32 %v6092_v9, %v5904_v1  ;;  %v6087_v16 = vadd.f32 %v7692_v29, %v6086_v12 }
0x3548   :  { %v6095_v19 = vadd.f32 %v6087_v16, %v5903_v62  ;;  %v6102_v56 = vsel %vm1021_vm2, %v6096_v13, 0.0 }
0x3549   :  { %6103 = vadd.xlane.f32.xlu0 %v6102_v56 }
0x354a   :  { %v6099_v37 = vsel %vm1021_vm2, %v6095_v19, 0.0 }
0x354b   :  { %6100 = vadd.xlane.f32.xlu1 %v6099_v37 }
0x35d2   :  { %v6104_v26 = vpop.xlane.xlu0 %6103 }
0x35d3   :  { %v6106_v6 = vmul.f32 0.03125, %v6104_v26 }
0x35d4   :  { %v6101_v31 = vpop.xlane.xlu1 %6100 }
0x35d5   :  { %v6108_v50 = vsub.f32 %v6096_v13, %v6106_v6  ;;  %v6105_v35 = vmul.f32 0.03125, %v6101_v31 }
0x35d7   :  { %v6107_v47 = vsub.f32 %v6095_v19, %v6105_v35  ;;  %v6110_v21 = vmul.f32 %v6108_v50, %v6108_v50  ;;  %v6683_v35 = vlaneseq }
0x35d9   :  { %v6114_v25 = vsel %vm1021_vm2, %v6110_v21, 0.0  ;;  %v6109_v14 = vmul.f32 %v6107_v47, %v6107_v47 }
0x35da   :  { %6115 = vadd.xlane.f32.xlu0 %v6114_v25 }
0x35db   :  { %v6111_v59 = vsel %vm1021_vm2, %v6109_v14, 0.0 }
0x35dc   :  { %6112 = vadd.xlane.f32.xlu1 %v6111_v59  ;;  %v6684_v59 = vshrl.u32 %v6683_v35, 7 }
0x3663   :  { %v6116_v38 = vpop.xlane.xlu0 %6115 }
0x3664   :  { %v6118_v51 = vmul.f32 0.03125, %v6116_v38 }
0x3665   :  { %v6113_v20 = vpop.xlane.xlu1 %6112 }
0x3666   :  { %v6120_v30 = vadd.f32 1e-05, %v6118_v51  ;;  %v6117_v15 = vmul.f32 0.03125, %v6113_v20 }
0x3668   :  { %9068 = vrsqrt.f32 %v6120_v30  ;;  %v6119_v5 = vadd.f32 1e-05, %v6117_v15  ;;  %v12131_v15 = vsub.s32 0, %v6684_v59 }
0x366a   :  { %9070 = vrsqrt.f32 %v6119_v5 }
0x3675   :  { %v9069_v34 = vpop.eup %9068 }
0x3676   :  { %v6124_v40 = vmul.f32 %v9069_v34, %v6108_v50 }
0x3677   :  { %v9071_v36 = vpop.eup %9070 }
0x3678   :  { %v6123_v7 = vmul.f32 %v9071_v36, %v6107_v47  ;;  %v6132_v39 = vmul.f32 %v7695_v33, %v6124_v40 }
0x367a   :  { %v6131_v10 = vmul.f32 %v7695_v33, %v6123_v7  ;;  %v6140_v23 = vadd.f32 %v7696_v44, %v6132_v39 }
0x367c   :  { %v6139_v17 = vadd.f32 %v7696_v44, %v6131_v10 }
0x367e   :  { %8675 = vmatprep.mubr.msk.f32.mxu1 %vm1021_vm2, %v6139_v17 }
0x367f   :  { %8676 = vmatmul.mubr.msk.f32.vlgmr.msra.gmra.mxu1 %vm1021_vm2, %v6140_v23  ;;  %vm7275_vm2 = vcmask 39968  }
0x373f   :  { %v8677_v54 = vpop.f32.mrf.mxu1 }
0x3740   :  { %v12061_v46 = vadd.f32 %v8677_v54, %v7697_v27 }
0x3741   :  { %v6224_v48 = vpop.f32.mrf.mxu1 }
0x3742   :  { %13161 = vst [vmem:[#allocation162_spill] sm:$0xff] %v12061_v46  ;;  %v12063_v53 = vadd.f32 %v7697_v27, %v6224_v48  ;;  %v12067_v57 = vmul.f32 %v12061_v46, %v12061_v46  ;;  %7249 = vst.msk [vmem:[%s10708_s3 + $0x8] sm:$0xff] %vm7247_vm7, %v12061_v46  ;;  %v6234_v29 = vmax.f32 %v12061_v46, 0.0 }
0x3743   :  { %7252 = vst.msk [vmem:[%s10708_s3 + $0x8] sm:$0xff] %vm7250_vm8, %v12061_v46 }
0x3744   :  { %13162 = vst [vmem:[#allocation163_spill] sm:$0xff] %v12063_v53  ;;  %6263 = vrot.lane.b32.xlu1 %v12067_v57, %s10307_s28  ;;  %6255 = vrot.lane.b32.xlu0 %v12067_v57, %s10308_s8  ;;  %7255 = vst.msk [vmem:[%s10708_s3 + $0x8] sm:$0xff] %vm7253_vm9, %v12061_v46  ;;  %v6249_v41 = vmul.f32 %v12063_v53, %v12063_v53  ;;  %v6233_v8 = vmax.f32 %v12063_v53, 0.0  ;;  %v12107_v12 = vadd.f32 1e-06, %v6234_v29 }
0x3745   :  { %7248 = vst.msk [vmem:[%s10708_s3] sm:$0xff] %vm7247_vm7, %v12063_v53  ;;  %vm7330_vm7 = vcmask 80968  }
0x3746   :  { %7251 = vst.msk [vmem:[%s10708_s3] sm:$0xff] %vm7250_vm8, %v12063_v53  ;;  %13163 = vst [vmem:[#allocation164_spill] sm:$0xff] %v12107_v12  ;;  %v12109_v13 = vadd.f32 1e-06, %v6233_v8  ;;  %vm7341_vm8 = vcmask 89168  }
0x3747   :  { %7254 = vst.msk [vmem:[%s10708_s3] sm:$0xff] %vm7253_vm9, %v12063_v53  ;;  %vm7352_vm9 = vcmask 97368  }
0x3748   :  { %6269 = vrot.lane.b32.xlu0 %v6249_v41, %s10309_s6  ;;  %6253 = vrot.lane.b32.xlu1 %v6249_v41, %s10308_s8  ;;  %13164 = vst [vmem:[#allocation165_spill] sm:$0xff] %v12109_v13 }
0x374c   :  { %6261 = vrot.lane.b32.xlu1 %v6249_v41, %s10307_s28  ;;  %6663 = vrot.lane.b32.xlu0 %v6661_v18, %s10308_s8 }
0x3750   :  { %6271 = vrot.lane.b32.xlu1 %v12067_v57, %s10309_s6 }
0x3754   :  { %6667 = vrot.lane.b32.xlu1 %v6661_v18, %s10307_s28 }
0x37b6   :  { %v6264_v52 = vpop.permute.xlu1 %6263  ;;  %v6256_v60 = vpop.permute.xlu0 %6255 }
0x37b7   :  { %v6260_v19 = vadd.f32 %v6256_v60, %v12067_v57 }
0x37b9   :  { %v6268_v37 = vadd.f32 %v6264_v52, %v6260_v19 }
0x37ba   :  { %v6254_v61 = vpop.permute.xlu1 %6253  ;;  %v6270_v62 = vpop.permute.xlu0 %6269 }
0x37bb   :  { %v6259_v16 = vadd.f32 %v6254_v61, %v6249_v41 }
0x37be   :  { %v6262_v63 = vpop.permute.xlu1 %6261  ;;  %v6664_v1 = vpop.permute.xlu0 %6663 }
0x37bf   :  { %v6666_v24 = vadd.f32 %v6664_v1, %v6661_v18  ;;  %v6267_v56 = vadd.f32 %v6262_v63, %v6259_v16 }
0x37c1   :  { %v6275_v26 = vadd.f32 %v6270_v62, %v6267_v56 }
0x37c2   :  { %v6272_v32 = vpop.permute.xlu1 %6271 }
0x37c3   :  { %v6276_v6 = vadd.f32 %v6272_v32, %v6268_v37  ;;  %vm6279_vm12 = vcmp.eq.f32.partialorder %v6275_v26, inf  ;;  %v6282_v0 = vand.u32 2147483648, %v6275_v26  ;;  %vm6281_vm14 = vcmp.eq.f32.partialorder %v6275_v26, 0.0 }
0x37c5   :  { %vm6286_vm13 = vcmp.eq.f32.partialorder %v6276_v6, inf  ;;  %v6289_v38 = vand.u32 2147483648, %v6276_v6  ;;  %vm6288_vm15 = vcmp.eq.f32.partialorder %v6276_v6, 0.0 }
0x37c6   :  { %v6668_v2 = vpop.permute.xlu1 %6667 }
0x37c7   :  { %v6670_v4 = vadd.f32 %v6668_v2, %v6666_v24 }
0x37c9   :  { %9072 = vrsqrt.f32 %v6670_v4  ;;  %vm6673_vm10 = vcmp.eq.f32.partialorder %v6670_v4, inf  ;;  %v6676_v45 = vand.u32 2147483648, %v6670_v4  ;;  %vm6675_vm11 = vcmp.eq.f32.partialorder %v6670_v4, 0.0 }
0x37d6   :  { %v9073_v28 = vpop.eup %9072 }
0x37d7   :  { %v6672_v43 = vmul.f32 %v9073_v28, %v6670_v4 }
0x37d9   :  { %v6674_v49 = vsel %vm6673_vm10, %v6670_v4, %v6672_v43 }
0x37da   :  { %v6677_v3 = vsel %vm6675_vm11, %v6676_v45, %v6674_v49 }
0x37db   :  { %v6678_v58 = vmax.f32 %v6677_v3, 1e-12 }
0x37dd   :  { %9074 = vrcp.f32 %v6678_v58 }
0x37de   :  { %9076 = vrsqrt.f32 %v6275_v26 }
0x37df   :  { %9078 = vrsqrt.f32 %v6276_v6 }
0x37ea   :  { %v12101_v9 = vpop.eup %9074 }
0x37eb   :  { %6715 = vrot.lane.b32.xlu1 %v12101_v9, %s10310_s30  ;;  %6697 = vrot.lane.b32.xlu0 %v12101_v9, %s10311_s27  ;;  %v9077_v31 = vpop.eup %9076 }
0x37ec   :  { %v9079_v50 = vpop.eup %9078  ;;  %v6278_v47 = vmul.f32 %v9077_v31, %v6275_v26 }
0x37ed   :  { %v6285_v21 = vmul.f32 %v9079_v50, %v6276_v6 }
0x37ee   :  { %v6280_v11 = vsel %vm6279_vm12, %v6275_v26, %v6278_v47 }
0x37ef   :  { %6709 = vrot.lane.b32.xlu1 %v12107_v12, %s10312_s26  ;;  %6707 = vrot.lane.b32.xlu0 %v12109_v13, %s10312_s26  ;;  %v6287_v42 = vsel %vm6286_vm13, %v6276_v6, %v6285_v21  ;;  %v6283_v30 = vsel %vm6281_vm14, %v6282_v0, %v6280_v11 }
0x37f0   :  { %v6290_v34 = vsel %vm6288_vm15, %v6289_v38, %v6287_v42  ;;  %v6291_v40 = vmax.f32 %v6283_v30, 1e-12 }
0x37f1   :  { %v6292_v39 = vmax.f32 %v6290_v34, 1e-12 }
0x37f2   :  { %9080 = vrcp.f32 %v6291_v40 }
0x37f3   :  { %6727 = vrot.lane.b32.xlu1 %v12107_v12, %s10313_s24  ;;  %6725 = vrot.lane.b32.xlu0 %v12109_v13, %s10313_s24  ;;  %9082 = vrcp.f32 %v6292_v39 }
0x37f7   :  { %6939 = vrot.lane.b32.xlu1 %v12107_v12, %s10314_s1  ;;  %6937 = vrot.lane.b32.xlu0 %v12109_v13, %s10314_s1 }
0x37fb   :  { %6947 = vrot.lane.b32.xlu1 %v12107_v12, %s10315_s2  ;;  %6945 = vrot.lane.b32.xlu0 %v12109_v13, %s10315_s2 }
0x37ff   :  { %7095 = vrot.lane.b32.xlu1 %v12107_v12, %s10300_s14  ;;  %7093 = vrot.lane.b32.xlu0 %v12109_v13, %s10300_s14  ;;  %s10318_s14 = smov 123   ;;  %v9081_v62 = vpop.eup %9080 }
0x3800   :  { %v9083_v63 = vpop.eup %9082  ;;  %v12202_v32 = vmul.f32 %v9081_v62, %v12063_v53 }
0x3801   :  { %v12199_v1 = vmul.f32 %v9083_v63, %v12061_v46 }
0x3803   :  { %7103 = vrot.lane.b32.xlu1 %v12107_v12, %s10316_s7  ;;  %7101 = vrot.lane.b32.xlu0 %v12109_v13, %s10316_s7 }
0x3807   :  { %6690 = vrot.lane.b32.xlu1 %v12107_v12, %s10317_s5  ;;  %6688 = vrot.lane.b32.xlu0 %v12109_v13, %s10317_s5 }
0x385d   :  { %v6716_v25 = vpop.permute.xlu1 %6715  ;;  %v6698_v14 = vpop.permute.xlu0 %6697 }
0x385e   :  { %v6718_v22 = vmul.f32 %v6716_v25, %v12082_v55  ;;  %v6700_v5 = vmul.f32 %v6698_v14, %v12082_v55 }
0x3860   :  { %v12135_v33 = vrot.slane %v6718_v22, %v12131_v15  ;;  %v12142_v44 = vrot.slane %v6700_v5, %v12131_v15 }
0x3861   :  { %v6710_v51 = vpop.permute.xlu1 %6709  ;;  %v6708_v20 = vpop.permute.xlu0 %6707 }
0x3862   :  { %v12157_v54 = vmul.f32 %v6710_v51, %v12142_v44  ;;  %v12160_v48 = vmul.f32 %v6708_v20, %v12142_v44 }
0x3864   :  { %13167 = vst [vmem:[#allocation168_spill] sm:$0xff] %v12157_v54  ;;  %13168 = vst [vmem:[#allocation169_spill] sm:$0xff] %v12160_v48 }
0x3865   :  { %v12137_v36 = vpop.permute.xlu1 %6727  ;;  %v12139_v7 = vpop.permute.xlu0 %6725 }
0x3866   :  { %v12146_v10 = vmul.f32 %v12137_v36, %v12135_v33  ;;  %v12150_v17 = vmul.f32 %v12139_v7, %v12135_v33 }
0x3868   :  { %13165 = vst [vmem:[#allocation166_spill] sm:$0xff] %v12146_v10  ;;  %13166 = vst [vmem:[#allocation167_spill] sm:$0xff] %v12150_v17  ;;  %6737 = vrot.lane.b32.xlu1 %v12146_v10, %s10307_s28  ;;  %6735 = vrot.lane.b32.xlu0 %v12150_v17, %s10307_s28 }
0x3869   :  { %v6940_v23 = vpop.permute.xlu1 %6939  ;;  %v6938_v27 = vpop.permute.xlu0 %6937 }
0x386a   :  { %v12183_v60 = vmul.f32 %v6940_v23, %v12142_v44  ;;  %v12186_v61 = vmul.f32 %v6938_v27, %v12142_v44 }
0x386c   :  { %6747 = vrot.lane.b32.xlu1 %v12157_v54, %s10308_s8  ;;  %6745 = vrot.lane.b32.xlu0 %v12160_v48, %s10308_s8  ;;  %13171 = vst [vmem:[#allocation172_spill] sm:$0xff] %v12183_v60  ;;  %13172 = vst [vmem:[#allocation173_spill] sm:$0xff] %v12186_v61 }
0x386d   :  { %v12166_v57 = vpop.permute.xlu1 %6947  ;;  %v12168_v41 = vpop.permute.xlu0 %6945 }
0x386e   :  { %v12172_v18 = vmul.f32 %v12166_v57, %v12135_v33  ;;  %v12176_v52 = vmul.f32 %v12168_v41, %v12135_v33 }
0x3870   :  { %13169 = vst [vmem:[#allocation170_spill] sm:$0xff] %v12172_v18  ;;  %13170 = vst [vmem:[#allocation171_spill] sm:$0xff] %v12176_v52  ;;  %6957 = vrot.lane.b32.xlu1 %v12172_v18, %s10318_s14  ;;  %6955 = vrot.lane.b32.xlu0 %v12176_v52, %s10318_s14 }
0x3871   :  { %v12226_v24 = vpop.permute.xlu1 %7095  ;;  %v12228_v2 = vpop.permute.xlu0 %7093 }
0x3874   :  { %6967 = vrot.lane.b32.xlu1 %v12183_v60, %s10319_s19  ;;  %6965 = vrot.lane.b32.xlu0 %v12186_v61, %s10319_s19 }
0x3875   :  { %v12230_v4 = vpop.permute.xlu1 %7103  ;;  %v12232_v28 = vpop.permute.xlu0 %7101 }
0x3878   :  { %6303 = vrot.lane.b32.xlu1 %v9083_v63, %s10311_s27  ;;  %6301 = vrot.lane.b32.xlu0 %v9081_v62, %s10311_s27 }
0x3879   :  { %v12234_v43 = vpop.permute.xlu1 %6690  ;;  %v12236_v45 = vpop.permute.xlu0 %6688 }
0x387c   :  { %6311 = vrot.lane.b32.xlu1 %v9083_v63, %s10310_s30  ;;  %6309 = vrot.lane.b32.xlu0 %v9081_v62, %s10310_s30 }
0x3880   :  { %6319 = vrot.lane.b32.xlu1 %v9083_v63, %s10320_s10  ;;  %6317 = vrot.lane.b32.xlu0 %v9081_v62, %s10320_s10 }
0x3884   :  { %6405 = vrot.lane.b32.xlu1 %v12199_v1, %s10309_s6  ;;  %6403 = vrot.lane.b32.xlu0 %v12202_v32, %s10309_s6 }
0x3888   :  { %6485 = vrot.lane.b32.xlu1 %v12199_v1, %s10307_s28  ;;  %6483 = vrot.lane.b32.xlu0 %v12202_v32, %s10307_s28 }
0x388c   :  { %6565 = vrot.lane.b32.xlu1 %v12199_v1, %s10308_s8  ;;  %6563 = vrot.lane.b32.xlu0 %v12202_v32, %s10308_s8 }
0x3890   :  { %6329 = vrot.lane.b32.xlu1 %v12199_v1, %s10319_s19  ;;  %6327 = vrot.lane.b32.xlu0 %v12202_v32, %s10319_s19 }
0x3894   :  { %6583 = vrot.lane.b32.xlu1 %v12199_v1, %s10302_s17  ;;  %6581 = vrot.lane.b32.xlu0 %v12202_v32, %s10302_s17 }
0x3898   :  { %6857 = vrot.lane.b32.xlu1 %v12199_v1, %s10321_s25  ;;  %6855 = vrot.lane.b32.xlu0 %v12202_v32, %s10321_s25 }
0x38da   :  { %v12238_v49 = vpop.permute.xlu1 %6737  ;;  %v12240_v3 = vpop.permute.xlu0 %6735 }
0x38de   :  { %v12242_v58 = vpop.permute.xlu1 %6747  ;;  %v12244_v29 = vpop.permute.xlu0 %6745 }
0x38df   :  { %13173 = vst [vmem:[#allocation174_spill] sm:$0xff] %v12244_v29 }
0x38e2   :  { %v12246_v8 = vpop.permute.xlu1 %6957  ;;  %v12248_v16 = vpop.permute.xlu0 %6955 }
0x38e6   :  { %v12250_v19 = vpop.permute.xlu1 %6967  ;;  %v12252_v56 = vpop.permute.xlu0 %6965 }
0x38ea   :  { %v6304_v37 = vpop.permute.xlu1 %6303  ;;  %v6302_v26 = vpop.permute.xlu0 %6301 }
0x38eb   :  { %v12255_v6 = vmul.f32 %v6304_v37, %v12061_v46  ;;  %v12258_v31 = vmul.f32 %v6302_v26, %v12063_v53 }
0x38ed   :  { %6339 = vrot.lane.b32.xlu1 %v12255_v6, %s10319_s19  ;;  %6337 = vrot.lane.b32.xlu0 %v12258_v31, %s10319_s19 }
0x38ee   :  { %v6312_v50 = vpop.permute.xlu1 %6311  ;;  %v6310_v35 = vpop.permute.xlu0 %6309 }
0x38ef   :  { %v12265_v47 = vmul.f32 %v6312_v50, %v12061_v46  ;;  %v12268_v21 = vmul.f32 %v6310_v35, %v12063_v53 }
0x38f1   :  { %6359 = vrot.lane.b32.xlu1 %v12265_v47, %s10319_s19  ;;  %6357 = vrot.lane.b32.xlu0 %v12268_v21, %s10319_s19 }
0x38f2   :  { %v6320_v25 = vpop.permute.xlu1 %6319  ;;  %v6318_v14 = vpop.permute.xlu0 %6317 }
0x38f3   :  { %v12275_v59 = vmul.f32 %v6320_v25, %v12061_v46  ;;  %v12278_v11 = vmul.f32 %v6318_v14, %v12063_v53 }
0x38f5   :  { %6423 = vrot.lane.b32.xlu1 %v12275_v59, %s10318_s14  ;;  %6421 = vrot.lane.b32.xlu0 %v12278_v11, %s10318_s14 }
0x38f6   :  { %v6406_v0 = vpop.permute.xlu1 %6405  ;;  %v6404_v42 = vpop.permute.xlu0 %6403 }
0x38f7   :  { %v6410_v51 = vmul.f32 %v6406_v0, %v12255_v6  ;;  %v6409_v20 = vmul.f32 %v6404_v42, %v12258_v31 }
0x38f9   :  { %6467 = vrot.lane.b32.xlu1 %v12275_v59, %s10322_s11  ;;  %6465 = vrot.lane.b32.xlu0 %v12278_v11, %s10322_s11 }
0x38fa   :  { %v6486_v22 = vpop.permute.xlu1 %6485  ;;  %v6484_v38 = vpop.permute.xlu0 %6483 }
0x38fb   :  { %v6490_v30 = vmul.f32 %v6486_v22, %v12265_v47  ;;  %v6489_v5 = vmul.f32 %v6484_v38, %v12268_v21 }
0x38fd   :  { %6379 = vrot.lane.b32.xlu1 %v12275_v59, %s10319_s19  ;;  %6377 = vrot.lane.b32.xlu0 %v12278_v11, %s10319_s19 }
0x38fe   :  { %v6566_v34 = vpop.permute.xlu1 %6565  ;;  %v6564_v40 = vpop.permute.xlu0 %6563 }
0x38ff   :  { %v6570_v39 = vmul.f32 %v6566_v34, %v12275_v59  ;;  %v6569_v23 = vmul.f32 %v6564_v40, %v12278_v11 }
0x3901   :  { %6441 = vrot.lane.b32.xlu1 %v12265_v47, %s10309_s6  ;;  %6439 = vrot.lane.b32.xlu0 %v12268_v21, %s10309_s6 }
0x3902   :  { %v12348_v27 = vpop.permute.xlu1 %6329  ;;  %v12350_v62 = vpop.permute.xlu0 %6327 }
0x3903   :  { %v6334_v61 = vmul.f32 %v12348_v27, %v12199_v1  ;;  %v6333_v18 = vmul.f32 %v12350_v62, %v12202_v32 }
0x3905   :  { %6529 = vrot.lane.b32.xlu1 %v12265_v47, %s10318_s14  ;;  %6527 = vrot.lane.b32.xlu0 %v12268_v21, %s10318_s14 }
0x3906   :  { %v12352_v63 = vpop.permute.xlu1 %6583  ;;  %v12354_v37 = vpop.permute.xlu0 %6581 }
0x3909   :  { %6503 = vrot.lane.b32.xlu1 %v12255_v6, %s10307_s28  ;;  %6501 = vrot.lane.b32.xlu0 %v12258_v31, %s10307_s28 }
0x390a   :  { %v12356_v26 = vpop.permute.xlu1 %6857  ;;  %v12358_v50 = vpop.permute.xlu0 %6855 }
0x390b   :  { %13174 = vst [vmem:[#allocation175_spill] sm:$0xff] %v12358_v50 }
0x390d   :  { %6547 = vrot.lane.b32.xlu1 %v12255_v6, %s10309_s6  ;;  %6545 = vrot.lane.b32.xlu0 %v12258_v31, %s10309_s6 }
0x3911   :  { %6397 = vrot.lane.b32.xlu1 %v12255_v6, %s10318_s14  ;;  %6395 = vrot.lane.b32.xlu0 %v12258_v31, %s10318_s14 }
0x3915   :  { %6459 = vrot.lane.b32.xlu1 %v12265_v47, %s10322_s11  ;;  %6457 = vrot.lane.b32.xlu0 %v12268_v21, %s10322_s11 }
0x3919   :  { %6521 = vrot.lane.b32.xlu1 %v12275_v59, %s10323_s20  ;;  %6519 = vrot.lane.b32.xlu0 %v12278_v11, %s10323_s20 }
0x391d   :  { %6591 = vrot.lane.b32.xlu1 %v12255_v6, %s10324_s21  ;;  %6589 = vrot.lane.b32.xlu0 %v12258_v31, %s10324_s21 }
0x3921   :  { %6601 = vrot.lane.b32.xlu1 %v12265_v47, %s10325_s4  ;;  %6599 = vrot.lane.b32.xlu0 %v12268_v21, %s10325_s4 }
0x3925   :  { %6611 = vrot.lane.b32.xlu1 %v12275_v59, %s10326_s0  ;;  %6609 = vrot.lane.b32.xlu0 %v12278_v11, %s10326_s0 }
0x3929   :  { %6865 = vrot.lane.b32.xlu1 %v12255_v6, %s10327_s12  ;;  %6863 = vrot.lane.b32.xlu0 %v12258_v31, %s10327_s12 }
0x392d   :  { %6875 = vrot.lane.b32.xlu1 %v12265_v47, %s10328_s15  ;;  %6873 = vrot.lane.b32.xlu0 %v12268_v21, %s10328_s15 }
0x3931   :  { %6885 = vrot.lane.b32.xlu1 %v12275_v59, %s10316_s7  ;;  %6883 = vrot.lane.b32.xlu0 %v12278_v11, %s10316_s7 }
0x3935   :  { %6415 = vrot.lane.b32.xlu1 %v6410_v51, %s10308_s8  ;;  %6413 = vrot.lane.b32.xlu0 %v6409_v20, %s10308_s8 }
0x3939   :  { %6495 = vrot.lane.b32.xlu1 %v6490_v30, %s10307_s28  ;;  %6493 = vrot.lane.b32.xlu0 %v6489_v5, %s10307_s28 }
0x393d   :  { %6575 = vrot.lane.b32.xlu1 %v6570_v39, %s10309_s6  ;;  %6573 = vrot.lane.b32.xlu0 %v6569_v23, %s10309_s6 }
0x395f   :  { %v6340_v35 = vpop.permute.xlu1 %6339  ;;  %v6338_v25 = vpop.permute.xlu0 %6337 }
0x3960   :  { %v6344_v14 = vmul.f32 %v6340_v35, %v12255_v6  ;;  %v6343_v0 = vmul.f32 %v6338_v25, %v12258_v31 }
0x3962   :  { %6349 = vrot.lane.b32.xlu1 %v6344_v14, %s10308_s8  ;;  %6347 = vrot.lane.b32.xlu0 %v6343_v0, %s10308_s8 }
0x3963   :  { %v6360_v42 = vpop.permute.xlu1 %6359  ;;  %v6358_v22 = vpop.permute.xlu0 %6357 }
0x3964   :  { %v6364_v38 = vmul.f32 %v6360_v42, %v12265_v47  ;;  %v6363_v51 = vmul.f32 %v6358_v22, %v12268_v21 }
0x3966   :  { %6369 = vrot.lane.b32.xlu1 %v6364_v38, %s10307_s28  ;;  %6367 = vrot.lane.b32.xlu0 %v6363_v51, %s10307_s28 }
0x3967   :  { %v6424_v20 = vpop.permute.xlu1 %6423  ;;  %v6422_v30 = vpop.permute.xlu0 %6421 }
0x3968   :  { %v6428_v5 = vmul.f32 %v6424_v20, %v12265_v47  ;;  %v6427_v34 = vmul.f32 %v6422_v30, %v12268_v21 }
0x396a   :  { %6433 = vrot.lane.b32.xlu1 %v6428_v5, %s10307_s28  ;;  %6431 = vrot.lane.b32.xlu0 %v6427_v34, %s10307_s28 }
0x396b   :  { %v6468_v40 = vpop.permute.xlu1 %6467  ;;  %v6466_v39 = vpop.permute.xlu0 %6465 }
0x396c   :  { %v6472_v23 = vmul.f32 %v6468_v40, %v12255_v6  ;;  %v6471_v35 = vmul.f32 %v6466_v39, %v12258_v31 }
0x396e   :  { %6477 = vrot.lane.b32.xlu1 %v6472_v23, %s10308_s8  ;;  %6475 = vrot.lane.b32.xlu0 %v6471_v35, %s10308_s8 }
0x396f   :  { %v6380_v25 = vpop.permute.xlu1 %6379  ;;  %v6378_v14 = vpop.permute.xlu0 %6377 }
0x3970   :  { %v6384_v0 = vmul.f32 %v6380_v25, %v12275_v59  ;;  %v6383_v42 = vmul.f32 %v6378_v14, %v12278_v11  ;;  %v6681_v14 = vmul.f32 %v12101_v9, %v12082_v55 }
0x3972   :  { %6389 = vrot.lane.b32.xlu1 %v6384_v0, %s10309_s6  ;;  %6387 = vrot.lane.b32.xlu0 %v6383_v42, %s10309_s6 }
0x3973   :  { %v6442_v22 = vpop.permute.xlu1 %6441  ;;  %v6440_v38 = vpop.permute.xlu0 %6439 }
0x3974   :  { %v6446_v51 = vmul.f32 %v6442_v22, %v12275_v59  ;;  %v6445_v20 = vmul.f32 %v6440_v38, %v12278_v11  ;;  %v12397_v22 = vrot.slane %v6681_v14, %v12131_v15  ;;  %v12415_v15 = vmul.f32 %v12230_v4, %v12135_v33 }
0x3976   :  { %6451 = vrot.lane.b32.xlu1 %v6446_v51, %s10309_s6  ;;  %6449 = vrot.lane.b32.xlu0 %v6445_v20, %s10309_s6  ;;  %v12403_v55 = vmul.f32 %v12137_v36, %v12397_v22  ;;  %v12407_v9 = vmul.f32 %v12139_v7, %v12397_v22  ;;  %13177 = vst [vmem:[#allocation178_spill] sm:$0xff] %v12415_v15 }
0x3977   :  { %v6530_v30 = vpop.permute.xlu1 %6529  ;;  %v6528_v5 = vpop.permute.xlu0 %6527  ;;  %v12427_v36 = vmul.f32 %v12226_v24, %v12142_v44  ;;  %v12431_v7 = vmul.f32 %v12228_v2, %v12142_v44  ;;  %v12443_v24 = vmul.f32 %v12168_v41, %v12397_v22 }
0x3978   :  { %v6534_v34 = vmul.f32 %v6530_v30, %v12255_v6  ;;  %v6533_v40 = vmul.f32 %v6528_v5, %v12258_v31  ;;  %13175 = vst [vmem:[#allocation176_spill] sm:$0xff] %v12403_v55  ;;  %13176 = vst [vmem:[#allocation177_spill] sm:$0xff] %v12407_v9 }
0x3979   :  { %13179 = vst [vmem:[#allocation180_spill] sm:$0xff] %v12427_v36  ;;  %13180 = vst [vmem:[#allocation181_spill] sm:$0xff] %v12431_v7 }
0x397a   :  { %6539 = vrot.lane.b32.xlu1 %v6534_v34, %s10308_s8  ;;  %6537 = vrot.lane.b32.xlu0 %v6533_v40, %s10308_s8  ;;  %13182 = vst [vmem:[#allocation183_spill] sm:$0xff] %v12443_v24 }
0x397b   :  { %v6504_v39 = vpop.permute.xlu1 %6503  ;;  %v6502_v23 = vpop.permute.xlu0 %6501 }
0x397c   :  { %v6508_v35 = vmul.f32 %v6504_v39, %v12275_v59  ;;  %v6507_v25 = vmul.f32 %v6502_v23, %v12278_v11 }
0x397e   :  { %6513 = vrot.lane.b32.xlu1 %v6508_v35, %s10309_s6  ;;  %6511 = vrot.lane.b32.xlu0 %v6507_v25, %s10309_s6 }
0x397f   :  { %v6548_v6 = vpop.permute.xlu1 %6547  ;;  %v6546_v0 = vpop.permute.xlu0 %6545 }
0x3980   :  { %v6552_v31 = vmul.f32 %v6548_v6, %v12265_v47  ;;  %v6551_v42 = vmul.f32 %v6546_v0, %v12268_v21  ;;  %v12419_v47 = vmul.f32 %v12232_v28, %v12135_v33  ;;  %v12439_v33 = vmul.f32 %v12166_v57, %v12397_v22 }
0x3982   :  { %6557 = vrot.lane.b32.xlu1 %v6552_v31, %s10307_s28  ;;  %6555 = vrot.lane.b32.xlu0 %v6551_v42, %s10307_s28  ;;  %13178 = vst [vmem:[#allocation179_spill] sm:$0xff] %v12419_v47  ;;  %13181 = vst [vmem:[#allocation182_spill] sm:$0xff] %v12439_v33 }
0x3983   :  { %v6398_v4 = vpop.permute.xlu1 %6397  ;;  %v6396_v21 = vpop.permute.xlu0 %6395 }
0x3984   :  { %v6401_v17 = vmul.f32 %v6396_v21, %v12202_v32 }
0x3986   :  { %6979 = vrot.lane.b32.xlu1 %v12403_v55, %s10309_s6  ;;  %6977 = vrot.lane.b32.xlu0 %v12407_v9, %s10309_s6  ;;  %v6402_v9 = vmul.f32 %v6398_v4, %v12199_v1 }
0x3987   :  { %v6460_v44 = vpop.permute.xlu1 %6459  ;;  %v6458_v2 = vpop.permute.xlu0 %6457 }
0x3988   :  { %v6464_v54 = vmul.f32 %v6460_v44, %v12199_v1 }
0x398a   :  { %7113 = vrot.lane.b32.xlu1 %v12415_v15, %s10302_s17  ;;  %7111 = vrot.lane.b32.xlu0 %v12419_v47, %s10302_s17  ;;  %s10329_s17 = smov 4  }
0x398b   :  { %v6522_v28 = vpop.permute.xlu1 %6521  ;;  %v6520_v59 = vpop.permute.xlu0 %6519 }
0x398c   :  { %v6526_v44 = vmul.f32 %v6522_v28, %v12199_v1 }
0x398e   :  { %7123 = vrot.lane.b32.xlu1 %v12427_v36, %s10323_s20  ;;  %7121 = vrot.lane.b32.xlu0 %v12431_v7, %s10323_s20 }
0x398f   :  { %v12449_v11 = vpop.permute.xlu1 %6591  ;;  %v12451_v38 = vpop.permute.xlu0 %6589 }
0x3992   :  { %7135 = vrot.lane.b32.xlu1 %v12439_v33, %s10322_s11  ;;  %7133 = vrot.lane.b32.xlu0 %v12443_v24, %s10322_s11 }
0x3993   :  { %v12453_v57 = vpop.permute.xlu1 %6601  ;;  %v12455_v51 = vpop.permute.xlu0 %6599 }
0x3997   :  { %v12457_v41 = vpop.permute.xlu1 %6611  ;;  %v12459_v20 = vpop.permute.xlu0 %6609 }
0x399b   :  { %v12461_v30 = vpop.permute.xlu1 %6865  ;;  %v12463_v5 = vpop.permute.xlu0 %6863 }
0x399c   :  { %13183 = vst [vmem:[#allocation184_spill] sm:$0xff] %v12463_v5 }
0x399f   :  { %v12465_v34 = vpop.permute.xlu1 %6875  ;;  %v12467_v40 = vpop.permute.xlu0 %6873 }
0x39a0   :  { %13184 = vst [vmem:[#allocation185_spill] sm:$0xff] %v12465_v34  ;;  %13185 = vst [vmem:[#allocation186_spill] sm:$0xff] %v12467_v40 }
0x39a3   :  { %v12469_v39 = vpop.permute.xlu1 %6885  ;;  %v12471_v23 = vpop.permute.xlu0 %6883 }
0x39a4   :  { %13186 = vst [vmem:[#allocation187_spill] sm:$0xff] %v12469_v39  ;;  %13187 = vst [vmem:[#allocation188_spill] sm:$0xff] %v12471_v23  ;;  %v6463_v23 = vmul.f32 %v6458_v2, %v12202_v32  ;;  %v6525_v2 = vmul.f32 %v6520_v59, %v12202_v32 }
0x39a7   :  { %v6416_v35 = vpop.permute.xlu1 %6415  ;;  %v6414_v25 = vpop.permute.xlu0 %6413 }
0x39a8   :  { %v6420_v40 = vadd.f32 %v6416_v35, %v6402_v9  ;;  %v6419_v5 = vadd.f32 %v6414_v25, %v6401_v17 }
0x39ab   :  { %v6496_v14 = vpop.permute.xlu1 %6495  ;;  %v6494_v6 = vpop.permute.xlu0 %6493 }
0x39af   :  { %v12473_v0 = vpop.permute.xlu1 %6575  ;;  %v12475_v31 = vpop.permute.xlu0 %6573 }
0x39d4   :  { %v6350_v42 = vpop.permute.xlu1 %6349  ;;  %v6348_v13 = vpop.permute.xlu0 %6347 }
0x39d5   :  { %v6354_v60 = vsub.f32 %v6334_v61, %v6350_v42  ;;  %v6353_v55 = vsub.f32 %v6333_v18, %v6348_v13 }
0x39d8   :  { %v6370_v12 = vpop.permute.xlu1 %6369  ;;  %v6368_v53 = vpop.permute.xlu0 %6367 }
0x39d9   :  { %v6374_v50 = vsub.f32 %v6354_v60, %v6370_v12  ;;  %v6373_v39 = vsub.f32 %v6353_v55, %v6368_v53 }
0x39dc   :  { %v6434_v47 = vpop.permute.xlu1 %6433  ;;  %v6432_v46 = vpop.permute.xlu0 %6431 }
0x39dd   :  { %v6438_v27 = vadd.f32 %v6434_v47, %v6420_v40  ;;  %v6437_v13 = vadd.f32 %v6432_v46, %v6419_v5 }
0x39e0   :  { %v6478_v7 = vpop.permute.xlu1 %6477  ;;  %v6476_v15 = vpop.permute.xlu0 %6475 }
0x39e1   :  { %v6482_v34 = vsub.f32 %v6464_v54, %v6478_v7  ;;  %v6481_v29 = vsub.f32 %v6463_v23, %v6476_v15 }
0x39e3   :  { %v6500_v17 = vadd.f32 %v6496_v14, %v6482_v34  ;;  %v6499_v54 = vadd.f32 %v6494_v6, %v6481_v29 }
0x39e4   :  { %v6390_v24 = vpop.permute.xlu1 %6389  ;;  %v6388_v36 = vpop.permute.xlu0 %6387 }
0x39e5   :  { %v12485_v62 = vsub.f32 %v6374_v50, %v6390_v24  ;;  %v12487_v4 = vsub.f32 %v6373_v39, %v6388_v36 }
0x39e7   :  { %v6588_v12 = vmul.f32 %v12352_v63, %v12485_v62  ;;  %v6620_v60 = vmul.f32 %v12449_v11, %v12485_v62  ;;  %v6634_v50 = vmul.f32 %v12453_v57, %v12485_v62  ;;  %v6648_v46 = vmul.f32 %v12457_v41, %v12485_v62 }
0x39e8   :  { %v6452_v52 = vpop.permute.xlu1 %6451  ;;  %v6450_v33 = vpop.permute.xlu0 %6449  ;;  %v6619_v47 = vmul.f32 %v12451_v38, %v12487_v4  ;;  %v6647_v5 = vmul.f32 %v12459_v20, %v12487_v4 }
0x39e9   :  { %v12489_v18 = vsub.f32 %v6438_v27, %v6452_v52  ;;  %v12495_v53 = vsub.f32 %v6437_v13, %v6450_v33  ;;  %v12505_v52 = vmul.f32 %v12354_v37, %v12487_v4 }
0x39eb   :  { %v6596_v55 = vmul.f32 %v12449_v11, %v12489_v18  ;;  %v6622_v29 = vmul.f32 %v12352_v63, %v12489_v18  ;;  %v6636_v36 = vmul.f32 %v12457_v41, %v12489_v18  ;;  %v6650_v7 = vmul.f32 %v12453_v57, %v12489_v18 }
0x39ec   :  { %v6540_v48 = vpop.permute.xlu1 %6539  ;;  %v6538_v10 = vpop.permute.xlu0 %6537  ;;  %v6621_v24 = vmul.f32 %v12354_v37, %v12495_v53  ;;  %v6635_v28 = vmul.f32 %v12459_v20, %v12495_v53  ;;  %v6595_v34 = vmul.f32 %v12451_v38, %v12495_v53  ;;  %v6649_v35 = vmul.f32 %v12455_v51, %v12495_v53 }
0x39ed   :  { %v6544_v9 = vadd.f32 %v6540_v48, %v6526_v44  ;;  %v6543_v15 = vadd.f32 %v6538_v10, %v6525_v2  ;;  %v6633_v10 = vmul.f32 %v12455_v51, %v12487_v4  ;;  %v6598_v39 = vsub.f32 %v6588_v12, %v6596_v55 }
0x39ee   :  { %v6624_v23 = vadd.f32 %v6622_v29, %v6620_v60  ;;  %v6638_v14 = vsub.f32 %v6634_v50, %v6636_v36 }
0x39ef   :  { %v6637_v13 = vsub.f32 %v6633_v10, %v6635_v28 }
0x39f0   :  { %v6514_v61 = vpop.permute.xlu1 %6513  ;;  %v6512_v21 = vpop.permute.xlu0 %6511 }
0x39f1   :  { %v12517_v33 = vadd.f32 %v6514_v61, %v6500_v17  ;;  %v12529_v40 = vadd.f32 %v6512_v21, %v6499_v54  ;;  %v6652_v61 = vadd.f32 %v6650_v7, %v6648_v46  ;;  %v6623_v21 = vadd.f32 %v6621_v24, %v6619_v47 }
0x39f2   :  { %v12575_v7 = vmul.f32 %v12234_v43, %v12397_v22 }
0x39f3   :  { %v6626_v6 = vmul.f32 %v12457_v41, %v12517_v33  ;;  %v6640_v42 = vmul.f32 %v12352_v63, %v12517_v33  ;;  %v6654_v44 = vmul.f32 %v12449_v11, %v12517_v33  ;;  %v6639_v2 = vmul.f32 %v12354_v37, %v12529_v40 }
0x39f4   :  { %v6558_v1 = vpop.permute.xlu1 %6557  ;;  %v6556_v32 = vpop.permute.xlu0 %6555  ;;  %v6606_v54 = vmul.f32 %v12453_v57, %v12517_v33  ;;  %v6653_v60 = vmul.f32 %v12451_v38, %v12529_v40  ;;  %13189 = vst [vmem:[#allocation190_spill] sm:$0xff] %v12575_v7 }
0x39f5   :  { %v6562_v59 = vsub.f32 %v6544_v9, %v6558_v1  ;;  %v6561_v48 = vsub.f32 %v6543_v15, %v6556_v32  ;;  %v6628_v46 = vadd.f32 %v6626_v6, %v6624_v23  ;;  %v6642_v1 = vadd.f32 %v6640_v42, %v6638_v14 }
0x39f6   :  { %v6656_v29 = vsub.f32 %v6652_v61, %v6654_v44  ;;  %v6762_v23 = vmul.f32 %v12242_v58, %v12489_v18  ;;  %v6764_v14 = vmul.f32 %v12575_v7, %v12517_v33  ;;  %v12610_v6 = vmul.f32 %v12240_v3, %v12495_v53 }
0x39f7   :  { %v12534_v25 = vadd.f32 %v12473_v0, %v6562_v59  ;;  %v12541_v27 = vadd.f32 %v12475_v31, %v6561_v48  ;;  %v6625_v0 = vmul.f32 %v12459_v20, %v12529_v40  ;;  %v6651_v31 = vadd.f32 %v6649_v35, %v6647_v5 }
0x39f8   :  { %v12588_v48 = vmul.f32 %v12236_v45, %v12397_v22  ;;  %v6980_v43 = vpop.permute.xlu1 %6979  ;;  %v6978_v35 = vpop.permute.xlu0 %6977 }
0x39f9   :  { %13188 = vst [vmem:[#allocation189_spill] sm:$0xff] %v12534_v25  ;;  %v6630_v12 = vmul.f32 %v12453_v57, %v12534_v25  ;;  %v6644_v17 = vmul.f32 %v12449_v11, %v12534_v25  ;;  %v6658_v50 = vmul.f32 %v12352_v63, %v12534_v25  ;;  %v6629_v32 = vmul.f32 %v12455_v51, %v12541_v27 }
0x39fa   :  { %v6643_v55 = vmul.f32 %v12451_v38, %v12541_v27  ;;  %v6605_v11 = vmul.f32 %v12455_v51, %v12529_v40  ;;  %v6616_v57 = vmul.f32 %v12457_v41, %v12534_v25  ;;  %v6657_v9 = vmul.f32 %v12354_v37, %v12541_v27  ;;  %13190 = vst [vmem:[#allocation191_spill] sm:$0xff] %v12588_v48 }
0x39fb   :  { %v6627_v15 = vadd.f32 %v6625_v0, %v6623_v21  ;;  %v6641_v63 = vadd.f32 %v6639_v2, %v6637_v13  ;;  %v12569_v47 = vsub.f32 %v6628_v46, %v6630_v12  ;;  %v12571_v36 = vadd.f32 %v6644_v17, %v6642_v1  ;;  %v13193_v1 = vld [vmem:[#allocation185_spill] sm:$0xff] }
0x39fc   :  { %v6608_v38 = vsub.f32 %v6598_v39, %v6606_v54  ;;  %v6655_v24 = vsub.f32 %v6651_v31, %v6653_v60  ;;  %v12577_v28 = vadd.f32 %v6658_v50, %v6656_v29  ;;  %v6597_v51 = vsub.f32 %v12505_v52, %v6595_v34  ;;  %v13192_v60 = vld [vmem:[#allocation174_spill] sm:$0xff] }
0x39fd   :  { %v6615_v41 = vmul.f32 %v12459_v20, %v12541_v27  ;;  %v12582_v37 = vsub.f32 %v6627_v15, %v6629_v32  ;;  %v12584_v59 = vadd.f32 %v6643_v55, %v6641_v63  ;;  %v12596_v39 = vmul.f32 %v12238_v49, %v12489_v18  ;;  %v13194_v55 = vld [vmem:[#allocation187_spill] sm:$0xff] }
0x39fe   :  { %v12590_v10 = vsub.f32 %v6608_v38, %v6616_v57  ;;  %v12592_v5 = vadd.f32 %v6657_v9, %v6655_v24  ;;  %v6607_v52 = vsub.f32 %v6597_v51, %v6605_v11  ;;  %v6990_v20 = vmul.f32 %v12250_v19, %v12569_v47  ;;  %v7114_v51 = vpop.permute.xlu1 %7113 }
0x39ff   :  { %v6992_v34 = vmul.f32 %v6980_v43, %v12571_v36  ;;  %v6986_v45 = vmul.f32 %v12246_v8, %v12569_v47  ;;  %v6984_v22 = vmul.f32 %v6980_v43, %v12577_v28  ;;  %v6989_v61 = vmul.f32 %v12252_v56, %v12582_v37 }
0x3a00   :  { %v12612_v42 = vsub.f32 %v6607_v52, %v6615_v41  ;;  %v6991_v21 = vmul.f32 %v6978_v35, %v12584_v59  ;;  %v6763_v13 = vmul.f32 %v12588_v48, %v12529_v40  ;;  %v6985_v44 = vmul.f32 %v12248_v16, %v12582_v37  ;;  %v13198_v41 = vld [vmem:[#allocation186_spill] sm:$0xff]  ;;  %v13199_v52 = vld [vmem:[#allocation188_spill] sm:$0xff] }
0x3a01   :  { %v6983_v0 = vmul.f32 %v6978_v35, %v12592_v5  ;;  %v6894_v2 = vmul.f32 %v12461_v30, %v12590_v10  ;;  %v6896_v12 = vmul.f32 %v12356_v26, %v12569_v47  ;;  %v12626_v17 = vsub.f32 %v6990_v20, %v6992_v34 }
0x3a02   :  { %v6742_v31 = vmul.f32 %v12238_v49, %v12517_v33  ;;  %v12632_v54 = vmul.f32 %v12240_v3, %v12529_v40  ;;  %v6761_v50 = vmul.f32 %v13192_v60, %v12495_v53  ;;  %v6988_v46 = vsub.f32 %v6984_v22, %v6986_v45  ;;  %v13196_v49 = vld [vmem:[#allocation184_spill] sm:$0xff]  ;;  %v13197_v3 = vld [vmem:[#allocation175_spill] sm:$0xff] }
0x3a03   :  { %13191 = vst [vmem:[#allocation192_spill] sm:$0xff] %v12626_v17  ;;  %v6908_v32 = vmul.f32 %v13193_v1, %v12590_v10  ;;  %v6910_v29 = vmul.f32 %v13194_v55, %v12569_v47  ;;  %v12640_v11 = vsub.f32 %v6762_v23, %v6764_v14  ;;  %v12642_v57 = vsub.f32 %v6989_v61, %v6991_v21 }
0x3a04   :  { %v6893_v9 = vmul.f32 %v13196_v49, %v12612_v42  ;;  %v6895_v15 = vmul.f32 %v13197_v3, %v12582_v37  ;;  %v12648_v63 = vsub.f32 %v6761_v50, %v6763_v13  ;;  %v12650_v38 = vsub.f32 %v6983_v0, %v6985_v44 }
0x3a05   :  { %13195 = vst [vmem:[#allocation174_spill] sm:$0xff] %v12642_v57  ;;  %v6898_v24 = vadd.f32 %v6896_v12, %v6894_v2  ;;  %v6907_v43 = vmul.f32 %v13198_v41, %v12612_v42  ;;  %v6909_v20 = vmul.f32 %v13199_v52, %v12582_v37  ;;  %v12658_v34 = vmul.f32 %v12626_v17, %v12571_v36  ;;  %v7112_v12 = vpop.permute.xlu0 %7111 }
0x3a06   :  { %v6900_v23 = vmul.f32 %v13194_v55, %v12571_v36  ;;  %v6904_v45 = vmul.f32 %v13193_v1, %v12577_v28  ;;  %v6922_v22 = vmul.f32 %v13194_v55, %v12590_v10  ;;  %v12667_v35 = vmul.f32 %v6988_v46, %v12577_v28 }
0x3a07   :  { %v12671_v14 = vmul.f32 %v12626_v17, %v12569_v47  ;;  %v6912_v61 = vsub.f32 %v6908_v32, %v6910_v29  ;;  %v6924_v21 = vmul.f32 %v13193_v1, %v12569_v47  ;;  %v12676_v13 = vmul.f32 %v6988_v46, %v12569_v47 }
0x3a08   :  { %v12679_v44 = vmul.f32 %v6988_v46, %v12590_v10  ;;  %v12683_v0 = vmul.f32 %v12642_v57, %v12584_v59  ;;  %v6897_v2 = vadd.f32 %v6895_v15, %v6893_v9  ;;  %v6902_v50 = vadd.f32 %v6900_v23, %v6898_v24  ;;  %v7124_v23 = vpop.permute.xlu1 %7123 }
0x3a09   :  { %13200 = vst [vmem:[#allocation185_spill] sm:$0xff] %v12671_v14  ;;  %13201 = vst [vmem:[#allocation187_spill] sm:$0xff] %v12676_v13  ;;  %v6914_v17 = vmul.f32 %v12356_v26, %v12571_v36  ;;  %v6911_v32 = vsub.f32 %v6907_v43, %v6909_v20  ;;  %v6926_v29 = vadd.f32 %v6924_v21, %v6922_v22 }
0x3a0a   :  { %13202 = vst [vmem:[#allocation184_spill] sm:$0xff] %v12679_v44  ;;  %13203 = vst [vmem:[#allocation175_spill] sm:$0xff] %v12683_v0  ;;  %v12689_v14 = vmul.f32 %v12650_v38, %v12592_v5  ;;  %v12693_v46 = vmul.f32 %v12642_v57, %v12582_v37  ;;  %v6899_v13 = vmul.f32 %v13199_v52, %v12584_v59 }
0x3a0b   :  { %v6913_v9 = vmul.f32 %v13197_v3, %v12584_v59  ;;  %v6916_v15 = vadd.f32 %v6914_v17, %v6912_v61  ;;  %v6862_v24 = vmul.f32 %v12356_v26, %v12590_v10  ;;  %v6870_v43 = vmul.f32 %v12461_v30, %v12569_v47 }
0x3a0c   :  { %13204 = vst [vmem:[#allocation186_spill] sm:$0xff] %v12693_v46  ;;  %v6928_v20 = vmul.f32 %v12461_v30, %v12571_v36  ;;  %v12707_v22 = vmul.f32 %v12650_v38, %v12582_v37  ;;  %v6901_v21 = vadd.f32 %v6899_v13, %v6897_v2  ;;  %v6921_v57 = vmul.f32 %v13199_v52, %v12612_v42  ;;  %v12721_v13 = vpop.permute.xlu0 %7121 }
0x3a0d   :  { %v6923_v17 = vmul.f32 %v13198_v41, %v12582_v37  ;;  %v12713_v61 = vsub.f32 %v6902_v50, %v6904_v45  ;;  %v6918_v47 = vmul.f32 %v12461_v30, %v12577_v28  ;;  %v6915_v46 = vadd.f32 %v6913_v9, %v6911_v32 }
0x3a0e   :  { %13205 = vst [vmem:[#allocation193_spill] sm:$0xff] %v12707_v22  ;;  %v6930_v44 = vsub.f32 %v6926_v29, %v6928_v20  ;;  %v6903_v0 = vmul.f32 %v13198_v41, %v12592_v5  ;;  %v6917_v22 = vmul.f32 %v13196_v49, %v12592_v5  ;;  %v6752_v2 = vmul.f32 %v12242_v58, %v12534_v25 }
0x3a0f   :  { %v6756_v45 = vmul.f32 %v12575_v7, %v12534_v25  ;;  %v12727_v50 = vadd.f32 %v6918_v47, %v6916_v15  ;;  %v6872_v52 = vsub.f32 %v6862_v24, %v6870_v43  ;;  %v6880_v30 = vmul.f32 %v13193_v1, %v12571_v36  ;;  %v7136_v43 = vpop.permute.xlu1 %7135 }
0x3a10   :  { %v6932_v32 = vmul.f32 %v12356_v26, %v12577_v28  ;;  %v12733_v29 = vsub.f32 %v6901_v21, %v6903_v0  ;;  %v12737_v9 = vmul.f32 %v13194_v55, %v12577_v28  ;;  %v6925_v20 = vadd.f32 %v6923_v17, %v6921_v57  ;;  %v7134_v17 = vpop.permute.xlu0 %7133 }
0x3a11   :  { %v12739_v58 = vsub.f32 %v6742_v31, %v6752_v2  ;;  %v7142_v7 = vmul.f32 %v7114_v51, %v12713_v61  ;;  %v12742_v15 = vadd.f32 %v6917_v22, %v6915_v46  ;;  %v12747_v1 = vsub.f32 %v6756_v45, %v12596_v39 }
0x3a12   :  { %v12744_v24 = vadd.f32 %v6932_v32, %v6930_v44  ;;  %v12751_v26 = vmul.f32 %v13197_v3, %v12612_v42  ;;  %v12755_v55 = vmul.f32 %v13196_v49, %v12582_v37  ;;  %v6927_v31 = vmul.f32 %v13196_v49, %v12584_v59 }
0x3a13   :  { %v6774_v57 = vmul.f32 %v12739_v58, %v12534_v25  ;;  %v7118_v44 = vmul.f32 %v7114_v51, %v12727_v50  ;;  %v12762_v0 = vsub.f32 %v6872_v52, %v6880_v30  ;;  %v7146_v39 = vmul.f32 %v7124_v23, %v12713_v61 }
0x3a14   :  { %v6776_v46 = vmul.f32 %v12640_v11, %v12489_v18  ;;  %v12768_v22 = vmul.f32 %v7112_v12, %v12733_v29  ;;  %v12772_v37 = vmul.f32 %v13198_v41, %v12584_v59  ;;  %v6929_v49 = vsub.f32 %v6925_v20, %v6927_v31 }
0x3a15   :  { %v7148_v21 = vmul.f32 %v7136_v43, %v12727_v50  ;;  %v7140_v51 = vmul.f32 %v7136_v43, %v12744_v24  ;;  %v6794_v47 = vmul.f32 %v12747_v1, %v12485_v62  ;;  %v6751_v2 = vmul.f32 %v13192_v60, %v12541_v27 }
0x3a16   :  { %v6778_v52 = vsub.f32 %v6774_v57, %v6776_v46  ;;  %v12781_v45 = vmul.f32 %v7112_v12, %v12742_v15  ;;  %v6931_v30 = vmul.f32 %v13197_v3, %v12592_v5  ;;  %v6755_v32 = vmul.f32 %v12588_v48, %v12541_v27 }
0x3a17   :  { %v7145_v20 = vmul.f32 %v12721_v13, %v12733_v29  ;;  %v7147_v43 = vmul.f32 %v7134_v17, %v12742_v15  ;;  %v6780_v60 = vmul.f32 %v12747_v1, %v12489_v18  ;;  %v7128_v12 = vmul.f32 %v7124_v23, %v12744_v24 }
0x3a18   :  { %v6796_v31 = vadd.f32 %v6794_v47, %v6778_v52  ;;  %v12795_v57 = vadd.f32 %v6931_v30, %v6929_v49  ;;  %v12797_v46 = vsub.f32 %v7146_v39, %v7148_v21  ;;  %v12800_v3 = vsub.f32 %v12632_v54, %v6751_v2 }
0x3a19   :  { %v12802_v41 = vsub.f32 %v7140_v51, %v7142_v7  ;;  %v12805_v25 = vsub.f32 %v6755_v32, %v12610_v6  ;;  %v6782_v52 = vmul.f32 %v12739_v58, %v12517_v33  ;;  %v6775_v23 = vmul.f32 %v12648_v63, %v12495_v53 }
0x3a1a   :  { %13206 = vst [vmem:[#allocation194_spill] sm:$0xff] %v12800_v3  ;;  %v6798_v48 = vmul.f32 2.0, %v6796_v31  ;;  %v6773_v18 = vmul.f32 %v12800_v3, %v12541_v27  ;;  %v6781_v39 = vmul.f32 %v12800_v3, %v12529_v40  ;;  %v6962_v7 = vmul.f32 %v12246_v8, %v12571_v36 }
0x3a1b   :  { %v6784_v54 = vsub.f32 %v6780_v60, %v6782_v52  ;;  %v6810_v6 = vmul.f32 %v12640_v11, %v12485_v62  ;;  %v6779_v49 = vmul.f32 %v12805_v25, %v12495_v53  ;;  %v6972_v21 = vmul.f32 %v12250_v19, %v12577_v28 }
0x3a1c   :  { %6803 = vrot.lane.b32.xlu1 %v6798_v48, %s10311_s27  ;;  %v6777_v51 = vsub.f32 %v6773_v18, %v6775_v23  ;;  %v6793_v47 = vmul.f32 %v12805_v25, %v12487_v4  ;;  %v6961_v2 = vmul.f32 %v12248_v16, %v12584_v59  ;;  %v6971_v8 = vmul.f32 %v12252_v56, %v12592_v5  ;;  %v13207_v16 = vld [vmem:[#allocation175_spill] sm:$0xff] }
0x3a1d   :  { %v6812_v48 = vadd.f32 %v6810_v6, %v6784_v54  ;;  %v6783_v30 = vsub.f32 %v6779_v49, %v6781_v39  ;;  %v6974_v32 = vsub.f32 %v6962_v7, %v6972_v21  ;;  %v7000_v31 = vsub.f32 %v12658_v34, %v12667_v35  ;;  %v13208_v49 = vld [vmem:[#allocation185_spill] sm:$0xff] }
0x3a1e   :  { %v7139_v53 = vmul.f32 %v7134_v17, %v12795_v57  ;;  %v6795_v60 = vadd.f32 %v6793_v47, %v6777_v51  ;;  %v6809_v19 = vmul.f32 %v12648_v63, %v12487_v4  ;;  %v6973_v52 = vsub.f32 %v6961_v2, %v6971_v8  ;;  %v13210_v47 = vld [vmem:[#allocation187_spill] sm:$0xff] }
0x3a1f   :  { %v6814_v18 = vmul.f32 2.0, %v6812_v48  ;;  %v7014_v23 = vmul.f32 %v6974_v32, %v12590_v10  ;;  %v6999_v3 = vsub.f32 %v13207_v16, %v12689_v14  ;;  %v7002_v56 = vmul.f32 %v6974_v32, %v12577_v28  ;;  %v13211_v48 = vld [vmem:[#allocation186_spill] sm:$0xff] }
0x3a20   :  { %v6797_v39 = vmul.f32 2.0, %v6795_v60  ;;  %v6811_v7 = vadd.f32 %v6809_v19, %v6783_v30  ;;  %v7001_v54 = vmul.f32 %v6973_v52, %v12592_v5  ;;  %v7010_v34 = vmul.f32 %v6974_v32, %v12571_v36 }
0x3a21   :  { %v7130_v35 = vsub.f32 %v7118_v44, %v7128_v12  ;;  %v12841_v17 = vsub.f32 %v7145_v20, %v7147_v43  ;;  %6819 = vrot.lane.b32.xlu1 %v6814_v18, %s10310_s30  ;;  %v7016_v6 = vadd.f32 %v7014_v23, %v7000_v31  ;;  %v7006_v21 = vsub.f32 %v7002_v56, %v13208_v49  ;;  %v13209_v43 = vld [vmem:[#allocation184_spill] sm:$0xff] }
0x3a22   :  { %v7127_v51 = vmul.f32 %v12721_v13, %v12795_v57  ;;  %v7152_v28 = vmul.f32 %v12797_v46, %v12727_v50  ;;  %v7154_v14 = vmul.f32 %v12802_v41, %v12744_v24  ;;  %6801 = vrot.lane.b32.xlu0 %v6797_v39, %s10311_s27  ;;  %v7013_v36 = vmul.f32 %v6973_v52, %v12612_v42  ;;  %v13212_v31 = vld [vmem:[#allocation192_spill] sm:$0xff] }
0x3a23   :  { %v12854_v44 = vsub.f32 %v7139_v53, %v12768_v22  ;;  %v7018_v20 = vmul.f32 2.0, %v7016_v6  ;;  %v7032_v12 = vadd.f32 %v13209_v43, %v7006_v21  ;;  %v7012_v2 = vsub.f32 %v13210_v47, %v7010_v34  ;;  %v13213_v53 = vld [vmem:[#allocation188_spill] sm:$0xff] }
0x3a24   :  { %v6813_v8 = vmul.f32 2.0, %v6811_v7  ;;  %v7015_v13 = vadd.f32 %v7013_v36, %v6999_v3  ;;  %v7005_v30 = vsub.f32 %v7001_v54, %v13211_v48  ;;  %v7009_v32 = vmul.f32 %v6973_v52, %v12584_v59 }
0x3a25   :  { %v7046_v60 = vmul.f32 %v13212_v31, %v12590_v10  ;;  %v7029_v19 = vmul.f32 %v12650_v38, %v12612_v42  ;;  %v6892_v22 = vsub.f32 %v12762_v0, %v12737_v9  ;;  %v6889_v18 = vmul.f32 %v13213_v53, %v12592_v5  ;;  %7023 = vrot.lane.b32.xlu1 %v7018_v20, %s10320_s10 }
0x3a26   :  { %v7158_v3 = vmul.f32 %v7130_v35, %v12744_v24  ;;  %v13214_v59 = vsub.f32 %v12751_v26, %v12755_v55  ;;  %v7160_v10 = vmul.f32 %v12797_v46, %v12713_v61  ;;  %v7151_v38 = vmul.f32 %v12841_v17, %v12742_v15  ;;  %6817 = vrot.lane.b32.xlu0 %v6813_v8, %s10310_s30  ;;  %v13215_v26 = vld [vmem:[#allocation193_spill] sm:$0xff] }
0x3a27   :  { %v7129_v9 = vsub.f32 %v12781_v45, %v7127_v51  ;;  %v7034_v5 = vmul.f32 2.0, %v7032_v12  ;;  %v7048_v0 = vadd.f32 %v7046_v60, %v7012_v2  ;;  %v7156_v23 = vsub.f32 %v7152_v28, %v7154_v14  ;;  %v13217_v28 = vld [vmem:[#allocation189_spill] sm:$0xff] }
0x3a28   :  { %v6881_v52 = vsub.f32 %v13214_v59, %v12772_v37  ;;  %v7153_v24 = vmul.f32 %v12854_v44, %v12795_v57  ;;  %v7017_v16 = vmul.f32 2.0, %v7015_v13  ;;  %v7031_v56 = vadd.f32 %v7029_v19, %v7005_v30  ;;  %v13216_v37 = vld [vmem:[#allocation174_spill] sm:$0xff] }
0x3a29   :  { %v7011_v55 = vsub.f32 %v13215_v26, %v7009_v32  ;;  %v7045_v39 = vmul.f32 %v13216_v37, %v12612_v42  ;;  %v7170_v7 = vmul.f32 %v7130_v35, %v6892_v22  ;;  %7039 = vrot.lane.b32.xlu1 %v7034_v5, %s10329_s17  ;;  %v7166_v54 = vmul.f32 %v7130_v35, %v12727_v50 }
0x3a2a   :  { %v6891_v34 = vsub.f32 %v6881_v52, %v6889_v18  ;;  %v7164_v45 = vmul.f32 %v12802_v41, %v12713_v61  ;;  %v7159_v6 = vmul.f32 %v12841_v17, %v12733_v29  ;;  %7021 = vrot.lane.b32.xlu0 %v7017_v16, %s10320_s10  ;;  %v7050_v49 = vmul.f32 2.0, %v7048_v0 }
0x3a2b   :  { %v7172_v21 = vadd.f32 %v7170_v7, %v7156_v23  ;;  %v7162_v51 = vsub.f32 %v7158_v3, %v7160_v10  ;;  %v6770_v42 = vmul.f32 %v12747_v1, %v13217_v28  ;;  %v7157_v14 = vmul.f32 %v7129_v9, %v12795_v57  ;;  %v13219_v3 = vld [vmem:[#allocation190_spill] sm:$0xff] }
0x3a2c   :  { %v7033_v36 = vmul.f32 2.0, %v7031_v56  ;;  %v7047_v20 = vadd.f32 %v7045_v39, %v7011_v55  ;;  %v7155_v50 = vsub.f32 %v7151_v38, %v7153_v24  ;;  %v7186_v35 = vmul.f32 %v12802_v41, %v6892_v22  ;;  %v13222_v24 = vld [vmem:[#allocation166_spill] sm:$0xff]  ;;  %v13223_v56 = vld [vmem:[#allocation169_spill] sm:$0xff]  ;;  %v13224_v39 = vld [vmem:[#allocation176_spill] sm:$0xff] }
0x3a2d   :  { %7055 = vrot.lane.b32.xlu1 %v7050_v49, %s10330_s13  ;;  %v6768_v61 = vmul.f32 %v12640_v11, %v12517_v33  ;;  %v7165_v43 = vmul.f32 %v7129_v9, %v12742_v15  ;;  %v7169_v12 = vmul.f32 %v7129_v9, %v6891_v34  ;;  %v7163_v47 = vmul.f32 %v12854_v44, %v12733_v29  ;;  %v13221_v9 = vld [vmem:[#allocation168_spill] sm:$0xff] }
0x3a2e   :  { %7037 = vrot.lane.b32.xlu0 %v7033_v36, %s10329_s17  ;;  %v7174_v1 = vmul.f32 2.0, %v7172_v21  ;;  %v7188_v2 = vadd.f32 %v7186_v35, %v7162_v51  ;;  %v7168_v57 = vsub.f32 %v7164_v45, %v7166_v54  ;;  %v7049_v13 = vmul.f32 2.0, %v7047_v20  ;;  %v13225_v54 = vld [vmem:[#allocation167_spill] sm:$0xff]  ;;  %v13226_v49 = vld [vmem:[#allocation172_spill] sm:$0xff]  ;;  %v13227_v51 = vld [vmem:[#allocation177_spill] sm:$0xff] }
0x3a2f   :  { %v6772_v8 = vsub.f32 %v6768_v61, %v6770_v42  ;;  %v7171_v48 = vadd.f32 %v7169_v12, %v7155_v50  ;;  %v7161_v30 = vsub.f32 %v7157_v14, %v7159_v6  ;;  %v6769_v41 = vmul.f32 %v12805_v25, %v12541_v27  ;;  %v13228_v36 = vld [vmem:[#allocation170_spill] sm:$0xff]  ;;  %v13229_v50 = vld [vmem:[#allocation173_spill] sm:$0xff] }
0x3a30   :  { %v7202_v33 = vmul.f32 %v12797_v46, %v6892_v22  ;;  %v6786_v11 = vmul.f32 %v12739_v58, %v12485_v62  ;;  %v7185_v29 = vmul.f32 %v12854_v44, %v6891_v34  ;;  %v6767_v15 = vmul.f32 %v12648_v63, %v12529_v40  ;;  %v13218_v62 = vld [vmem:[#allocation194_spill] sm:$0xff] }
0x3a31   :  { %7179 = vrot.lane.b32.xlu1 %v7174_v1, %s10331_s16  ;;  %v7190_v32 = vmul.f32 2.0, %v7188_v2  ;;  %v7173_v19 = vmul.f32 2.0, %v7171_v48  ;;  %v7167_v25 = vsub.f32 %v7163_v47, %v7165_v43  ;;  %v7201_v46 = vmul.f32 %v12841_v17, %v6891_v34  ;;  %v13220_v17 = vld [vmem:[#allocation191_spill] sm:$0xff]  ;;  %v13230_v12 = vld [vmem:[#allocation182_spill] sm:$0xff] }
0x3a32   :  { %7053 = vrot.lane.b32.xlu0 %v7049_v13, %s10330_s13  ;;  %v7204_v31 = vadd.f32 %v7202_v33, %v7168_v57  ;;  %v6788_v60 = vadd.f32 %v6786_v11, %v6772_v8  ;;  %v7187_v53 = vadd.f32 %v7185_v29, %v7161_v30  ;;  %v6771_v27 = vsub.f32 %v6767_v15, %v6769_v41  ;;  %v13231_v1 = vld [vmem:[#allocation171_spill] sm:$0xff]  ;;  %v13232_v13 = vld [vmem:[#allocation180_spill] sm:$0xff]  ;;  %v13234_v29 = vld [vmem:[#allocation178_spill] sm:$0xff] }
0x3a33   :  { %v6785_v58 = vmul.f32 %v13218_v62, %v12487_v4  ;;  %v7203_v40 = vadd.f32 %v7201_v46, %v7167_v25  ;;  %v13233_v30 = vld [vmem:[#allocation183_spill] sm:$0xff] }
0x3a34   :  { %v7206_v44 = vmul.f32 2.0, %v7204_v31  ;;  %v6790_v22 = vmul.f32 2.0, %v6788_v60  ;;  %v7189_v18 = vmul.f32 2.0, %v7187_v53  ;;  %v13236_v53 = vld [vmem:[#allocation162_spill] sm:$0xff] }
0x3a35   :  { %7195 = vrot.lane.b32.xlu1 %v7190_v32, %s10332_s23  ;;  %v6787_v63 = vadd.f32 %v6785_v58, %v6771_v27  ;;  %v7205_v52 = vmul.f32 2.0, %v7203_v40  ;;  %v13235_v32 = vld [vmem:[#allocation181_spill] sm:$0xff]  ;;  %v13237_v27 = vld [vmem:[#allocation179_spill] sm:$0xff] }
0x3a36   :  { %7177 = vrot.lane.b32.xlu0 %v7173_v19, %s10331_s16  ;;  %v6792_v59 = vadd.f32 %v6790_v22, %v13219_v3  ;;  %v13238_v58 = vld [vmem:[#allocation163_spill] sm:$0xff]  ;;  %v13239_v22 = vld [vmem:[#allocation164_spill] sm:$0xff] }
0x3a37   :  { %v6789_v10 = vmul.f32 2.0, %v6787_v63 }
0x3a39   :  { %7211 = vrot.lane.b32.xlu1 %v7206_v44, %s10249_s22  ;;  %v6791_v38 = vadd.f32 %v6789_v10, %v13220_v17 }
0x3a3a   :  { %7193 = vrot.lane.b32.xlu0 %v7189_v18, %s10332_s23  ;;  %v13240_v18 = vld [vmem:[#allocation165_spill] sm:$0xff] }
0x3a3d   :  { %6829 = vrot.lane.b32.xlu1 %v6792_v59, %s10309_s6 }
0x3a3e   :  { %7209 = vrot.lane.b32.xlu0 %v7205_v52, %s10249_s22  ;;  %s10333_s22 = smov 105  }
0x3a42   :  { %6827 = vrot.lane.b32.xlu0 %v6791_v38, %s10309_s6 }
0x3a8e   :  { %v6804_v4 = vpop.permute.xlu1 %6803 }
0x3a8f   :  { %v6808_v5 = vadd.f32 %v6804_v4, %v13221_v9 }
0x3a91   :  { %6839 = vrot.lane.b32.xlu1 %v6808_v5, %s10309_s6 }
0x3a93   :  { %v6820_v0 = vpop.permute.xlu1 %6819 }
0x3a94   :  { %v6802_v23 = vpop.permute.xlu0 %6801  ;;  %v6824_v16 = vadd.f32 %v6820_v0, %v13222_v24 }
0x3a95   :  { %v6807_v26 = vadd.f32 %v6802_v23, %v13223_v56 }
0x3a96   :  { %6849 = vrot.lane.b32.xlu1 %v6824_v16, %s10309_s6 }
0x3a97   :  { %6837 = vrot.lane.b32.xlu0 %v6807_v26, %s10309_s6  ;;  %v7024_v55 = vpop.permute.xlu1 %7023 }
0x3a98   :  { %v6818_v37 = vpop.permute.xlu0 %6817  ;;  %v7028_v7 = vadd.f32 %v7024_v55, %v13224_v39 }
0x3a99   :  { %v6823_v34 = vadd.f32 %v6818_v37, %v13225_v54 }
0x3a9a   :  { %7065 = vrot.lane.b32.xlu1 %v7028_v7, %s10322_s11 }
0x3a9b   :  { %6847 = vrot.lane.b32.xlu0 %v6823_v34, %s10309_s6  ;;  %v7040_v45 = vpop.permute.xlu1 %7039 }
0x3a9c   :  { %v7022_v6 = vpop.permute.xlu0 %7021  ;;  %v7044_v21 = vadd.f32 %v7040_v45, %v13226_v49 }
0x3a9d   :  { %v7027_v28 = vadd.f32 %v7022_v6, %v13227_v51 }
0x3a9e   :  { %7075 = vrot.lane.b32.xlu1 %v7044_v21, %s10322_s11 }
0x3a9f   :  { %7063 = vrot.lane.b32.xlu0 %v7027_v28, %s10322_s11  ;;  %v7056_v42 = vpop.permute.xlu1 %7055 }
0x3aa0   :  { %v7038_v14 = vpop.permute.xlu0 %7037  ;;  %v7060_v20 = vadd.f32 %v7056_v42, %v13228_v36 }
0x3aa1   :  { %v7043_v35 = vadd.f32 %v7038_v14, %v13229_v50 }
0x3aa2   :  { %7085 = vrot.lane.b32.xlu1 %v7060_v20, %s10322_s11 }
0x3aa3   :  { %7073 = vrot.lane.b32.xlu0 %v7043_v35, %s10322_s11  ;;  %v7180_v61 = vpop.permute.xlu1 %7179 }
0x3aa4   :  { %v7054_v43 = vpop.permute.xlu0 %7053  ;;  %v7184_v47 = vadd.f32 %v7180_v61, %v13230_v12 }
0x3aa5   :  { %v7059_v2 = vadd.f32 %v7054_v43, %v13231_v1 }
0x3aa6   :  { %7221 = vrot.lane.b32.xlu1 %v7184_v47, %s10324_s21 }
0x3aa7   :  { %7083 = vrot.lane.b32.xlu0 %v7059_v2, %s10322_s11  ;;  %v7196_v57 = vpop.permute.xlu1 %7195 }
0x3aa8   :  { %v7178_v8 = vpop.permute.xlu0 %7177  ;;  %v7200_v48 = vadd.f32 %v7196_v57, %v13232_v13 }
0x3aa9   :  { %v7183_v41 = vadd.f32 %v7178_v8, %v13233_v30 }
0x3aaa   :  { %7231 = vrot.lane.b32.xlu1 %v7200_v48, %s10324_s21 }
0x3aab   :  { %7219 = vrot.lane.b32.xlu0 %v7183_v41, %s10324_s21  ;;  %v7212_v33 = vpop.permute.xlu1 %7211 }
0x3aac   :  { %v7194_v11 = vpop.permute.xlu0 %7193  ;;  %v7216_v15 = vadd.f32 %v7212_v33, %v13234_v29 }
0x3aad   :  { %v7199_v31 = vadd.f32 %v7194_v11, %v13235_v32 }
0x3aae   :  { %7241 = vrot.lane.b32.xlu1 %v7216_v15, %s10324_s21 }
0x3aaf   :  { %7229 = vrot.lane.b32.xlu0 %v7199_v31, %s10324_s21  ;;  %v6830_v60 = vpop.permute.xlu1 %6829 }
0x3ab0   :  { %v7210_v19 = vpop.permute.xlu0 %7209  ;;  %v6834_v25 = vadd.f32 %v6830_v60, %v13236_v53 }
0x3ab1   :  { %v7215_v46 = vadd.f32 %v7210_v19, %v13237_v27 }
0x3ab2   :  { %7260 = vrot.lane.b32.xlu1 %v6834_v25, %s10320_s10 }
0x3ab3   :  { %7239 = vrot.lane.b32.xlu0 %v7215_v46, %s10324_s21 }
0x3ab4   :  { %v6828_v62 = vpop.permute.xlu0 %6827 }
0x3ab5   :  { %v6833_v44 = vadd.f32 %v6828_v62, %v13238_v58 }
0x3ab6   :  { %6241 = vrot.lane.b32.xlu1 %v13239_v22, %s10333_s22 }
0x3ab7   :  { %7258 = vrot.lane.b32.xlu0 %v6833_v44, %s10320_s10 }
0x3abb   :  { %6239 = vrot.lane.b32.xlu0 %v13240_v18, %s10333_s22 }
0x3b03   :  { %v6840_v40 = vpop.permute.xlu1 %6839 }
0x3b04   :  { %v6844_v63 = vadd.f32 %v6840_v40, %v13236_v53 }
0x3b06   :  { %7271 = vrot.lane.b32.xlu1 %v6844_v63, %s10320_s10 }
0x3b08   :  { %v6850_v3 = vpop.permute.xlu1 %6849 }
0x3b09   :  { %v6838_v59 = vpop.permute.xlu0 %6837  ;;  %v6854_v52 = vadd.f32 %v6850_v3, %v13236_v53 }
0x3b0a   :  { %v6843_v10 = vadd.f32 %v6838_v59, %v13238_v58 }
0x3b0b   :  { %7282 = vrot.lane.b32.xlu1 %v6854_v52, %s10320_s10 }
0x3b0c   :  { %7269 = vrot.lane.b32.xlu0 %v6843_v10, %s10320_s10  ;;  %v7066_v17 = vpop.permute.xlu1 %7065 }
0x3b0d   :  { %v6848_v38 = vpop.permute.xlu0 %6847  ;;  %v7070_v4 = vadd.f32 %v7066_v17, %v6834_v25 }
0x3b0e   :  { %v6853_v9 = vadd.f32 %v6848_v38, %v13238_v58 }
0x3b0f   :  { %7293 = vrot.lane.b32.xlu1 %v7070_v4, %s10331_s16 }
0x3b10   :  { %7280 = vrot.lane.b32.xlu0 %v6853_v9, %s10320_s10  ;;  %v7076_v5 = vpop.permute.xlu1 %7075 }
0x3b11   :  { %v7064_v0 = vpop.permute.xlu0 %7063  ;;  %v7080_v23 = vadd.f32 %v7076_v5, %v6844_v63 }
0x3b12   :  { %v7069_v24 = vadd.f32 %v7064_v0, %v6833_v44 }
0x3b13   :  { %7304 = vrot.lane.b32.xlu1 %v7080_v23, %s10331_s16 }
0x3b14   :  { %7291 = vrot.lane.b32.xlu0 %v7069_v24, %s10331_s16  ;;  %v7086_v16 = vpop.permute.xlu1 %7085 }
0x3b15   :  { %v7074_v56 = vpop.permute.xlu0 %7073  ;;  %v7090_v26 = vadd.f32 %v7086_v16, %v6854_v52 }
0x3b16   :  { %v7079_v55 = vadd.f32 %v7074_v56, %v6843_v10 }
0x3b17   :  { %7315 = vrot.lane.b32.xlu1 %v7090_v26, %s10331_s16 }
0x3b18   :  { %7302 = vrot.lane.b32.xlu0 %v7079_v55, %s10331_s16  ;;  %v7222_v37 = vpop.permute.xlu1 %7221 }
0x3b19   :  { %v7084_v39 = vpop.permute.xlu0 %7083  ;;  %v7226_v7 = vadd.f32 %v7222_v37, %v7070_v4 }
0x3b1a   :  { %v7089_v54 = vadd.f32 %v7084_v39, %v6853_v9 }
0x3b1b   :  { %7326 = vrot.lane.b32.xlu1 %v7226_v7, %s10334_s18 }
0x3b1c   :  { %7313 = vrot.lane.b32.xlu0 %v7089_v54, %s10331_s16  ;;  %v7232_v34 = vpop.permute.xlu1 %7231 }
0x3b1d   :  { %v7220_v45 = vpop.permute.xlu0 %7219  ;;  %v7236_v6 = vadd.f32 %v7232_v34, %v7080_v23 }
0x3b1e   :  { %v7225_v49 = vadd.f32 %v7220_v45, %v7069_v24 }
0x3b1f   :  { %7337 = vrot.lane.b32.xlu1 %v7236_v6, %s10334_s18 }
0x3b20   :  { %7324 = vrot.lane.b32.xlu0 %v7225_v49, %s10334_s18  ;;  %v7242_v21 = vpop.permute.xlu1 %7241 }
0x3b21   :  { %v7230_v51 = vpop.permute.xlu0 %7229  ;;  %v7246_v28 = vadd.f32 %v7242_v21, %v7090_v26 }
0x3b22   :  { %v7235_v42 = vadd.f32 %v7230_v51, %v7079_v55 }
0x3b23   :  { %7348 = vrot.lane.b32.xlu1 %v7246_v28, %s10334_s18 }
0x3b24   :  { %7335 = vrot.lane.b32.xlu0 %v7235_v42, %s10334_s18  ;;  %v7261_v14 = vpop.permute.xlu1 %7260 }
0x3b25   :  { %v7240_v36 = vpop.permute.xlu0 %7239  ;;  %7266 = vst.msk [vmem:[%s10708_s3 + $0x8] sm:$0xff] %vm7264_vm0, %v7261_v14 }
0x3b26   :  { %v7245_v20 = vadd.f32 %v7240_v36, %v7089_v54 }
0x3b28   :  { %7346 = vrot.lane.b32.xlu0 %v7245_v20, %s10334_s18  ;;  %v6242_v50 = vpop.permute.xlu1 %6241 }
0x3b29   :  { %v7259_v35 = vpop.permute.xlu0 %7258  ;;  %6247 = vst.msk [vmem:[%s10713_s29 + $0x8] sm:$0xff] %vm6245_vm1, %v6242_v50 }
0x3b2a   :  { %7265 = vst.msk [vmem:[%s10708_s3] sm:$0xff] %vm7264_vm0, %v7259_v35 }
0x3b2d   :  { %v6240_v61 = vpop.permute.xlu0 %6239 }
0x3b2e   :  { %6246 = vst.msk [vmem:[%s10713_s29] sm:$0xff] %vm6245_vm1, %v6240_v61 }
0x3b78   :  { %v7272_v43 = vpop.permute.xlu1 %7271 }
0x3b79   :  { %7277 = vst.msk [vmem:[%s10708_s3 + $0x8] sm:$0xff] %vm7275_vm2, %v7272_v43 }
0x3b7d   :  { %v7283_v12 = vpop.permute.xlu1 %7282 }
0x3b7e   :  { %v7270_v47 = vpop.permute.xlu0 %7269  ;;  %7288 = vst.msk [vmem:[%s10708_s3 + $0x8] sm:$0xff] %vm7286_vm3, %v7283_v12 }
0x3b7f   :  { %7276 = vst.msk [vmem:[%s10708_s3] sm:$0xff] %vm7275_vm2, %v7270_v47 }
0x3b81   :  { %v7294_v1 = vpop.permute.xlu1 %7293 }
0x3b82   :  { %v7281_v2 = vpop.permute.xlu0 %7280  ;;  %7299 = vst.msk [vmem:[%s10708_s3 + $0x8] sm:$0xff] %vm7297_vm4, %v7294_v1 }
0x3b83   :  { %7287 = vst.msk [vmem:[%s10708_s3] sm:$0xff] %vm7286_vm3, %v7281_v2 }
0x3b85   :  { %v7305_v57 = vpop.permute.xlu1 %7304 }
0x3b86   :  { %v7292_v8 = vpop.permute.xlu0 %7291  ;;  %7310 = vst.msk [vmem:[%s10708_s3 + $0x8] sm:$0xff] %vm7308_vm5, %v7305_v57 }
0x3b87   :  { %7298 = vst.msk [vmem:[%s10708_s3] sm:$0xff] %vm7297_vm4, %v7292_v8 }
0x3b89   :  { %v7316_v13 = vpop.permute.xlu1 %7315 }
0x3b8a   :  { %v7303_v48 = vpop.permute.xlu0 %7302  ;;  %7321 = vst.msk [vmem:[%s10708_s3 + $0x8] sm:$0xff] %vm7319_vm6, %v7316_v13 }
0x3b8b   :  { %7309 = vst.msk [vmem:[%s10708_s3] sm:$0xff] %vm7308_vm5, %v7303_v48 }
0x3b8d   :  { %v7327_v30 = vpop.permute.xlu1 %7326 }
0x3b8e   :  { %v7314_v41 = vpop.permute.xlu0 %7313  ;;  %7332 = vst.msk [vmem:[%s10708_s3 + $0x8] sm:$0xff] %vm7330_vm7, %v7327_v30 }
0x3b8f   :  { %7320 = vst.msk [vmem:[%s10708_s3] sm:$0xff] %vm7319_vm6, %v7314_v41 }
0x3b91   :  { %v7338_v33 = vpop.permute.xlu1 %7337 }
0x3b92   :  { %v7325_v11 = vpop.permute.xlu0 %7324  ;;  %7343 = vst.msk [vmem:[%s10708_s3 + $0x8] sm:$0xff] %vm7341_vm8, %v7338_v33 }
0x3b93   :  { %7331 = vst.msk [vmem:[%s10708_s3] sm:$0xff] %vm7330_vm7, %v7325_v11 }
0x3b95   :  { %v7349_v29 = vpop.permute.xlu1 %7348 }
0x3b96   :  { %v7336_v15 = vpop.permute.xlu0 %7335  ;;  %7354 = vst.msk [vmem:[%s10708_s3 + $0x8] sm:$0xff] %vm7352_vm9, %v7349_v29 }
0x3b97   :  { %7342 = vst.msk [vmem:[%s10708_s3] sm:$0xff] %vm7341_vm8, %v7336_v15 }
0x3b9a   :  { %v7347_v32 = vpop.permute.xlu0 %7346 }
0x3b9b   :  { %7353 = vst.msk [vmem:[%s10708_s3] sm:$0xff] %vm7352_vm9, %v7347_v32 }
0x3b9c   :  { %7363 = vsyncpa [#allocation3], 1 }
0x3b9d   :  { %7364 = vsyncpa [#allocation5], 1 }
0x3b9e   :  { %7365 = vsyncpa [#allocation8], 1 }
0x3b9f   :  { %7366 = vsyncpa [#allocation11], 1 }
0x3ba0   :  { %7367 = vsyncpa [#allocation14], 1 }
0x3ba1   :  { %7368 = vsyncpa [#allocation17], 1 }
0x3ba2   :  { %7369 = vsyncpa [#allocation20], 1 }
0x3ba3   :  { %7370 = vsyncpa [#allocation23], 1 }
0x3ba4   :  { %7371 = vsyncpa [#allocation26], 1 }
0x3ba5   :  { %7372 = vsyncpa [#allocation29], 1 }
0x3ba6   :  { %7373 = vsyncpa [#allocation32], 1 }
0x3ba7   :  { %7374 = vsyncpa [#allocation35], 1 }
0x3ba8   :  { %7375 = vsyncpa [#allocation38], 1 }
0x3ba9   :  { %7376 = vsyncpa [#allocation41], 1 }
0x3baa   :  { %7377 = vsyncpa [#allocation44], 1 }
0x3bab   :  { %7378 = vsyncpa [#allocation47], 1 }
0x3bac   :  { %7379 = vsyncpa [#allocation50], 1 }
0x3bad   :  { %7380 = vsyncpa [#allocation53], 1 }
0x3bae   :  { %7381 = vsyncpa [#allocation56], 1 }
0x3baf   :  { %7382 = vsyncpa [#allocation59], 1 }
0x3bb0   :  { %7383 = vsyncpa [#allocation62], 1 }
0x3bb1   :  { %7384 = vsyncpa [#allocation65], 1 }
0x3bb2   :  { %7385 = vsyncpa [#allocation68], 1 }
0x3bb3   :  { %7386 = vsyncpa [#allocation71], 1 }
0x3bb4   :  { %7387 = vsyncpa [#allocation74], 1 }
0x3bb5   :  { %7388 = vsyncpa [#allocation77], 1 }

</bundles_post_ra>
